<compile_context>
chip_gen: v5e
topology: v5e:2x2
jax: 0.10.0
libtpu: 0.0.40
codegen_flags: <defaults>
</compile_context>

<pallas_src>
import functools

import numpy as np
import jax
import jax.numpy as jnp
from jax import lax
from jax.experimental import pallas as pl
from jax.experimental.pallas import tpu as pltpu


# ----------------------------------------------------------------------------
# In-kernel building blocks.
#
# Activation layout: pad[b, y, xp*cin + c]  with xp in [0, w+2) (1-px border).
# 3x3 "same" conv = sum over dy of  pad[:, dy:dy+h, :] @ B[dy]
# where B[dy] is a pre-built banded weight of shape ((w+2)*cin, w*cout):
#   B[dy][(x+dx)*cin + c, x*cout + o] = W[dy, dx, c, o].
# ----------------------------------------------------------------------------
def _conv_relu_pool(pad_ref, wb_ref, bias_ref, n, h, w, cin, cout):
    k = (w + 2) * cin
    acc = jnp.zeros((n * h, w * cout), jnp.float32)
    for dy in range(3):                                    # 3 matmuls, big K, N=512
        a = pad_ref[:, dy:dy + h, :].reshape(n * h, k)     # bf16, lane-dense
        acc = acc + jnp.dot(a, wb_ref[dy], preferred_element_type=jnp.float32)
    z = jnp.maximum(acc + bias_ref[...], 0.0)              # bias + ReLU in f32

    # 2x2 stride-2 max pool.
    # H: max over adjacent row pairs (sublane pairs; h is even so pairs never
    #    cross the batch boundary).
    z = z.reshape(n * (h // 2), 2, w * cout)
    z = jnp.max(z, axis=1)                                 # (n*h/2, w*cout)
    # W: max over adjacent lane groups of `cout`.
    z = z.reshape(n * (h // 2), w // 2, 2 * cout)
    z = jnp.maximum(z[:, :, :cout], z[:, :, cout:])        # (n*h/2, w/2, cout)
    return z.reshape(n, h // 2, (w // 2) * cout)           # f32


def _store_padded(pad_ref, act, n, h, w, c):
    """Zero only the 1-pixel border, then store act (n, h, w*c) into the interior."""
    zrow = jnp.zeros((n, 1, (w + 2) * c), pad_ref.dtype)
    zcol = jnp.zeros((n, h + 2, c), pad_ref.dtype)
    pad_ref[:, 0:1, :] = zrow
    pad_ref[:, h + 1:h + 2, :] = zrow
    pad_ref[:, :, 0:c] = zcol
    pad_ref[:, :, (w + 1) * c:(w + 2) * c] = zcol
    pad_ref[:, 1:h + 1, c:(w + 1) * c] = act.astype(pad_ref.dtype)


# ----------------------------------------------------------------------------
# Fused whole-network kernel (one batch tile per grid step).
# ----------------------------------------------------------------------------
def cnn_fused_kernel(x_ref, wb1_ref, bt1_ref, wb2_ref, bt2_ref, wb3_ref, bt3_ref,
                     fw1_ref, fb1_ref, fw2_ref, fb2_ref, o_ref,
                     pad1, pad2, pad3, *, n, h, w):
    # ----- layer 1: conv(3->32) + ReLU + pool -----
    _store_padded(pad1, x_ref[...], n, h, w, 3)
    y = _conv_relu_pool(pad1, wb1_ref, bt1_ref, n, h, w, 3, 32)

    # ----- layer 2: conv(32->64) + ReLU + pool -----
    h2, w2 = h // 2, w // 2
    _store_padded(pad2, y, n, h2, w2, 32)
    y = _conv_relu_pool(pad2, wb2_ref, bt2_ref, n, h2, w2, 32, 64)

    # ----- layer 3: conv(64->128) + ReLU + pool -----
    h3, w3 = h2 // 2, w2 // 2
    _store_padded(pad3, y, n, h3, w3, 64)
    y = _conv_relu_pool(pad3, wb3_ref, bt3_ref, n, h3, w3, 64, 128)
    # y: (n, h/8, (w/8)*128) f32

    # ----- classifier head: one K=512 matmul (flatten perm folded into fw1) -----
    feat = y.reshape(n, -1).astype(jnp.bfloat16)                       # (n, 512)
    hid = jnp.dot(feat, fw1_ref[...], preferred_element_type=jnp.float32)
    hid = jnp.maximum(hid + fb1_ref[...], 0.0).astype(jnp.bfloat16)
    out = jnp.dot(hid, fw2_ref[...],
                  preferred_element_type=jnp.float32) + fb2_ref[...]
    o_ref[...] = out.astype(o_ref.dtype)


_WEIGHT_KEYS = ("wb1", "bt1", "wb2", "bt2", "wb3", "bt3",
                "fw1", "fb1", "fw2", "fb2")


def _nbytes(a):
    return int(np.prod(a.shape)) * jnp.dtype(a.dtype).itemsize


def _replicated_spec(arr):
    nd = arr.ndim
    return pl.BlockSpec(arr.shape, lambda i, _nd=nd: (0,) * _nd)


def fused_cnn(x_folded, p, *, batch_tile=None):
    n, h, wc = x_folded.shape
    w = wc // 3
    assert h % 8 == 0 and w % 8 == 0, "three 2x pools need H, W divisible by 8"
    num_classes = p["fb2"].shape[-1]

    nb = batch_tile or (n if n <= 128 else 128)
    assert n % nb == 0 and (nb == n or nb % 8 == 0)
    grid = (n // nb,)

    scratch = [
        pltpu.VMEM((nb, h + 2, (w + 2) * 3), jnp.bfloat16),
        pltpu.VMEM((nb, h // 2 + 2, (w // 2 + 2) * 32), jnp.bfloat16),
        pltpu.VMEM((nb, h // 4 + 2, (w // 4 + 2) * 64), jnp.bfloat16),
    ]

    # VMEM limit: double-buffered inputs/output + scratch + headroom for the
    # f32 accumulators / intermediates.
    weight_bytes = sum(_nbytes(p[k]) for k in _WEIGHT_KEYS)
    io_bytes = nb * h * wc * 2 + nb * num_classes * 4
    scratch_bytes = 2 * (nb * (h + 2) * (w + 2) * 3
                         + nb * (h // 2 + 2) * (w // 2 + 2) * 32
                         + nb * (h // 4 + 2) * (w // 4 + 2) * 64)
    vmem_limit = 2 * (weight_bytes + io_bytes) + scratch_bytes + (8 << 20)
    vmem_limit = int(min(max(vmem_limit, 16 << 20), 64 << 20))

    kernel = functools.partial(cnn_fused_kernel, n=nb, h=h, w=w)
    in_specs = [pl.BlockSpec((nb, h, wc), lambda i: (i, 0, 0))]
    in_specs += [_replicated_spec(p[k]) for k in _WEIGHT_KEYS]

    return pl.pallas_call(
        kernel,
        out_shape=jax.ShapeDtypeStruct((n, num_classes), jnp.float32),
        grid_spec=pltpu.PrefetchScalarGridSpec(
            num_scalar_prefetch=0,
            grid=grid,
            in_specs=in_specs,
            out_specs=pl.BlockSpec((nb, num_classes), lambda i: (i, 0)),
            scratch_shapes=scratch),
        compiler_params=pltpu.CompilerParams(
            dimension_semantics=("parallel",),      # batch tiles -> both v7x cores
            vmem_limit_bytes=vmem_limit),
    )(x_folded, *[p[k] for k in _WEIGHT_KEYS])


# ----------------------------------------------------------------------------
# One-time (host) parameter preparation:
#   * conv weights -> banded matrices (3, (w+2)*cin, w*cout), bf16
#   * conv biases tiled across W -> (1, w*cout), f32
#   * torch NCHW-flatten permutation folded into fc1, bf16
# ----------------------------------------------------------------------------
def prepare_params(params, input_hw):
    H, W = input_hw
    (w1, b1), (w2, b2), (w3, b3) = params["convs"]
    fw1, fb1, fw2, fb2 = params["fc"]
    ho, wo = H // 8, W // 8
    c3 = w3.shape[-1]
    hidden = fw1.shape[-1]

    def banded(wt, width):  # wt: HWIO (3, 3, cin, cout)
        _, _, cin, cout = wt.shape
        w_np = np.asarray(wt, np.float32)
        band = np.zeros((3, (width + 2) * cin, width * cout), np.float32)
        for dy in range(3):
            for x in range(width):
                for dx in range(3):
                    xp = x + dx
                    band[dy, xp * cin:(xp + 1) * cin,
                         x * cout:(x + 1) * cout] = w_np[dy, dx]
        return jnp.asarray(band, jnp.bfloat16)

    def tiled_bias(b, width):
        return jnp.tile(jnp.asarray(b, jnp.float32), width).reshape(1, -1)

    # torch Flatten order is (C, H, W); kernel feature order is (y, x, c).
    fw1_k = (jnp.asarray(fw1).reshape(c3, ho, wo, hidden)
             .transpose(1, 2, 0, 3)
             .reshape(ho * wo * c3, hidden)).astype(jnp.bfloat16)

    f32 = jnp.float32
    return {
        "wb1": banded(w1, W),      "bt1": tiled_bias(b1, W),
        "wb2": banded(w2, W // 2), "bt2": tiled_bias(b2, W // 2),
        "wb3": banded(w3, W // 4), "bt3": tiled_bias(b3, W // 4),
        "fw1": fw1_k,              "fb1": jnp.asarray(fb1, f32).reshape(1, -1),
        "fw2": jnp.asarray(fw2, jnp.bfloat16),
        "fb2": jnp.asarray(fb2, f32).reshape(1, -1),
    }


@jax.jit
def cnn_forward(x_nchw, prepped):
    n, c, h, w = x_nchw.shape
    # NCHW -> (N, H, W*C): fold width+channels onto the lane axis (tiny one-time glue).
    x_folded = (jnp.transpose(x_nchw, (0, 2, 3, 1))
                .reshape(n, h, w * c).astype(jnp.bfloat16))
    return fused_cnn(x_folded, prepped)


# ----------------------------------------------------------------------------
# Pure-JAX f32 reference (PyTorch semantics) for a silent correctness check.
# ----------------------------------------------------------------------------
def ref_forward(x_nchw, params):
    x = x_nchw
    for w, b in params["convs"]:
        x = lax.conv_general_dilated(
            x, w, window_strides=(1, 1), padding="SAME",
            dimension_numbers=("NCHW", "HWIO", "NCHW"))
        x = jnp.maximum(x + b[None, :, None, None], 0.0)
        x = lax.reduce_window(x, -jnp.inf, lax.max,
                              (1, 1, 2, 2), (1, 1, 2, 2), "VALID")
    feat = x.reshape(x.shape[0], -1)           # NCHW flatten (torch order)
    w1, b1, w2, b2 = params["fc"]
    h = jnp.maximum(feat @ w1 + b1, 0.0)
    return h @ w2 + b2


def init_params(key, num_classes=10, input_hw=(16, 16)):
    H, W = input_hw
    conv_dims = [(3, 32), (32, 64), (64, 128)]
    keys = jax.random.split(key, 2 * len(conv_dims) + 4)
    convs = []
    for i, (cin, cout) in enumerate(conv_dims):
        scale = 1.0 / jnp.sqrt(9.0 * cin)
        w = jax.random.normal(keys[2 * i], (3, 3, cin, cout), jnp.float32) * scale
        b = jax.random.normal(keys[2 * i + 1], (cout,), jnp.float32) * 0.01
        convs.append((w, b))
    num_fc_inputs = 128 * (H // 8) * (W // 8)   # 512 for 16x16 input
    w1 = jax.random.normal(keys[-4], (num_fc_inputs, 512), jnp.float32) / jnp.sqrt(
        float(num_fc_inputs))
    b1 = jax.random.normal(keys[-3], (512,), jnp.float32) * 0.01
    w2 = jax.random.normal(keys[-2], (512, num_classes), jnp.float32) / jnp.sqrt(512.0)
    b2 = jax.random.normal(keys[-1], (num_classes,), jnp.float32) * 0.01
    return {"convs": convs, "fc": (w1, b1, w2, b2)}


if __name__ == "__main__":
    key = jax.random.PRNGKey(0)
    k_in, k_par = jax.random.split(key)

    # 3-channel 16x16 images (batch=2), 10 classes -- consistent with the module.
    x = jax.random.normal(k_in, (2, 3, 16, 16), jnp.float32)
    params = init_params(k_par, num_classes=10, input_hw=(16, 16))
    prepped = prepare_params(params, (16, 16))

    out = jax.block_until_ready(cnn_forward(x, prepped))
    assert out.shape == (2, 10) and out.dtype == jnp.float32

    ref = jax.block_until_ready(ref_forward(x, params))
    # bf16 MXU operands / bf16 activation buffers vs. f32 reference.
    assert jnp.allclose(out, ref, rtol=5e-2, atol=5e-2), "mismatch vs reference"

    print("KERNEL_OK")
</pallas_src>

<mosaic_0001>
module attributes {stable_mosaic.version = 11 : i64} {
  func.func @cnn_fused_kernel(%arg0: i32, %arg1: memref<2x16x48xbf16, #tpu.memory_space<vmem>>, %arg2: memref<3x54x512xbf16, #tpu.memory_space<vmem>>, %arg3: memref<1x512xf32, #tpu.memory_space<vmem>>, %arg4: memref<3x320x512xbf16, #tpu.memory_space<vmem>>, %arg5: memref<1x512xf32, #tpu.memory_space<vmem>>, %arg6: memref<3x384x512xbf16, #tpu.memory_space<vmem>>, %arg7: memref<1x512xf32, #tpu.memory_space<vmem>>, %arg8: memref<512x512xbf16, #tpu.memory_space<vmem>>, %arg9: memref<1x512xf32, #tpu.memory_space<vmem>>, %arg10: memref<512x10xbf16, #tpu.memory_space<vmem>>, %arg11: memref<1x10xf32, #tpu.memory_space<vmem>>, %arg12: memref<2x10xf32, #tpu.memory_space<vmem>>, %arg13: memref<2x18x54xbf16, #tpu.memory_space<vmem>>, %arg14: memref<2x10x320xbf16, #tpu.memory_space<vmem>>, %arg15: memref<2x6x384xbf16, #tpu.memory_space<vmem>>) attributes {dimension_semantics = [#tpu.dimension_semantics<parallel>], iteration_bounds = array<i64: 1>, scalar_prefetch = 0 : i64, scratch_operands = 3 : i64, tpu.core_type = #tpu.core_type<tc>, window_params = [{transform_indices = @transform_0, window_bounds = array<i64: 2, 16, 48>}, {pipeline_mode = #tpu.pipeline_mode<synchronous>, transform_indices = @transform_1, window_bounds = array<i64: 3, 54, 512>}, {pipeline_mode = #tpu.pipeline_mode<synchronous>, transform_indices = @transform_2, window_bounds = array<i64: 1, 512>}, {pipeline_mode = #tpu.pipeline_mode<synchronous>, transform_indices = @transform_3, window_bounds = array<i64: 3, 320, 512>}, {pipeline_mode = #tpu.pipeline_mode<synchronous>, transform_indices = @transform_4, window_bounds = array<i64: 1, 512>}, {pipeline_mode = #tpu.pipeline_mode<synchronous>, transform_indices = @transform_5, window_bounds = array<i64: 3, 384, 512>}, {pipeline_mode = #tpu.pipeline_mode<synchronous>, transform_indices = @transform_6, window_bounds = array<i64: 1, 512>}, {pipeline_mode = #tpu.pipeline_mode<synchronous>, transform_indices = @transform_7, window_bounds = array<i64: 512, 512>}, {pipeline_mode = #tpu.pipeline_mode<synchronous>, transform_indices = @transform_8, window_bounds = array<i64: 1, 512>}, {pipeline_mode = #tpu.pipeline_mode<synchronous>, transform_indices = @transform_9, window_bounds = array<i64: 512, 10>}, {pipeline_mode = #tpu.pipeline_mode<synchronous>, transform_indices = @transform_10, window_bounds = array<i64: 1, 10>}, {transform_indices = @transform_11, window_bounds = array<i64: 2, 10>}]} {
    %c0 = arith.constant 0 : index
    %c0_0 = arith.constant 0 : index
    %c0_1 = arith.constant 0 : index
    %0 = vector.load %arg1[%c0, %c0_0, %c0_1] : memref<2x16x48xbf16, #tpu.memory_space<vmem>>, vector<2x16x48xbf16>
    %cst = arith.constant 0.000000e+00 : bf16
    %1 = vector.broadcast %cst : bf16 to vector<2x1x54xbf16>
    %cst_2 = arith.constant 0.000000e+00 : bf16
    %2 = vector.broadcast %cst_2 : bf16 to vector<2x18x3xbf16>
    %c0_3 = arith.constant 0 : index
    %c0_4 = arith.constant 0 : index
    %c0_5 = arith.constant 0 : index
    %3 = vector.load %arg13[%c0_3, %c0_4, %c0_5] : memref<2x18x54xbf16, #tpu.memory_space<vmem>>, vector<2x1x54xbf16>
    tpu.vector_store %arg13[%c0_3, %c0_4, %c0_5], %1 {strides = array<i32>} : memref<2x18x54xbf16, #tpu.memory_space<vmem>>, vector<2x1x54xbf16>,
    %c0_6 = arith.constant 0 : index
    %c17 = arith.constant 17 : index
    %c0_7 = arith.constant 0 : index
    %4 = vector.load %arg13[%c0_6, %c17, %c0_7] : memref<2x18x54xbf16, #tpu.memory_space<vmem>>, vector<2x1x54xbf16>
    tpu.vector_store %arg13[%c0_6, %c17, %c0_7], %1 {strides = array<i32>} : memref<2x18x54xbf16, #tpu.memory_space<vmem>>, vector<2x1x54xbf16>,
    %c0_8 = arith.constant 0 : index
    %c0_9 = arith.constant 0 : index
    %c0_10 = arith.constant 0 : index
    %5 = vector.load %arg13[%c0_8, %c0_9, %c0_10] : memref<2x18x54xbf16, #tpu.memory_space<vmem>>, vector<2x18x3xbf16>
    tpu.vector_store %arg13[%c0_8, %c0_9, %c0_10], %2 {strides = array<i32>} : memref<2x18x54xbf16, #tpu.memory_space<vmem>>, vector<2x18x3xbf16>,
    %c0_11 = arith.constant 0 : index
    %c0_12 = arith.constant 0 : index
    %c51 = arith.constant 51 : index
    %6 = vector.load %arg13[%c0_11, %c0_12, %c51] : memref<2x18x54xbf16, #tpu.memory_space<vmem>>, vector<2x18x3xbf16>
    tpu.vector_store %arg13[%c0_11, %c0_12, %c51], %2 {strides = array<i32>} : memref<2x18x54xbf16, #tpu.memory_space<vmem>>, vector<2x18x3xbf16>,
    %c0_13 = arith.constant 0 : index
    %c1 = arith.constant 1 : index
    %c3 = arith.constant 3 : index
    %7 = vector.load %arg13[%c0_13, %c1, %c3] : memref<2x18x54xbf16, #tpu.memory_space<vmem>>, vector<2x16x48xbf16>
    tpu.vector_store %arg13[%c0_13, %c1, %c3], %0 {strides = array<i32>} : memref<2x18x54xbf16, #tpu.memory_space<vmem>>, vector<2x16x48xbf16>,
    %cst_14 = arith.constant 0.000000e+00 : f32
    %8 = vector.broadcast %cst_14 : f32 to vector<32x512xf32>
    %c0_15 = arith.constant 0 : index
    %c0_16 = arith.constant 0 : index
    %c0_17 = arith.constant 0 : index
    %9 = vector.load %arg13[%c0_15, %c0_16, %c0_17] : memref<2x18x54xbf16, #tpu.memory_space<vmem>>, vector<2x16x54xbf16>
    %10 = vector.shape_cast %9 : vector<2x16x54xbf16> to vector<32x54xbf16>
    %c0_18 = arith.constant 0 : index
    %c0_19 = arith.constant 0 : index
    %c0_20 = arith.constant 0 : index
    %11 = vector.load %arg2[%c0_18, %c0_19, %c0_20] : memref<3x54x512xbf16, #tpu.memory_space<vmem>>, vector<1x54x512xbf16>
    %12 = vector.shape_cast %11 : vector<1x54x512xbf16> to vector<54x512xbf16>
    %cst_21 = arith.constant dense<0.000000e+00> : vector<32x512xf32>
    %13 = tpu.matmul %10, %12, %cst_21 {dimension_numbers = #tpu.dot_dimension_numbers<[1], [0], [0], [1], [0, 0, 1, 1], [], []>} : vector<32x54xbf16>, vector<54x512xbf16>, vector<32x512xf32> -> vector<32x512xf32>
    %14 = arith.addf %8, %13 : vector<32x512xf32>
    %c0_22 = arith.constant 0 : index
    %c1_23 = arith.constant 1 : index
    %c0_24 = arith.constant 0 : index
    %15 = vector.load %arg13[%c0_22, %c1_23, %c0_24] : memref<2x18x54xbf16, #tpu.memory_space<vmem>>, vector<2x16x54xbf16>
    %16 = vector.shape_cast %15 : vector<2x16x54xbf16> to vector<32x54xbf16>
    %c1_25 = arith.constant 1 : index
    %c0_26 = arith.constant 0 : index
    %c0_27 = arith.constant 0 : index
    %17 = vector.load %arg2[%c1_25, %c0_26, %c0_27] : memref<3x54x512xbf16, #tpu.memory_space<vmem>>, vector<1x54x512xbf16>
    %18 = vector.shape_cast %17 : vector<1x54x512xbf16> to vector<54x512xbf16>
    %cst_28 = arith.constant dense<0.000000e+00> : vector<32x512xf32>
    %19 = tpu.matmul %16, %18, %cst_28 {dimension_numbers = #tpu.dot_dimension_numbers<[1], [0], [0], [1], [0, 0, 1, 1], [], []>} : vector<32x54xbf16>, vector<54x512xbf16>, vector<32x512xf32> -> vector<32x512xf32>
    %20 = arith.addf %14, %19 : vector<32x512xf32>
    %c0_29 = arith.constant 0 : index
    %c2 = arith.constant 2 : index
    %c0_30 = arith.constant 0 : index
    %21 = vector.load %arg13[%c0_29, %c2, %c0_30] : memref<2x18x54xbf16, #tpu.memory_space<vmem>>, vector<2x16x54xbf16>
    %22 = vector.shape_cast %21 : vector<2x16x54xbf16> to vector<32x54xbf16>
    %c2_31 = arith.constant 2 : index
    %c0_32 = arith.constant 0 : index
    %c0_33 = arith.constant 0 : index
    %23 = vector.load %arg2[%c2_31, %c0_32, %c0_33] : memref<3x54x512xbf16, #tpu.memory_space<vmem>>, vector<1x54x512xbf16>
    %24 = vector.shape_cast %23 : vector<1x54x512xbf16> to vector<54x512xbf16>
    %cst_34 = arith.constant dense<0.000000e+00> : vector<32x512xf32>
    %25 = tpu.matmul %22, %24, %cst_34 {dimension_numbers = #tpu.dot_dimension_numbers<[1], [0], [0], [1], [0, 0, 1, 1], [], []>} : vector<32x54xbf16>, vector<54x512xbf16>, vector<32x512xf32> -> vector<32x512xf32>
    %26 = arith.addf %20, %25 : vector<32x512xf32>
    %c0_35 = arith.constant 0 : index
    %c0_36 = arith.constant 0 : index
    %27 = vector.load %arg3[%c0_35, %c0_36] : memref<1x512xf32, #tpu.memory_space<vmem>>, vector<1x512xf32>
    %28 = vector.broadcast %27 : vector<1x512xf32> to vector<32x512xf32>
    %29 = arith.addf %26, %28 : vector<32x512xf32>
    %cst_37 = arith.constant 0.000000e+00 : f32
    %30 = vector.broadcast %cst_37 : f32 to vector<32x512xf32>
    %31 = arith.maximumf %29, %30 : vector<32x512xf32>
    %32 = vector.shape_cast %31 : vector<32x512xf32> to vector<16x2x512xf32>
    %cst_38 = arith.constant dense<0xFF800000> : vector<16x512xf32>
    %33 = vector.multi_reduction <maximumf>, %32, %cst_38 [1] : vector<16x2x512xf32> to vector<16x512xf32>
    %34 = vector.shape_cast %33 : vector<16x512xf32> to vector<16x8x64xf32>
    %35 = vector.extract_strided_slice %34 {offsets = [0, 0, 0], sizes = [16, 8, 32], strides = [1, 1, 1]} : vector<16x8x64xf32> to vector<16x8x32xf32>
    %36 = vector.extract_strided_slice %34 {offsets = [0, 0, 32], sizes = [16, 8, 32], strides = [1, 1, 1]} : vector<16x8x64xf32> to vector<16x8x32xf32>
    %37 = arith.maximumf %35, %36 : vector<16x8x32xf32>
    %38 = vector.shape_cast %37 : vector<16x8x32xf32> to vector<2x8x256xf32>
    %cst_39 = arith.constant 0.000000e+00 : bf16
    %39 = vector.broadcast %cst_39 : bf16 to vector<2x1x320xbf16>
    %cst_40 = arith.constant 0.000000e+00 : bf16
    %40 = vector.broadcast %cst_40 : bf16 to vector<2x10x32xbf16>
    %c0_41 = arith.constant 0 : index
    %c0_42 = arith.constant 0 : index
    %c0_43 = arith.constant 0 : index
    %41 = vector.load %arg14[%c0_41, %c0_42, %c0_43] : memref<2x10x320xbf16, #tpu.memory_space<vmem>>, vector<2x1x320xbf16>
    tpu.vector_store %arg14[%c0_41, %c0_42, %c0_43], %39 {strides = array<i32>} : memref<2x10x320xbf16, #tpu.memory_space<vmem>>, vector<2x1x320xbf16>,
    %c0_44 = arith.constant 0 : index
    %c9 = arith.constant 9 : index
    %c0_45 = arith.constant 0 : index
    %42 = vector.load %arg14[%c0_44, %c9, %c0_45] : memref<2x10x320xbf16, #tpu.memory_space<vmem>>, vector<2x1x320xbf16>
    tpu.vector_store %arg14[%c0_44, %c9, %c0_45], %39 {strides = array<i32>} : memref<2x10x320xbf16, #tpu.memory_space<vmem>>, vector<2x1x320xbf16>,
    %c0_46 = arith.constant 0 : index
    %c0_47 = arith.constant 0 : index
    %c0_48 = arith.constant 0 : index
    %43 = vector.load %arg14[%c0_46, %c0_47, %c0_48] : memref<2x10x320xbf16, #tpu.memory_space<vmem>>, vector<2x10x32xbf16>
    tpu.vector_store %arg14[%c0_46, %c0_47, %c0_48], %40 {strides = array<i32>} : memref<2x10x320xbf16, #tpu.memory_space<vmem>>, vector<2x10x32xbf16>,
    %c0_49 = arith.constant 0 : index
    %c0_50 = arith.constant 0 : index
    %c288 = arith.constant 288 : index
    %44 = vector.load %arg14[%c0_49, %c0_50, %c288] : memref<2x10x320xbf16, #tpu.memory_space<vmem>>, vector<2x10x32xbf16>
    tpu.vector_store %arg14[%c0_49, %c0_50, %c288], %40 {strides = array<i32>} : memref<2x10x320xbf16, #tpu.memory_space<vmem>>, vector<2x10x32xbf16>,
    %45 = arith.truncf %38 : vector<2x8x256xf32> to vector<2x8x256xbf16>
    %c0_51 = arith.constant 0 : index
    %c1_52 = arith.constant 1 : index
    %c32 = arith.constant 32 : index
    %46 = vector.load %arg14[%c0_51, %c1_52, %c32] : memref<2x10x320xbf16, #tpu.memory_space<vmem>>, vector<2x8x256xbf16>
    tpu.vector_store %arg14[%c0_51, %c1_52, %c32], %45 {strides = array<i32>} : memref<2x10x320xbf16, #tpu.memory_space<vmem>>, vector<2x8x256xbf16>,
    %cst_53 = arith.constant 0.000000e+00 : f32
    %47 = vector.broadcast %cst_53 : f32 to vector<16x512xf32>
    %c0_54 = arith.constant 0 : index
    %c0_55 = arith.constant 0 : index
    %c0_56 = arith.constant 0 : index
    %48 = vector.load %arg14[%c0_54, %c0_55, %c0_56] : memref<2x10x320xbf16, #tpu.memory_space<vmem>>, vector<2x8x320xbf16>
    %49 = vector.shape_cast %48 : vector<2x8x320xbf16> to vector<16x320xbf16>
    %c0_57 = arith.constant 0 : index
    %c0_58 = arith.constant 0 : index
    %c0_59 = arith.constant 0 : index
    %50 = vector.load %arg4[%c0_57, %c0_58, %c0_59] : memref<3x320x512xbf16, #tpu.memory_space<vmem>>, vector<1x320x512xbf16>
    %51 = vector.shape_cast %50 : vector<1x320x512xbf16> to vector<320x512xbf16>
    %cst_60 = arith.constant dense<0.000000e+00> : vector<16x512xf32>
    %52 = tpu.matmul %49, %51, %cst_60 {dimension_numbers = #tpu.dot_dimension_numbers<[1], [0], [0], [1], [0, 0, 1, 1], [], []>} : vector<16x320xbf16>, vector<320x512xbf16>, vector<16x512xf32> -> vector<16x512xf32>
    %53 = arith.addf %47, %52 : vector<16x512xf32>
    %c0_61 = arith.constant 0 : index
    %c1_62 = arith.constant 1 : index
    %c0_63 = arith.constant 0 : index
    %54 = vector.load %arg14[%c0_61, %c1_62, %c0_63] : memref<2x10x320xbf16, #tpu.memory_space<vmem>>, vector<2x8x320xbf16>
    %55 = vector.shape_cast %54 : vector<2x8x320xbf16> to vector<16x320xbf16>
    %c1_64 = arith.constant 1 : index
    %c0_65 = arith.constant 0 : index
    %c0_66 = arith.constant 0 : index
    %56 = vector.load %arg4[%c1_64, %c0_65, %c0_66] : memref<3x320x512xbf16, #tpu.memory_space<vmem>>, vector<1x320x512xbf16>
    %57 = vector.shape_cast %56 : vector<1x320x512xbf16> to vector<320x512xbf16>
    %cst_67 = arith.constant dense<0.000000e+00> : vector<16x512xf32>
    %58 = tpu.matmul %55, %57, %cst_67 {dimension_numbers = #tpu.dot_dimension_numbers<[1], [0], [0], [1], [0, 0, 1, 1], [], []>} : vector<16x320xbf16>, vector<320x512xbf16>, vector<16x512xf32> -> vector<16x512xf32>
    %59 = arith.addf %53, %58 : vector<16x512xf32>
    %c0_68 = arith.constant 0 : index
    %c2_69 = arith.constant 2 : index
    %c0_70 = arith.constant 0 : index
    %60 = vector.load %arg14[%c0_68, %c2_69, %c0_70] : memref<2x10x320xbf16, #tpu.memory_space<vmem>>, vector<2x8x320xbf16>
    %61 = vector.shape_cast %60 : vector<2x8x320xbf16> to vector<16x320xbf16>
    %c2_71 = arith.constant 2 : index
    %c0_72 = arith.constant 0 : index
    %c0_73 = arith.constant 0 : index
    %62 = vector.load %arg4[%c2_71, %c0_72, %c0_73] : memref<3x320x512xbf16, #tpu.memory_space<vmem>>, vector<1x320x512xbf16>
    %63 = vector.shape_cast %62 : vector<1x320x512xbf16> to vector<320x512xbf16>
    %cst_74 = arith.constant dense<0.000000e+00> : vector<16x512xf32>
    %64 = tpu.matmul %61, %63, %cst_74 {dimension_numbers = #tpu.dot_dimension_numbers<[1], [0], [0], [1], [0, 0, 1, 1], [], []>} : vector<16x320xbf16>, vector<320x512xbf16>, vector<16x512xf32> -> vector<16x512xf32>
    %65 = arith.addf %59, %64 : vector<16x512xf32>
    %c0_75 = arith.constant 0 : index
    %c0_76 = arith.constant 0 : index
    %66 = vector.load %arg5[%c0_75, %c0_76] : memref<1x512xf32, #tpu.memory_space<vmem>>, vector<1x512xf32>
    %67 = vector.broadcast %66 : vector<1x512xf32> to vector<16x512xf32>
    %68 = arith.addf %65, %67 : vector<16x512xf32>
    %cst_77 = arith.constant 0.000000e+00 : f32
    %69 = vector.broadcast %cst_77 : f32 to vector<16x512xf32>
    %70 = arith.maximumf %68, %69 : vector<16x512xf32>
    %71 = vector.shape_cast %70 : vector<16x512xf32> to vector<8x2x512xf32>
    %cst_78 = arith.constant dense<0xFF800000> : vector<8x512xf32>
    %72 = vector.multi_reduction <maximumf>, %71, %cst_78 [1] : vector<8x2x512xf32> to vector<8x512xf32>
    %73 = vector.shape_cast %72 : vector<8x512xf32> to vector<8x4x128xf32>
    %74 = vector.extract_strided_slice %73 {offsets = [0, 0, 0], sizes = [8, 4, 64], strides = [1, 1, 1]} : vector<8x4x128xf32> to vector<8x4x64xf32>
    %75 = vector.extract_strided_slice %73 {offsets = [0, 0, 64], sizes = [8, 4, 64], strides = [1, 1, 1]} : vector<8x4x128xf32> to vector<8x4x64xf32>
    %76 = arith.maximumf %74, %75 : vector<8x4x64xf32>
    %77 = vector.shape_cast %76 : vector<8x4x64xf32> to vector<2x4x256xf32>
    %cst_79 = arith.constant 0.000000e+00 : bf16
    %78 = vector.broadcast %cst_79 : bf16 to vector<2x1x384xbf16>
    %cst_80 = arith.constant 0.000000e+00 : bf16
    %79 = vector.broadcast %cst_80 : bf16 to vector<2x6x64xbf16>
    %c0_81 = arith.constant 0 : index
    %c0_82 = arith.constant 0 : index
    %c0_83 = arith.constant 0 : index
    %80 = vector.load %arg15[%c0_81, %c0_82, %c0_83] : memref<2x6x384xbf16, #tpu.memory_space<vmem>>, vector<2x1x384xbf16>
    tpu.vector_store %arg15[%c0_81, %c0_82, %c0_83], %78 {strides = array<i32>} : memref<2x6x384xbf16, #tpu.memory_space<vmem>>, vector<2x1x384xbf16>,
    %c0_84 = arith.constant 0 : index
    %c5 = arith.constant 5 : index
    %c0_85 = arith.constant 0 : index
    %81 = vector.load %arg15[%c0_84, %c5, %c0_85] : memref<2x6x384xbf16, #tpu.memory_space<vmem>>, vector<2x1x384xbf16>
    tpu.vector_store %arg15[%c0_84, %c5, %c0_85], %78 {strides = array<i32>} : memref<2x6x384xbf16, #tpu.memory_space<vmem>>, vector<2x1x384xbf16>,
    %c0_86 = arith.constant 0 : index
    %c0_87 = arith.constant 0 : index
    %c0_88 = arith.constant 0 : index
    %82 = vector.load %arg15[%c0_86, %c0_87, %c0_88] : memref<2x6x384xbf16, #tpu.memory_space<vmem>>, vector<2x6x64xbf16>
    tpu.vector_store %arg15[%c0_86, %c0_87, %c0_88], %79 {strides = array<i32>} : memref<2x6x384xbf16, #tpu.memory_space<vmem>>, vector<2x6x64xbf16>,
    %c0_89 = arith.constant 0 : index
    %c0_90 = arith.constant 0 : index
    %c320 = arith.constant 320 : index
    %83 = vector.load %arg15[%c0_89, %c0_90, %c320] : memref<2x6x384xbf16, #tpu.memory_space<vmem>>, vector<2x6x64xbf16>
    tpu.vector_store %arg15[%c0_89, %c0_90, %c320], %79 {strides = array<i32>} : memref<2x6x384xbf16, #tpu.memory_space<vmem>>, vector<2x6x64xbf16>,
    %84 = arith.truncf %77 : vector<2x4x256xf32> to vector<2x4x256xbf16>
    %c0_91 = arith.constant 0 : index
    %c1_92 = arith.constant 1 : index
    %c64 = arith.constant 64 : index
    %85 = vector.load %arg15[%c0_91, %c1_92, %c64] : memref<2x6x384xbf16, #tpu.memory_space<vmem>>, vector<2x4x256xbf16>
    tpu.vector_store %arg15[%c0_91, %c1_92, %c64], %84 {strides = array<i32>} : memref<2x6x384xbf16, #tpu.memory_space<vmem>>, vector<2x4x256xbf16>,
    %cst_93 = arith.constant 0.000000e+00 : f32
    %86 = vector.broadcast %cst_93 : f32 to vector<8x512xf32>
    %c0_94 = arith.constant 0 : index
    %c0_95 = arith.constant 0 : index
    %c0_96 = arith.constant 0 : index
    %87 = vector.load %arg15[%c0_94, %c0_95, %c0_96] : memref<2x6x384xbf16, #tpu.memory_space<vmem>>, vector<2x4x384xbf16>
    %88 = vector.shape_cast %87 : vector<2x4x384xbf16> to vector<8x384xbf16>
    %c0_97 = arith.constant 0 : index
    %c0_98 = arith.constant 0 : index
    %c0_99 = arith.constant 0 : index
    %89 = vector.load %arg6[%c0_97, %c0_98, %c0_99] : memref<3x384x512xbf16, #tpu.memory_space<vmem>>, vector<1x384x512xbf16>
    %90 = vector.shape_cast %89 : vector<1x384x512xbf16> to vector<384x512xbf16>
    %cst_100 = arith.constant dense<0.000000e+00> : vector<8x512xf32>
    %91 = tpu.matmul %88, %90, %cst_100 {dimension_numbers = #tpu.dot_dimension_numbers<[1], [0], [0], [1], [0, 0, 1, 1], [], []>} : vector<8x384xbf16>, vector<384x512xbf16>, vector<8x512xf32> -> vector<8x512xf32>
    %92 = arith.addf %86, %91 : vector<8x512xf32>
    %c0_101 = arith.constant 0 : index
    %c1_102 = arith.constant 1 : index
    %c0_103 = arith.constant 0 : index
    %93 = vector.load %arg15[%c0_101, %c1_102, %c0_103] : memref<2x6x384xbf16, #tpu.memory_space<vmem>>, vector<2x4x384xbf16>
    %94 = vector.shape_cast %93 : vector<2x4x384xbf16> to vector<8x384xbf16>
    %c1_104 = arith.constant 1 : index
    %c0_105 = arith.constant 0 : index
    %c0_106 = arith.constant 0 : index
    %95 = vector.load %arg6[%c1_104, %c0_105, %c0_106] : memref<3x384x512xbf16, #tpu.memory_space<vmem>>, vector<1x384x512xbf16>
    %96 = vector.shape_cast %95 : vector<1x384x512xbf16> to vector<384x512xbf16>
    %cst_107 = arith.constant dense<0.000000e+00> : vector<8x512xf32>
    %97 = tpu.matmul %94, %96, %cst_107 {dimension_numbers = #tpu.dot_dimension_numbers<[1], [0], [0], [1], [0, 0, 1, 1], [], []>} : vector<8x384xbf16>, vector<384x512xbf16>, vector<8x512xf32> -> vector<8x512xf32>
    %98 = arith.addf %92, %97 : vector<8x512xf32>
    %c0_108 = arith.constant 0 : index
    %c2_109 = arith.constant 2 : index
    %c0_110 = arith.constant 0 : index
    %99 = vector.load %arg15[%c0_108, %c2_109, %c0_110] : memref<2x6x384xbf16, #tpu.memory_space<vmem>>, vector<2x4x384xbf16>
    %100 = vector.shape_cast %99 : vector<2x4x384xbf16> to vector<8x384xbf16>
    %c2_111 = arith.constant 2 : index
    %c0_112 = arith.constant 0 : index
    %c0_113 = arith.constant 0 : index
    %101 = vector.load %arg6[%c2_111, %c0_112, %c0_113] : memref<3x384x512xbf16, #tpu.memory_space<vmem>>, vector<1x384x512xbf16>
    %102 = vector.shape_cast %101 : vector<1x384x512xbf16> to vector<384x512xbf16>
    %cst_114 = arith.constant dense<0.000000e+00> : vector<8x512xf32>
    %103 = tpu.matmul %100, %102, %cst_114 {dimension_numbers = #tpu.dot_dimension_numbers<[1], [0], [0], [1], [0, 0, 1, 1], [], []>} : vector<8x384xbf16>, vector<384x512xbf16>, vector<8x512xf32> -> vector<8x512xf32>
    %104 = arith.addf %98, %103 : vector<8x512xf32>
    %c0_115 = arith.constant 0 : index
    %c0_116 = arith.constant 0 : index
    %105 = vector.load %arg7[%c0_115, %c0_116] : memref<1x512xf32, #tpu.memory_space<vmem>>, vector<1x512xf32>
    %106 = vector.broadcast %105 : vector<1x512xf32> to vector<8x512xf32>
    %107 = arith.addf %104, %106 : vector<8x512xf32>
    %cst_117 = arith.constant 0.000000e+00 : f32
    %108 = vector.broadcast %cst_117 : f32 to vector<8x512xf32>
    %109 = arith.maximumf %107, %108 : vector<8x512xf32>
    %110 = vector.shape_cast %109 : vector<8x512xf32> to vector<4x2x512xf32>
    %cst_118 = arith.constant dense<0xFF800000> : vector<4x512xf32>
    %111 = vector.multi_reduction <maximumf>, %110, %cst_118 [1] : vector<4x2x512xf32> to vector<4x512xf32>
    %112 = vector.shape_cast %111 : vector<4x512xf32> to vector<4x2x256xf32>
    %113 = vector.extract_strided_slice %112 {offsets = [0, 0, 0], sizes = [4, 2, 128], strides = [1, 1, 1]} : vector<4x2x256xf32> to vector<4x2x128xf32>
    %114 = vector.extract_strided_slice %112 {offsets = [0, 0, 128], sizes = [4, 2, 128], strides = [1, 1, 1]} : vector<4x2x256xf32> to vector<4x2x128xf32>
    %115 = arith.maximumf %113, %114 : vector<4x2x128xf32>
    %116 = vector.shape_cast %115 : vector<4x2x128xf32> to vector<2x2x256xf32>
    %117 = vector.shape_cast %116 : vector<2x2x256xf32> to vector<2x512xf32>
    %118 = arith.truncf %117 : vector<2x512xf32> to vector<2x512xbf16>
    %c0_119 = arith.constant 0 : index
    %c0_120 = arith.constant 0 : index
    %119 = vector.load %arg8[%c0_119, %c0_120] : memref<512x512xbf16, #tpu.memory_space<vmem>>, vector<512x512xbf16>
    %cst_121 = arith.constant dense<0.000000e+00> : vector<2x512xf32>
    %120 = tpu.matmul %118, %119, %cst_121 {dimension_numbers = #tpu.dot_dimension_numbers<[1], [0], [0], [1], [0, 0, 1, 1], [], []>} : vector<2x512xbf16>, vector<512x512xbf16>, vector<2x512xf32> -> vector<2x512xf32>
    %c0_122 = arith.constant 0 : index
    %c0_123 = arith.constant 0 : index
    %121 = vector.load %arg9[%c0_122, %c0_123] : memref<1x512xf32, #tpu.memory_space<vmem>>, vector<1x512xf32>
    %122 = vector.broadcast %121 : vector<1x512xf32> to vector<2x512xf32>
    %123 = arith.addf %120, %122 : vector<2x512xf32>
    %cst_124 = arith.constant 0.000000e+00 : f32
    %124 = vector.broadcast %cst_124 : f32 to vector<2x512xf32>
    %125 = arith.maximumf %123, %124 : vector<2x512xf32>
    %126 = arith.truncf %125 : vector<2x512xf32> to vector<2x512xbf16>
    %c0_125 = arith.constant 0 : index
    %c0_126 = arith.constant 0 : index
    %127 = vector.load %arg10[%c0_125, %c0_126] : memref<512x10xbf16, #tpu.memory_space<vmem>>, vector<512x10xbf16>
    %cst_127 = arith.constant dense<0.000000e+00> : vector<2x10xf32>
    %128 = tpu.matmul %126, %127, %cst_127 {dimension_numbers = #tpu.dot_dimension_numbers<[1], [0], [0], [1], [0, 0, 1, 1], [], []>} : vector<2x512xbf16>, vector<512x10xbf16>, vector<2x10xf32> -> vector<2x10xf32>
    %c0_128 = arith.constant 0 : index
    %c0_129 = arith.constant 0 : index
    %129 = vector.load %arg11[%c0_128, %c0_129] : memref<1x10xf32, #tpu.memory_space<vmem>>, vector<1x10xf32>
    %130 = vector.broadcast %129 : vector<1x10xf32> to vector<2x10xf32>
    %131 = arith.addf %128, %130 : vector<2x10xf32>
    %c0_130 = arith.constant 0 : index
    %c0_131 = arith.constant 0 : index
    %132 = vector.load %arg12[%c0_130, %c0_131] : memref<2x10xf32, #tpu.memory_space<vmem>>, vector<2x10xf32>
    tpu.vector_store %arg12[%c0_130, %c0_131], %131 {strides = array<i32>} : memref<2x10xf32, #tpu.memory_space<vmem>>, vector<2x10xf32>,
    return
  }
  func.func @transform_0(%arg0: i32) -> (i32, i32, i32) {
    %c0_i32 = arith.constant 0 : i32
    %c0_i32_0 = arith.constant 0 : i32
    %c0_i32_1 = arith.constant 0 : i32
    return %arg0, %c0_i32, %c0_i32_0 : i32, i32, i32
  }
  func.func @transform_1(%arg0: i32) -> (i32, i32, i32) {
    %c0_i32 = arith.constant 0 : i32
    %c0_i32_0 = arith.constant 0 : i32
    %c0_i32_1 = arith.constant 0 : i32
    %c0_i32_2 = arith.constant 0 : i32
    return %c0_i32, %c0_i32_0, %c0_i32_1 : i32, i32, i32
  }
  func.func @transform_2(%arg0: i32) -> (i32, i32) {
    %c0_i32 = arith.constant 0 : i32
    %c0_i32_0 = arith.constant 0 : i32
    %c0_i32_1 = arith.constant 0 : i32
    return %c0_i32, %c0_i32_0 : i32, i32
  }
  func.func @transform_3(%arg0: i32) -> (i32, i32, i32) {
    %c0_i32 = arith.constant 0 : i32
    %c0_i32_0 = arith.constant 0 : i32
    %c0_i32_1 = arith.constant 0 : i32
    %c0_i32_2 = arith.constant 0 : i32
    return %c0_i32, %c0_i32_0, %c0_i32_1 : i32, i32, i32
  }
  func.func @transform_4(%arg0: i32) -> (i32, i32) {
    %c0_i32 = arith.constant 0 : i32
    %c0_i32_0 = arith.constant 0 : i32
    %c0_i32_1 = arith.constant 0 : i32
    return %c0_i32, %c0_i32_0 : i32, i32
  }
  func.func @transform_5(%arg0: i32) -> (i32, i32, i32) {
    %c0_i32 = arith.constant 0 : i32
    %c0_i32_0 = arith.constant 0 : i32
    %c0_i32_1 = arith.constant 0 : i32
    %c0_i32_2 = arith.constant 0 : i32
    return %c0_i32, %c0_i32_0, %c0_i32_1 : i32, i32, i32
  }
  func.func @transform_6(%arg0: i32) -> (i32, i32) {
    %c0_i32 = arith.constant 0 : i32
    %c0_i32_0 = arith.constant 0 : i32
    %c0_i32_1 = arith.constant 0 : i32
    return %c0_i32, %c0_i32_0 : i32, i32
  }
  func.func @transform_7(%arg0: i32) -> (i32, i32) {
    %c0_i32 = arith.constant 0 : i32
    %c0_i32_0 = arith.constant 0 : i32
    %c0_i32_1 = arith.constant 0 : i32
    return %c0_i32, %c0_i32_0 : i32, i32
  }
  func.func @transform_8(%arg0: i32) -> (i32, i32) {
    %c0_i32 = arith.constant 0 : i32
    %c0_i32_0 = arith.constant 0 : i32
    %c0_i32_1 = arith.constant 0 : i32
    return %c0_i32, %c0_i32_0 : i32, i32
  }
  func.func @transform_9(%arg0: i32) -> (i32, i32) {
    %c0_i32 = arith.constant 0 : i32
    %c0_i32_0 = arith.constant 0 : i32
    %c0_i32_1 = arith.constant 0 : i32
    return %c0_i32, %c0_i32_0 : i32, i32
  }
  func.func @transform_10(%arg0: i32) -> (i32, i32) {
    %c0_i32 = arith.constant 0 : i32
    %c0_i32_0 = arith.constant 0 : i32
    %c0_i32_1 = arith.constant 0 : i32
    return %c0_i32, %c0_i32_0 : i32, i32
  }
  func.func @transform_11(%arg0: i32) -> (i32, i32) {
    %c0_i32 = arith.constant 0 : i32
    %c0_i32_0 = arith.constant 0 : i32
    return %arg0, %c0_i32 : i32, i32
  }
}

</mosaic_0001>

<bundles_post_ra>
// kernel: cnn_forward.1
= control target key start
LH: loop header
LB: loop body
LE: loop exit
PB: predicated region body
PF: predicated region fallthrough
CT: control target
= control target key end

     0   :  { %16 = vsyncpa [#allocation6], 0  ;;  %s16449_s0 = inlined_call_operand.vmem [shape: bf16[2,16,48], index: 0, kind: input, shape index: {}]   ;;  %s16450_s1 = inlined_call_operand.hbm [shape: bf16[3,54,512], index: 1, kind: input, shape index: {}]   ;;  %s16451_s2 = inlined_call_operand.hbm [shape: f32[1,512], index: 2, kind: input, shape index: {}]   ;;  %s16452_s3 = inlined_call_operand.hbm [shape: bf16[3,320,512], index: 3, kind: input, shape index: {}]   ;;  %s16453_s4 = inlined_call_operand.hbm [shape: f32[1,512], index: 4, kind: input, shape index: {}]   ;;  %s16454_s5 = inlined_call_operand.hbm [shape: bf16[3,384,512], index: 5, kind: input, shape index: {}]   ;;  %s16455_s6 = inlined_call_operand.hbm [shape: f32[1,512], index: 6, kind: input, shape index: {}]   ;;  %s16456_s7 = inlined_call_operand.hbm [shape: bf16[512,512], index: 7, kind: input, shape index: {}]   ;;  %s16457_s8 = inlined_call_operand.hbm [shape: f32[1,512], index: 8, kind: input, shape index: {}]   ;;  %s16458_s9 = inlined_call_operand.vmem [shape: bf16[512,10], index: 9, kind: input, shape index: {}]   ;;  %s16459_s10 = inlined_call_operand.hbm [shape: f32[1,10], index: 10, kind: input, shape index: {}]   ;;  %s16460_s11 = inlined_call_operand.hbm [shape: f32[2,10], index: 11, kind: output, shape index: {}]  }
   0x1   :  { %17 = vsyncpa [#allocation9], 0 }
   0x2   :  { %18 = vsyncpa [#allocation12], 0 }
   0x3   :  { %19 = vsyncpa [#allocation15], 0 }
   0x4   :  { %20 = vsyncpa [#allocation18], 0  ;;  %s42_s19 = sshll.u32 %s16451_s2, 4  ;;  %s43_s19 = int_to_ptr.hbm [resolvable:$true] %s42_s19 }
   0x5   :  { %21 = vsyncpa [#allocation7], 0  ;;  %s13870_s20 = smov [#allocation8]   ;;  %s66_s24 = sshll.u32 %s16453_s4, 4  ;;  %s67_s24 = int_to_ptr.hbm [resolvable:$true] %s66_s24 }
   0x6   :  { %s44_s21 = sshll.u32 %s13870_s20, 4  ;;  %s13871_s25 = smov [#allocation11]   ;;  %s45_s21 = int_to_ptr.vmem [resolvable:$true] %s44_s21 }
   0x7   :  { %47 = dma.hbm_to_vmem [thread:$0]  %s43_s19, 64, %s45_s21, [#allocation9]  }
   0x8   :  { %s68_s26 = sshll.u32 %s13871_s25, 4  ;;  %s90_s29 = sshll.u32 %s16455_s6, 4  ;;  %s69_s26 = int_to_ptr.vmem [resolvable:$true] %s68_s26  ;;  %s91_s29 = int_to_ptr.hbm [resolvable:$true] %s90_s29 }
   0x9   :  { %71 = dma.hbm_to_vmem [thread:$0]  %s67_s24, 64, %s69_s26, [#allocation12]  }
   0xa   :  { %s114_s12 = sshll.u32 %s16457_s8, 4  ;;  %s13872_s13 = smov [#allocation14]   ;;  %s115_s12 = int_to_ptr.hbm [resolvable:$true] %s114_s12 }
   0xb   :  { %s92_s14 = sshll.u32 %s13872_s13, 4  ;;  %s13873_s4 = smov [#allocation17]   ;;  %s93_s14 = int_to_ptr.vmem [resolvable:$true] %s92_s14 }
   0xc   :  { %95 = dma.hbm_to_vmem [thread:$0]  %s91_s29, 64, %s93_s14, [#allocation15]  }
   0xd   :  { %s116_s15 = sshll.u32 %s13873_s4, 4  ;;  %s28_s18 = sshll.u32 %s16450_s1, 4  ;;  %s117_s15 = int_to_ptr.vmem [resolvable:$true] %s116_s15  ;;  %s29_s18 = int_to_ptr.hbm [resolvable:$true] %s28_s18 }
   0xe   :  { %119 = dma.hbm_to_vmem [thread:$0]  %s115_s12, 64, %s117_s15, [#allocation18]  }
   0xf   :  { %s13874_s6 = smov [#allocation5]   ;;  %s52_s8 = sshll.u32 %s16452_s3, 4  ;;  %s53_s8 = int_to_ptr.hbm [resolvable:$true] %s52_s8 }
  0x10   :  { %s30_s19 = sshll.u32 %s13874_s6, 4  ;;  %s13875_s22 = smov 256   ;;  %s31_s19 = int_to_ptr.vmem [resolvable:$true] %s30_s19 }
  0x11   :  { %s13876_s23 = smov 16   ;;  %s13877_s24 = smov [#allocation10]  }
  0x12   :  { %36 = dma.hbm_to_vmem [thread:$0]  %s29_s18, 5376, %s31_s19, [#allocation6], %s13875_s22, %s13875_s22, %s13876_s23  }
  0x13   :  { %s54_s25 = sshll.u32 %s13877_s24, 4  ;;  %s76_s1 = sshll.u32 %s16454_s5, 4  ;;  %s55_s25 = int_to_ptr.vmem [resolvable:$true] %s54_s25  ;;  %s77_s1 = int_to_ptr.hbm [resolvable:$true] %s76_s1 }
  0x14   :  { %60 = dma.hbm_to_vmem [thread:$0]  %s53_s8, 30720, %s55_s25, [#allocation9], %s13875_s22, %s13875_s22, %s13876_s23  }
  0x15   :  { %s100_s2 = sshll.u32 %s16456_s7, 4  ;;  %s13878_s30 = smov [#allocation13]   ;;  %s101_s2 = int_to_ptr.hbm [resolvable:$true] %s100_s2 }
  0x16   :  { %s78_s12 = sshll.u32 %s13878_s30, 4  ;;  %s13879_s3 = smov [#allocation16]   ;;  %s79_s12 = int_to_ptr.vmem [resolvable:$true] %s78_s12 }
  0x17   :  { %84 = dma.hbm_to_vmem [thread:$0]  %s77_s1, 36864, %s79_s12, [#allocation12], %s13875_s22, %s13875_s22, %s13876_s23  }
  0x18   :  { %s102_s13 = sshll.u32 %s13879_s3, 4  ;;  %s127_s15 = sshll.u32 %s16459_s10, 4  ;;  %s103_s13 = int_to_ptr.vmem [resolvable:$true] %s102_s13  ;;  %s128_s15 = int_to_ptr.hbm [resolvable:$true] %s127_s15 }
  0x19   :  { %108 = dma.hbm_to_vmem [thread:$0]  %s101_s2, 16384, %s103_s13, [#allocation15], %s13875_s22, %s13875_s22, %s13876_s23  }
  0x1a   :  { %s13880_s5 = smov [#allocation19]  }
  0x1b   :  { %s129_s16 = sshll.u32 %s13880_s5, 4  ;;  %s130_s16 = int_to_ptr.vmem [resolvable:$true] %s129_s16 }
  0x1c   :  { %132 = dma.hbm_to_vmem [thread:$0]  %s128_s15, 16, %s130_s16, [#allocation18]  }
  0x1d   :  { %13858 = dma.done.wait [#allocation6], 5376  }
  0x1e   :  { %13859 = vsyncadd [#allocation6], 4294961920 }
  0x1f   :  { %13860 = dma.done.wait [#allocation9], 30784  }
  0x20   :  { %13861 = vsyncadd [#allocation9], 4294936512 }
  0x21   :  { %13862 = dma.done.wait [#allocation12], 36928  }
  0x22   :  { %13863 = vsyncadd [#allocation12], 4294930368 }
  0x23   :  { %13864 = dma.done.wait [#allocation15], 16448  }
  0x24   :  { %13865 = vsyncadd [#allocation15], 4294950848 }
  0x25   :  { %13866 = dma.done.wait [#allocation18], 80  }
  0x26   :  { %13867 = vsyncadd [#allocation18], 4294967216  ;;  %vm191_vm0 = vcmask 19456   ;;  %v16461_v0 = vmov 0   ;;  %vm174_vm1 = vcmask 434176   ;;  %vm199_vm2 = vcmask 437656  }
  0x27   :  { %193 = vst.msk [vmem:[#allocation2 + $0x4] sm:$0xf] %vm191_vm0, %v16461_v0  ;;  %vm16480_vm3 = vsmask.f32 256  ;;  %vm207_vm4 = vsmask.f32 4368 }
  0x28   :  { %197 = vst.msk [vmem:[#allocation2 + $0x10] sm:$0xf] %vm191_vm0, %v16461_v0  ;;  %vm13986_vm5 = vmand %vm174_vm1, %vm16480_vm3  ;;  %v170_v2 = vld [vmem:[%s16449_s0] sm:$0xf]  ;;  %v171_v3 = vld [vmem:[%s16449_s0 + $0x4] sm:$0xf] }
  0x29   :  { %201 = vst.msk [vmem:[#allocation2 + $0x4] sm:$0xf] %vm199_vm2, %v16461_v0  ;;  %v172_v4 = vld [vmem:[%s16449_s0 + $0x8] sm:$0xf]  ;;  %v210_v5 = vshrl.u32 %v170_v2, 16  ;;  %v213_v6 = vshll.u32 %v170_v2, 16  ;;  %vm208_vm6 = vmor %vm16480_vm3, %vm207_vm4 }
  0x2a   :  { %205 = vst.msk [vmem:[#allocation2 + $0x10] sm:$0xf] %vm199_vm2, %v16461_v0  ;;  %v218_v7 = vshrl.u32 %v171_v3, 16  ;;  %v173_v8 = vld [vmem:[%s16449_s0 + $0xc] sm:$0xf]  ;;  %v227_v9 = vshrl.u32 %v172_v4, 16 }
  0x2b   :  { %v235_v10 = vshrl.u32 %v173_v8, 16  ;;  %v238_v11 = vshll.u32 %v173_v8, 16  ;;  %v177_v12 = vld [vmem:[#allocation2] sm:$0x1]  ;;  %v212_v13 = vrot.slane %v210_v5, 7  ;;  %v221_v16 = vshll.u32 %v171_v3, 16 }
  0x2c   :  { %v220_v14 = vrot.slane %v218_v7, 7  ;;  %v178_v15 = vsel %vm13986_vm5, 0, %v177_v12  ;;  %v229_v17 = vrot.slane %v227_v9, 7  ;;  %s13882_s0 = smov 3   ;;  %v230_v23 = vshll.u32 %v172_v4, 16  ;;  %s13883_s8 = smov 64  }
  0x2d   :  { %v237_v18 = vrot.slane %v235_v10, 7  ;;  %179 = vst [vmem:[#allocation2] sm:$0x1] %v178_v15  ;;  %v215_v19 = vor.u32 %v213_v6, %v212_v13  ;;  %v216_v24 = vrot.slane %v212_v13, 4  ;;  %vm183_vm7 = vsmask.f32 7938 }
  0x2e   :  { %v225_v20 = vrot.slane %v220_v14, 4  ;;  %192 = vst.msk [vmem:[#allocation2] sm:$0xf] %vm191_vm0, %v16461_v0  ;;  %v233_v21 = vrot.slane %v229_v17, 4  ;;  %v223_v25 = vor.u32 %v221_v16, %v220_v14  ;;  %v232_v27 = vor.u32 %v230_v23, %v229_v17  ;;  %vm14012_vm8 = vmand %vm174_vm1, %vm183_vm7  ;;  %v185_v31 = vld [vmem:[#allocation2 + $0x8] sm:$0x1] }
  0x2f   :  { %v240_v22 = vor.u32 %v238_v11, %v237_v18  ;;  %200 = vst.msk [vmem:[#allocation2] sm:$0xf] %vm199_vm2, %v16461_v0  ;;  %243 = vrot.lane.b32.xlu0 %v215_v19, %s13882_s0  ;;  %v242_v29 = vrot.slane %v237_v18, 4  ;;  %v186_v32 = vsel %vm14012_vm8, 0, %v185_v31  ;;  %vm194_vm9 = vcmask 16384   ;;  %s13886_s22 = smov 96  }
  0x30   :  { %247 = vrot.lane.b32.xlu1 %v225_v20, %s13882_s0  ;;  %v224_v28 = vsel %vm208_vm6, %v216_v24, %v223_v25  ;;  %187 = vst [vmem:[#allocation2 + $0x8] sm:$0x1] %v186_v32  ;;  %vm202_vm10 = vcmask 434584   ;;  %v180_v33 = vld [vmem:[#allocation2 + $0xc] sm:$0x1]  ;;  %vm261_vm11 = vcmask 412696  }
  0x31   :  { %v241_v26 = vsel %vm208_vm6, %v233_v21, %v240_v22  ;;  %195 = vst.msk [vmem:[#allocation2 + $0x8] sm:$0x1] %vm194_vm9, %v16461_v0  ;;  %v181_v34 = vsel %vm13986_vm5, 0, %v180_v33  ;;  %v188_v35 = vld [vmem:[#allocation2 + $0x14] sm:$0x1]  ;;  %vm449_vm12 = vcmask 1042432   ;;  %vm14049_vm15 = vmand %vm261_vm11, %vm183_vm7 }
  0x32   :  { %251 = vrot.lane.b32.xlu2 %v241_v26, %s13882_s0  ;;  %203 = vst.msk [vmem:[#allocation2 + $0x8] sm:$0x1] %vm202_vm10, %v16461_v0  ;;  %v189_v36 = vsel %vm14012_vm8, 0, %v188_v35  ;;  %v364_v37 = vld [vmem:[#allocation5 + $0xd0] sm:$0x77]  ;;  %vm268_vm13 = vcmask 409624  }
  0x33   :  { %182 = vst [vmem:[#allocation2 + $0xc] sm:$0x1] %v181_v34  ;;  %v365_v38 = vld [vmem:[#allocation5 + $0xd8] sm:$0x77]  ;;  %v410_v40 = vunpack.c.l.b16 %v364_v37  ;;  %v411_v41 = vunpack.c.h.b16 %v364_v37  ;;  %v9681_v43 = vld [vmem:[#allocation5 + $0xb0] sm:$0xf]  ;;  %vm14041_vm14 = vmand %vm268_vm13, %vm16480_vm3 }
  0x34   :  { %196 = vst.msk [vmem:[#allocation2 + $0xc] sm:$0xf] %vm191_vm0, %v16461_v0  ;;  %v412_v42 = vunpack.c.l.b16 %v365_v38  ;;  %v413_v44 = vunpack.c.h.b16 %v365_v38  ;;  %v12633_v45 = vld [vmem:[#allocation5 + $0xbc] sm:$0xf0]  ;;  %v12631_v46 = vld [vmem:[#allocation5 + $0xb4] sm:$0xf] }
  0x35   :  { %204 = vst.msk [vmem:[#allocation2 + $0xc] sm:$0xf] %vm199_vm2, %v16461_v0  ;;  %v426_v47 = vpack.c.b16 %v410_v40, %v410_v40  ;;  %v427_v48 = vpack.c.b16 %v411_v41, %v411_v41  ;;  %v9683_v50 = vld [vmem:[#allocation5 + $0xc0] sm:$0xf0]  ;;  %v9689_v51 = vld [vmem:[#allocation5 + $0xb8] sm:$0xf]  ;;  %v9682_v59 = vor.u32 %v12633_v45, %v9681_v43 }
  0x36   :  { %190 = vst [vmem:[#allocation2 + $0x14] sm:$0x1] %v189_v36  ;;  %v428_v49 = vpack.c.b16 %v412_v42, %v412_v42  ;;  %v429_v52 = vpack.c.b16 %v413_v44, %v413_v44  ;;  %v12634_v53 = vld [vmem:[#allocation5 + $0xc4] sm:$0xf0]  ;;  %v12632_v54 = vld [vmem:[#allocation5 + $0xbc] sm:$0xf]  ;;  %v9686_v60 = vor.u32 %v12631_v46, %v9683_v50 }
  0x37   :  { %245 = vrot.lane.b32.xlu0 %v224_v28, %s13882_s0  ;;  %198 = vst.msk [vmem:[#allocation2 + $0x14] sm:$0x1] %vm194_vm9, %v16461_v0  ;;  %v451_v55 = vsel %vm449_vm12, %v426_v47, 0  ;;  %v454_v56 = vsel %vm449_vm12, %v427_v48, 0  ;;  %v9691_v61 = vld [vmem:[#allocation5 + $0xc8] sm:$0xf0]  ;;  %v9690_v63 = vor.u32 %v12634_v53, %v9689_v51 }
  0x38   :  { %249 = vrot.lane.b32.xlu1 %v232_v27, %s13882_s0  ;;  %206 = vst.msk [vmem:[#allocation2 + $0x14] sm:$0x1] %vm202_vm10, %v16461_v0  ;;  %v457_v57 = vsel %vm449_vm12, %v428_v49, 0  ;;  %466 = vmatpush.bf16.msra.mxu0 %v451_v55  ;;  %v460_v58 = vsel %vm449_vm12, %v429_v52, 0  ;;  %v9665_v62 = vld [vmem:[#allocation5 + $0x90] sm:$0xf]  ;;  %v9694_v1 = vor.u32 %v12632_v54, %v9691_v61 }
  0x39   :  { %485 = vmatpush.bf16.msra.mxu1 %v454_v56  ;;  %504 = vmatpush.bf16.msra.mxu2 %v457_v57  ;;  %v12629_v2 = vld [vmem:[#allocation5 + $0x9c] sm:$0xf0]  ;;  %v12627_v3 = vld [vmem:[#allocation5 + $0x94] sm:$0xf]  ;;  %v9667_v4 = vld [vmem:[#allocation5 + $0xa0] sm:$0xf0] }
  0x3a   :  { %253 = vrot.lane.b32.xlu2 %v242_v29, %s13882_s0  ;;  %523 = vmatpush.bf16.msra.mxu3 %v460_v58  ;;  %v9673_v5 = vld [vmem:[#allocation5 + $0x98] sm:$0xf]  ;;  %v12630_v6 = vld [vmem:[#allocation5 + $0xa4] sm:$0xf0]  ;;  %v12628_v7 = vld [vmem:[#allocation5 + $0x9c] sm:$0xf]  ;;  %v9666_v11 = vor.u32 %v12629_v2, %v9665_v62  ;;  %v9670_v12 = vor.u32 %v12627_v3, %v9667_v4 }
  0x3b   :  { %v9675_v10 = vld [vmem:[#allocation5 + $0xa8] sm:$0xf0]  ;;  %v9649_v13 = vld [vmem:[#allocation5 + $0x70] sm:$0xf]  ;;  %v12625_v14 = vld [vmem:[#allocation5 + $0x7c] sm:$0xf0]  ;;  %v9674_v17 = vor.u32 %v12630_v6, %v9673_v5 }
  0x3c   :  { %467 = vmatpush.bf16.msra.mxu0 %v9682_v59  ;;  %v12623_v15 = vld [vmem:[#allocation5 + $0x74] sm:$0xf]  ;;  %v9678_v18 = vor.u32 %v12628_v7, %v9675_v10  ;;  %v9651_v19 = vld [vmem:[#allocation5 + $0x80] sm:$0xf0]  ;;  %v9657_v20 = vld [vmem:[#allocation5 + $0x78] sm:$0xf]  ;;  %v9650_v25 = vor.u32 %v12625_v14, %v9649_v13 }
  0x3d   :  { %486 = vmatpush.bf16.msra.mxu1 %v9686_v60  ;;  %505 = vmatpush.bf16.msra.mxu2 %v9690_v63  ;;  %v12626_v22 = vld [vmem:[#allocation5 + $0x84] sm:$0xf0]  ;;  %v12624_v23 = vld [vmem:[#allocation5 + $0x7c] sm:$0xf]  ;;  %v9659_v24 = vld [vmem:[#allocation5 + $0x88] sm:$0xf0]  ;;  %v9654_v26 = vor.u32 %v12623_v15, %v9651_v19 }
  0x3e   :  { %524 = vmatpush.bf16.msra.mxu3 %v9694_v1  ;;  %v9658_v27 = vor.u32 %v12626_v22, %v9657_v20  ;;  %v9662_v28 = vor.u32 %v12624_v23, %v9659_v24  ;;  %v263_v30 = vld [vmem:[#allocation2] sm:$0xf]  ;;  %v270_v31 = vld [vmem:[#allocation2 + $0x8] sm:$0x1]  ;;  %vm16467_vm0 = vcmask 1046532   ;;  %v16494_v41 = vmov 0 }
  0x3f   :  { %v277_v16 = vld [vmem:[#allocation2 + $0x14] sm:$0x1]  ;;  %vm14067_vm1 = vmor %vm449_vm12, %vm16467_vm0  ;;  %v273_v42 = vld [vmem:[#allocation2 + $0xc] sm:$0xf]  ;;  %vm300_vm2 = vsmask.f32 3328 }
  0x40   :  { %468 = vmatpush.bf16.msra.mxu0 %v9666_v11  ;;  %v16495_v41 = vsel %vm14067_vm1, 4294967295, %v16494_v41  ;;  %v296_v54 = vld [vmem:[#allocation5 + $0x60] sm:$0x77]  ;;  %v297_v55 = vld [vmem:[#allocation5 + $0x68] sm:$0x77]  ;;  %vm442_vm6 = vcmask 441344  }
  0x41   :  { %487 = vmatpush.bf16.msra.mxu1 %v9670_v12  ;;  %506 = vmatpush.bf16.msra.mxu2 %v9674_v17  ;;  %16496 = vst [vmem:[#allocation27_spill] sm:$0xff] %v16495_v41  ;;  %v586_v58 = vunpack.c.l.b16 %v296_v54  ;;  %v587_v59 = vunpack.c.h.b16 %v296_v54  ;;  %vm301_vm4 = vsmask.f32 7440  ;;  %v588_v60 = vunpack.c.l.b16 %v297_v55  ;;  %v9745_v8 = vld [vmem:[#allocation5 + $0x40] sm:$0xf]  ;;  %s13887_s23 = smov 32  }
  0x42   :  { %525 = vmatpush.bf16.msra.mxu3 %v9678_v18  ;;  %v589_v61 = vunpack.c.h.b16 %v297_v55  ;;  %v12619_v15 = vld [vmem:[#allocation5 + $0x44] sm:$0xf]  ;;  %v9747_v22 = vld [vmem:[#allocation5 + $0x50] sm:$0xf0]  ;;  %v9753_v23 = vld [vmem:[#allocation5 + $0x48] sm:$0xf] }
  0x43   :  { %v602_v1 = vpack.c.b16 %v586_v58, %v586_v58  ;;  %v603_v2 = vpack.c.b16 %v587_v59, %v587_v59  ;;  %v604_v6 = vpack.c.b16 %v588_v60, %v588_v60  ;;  %v12620_v29 = vld [vmem:[#allocation5 + $0x4c] sm:$0xf]  ;;  %vm14103_vm5 = vmor %vm300_vm2, %vm301_vm4  ;;  %v12613_v60 = vld [vmem:[#allocation5 + $0xc] sm:$0xf0]  ;;  %vm16479_vm8 = vcmask 1041408   ;;  %s9633_s12 = sshll.u32 %s16460_s11, 4  ;;  %s9634_s12 = int_to_ptr.hbm [resolvable:$true] %s9633_s12 }
  0x44   :  { %469 = vmatpush.bf16.msra.mxu0 %v9650_v25  ;;  %v605_v7 = vpack.c.b16 %v589_v61, %v589_v61  ;;  %v12611_v61 = vld [vmem:[#allocation5 + $0x4] sm:$0xf]  ;;  %vm16477_vm9 = vcmask 1045508   ;;  %vm16478_vm10 = vcmask 1043458   ;;  %vm16468_vm13 = vcmask 1045506  }
  0x45   :  { %488 = vmatpush.bf16.msra.mxu1 %v9654_v26  ;;  %507 = vmatpush.bf16.msra.mxu2 %v9658_v27  ;;  %v625_v12 = vsel %vm449_vm12, %v602_v1, 0  ;;  %v628_v13 = vsel %vm449_vm12, %v603_v2, 0  ;;  %v631_v19 = vsel %vm449_vm12, %v604_v6, 0  ;;  %v9750_v27 = vor.u32 %v12619_v15, %v9747_v22  ;;  %v9715_v6 = vld [vmem:[#allocation5 + $0x10] sm:$0xf0] }
  0x46   :  { %526 = vmatpush.bf16.msra.mxu3 %v9662_v28  ;;  %v634_v20 = vsel %vm449_vm12, %v605_v7, 0  ;;  %v12622_v28 = vld [vmem:[#allocation5 + $0x54] sm:$0xf0]  ;;  %v9721_v7 = vld [vmem:[#allocation5 + $0x8] sm:$0xf]  ;;  %vm16473_vm2 = vcmask 1043459  }
  0x47   :  { %vm16483_vm4 = vcmask 1044484   ;;  %vm16471_vm0 = vcmask 1046534  }
  0x48   :  { %640 = vmatpush.bf16.msrb.mxu0 %v625_v12  ;;  %v9718_v12 = vor.u32 %v12611_v61, %v9715_v6 }
  0x49   :  { %659 = vmatpush.bf16.msrb.mxu1 %v628_v13  ;;  %678 = vmatpush.bf16.msrb.mxu2 %v631_v19  ;;  %v12612_v13 = vld [vmem:[#allocation5 + $0xc] sm:$0xf] }
  0x4a   :  { %697 = vmatpush.bf16.msrb.mxu3 %v634_v20 }
  0x4d   :  { %660 = vmatpush.bf16.msrb.mxu1 %v9750_v27 }
  0x8c   :  { %v252_v39 = vpop.permute.xlu2 %251 }
  0x8d   :  { %276 = vst.msk [vmem:[#allocation2 + $0x10] sm:$0xf] %vm261_vm11, %v252_v39 }
  0x94   :  { %v254_v9 = vpop.permute.xlu2 %253  ;;  %v14057_v36 = vld [vmem:[#allocation2 + $0x10] sm:$0xf] }
  0x95   :  { %v278_v21 = vsel %vm14041_vm14, %v254_v9, %v277_v16  ;;  %v730_v38 = vrot.slane %v14057_v36, 5  ;;  %v337_v48 = vshll.u32 %v14057_v36, 16  ;;  %v341_v49 = vshrl.u32 %v14057_v36, 16  ;;  %v12621_v9 = vld [vmem:[#allocation5 + $0x4c] sm:$0xf0] }
  0x96   :  { %279 = vst [vmem:[#allocation2 + $0x14] sm:$0x1] %v278_v21  ;;  %v9746_v14 = vor.u32 %v12621_v9, %v9745_v8  ;;  %v12614_v8 = vld [vmem:[#allocation5 + $0x14] sm:$0xf0] }
  0x97   :  { %v732_v39 = vrot.slane %v730_v38, 4  ;;  %v14083_v62 = vrot.slane %v337_v48, 5  ;;  %v14085_v63 = vrot.slane %v341_v49, 4  ;;  %v9737_v48 = vld [vmem:[#allocation5 + $0x28] sm:$0xf] }
  0x98   :  { %641 = vmatpush.bf16.msrb.mxu0 %v9746_v14  ;;  %v12618_v49 = vld [vmem:[#allocation5 + $0x34] sm:$0xf0]  ;;  %v9723_v14 = vld [vmem:[#allocation5 + $0x18] sm:$0xf0] }
  0x99   :  { %v9738_v55 = vor.u32 %v12618_v49, %v9737_v48  ;;  %v9726_v19 = vor.u32 %v12612_v13, %v9723_v14  ;;  %v12642_v13 = vld [vmem:[#allocation5 + $0x114] sm:$0xf0]  ;;  %v12640_v14 = vld [vmem:[#allocation5 + $0x10c] sm:$0xf] }
  0x9d   :  { %v14059_v37 = vld [vmem:[#allocation2 + $0x14] sm:$0x1] }
  0x9e   :  { %v733_v40 = vrot.slane %v14059_v37, 5  ;;  %v347_v22 = vshll.u32 %v14059_v37, 16 }
  0xa0   :  { %v14073_v43 = vsel %vm14067_vm1, %v732_v39, %v733_v40  ;;  %v349_v27 = vrot.slane %v347_v22, 5  ;;  %v12636_v22 = vld [vmem:[#allocation5 + $0xec] sm:$0xf] }
  0xa1   :  { %v244_v32 = vpop.permute.xlu0 %243 }
  0xa2   :  { %v248_v33 = vpop.permute.xlu1 %247  ;;  %v264_v34 = vsel %vm14049_vm15, %v244_v32, %v263_v30  ;;  %v16497_v30 = vmov 0 }
  0xa3   :  { %v271_v35 = vsel %vm14041_vm14, %v248_v33, %v270_v31  ;;  %265 = vst [vmem:[#allocation2] sm:$0xf] %v264_v34  ;;  %v16498_v30 = vsel %vm14103_vm5, 4294967295, %v16497_v30  ;;  %v9754_v33 = vor.u32 %v12622_v28, %v9753_v23  ;;  %v9755_v34 = vld [vmem:[#allocation5 + $0x58] sm:$0xf0]  ;;  %vm16475_vm14 = vcmask 1041409  }
  0xa4   :  { %272 = vst [vmem:[#allocation2 + $0x8] sm:$0x1] %v271_v35  ;;  %v9729_v35 = vld [vmem:[#allocation5 + $0x20] sm:$0xf]  ;;  %v9758_v40 = vor.u32 %v12620_v29, %v9755_v34 }
  0xa5   :  { %16499 = vst [vmem:[#allocation28_spill] sm:$0xff] %v16498_v30  ;;  %679 = vmatpush.bf16.msrb.mxu2 %v9754_v33  ;;  %v749_v33 = vld [vmem:[#allocation5 + $0x148] sm:$0x77] }
  0xa6   :  { %698 = vmatpush.bf16.msrb.mxu3 %v9758_v40  ;;  %v797_v40 = vunpack.c.h.b16 %v749_v33 }
  0xa9   :  { %v246_v44 = vpop.permute.xlu0 %245  ;;  %680 = vmatpush.bf16.msrb.mxu2 %v9738_v55  ;;  %v9805_v55 = vld [vmem:[#allocation5 + $0x130] sm:$0xf0] }
  0xaa   :  { %v250_v45 = vpop.permute.xlu1 %249  ;;  %267 = vst.msk [vmem:[#allocation2 + $0x4] sm:$0xf] %vm261_vm11, %v246_v44  ;;  %v280_v47 = vld [vmem:[#allocation2] sm:$0xf]  ;;  %v12615_v44 = vld [vmem:[#allocation5 + $0x24] sm:$0xf] }
  0xab   :  { %v274_v46 = vsel %vm14049_vm15, %v250_v45, %v273_v42  ;;  %v14080_v50 = vld [vmem:[#allocation2 + $0x8] sm:$0x1]  ;;  %v304_v51 = vshrl.u32 %v280_v47, 16  ;;  %v307_v52 = vshll.u32 %v280_v47, 16  ;;  %v14087_v3 = vld [vmem:[#allocation2] sm:$0xe] }
  0xac   :  { %275 = vst [vmem:[#allocation2 + $0xc] sm:$0xf] %v274_v46  ;;  %v323_v53 = vshll.u32 %v14080_v50, 16  ;;  %v726_v5 = vrot.slane %v14080_v50, 5  ;;  %v9767_v24 = vrot.slane %v14087_v3, 9  ;;  %vm16476_vm11 = vcmask 1045504  }
  0xad   :  { %v306_v56 = vrot.slane %v304_v51, 4  ;;  %v309_v57 = vrot.slane %v307_v52, 5  ;;  %v12617_v42 = vld [vmem:[#allocation5 + $0x2c] sm:$0xf0]  ;;  %v9731_v45 = vld [vmem:[#allocation5 + $0x30] sm:$0xf0] }
  0xae   :  { %v14089_v4 = vrot.slane %v323_v53, 5  ;;  %v9730_v46 = vor.u32 %v12617_v42, %v9729_v35  ;;  %v9734_v47 = vor.u32 %v12615_v44, %v9731_v45  ;;  %v12616_v51 = vld [vmem:[#allocation5 + $0x2c] sm:$0xf]  ;;  %vm16474_vm15 = vcmask 1042434  }
  0xaf   :  { %v310_v11 = vor.u32 %v309_v57, %v306_v56  ;;  %v9739_v56 = vld [vmem:[#allocation5 + $0x38] sm:$0xf0]  ;;  %v9713_v57 = vld [vmem:[#allocation5] sm:$0xf] }
  0xb0   :  { %v9742_v59 = vor.u32 %v12616_v51, %v9739_v56  ;;  %642 = vmatpush.bf16.msrb.mxu0 %v9730_v46  ;;  %661 = vmatpush.bf16.msrb.mxu1 %v9734_v47  ;;  %v9714_v3 = vor.u32 %v12613_v60, %v9713_v57  ;;  %v813_v47 = vpack.c.b16 %v797_v40, %v797_v40  ;;  %v12644_v60 = vld [vmem:[#allocation5 + $0x12c] sm:$0xf] }
  0xb1   :  { %v14092_v10 = vld [vmem:[#allocation2 + $0x4] sm:$0xf]  ;;  %v311_v31 = vrot.slane %v310_v11, 4 }
  0xb2   :  { %v313_v16 = vshll.u32 %v14092_v10, 16  ;;  %v317_v17 = vshrl.u32 %v14092_v10, 16  ;;  %v723_v1 = vrot.slane %v14092_v10, 5  ;;  %v344_v10 = vor.u32 %v14085_v63, %v14083_v62  ;;  %699 = vmatpush.bf16.msrb.mxu3 %v9742_v59  ;;  %v12646_v59 = vld [vmem:[#allocation5 + $0x134] sm:$0xf0] }
  0xb3   :  { %v282_v18 = vld [vmem:[#allocation2 + $0xc] sm:$0xf]  ;;  %v753_v63 = vunpack.c.l.b16 %v14073_v43  ;;  %v842_v51 = vsel %vm449_vm12, %v813_v47, 0 }
  0xb4   :  { %v328_v21 = vshrl.u32 %v282_v18, 16  ;;  %v315_v25 = vrot.slane %v313_v16, 5  ;;  %v319_v26 = vrot.slane %v317_v17, 4  ;;  %v331_v32 = vshll.u32 %v282_v18, 16  ;;  %v713_v15 = vld [vmem:[#allocation2 + $0xc] sm:$0xe]  ;;  %643 = vmatpush.bf16.msrb.mxu0 %v9714_v3  ;;  %662 = vmatpush.bf16.msrb.mxu1 %v9718_v12 }
  0xb5   :  { %v725_v16 = vrot.slane %v723_v1, 4  ;;  %v9722_v18 = vor.u32 %v12614_v8, %v9721_v7  ;;  %v9768_v20 = vrot.slane %v713_v15, 9  ;;  %v12641_v3 = vld [vmem:[#allocation5 + $0x10c] sm:$0xf0]  ;;  %v12639_v7 = vld [vmem:[#allocation5 + $0x104] sm:$0xf] }
  0xb6   :  { %v320_v39 = vor.u32 %v319_v26, %v315_v25  ;;  %v316_v52 = vsel %vm14103_vm5, %v311_v31, %v315_v25  ;;  %v330_v54 = vrot.slane %v328_v21, 4  ;;  %v333_v58 = vrot.slane %v331_v32, 5  ;;  %700 = vmatpush.bf16.msrb.mxu3 %v9726_v19  ;;  %v748_v32 = vld [vmem:[#allocation5 + $0x140] sm:$0x77]  ;;  %v9789_v8 = vld [vmem:[#allocation5 + $0x110] sm:$0xf0] }
  0xb7   :  { %v366_v9 = vunpack.c.l.b16 %v316_v52  ;;  %v727_v23 = vsel %vm14067_vm1, %v725_v16, %v726_v5  ;;  %v731_v37 = vsel %vm14067_vm1, %v9768_v20, %v730_v38  ;;  %681 = vmatpush.bf16.msrb.mxu2 %v9722_v18  ;;  %v345_v26 = vrot.slane %v344_v10, 4  ;;  %v9803_v52 = vld [vmem:[#allocation5 + $0x120] sm:$0xf]  ;;  %v9797_v15 = vld [vmem:[#allocation5 + $0x118] sm:$0xf0] }
  0xb8   :  { %v321_v53 = vrot.slane %v320_v39, 4  ;;  %v334_v21 = vor.u32 %v333_v58, %v330_v54  ;;  %v751_v25 = vunpack.c.l.b16 %v727_v23  ;;  %v752_v50 = vunpack.c.l.b16 %v731_v37  ;;  %v12643_v54 = vld [vmem:[#allocation5 + $0x124] sm:$0xf]  ;;  %v9811_v58 = vld [vmem:[#allocation5 + $0x128] sm:$0xf] }
  0xb9   :  { %v350_v38 = vsel %vm14103_vm5, %v345_v26, %v349_v27  ;;  %v794_v34 = vunpack.c.l.b16 %v748_v32  ;;  %v795_v35 = vunpack.c.h.b16 %v748_v32  ;;  %v796_v39 = vunpack.c.l.b16 %v749_v33  ;;  %v9771_v16 = vld [vmem:[#allocation5 + $0xe0] sm:$0xf]  ;;  %v12635_v18 = vld [vmem:[#allocation5 + $0xe4] sm:$0xf]  ;;  %v9773_v19 = vld [vmem:[#allocation5 + $0xf0] sm:$0xf0] }
  0xba   :  { %v326_v2 = vsel %vm14103_vm5, %v321_v53, %v14089_v4  ;;  %v724_v4 = vsel %vm14067_vm1, %v9767_v24, %v723_v1  ;;  %v335_v43 = vrot.slane %v334_v21, 4  ;;  %v14133_v28 = vpack.c.b16 %v753_v63, %v752_v50  ;;  %v12645_v53 = vld [vmem:[#allocation5 + $0x12c] sm:$0xf0]  ;;  %v9813_v1 = vld [vmem:[#allocation5 + $0x138] sm:$0xf0]  ;;  %v12609_v50 = vld [vmem:[#allocation2] sm:$0xff] }
  0xbb   :  { %v367_v11 = vunpack.c.l.b16 %v326_v2  ;;  %v750_v24 = vunpack.c.l.b16 %v724_v4  ;;  %v369_v31 = vunpack.c.l.b16 %v350_v38  ;;  %v810_v44 = vpack.c.b16 %v794_v34, %v794_v34  ;;  %v9787_v2 = vld [vmem:[#allocation5 + $0x100] sm:$0xf]  ;;  %v9779_v20 = vld [vmem:[#allocation5 + $0xe8] sm:$0xf]  ;;  %v12638_v21 = vld [vmem:[#allocation5 + $0xf4] sm:$0xf0] }
  0xbc   :  { %v340_v36 = vsel %vm14103_vm5, %v335_v43, %v14083_v62  ;;  %v811_v45 = vpack.c.b16 %v795_v35, %v795_v35  ;;  %v812_v46 = vpack.c.b16 %v796_v39, %v796_v39  ;;  %v9804_v56 = vor.u32 %v12645_v53, %v9803_v52  ;;  %v9781_v23 = vld [vmem:[#allocation5 + $0xf8] sm:$0xf0]  ;;  %v12610_v43 = vld [vmem:[#allocation2 + $0xc] sm:$0xff] }
  0xbd   :  { %v370_v17 = vpack.c.b16 %v367_v11, %v366_v9  ;;  %v14131_v5 = vpack.c.b16 %v751_v25, %v750_v24  ;;  %v368_v29 = vunpack.c.l.b16 %v340_v36  ;;  %v833_v62 = vsel %vm449_vm12, %v810_v44, 0  ;;  %v9795_v9 = vld [vmem:[#allocation5 + $0x108] sm:$0xf] }
  0xbe   :  { %v836_v48 = vsel %vm449_vm12, %v811_v45, 0  ;;  %v839_v49 = vsel %vm449_vm12, %v812_v46, 0  ;;  %v9808_v57 = vor.u32 %v12643_v54, %v9805_v55  ;;  %v9812_v61 = vor.u32 %v12646_v59, %v9811_v58  ;;  %v936_v59 = vld [vmem:[#allocation8] sm:$0xf] }
  0xbf   :  { %9695 = vmatmul.msk.bf16.vlgmr.msra.gmra.mxu0 %vm442_vm6, %v370_v17  ;;  %9697 = vmatmul.msk.bf16.vlgmr.msra.gmra.mxu1 %vm442_vm6, %v370_v17  ;;  %v371_v42 = vpack.c.b16 %v369_v31, %v368_v29  ;;  %v9816_v6 = vor.u32 %v12644_v60, %v9813_v1  ;;  %v9788_v11 = vor.u32 %v12641_v3, %v9787_v2  ;;  %v14206_v2 = vperm.slane %v936_v59, 1 }
  0xc0   :  { %9699 = vmatmul.msk.bf16.vlgmr.msra.gmra.mxu2 %vm442_vm6, %v370_v17  ;;  %9701 = vmatmul.msk.bf16.vlgmr.msra.gmra.mxu3 %vm442_vm6, %v370_v17  ;;  %v9792_v12 = vor.u32 %v12639_v7, %v9789_v8  ;;  %v9796_v10 = vor.u32 %v12642_v13, %v9795_v9  ;;  %v9800_v4 = vor.u32 %v12640_v14, %v9797_v15  ;;  %v12637_v17 = vld [vmem:[#allocation5 + $0xec] sm:$0xf0]  ;;  %v14211_v15 = vperm.slane %v936_v59, 2 }
  0xc1   :  { %848 = vmatpush.bf16.msra.mxu0 %v833_v62  ;;  %867 = vmatpush.bf16.msra.mxu1 %v836_v48  ;;  %v9772_v63 = vor.u32 %v12637_v17, %v9771_v16  ;;  %v9776_v24 = vor.u32 %v12635_v18, %v9773_v19  ;;  %v9780_v25 = vor.u32 %v12638_v21, %v9779_v20  ;;  %vm16469_vm12 = vcmask 1043456  }
  0xc2   :  { %886 = vmatpush.bf16.msra.mxu2 %v839_v49  ;;  %905 = vmatpush.bf16.msra.mxu3 %v842_v51  ;;  %v9784_v37 = vor.u32 %v12636_v22, %v9781_v23 }
  0xc5   :  { %849 = vmatpush.bf16.msra.mxu0 %v9804_v56  ;;  %868 = vmatpush.bf16.msra.mxu1 %v9808_v57 }
  0xc6   :  { %887 = vmatpush.bf16.msra.mxu2 %v9812_v61  ;;  %906 = vmatpush.bf16.msra.mxu3 %v9816_v6 }
  0xc9   :  { %850 = vmatpush.bf16.msra.mxu0 %v9788_v11  ;;  %869 = vmatpush.bf16.msra.mxu1 %v9792_v12  ;;  %v14209_v12 = vperm.slane %v936_v59, 0 }
  0xca   :  { %888 = vmatpush.bf16.msra.mxu2 %v9796_v10  ;;  %907 = vmatpush.bf16.msra.mxu3 %v9800_v4  ;;  %v14213_v10 = vperm.slane %v936_v59, 3 }
  0xcd   :  { %851 = vmatpush.bf16.msra.mxu0 %v9772_v63  ;;  %870 = vmatpush.bf16.msra.mxu1 %v9776_v24 }
  0xce   :  { %889 = vmatpush.bf16.msra.mxu2 %v9780_v25  ;;  %908 = vmatpush.bf16.msra.mxu3 %v9784_v37 }
  0xcf   :  { %9696 = vmatmul.msk.bf16.gmra.mxu0 %vm442_vm6, %v371_v42  ;;  %9698 = vmatmul.msk.bf16.gmra.mxu1 %vm442_vm6, %v371_v42 }
  0xd0   :  { %9700 = vmatmul.msk.bf16.gmra.mxu2 %vm442_vm6, %v371_v42  ;;  %9702 = vmatmul.msk.bf16.gmra.mxu3 %vm442_vm6, %v371_v42 }
  0xdf   :  { %9759 = vmatmul.msk.bf16.vlgmr.msrb.gmra.mxu0 %vm442_vm6, %v12609_v50  ;;  %9761 = vmatmul.msk.bf16.vlgmr.msrb.gmra.mxu1 %vm442_vm6, %v12609_v50 }
  0xe0   :  { %9763 = vmatmul.msk.bf16.vlgmr.msrb.gmra.mxu2 %vm442_vm6, %v12609_v50  ;;  %9765 = vmatmul.msk.bf16.vlgmr.msrb.gmra.mxu3 %vm442_vm6, %v12609_v50 }
  0xef   :  { %9760 = vmatmul.msk.bf16.gmra.mxu0 %vm442_vm6, %v12610_v43  ;;  %9762 = vmatmul.msk.bf16.gmra.mxu1 %vm442_vm6, %v12610_v43 }
  0xf0   :  { %9764 = vmatmul.msk.bf16.gmra.mxu2 %vm442_vm6, %v12610_v43  ;;  %9766 = vmatmul.msk.bf16.gmra.mxu3 %vm442_vm6, %v12610_v43 }
  0xff   :  { %9817 = vmatmul.msk.bf16.vlgmr.msra.gmra.mxu0 %vm442_vm6, %v14131_v5  ;;  %9819 = vmatmul.msk.bf16.vlgmr.msra.gmra.mxu1 %vm442_vm6, %v14131_v5 }
 0x100   :  { %9821 = vmatmul.msk.bf16.vlgmr.msra.gmra.mxu2 %vm442_vm6, %v14131_v5  ;;  %9823 = vmatmul.msk.bf16.vlgmr.msra.gmra.mxu3 %vm442_vm6, %v14131_v5 }
 0x10f   :  { %9818 = vmatmul.msk.bf16.gmra.mxu0 %vm442_vm6, %v14133_v28  ;;  %9820 = vmatmul.msk.bf16.gmra.mxu1 %vm442_vm6, %v14133_v28 }
 0x110   :  { %9822 = vmatmul.msk.bf16.gmra.mxu2 %vm442_vm6, %v14133_v28  ;;  %9824 = vmatmul.msk.bf16.gmra.mxu3 %vm442_vm6, %v14133_v28  ;;  %vm16472_vm6 = vcmask 1045509  }
 0x13c   :  { %v471_v26 = vpop.f32.mrf.mxu0  ;;  %v490_v27 = vpop.f32.mrf.mxu1 }
 0x143   :  { %v509_v36 = vpop.f32.mrf.mxu2  ;;  %v528_v38 = vpop.f32.mrf.mxu3 }
 0x144   :  { %v473_v29 = vpop.f32.mrf.mxu0  ;;  %v492_v31 = vpop.f32.mrf.mxu1 }
 0x14b   :  { %v14172_v32 = vpop.f32.mrf.mxu2  ;;  %v14174_v5 = vpop.f32.mrf.mxu3 }
 0x14c   :  { %v14176_v33 = vpop.f32.mrf.mxu0  ;;  %v14178_v34 = vpop.f32.mrf.mxu1 }
 0x153   :  { %v14180_v35 = vpop.f32.mrf.mxu2  ;;  %v14182_v39 = vpop.f32.mrf.mxu3 }
 0x154   :  { %v14184_v40 = vpop.f32.mrf.mxu0  ;;  %v14186_v28 = vpop.f32.mrf.mxu1 }
 0x15b   :  { %v14188_v42 = vpop.f32.mrf.mxu2  ;;  %v14190_v44 = vpop.f32.mrf.mxu3 }
 0x15c   :  { %v645_v45 = vpop.f32.mrf.mxu0  ;;  %v664_v46 = vpop.f32.mrf.mxu1 }
 0x15d   :  { %v665_v60 = vadd.f32 %v664_v46, %v490_v27  ;;  %v646_v8 = vadd.f32 %v645_v45, %v471_v26 }
 0x163   :  { %v683_v47 = vpop.f32.mrf.mxu2  ;;  %v702_v62 = vpop.f32.mrf.mxu3 }
 0x164   :  { %v647_v48 = vpop.f32.mrf.mxu0  ;;  %v666_v49 = vpop.f32.mrf.mxu1  ;;  %v684_v13 = vadd.f32 %v683_v47, %v509_v36  ;;  %v703_v14 = vadd.f32 %v702_v62, %v528_v38 }
 0x165   :  { %v667_v18 = vadd.f32 %v666_v49, %v492_v31  ;;  %v648_v37 = vadd.f32 %v647_v48, %v473_v29 }
 0x16b   :  { %v685_v51 = vpop.f32.mrf.mxu2  ;;  %v704_v52 = vpop.f32.mrf.mxu3 }
 0x16c   :  { %v14192_v53 = vpop.f32.mrf.mxu0  ;;  %v669_v54 = vpop.f32.mrf.mxu1  ;;  %v686_v46 = vadd.f32 %v685_v51, %v14172_v32  ;;  %v705_v47 = vadd.f32 %v704_v52, %v14174_v5 }
 0x16d   :  { %v670_v29 = vadd.f32 %v669_v54, %v14178_v34 }
 0x173   :  { %v14194_v55 = vpop.f32.mrf.mxu2  ;;  %v14196_v56 = vpop.f32.mrf.mxu3 }
 0x174   :  { %v14198_v57 = vpop.f32.mrf.mxu0  ;;  %v14200_v58 = vpop.f32.mrf.mxu1 }
 0x17b   :  { %v14202_v61 = vpop.f32.mrf.mxu2  ;;  %v14204_v1 = vpop.f32.mrf.mxu3 }
 0x17c   :  { %v853_v3 = vpop.f32.mrf.mxu0  ;;  %v872_v6 = vpop.f32.mrf.mxu1 }
 0x17d   :  { %v921_v7 = vadd.f32 %v872_v6, %v665_v60  ;;  %v920_v11 = vadd.f32 %v853_v3, %v646_v8 }
 0x17f   :  { %v947_v9 = vadd.f32 %v14206_v2, %v921_v7  ;;  %v946_v23 = vadd.f32 %v14209_v12, %v920_v11 }
 0x181   :  { %v963_v4 = vmax.f32 %v947_v9, 0.0  ;;  %v962_v27 = vmax.f32 %v946_v23, 0.0 }
 0x183   :  { %v891_v16 = vpop.f32.mrf.mxu2  ;;  %v910_v17 = vpop.f32.mrf.mxu3  ;;  %v994_v50 = vrot.slane %v963_v4, 6 }
 0x184   :  { %v922_v19 = vadd.f32 %v891_v16, %v684_v13  ;;  %v923_v20 = vadd.f32 %v910_v17, %v703_v14  ;;  %v855_v21 = vpop.f32.mrf.mxu0  ;;  %v874_v22 = vpop.f32.mrf.mxu1  ;;  %v651_v17 = vadd.f32 %v14192_v53, %v14176_v33  ;;  %v672_v33 = vadd.f32 %v14200_v58, %v14186_v28 }
 0x185   :  { %v925_v25 = vadd.f32 %v874_v22, %v667_v18  ;;  %v924_v31 = vadd.f32 %v855_v21, %v648_v37  ;;  %v1007_v62 = vsel %vm16479_vm8, %v962_v27, %v994_v50  ;;  %v1013_v59 = vsel %vm16478_vm10, %v962_v27, %v994_v50 }
 0x186   :  { %v948_v63 = vadd.f32 %v14211_v15, %v922_v19  ;;  %v949_v24 = vadd.f32 %v14213_v10, %v923_v20  ;;  %v1019_v32 = vsel %vm16477_vm9, %v962_v27, %v994_v50  ;;  %v1023_v52 = vsel %vm16476_vm11, %v994_v50, %v962_v27 }
 0x187   :  { %v951_v45 = vadd.f32 %v14206_v2, %v925_v25  ;;  %v950_v9 = vadd.f32 %v14209_v12, %v924_v31  ;;  %v689_v18 = vadd.f32 %v14194_v55, %v14180_v35  ;;  %v708_v20 = vadd.f32 %v14196_v56, %v14182_v39 }
 0x188   :  { %v964_v43 = vmax.f32 %v948_v63, 0.0  ;;  %v965_v26 = vmax.f32 %v949_v24, 0.0  ;;  %v653_v63 = vadd.f32 %v14198_v57, %v14184_v40 }
 0x189   :  { %v967_v11 = vmax.f32 %v951_v45, 0.0  ;;  %v14248_v35 = vmax.f32 %v950_v9, 0.0 }
 0x18a   :  { %v995_v36 = vrot.slane %v964_v43, 4  ;;  %v996_v38 = vrot.slane %v965_v26, 2 }
 0x18b   :  { %v893_v48 = vpop.f32.mrf.mxu2  ;;  %v912_v49 = vpop.f32.mrf.mxu3  ;;  %v14250_v24 = vrot.slane %v967_v11, 6 }
 0x18c   :  { %v1009_v60 = vsel %vm16477_vm9, %v995_v36, %v996_v38  ;;  %v1015_v3 = vsel %vm16476_vm11, %v996_v38, %v995_v36  ;;  %v1020_v6 = vsel %vm16479_vm8, %v995_v36, %v996_v38  ;;  %v858_v7 = vpop.f32.mrf.mxu0  ;;  %v877_v8 = vpop.f32.mrf.mxu1  ;;  %v1024_v51 = vsel %vm16478_vm10, %v995_v36, %v996_v38 }
 0x18d   :  { %v1011_v5 = vsel %vm16469_vm12, %v1007_v62, %v1009_v60  ;;  %v1017_v34 = vsel %vm16468_vm13, %v1013_v59, %v1015_v3  ;;  %v1021_v13 = vsel %vm16469_vm12, %v1020_v6, %v1019_v32  ;;  %v926_v14 = vadd.f32 %v893_v48, %v686_v46 }
 0x18e   :  { %v1018_v54 = vrot.slane %v1017_v34, 2  ;;  %1072 = vst [vmem:[#allocation1] ss:$4 sm:$0xff] %v1011_v5  ;;  %v927_v4 = vadd.f32 %v912_v49, %v705_v47  ;;  %v929_v16 = vadd.f32 %v877_v8, %v670_v29  ;;  %v1025_v19 = vsel %vm16468_vm13, %v1024_v51, %v1023_v52 }
 0x18f   :  { %v952_v21 = vadd.f32 %v14211_v15, %v926_v14  ;;  %v1022_v53 = vrot.slane %v1021_v13, 4  ;;  %v1026_v55 = vrot.slane %v1025_v19, 6  ;;  %v928_v39 = vadd.f32 %v858_v7, %v651_v17 }
 0x190   :  { %1078 = vst [vmem:[#allocation1 + $0x20] ss:$4 sm:$0xff] %v1018_v54  ;;  %v953_v22 = vadd.f32 %v14213_v10, %v927_v4  ;;  %v955_v23 = vadd.f32 %v14206_v2, %v929_v16  ;;  %v691_v32 = vadd.f32 %v14202_v61, %v14188_v42  ;;  %v710_v34 = vadd.f32 %v14204_v1, %v14190_v44 }
 0x191   :  { %v968_v25 = vmax.f32 %v952_v21, 0.0  ;;  %v954_v62 = vadd.f32 %v14209_v12, %v928_v39  ;;  %v1027_v51 = vsel %vm16479_vm8, %v14248_v35, %v14250_v24  ;;  %v1030_v54 = vsel %vm16478_vm10, %v14248_v35, %v14250_v24 }
 0x192   :  { %v969_v50 = vmax.f32 %v953_v22, 0.0  ;;  %v971_v43 = vmax.f32 %v955_v23, 0.0 }
 0x193   :  { %v896_v56 = vpop.f32.mrf.mxu2  ;;  %v915_v37 = vpop.f32.mrf.mxu3  ;;  %v998_v3 = vrot.slane %v968_v25, 4  ;;  %v970_v52 = vmax.f32 %v954_v62, 0.0 }
 0x194   :  { %v930_v26 = vadd.f32 %v896_v56, %v689_v18  ;;  %v931_v27 = vadd.f32 %v915_v37, %v708_v20  ;;  %v860_v36 = vpop.f32.mrf.mxu0  ;;  %v879_v38 = vpop.f32.mrf.mxu1  ;;  %v999_v6 = vrot.slane %v969_v50, 2  ;;  %v1000_v7 = vrot.slane %v971_v43, 6 }
 0x195   :  { %v14252_v40 = vld.sshfl [vmem:[#allocation1] sm:$0xff pattern:$0x73625140]  ;;  %v14254_v57 = vld.sshfl [vmem:[#allocation1 + $0x8] sm:$0xff pattern:$0x73625140]  ;;  %v932_v28 = vadd.f32 %v860_v36, %v653_v63  ;;  %v933_v58 = vadd.f32 %v879_v38, %v672_v33 }
 0x196   :  { %v14256_v31 = vld.sshfl [vmem:[#allocation1 + $0x10] sm:$0xff pattern:$0x73625140]  ;;  %v1076_v45 = vld.sshfl [vmem:[#allocation1 + $0x18] sm:$0xff pattern:$0x73625140]  ;;  %v956_v46 = vadd.f32 %v14211_v15, %v930_v26  ;;  %v957_v48 = vadd.f32 %v14213_v10, %v931_v27  ;;  %v1028_v42 = vsel %vm16477_vm9, %v998_v3, %v999_v6  ;;  %v1031_v44 = vsel %vm16476_vm11, %v999_v6, %v998_v3 }
 0x197   :  { %v14259_v47 = vld.sshfl [vmem:[#allocation1 + $0x20] sm:$0xff pattern:$0x73625140]  ;;  %v14261_v29 = vld.sshfl [vmem:[#allocation1 + $0x28] sm:$0xff pattern:$0x73625140]  ;;  %v958_v60 = vadd.f32 %v14209_v12, %v932_v28  ;;  %v959_v8 = vadd.f32 %v14206_v2, %v933_v58  ;;  %v1034_v2 = vsel %vm16477_vm9, %v14248_v35, %v14250_v24  ;;  %v1035_v1 = vsel %vm16479_vm8, %v998_v3, %v999_v6 }
 0x198   :  { %v14265_v49 = vld.sshfl [vmem:[#allocation1 + $0x30] sm:$0xff pattern:$0x73625140]  ;;  %v14267_v59 = vld.sshfl [vmem:[#allocation1 + $0x38] sm:$0xff pattern:$0x73625140]  ;;  %v1042_v9 = vsel %vm16479_vm8, %v970_v52, %v1000_v7  ;;  %v1045_v4 = vsel %vm16478_vm10, %v970_v52, %v1000_v7  ;;  %v1049_v16 = vsel %vm16477_vm9, %v970_v52, %v1000_v7  ;;  %v1053_v17 = vsel %vm16476_vm11, %v1000_v7, %v970_v52 }
 0x199   :  { %1083 = vst [vmem:[#allocation1] ss:$4 sm:$0xff] %v1022_v53  ;;  %v972_v5 = vmax.f32 %v956_v46, 0.0  ;;  %v973_v12 = vmax.f32 %v957_v48, 0.0  ;;  %v14285_v61 = vmax.f32 %v958_v60, 0.0  ;;  %v975_v11 = vmax.f32 %v959_v8, 0.0 }
 0x19a   :  { %1088 = vst [vmem:[#allocation1 + $0x20] ss:$4 sm:$0xff] %v1026_v55  ;;  %v1029_v19 = vsel %vm16469_vm12, %v1027_v51, %v1028_v42  ;;  %v1039_v20 = vsel %vm16478_vm10, %v998_v3, %v999_v6  ;;  %v1238_v22 = vsel %vm16479_vm8, %v1076_v45, -inf  ;;  %v1032_v33 = vsel %vm16468_vm13, %v1030_v54, %v1031_v44 }
 0x19b   :  { %v898_v13 = vpop.f32.mrf.mxu2  ;;  %v917_v14 = vpop.f32.mrf.mxu3  ;;  %v1001_v18 = vrot.slane %v972_v5, 4  ;;  %v1002_v21 = vrot.slane %v973_v12, 2  ;;  %v1036_v53 = vsel %vm16469_vm12, %v1035_v1, %v1034_v2  ;;  %v1038_v45 = vsel %vm16476_vm11, %v14250_v24, %v14248_v35 }
 0x19c   :  { %v934_v55 = vadd.f32 %v898_v13, %v691_v32  ;;  %v935_v25 = vadd.f32 %v917_v14, %v710_v34  ;;  %v1033_v46 = vrot.slane %v1032_v33, 2  ;;  %v1037_v62 = vrot.slane %v1036_v53, 4 }
 0x19d   :  { %v1043_v37 = vsel %vm16477_vm9, %v1001_v18, %v1002_v21  ;;  %v1046_v50 = vsel %vm16476_vm11, %v1002_v21, %v1001_v18  ;;  %v1050_v43 = vsel %vm16479_vm8, %v1001_v18, %v1002_v21  ;;  %v1054_v26 = vsel %vm16478_vm10, %v1001_v18, %v1002_v21 }
 0x19e   :  { %v14311_v27 = vsel %vm16469_vm12, %v1042_v9, %v1043_v37  ;;  %v14314_v36 = vsel %vm16468_vm13, %v1045_v4, %v1046_v50  ;;  %v14317_v38 = vsel %vm16469_vm12, %v1050_v43, %v1049_v16  ;;  %v14320_v28 = vsel %vm16468_vm13, %v1054_v26, %v1053_v17 }
 0x19f   :  { %v14325_v48 = vrot.slane %v975_v11, 6  ;;  %v1040_v3 = vsel %vm16468_vm13, %v1039_v20, %v1038_v45  ;;  %v960_v6 = vadd.f32 %v14211_v15, %v934_v55  ;;  %v961_v32 = vadd.f32 %v14213_v10, %v935_v25 }
 0x1a0   :  { %v14296_v23 = vld.sshfl [vmem:[#allocation1] sm:$0xff pattern:$0x73625140]  ;;  %v14298_v63 = vld.sshfl [vmem:[#allocation1 + $0x8] sm:$0xff pattern:$0x73625140] }
 0x1a1   :  { %v14302_v39 = vld.sshfl [vmem:[#allocation1 + $0x10] sm:$0xff pattern:$0x73625140]  ;;  %v14304_v56 = vld.sshfl [vmem:[#allocation1 + $0x18] sm:$0xff pattern:$0x73625140]  ;;  %v1060_v33 = vsel %vm16478_vm10, %v14285_v61, %v14325_v48 }
 0x1a2   :  { %1093 = vst [vmem:[#allocation1] ss:$4 sm:$0xff] %v1029_v19  ;;  %v1092_v58 = vld.sshfl [vmem:[#allocation1 + $0x38] sm:$0xff pattern:$0x73625140]  ;;  %v1239_v5 = vrot.slane %v1238_v22, 4 }
 0x1a3   :  { %v1090_v60 = vld.sshfl [vmem:[#allocation1 + $0x28] sm:$0xff pattern:$0x73625140]  ;;  %v1089_v7 = vld.sshfl [vmem:[#allocation1 + $0x20] sm:$0xff pattern:$0x73625140] }
 0x1a4   :  { %v1091_v8 = vld.sshfl [vmem:[#allocation1 + $0x30] sm:$0xff pattern:$0x73625140]  ;;  %v1322_v34 = vsel %vm16479_vm8, %v1092_v58, -inf  ;;  %v1224_v51 = vsel %vm16479_vm8, %v14254_v57, -inf  ;;  %v976_v35 = vmax.f32 %v960_v6, 0.0  ;;  %v1240_v2 = vmax.f32 %v1238_v22, %v1239_v5 }
 0x1a5   :  { %1098 = vst [vmem:[#allocation1 + $0x20] ss:$4 sm:$0xff] %v1033_v46  ;;  %v1323_v24 = vrot.slane %v1322_v34, 4  ;;  %v1225_v52 = vrot.slane %v1224_v51, 4  ;;  %v1308_v12 = vsel %vm16479_vm8, %v1090_v60, -inf  ;;  %v977_v54 = vmax.f32 %v961_v32, 0.0 }
 0x1a6   :  { %v1309_v42 = vrot.slane %v1308_v12, 4  ;;  %v1231_v15 = vsel %vm16479_vm8, %v14256_v31, -inf  ;;  %v14336_v44 = vrot.slane %v976_v35, 4  ;;  %v1041_v16 = vrot.slane %v1040_v3, 6 }
 0x1a7   :  { %v1324_v10 = vmax.f32 %v1322_v34, %v1323_v24  ;;  %v1226_v1 = vmax.f32 %v1224_v51, %v1225_v52  ;;  %v1232_v9 = vrot.slane %v1231_v15, 4  ;;  %v14346_v17 = vrot.slane %v977_v54, 2 }
 0x1a8   :  { %v1310_v13 = vmax.f32 %v1308_v12, %v1309_v42  ;;  %v1241_v18 = vrot.slane %v1240_v2, 2  ;;  %v1048_v37 = vrot.slane %v14314_v36, 2  ;;  %v1052_v50 = vrot.slane %v14317_v38, 4 }
 0x1a9   :  { %v14338_v11 = vld.sshfl [vmem:[#allocation1] sm:$0xff pattern:$0x73625140]  ;;  %v14340_v57 = vld.sshfl [vmem:[#allocation1 + $0x8] sm:$0xff pattern:$0x73625140]  ;;  %v1233_v31 = vmax.f32 %v1231_v15, %v1232_v9  ;;  %v1061_v53 = vsel %vm16476_vm11, %v14346_v17, %v14336_v44  ;;  %v1065_v46 = vsel %vm16479_vm8, %v14336_v44, %v14346_v17  ;;  %v1064_v52 = vsel %vm16477_vm9, %v14285_v61, %v14325_v48 }
 0x1aa   :  { %v14342_v14 = vld.sshfl [vmem:[#allocation1 + $0x10] sm:$0xff pattern:$0x73625140]  ;;  %v14344_v4 = vld.sshfl [vmem:[#allocation1 + $0x18] sm:$0xff pattern:$0x73625140]  ;;  %v14363_v43 = vsel %vm16468_vm13, %v1060_v33, %v1061_v53 }
 0x1ab   :  { %1103 = vst [vmem:[#allocation1] ss:$4 sm:$0xff] %v1037_v62  ;;  %v1325_v19 = vrot.slane %v1324_v10, 2  ;;  %v1227_v20 = vrot.slane %v1226_v1, 2  ;;  %v1311_v21 = vrot.slane %v1310_v13, 2  ;;  %v1315_v58 = vsel %vm16479_vm8, %v1091_v8, -inf }
 0x1ac   :  { %v14348_v22 = vld.sshfl [vmem:[#allocation1 + $0x20] sm:$0xff pattern:$0x73625140]  ;;  %v14356_v55 = vld.sshfl [vmem:[#allocation1 + $0x28] sm:$0xff pattern:$0x73625140]  ;;  %v1242_v62 = vmax.f32 %v1240_v2, %v1241_v18  ;;  %v1068_v2 = vsel %vm16476_vm11, %v14325_v48, %v14285_v61 }
 0x1ad   :  { %v14358_v25 = vld.sshfl [vmem:[#allocation1 + $0x30] sm:$0xff pattern:$0x73625140]  ;;  %v14365_v26 = vld.sshfl [vmem:[#allocation1 + $0x38] sm:$0xff pattern:$0x73625140]  ;;  %v1326_v3 = vmax.f32 %v1324_v10, %v1325_v19  ;;  %v1228_v6 = vmax.f32 %v1226_v1, %v1227_v20  ;;  %v1312_v32 = vmax.f32 %v1310_v13, %v1311_v21 }
 0x1ae   :  { %v1056_v45 = vrot.slane %v14320_v28, 6  ;;  %1108 = vst [vmem:[#allocation1 + $0x20] ss:$4 sm:$0xff] %v1041_v16  ;;  %v1234_v60 = vrot.slane %v1233_v31, 2  ;;  %v1243_v5 = vrot.slane %v1242_v62, 1  ;;  %v1316_v34 = vrot.slane %v1315_v58, 4 }
 0x1af   :  { %v1217_v51 = vsel %vm16479_vm8, %v14252_v40, -inf  ;;  %v1301_v8 = vsel %vm16479_vm8, %v1089_v7, -inf  ;;  %v14391_v40 = vsel %vm16469_vm12, %v1065_v46, %v1064_v52  ;;  %v1069_v7 = vsel %vm16478_vm10, %v14336_v44, %v14346_v17 }
 0x1b0   :  { %v1317_v42 = vmax.f32 %v1315_v58, %v1316_v34  ;;  %v1327_v15 = vrot.slane %v1326_v3, 1  ;;  %v1229_v10 = vrot.slane %v1228_v6, 1  ;;  %v1313_v1 = vrot.slane %v1312_v32, 1 }
 0x1b1   :  { %v1235_v9 = vmax.f32 %v1233_v31, %v1234_v60  ;;  %v1218_v16 = vrot.slane %v1217_v51, 4  ;;  %v1302_v18 = vrot.slane %v1301_v8, 4  ;;  %v1252_v19 = vsel %vm16479_vm8, %v14261_v29, -inf }
 0x1b2   :  { %v14376_v35 = vld.sshfl [vmem:[#allocation1] sm:$0xff pattern:$0x73625140]  ;;  %v14378_v24 = vld.sshfl [vmem:[#allocation1 + $0x8] sm:$0xff pattern:$0x73625140]  ;;  %v14399_v20 = vmax.f32 %v1242_v62, %v1243_v5  ;;  %v14401_v21 = vmax.f32 %v1326_v3, %v1327_v15  ;;  %v14403_v33 = vmax.f32 %v1228_v6, %v1229_v10  ;;  %v14405_v53 = vmax.f32 %v1312_v32, %v1313_v1 }
 0x1b3   :  { %16500 = vst [vmem:[#allocation29_spill] sm:$0xff] %v14376_v35  ;;  %v14383_v12 = vld.sshfl [vmem:[#allocation1 + $0x10] sm:$0xff pattern:$0x73625140]  ;;  %v1318_v13 = vrot.slane %v1317_v42, 2  ;;  %v14412_v31 = vsel %vm16468_vm13, %v1069_v7, %v1068_v2  ;;  %v1219_v62 = vmax.f32 %v1217_v51, %v1218_v16  ;;  %v1303_v5 = vmax.f32 %v1301_v8, %v1302_v18 }
 0x1b4   :  { %16501 = vst [vmem:[#allocation30_spill] sm:$0xff] %v14378_v24  ;;  %v14385_v54 = vld.sshfl [vmem:[#allocation1 + $0x18] sm:$0xff pattern:$0x73625140]  ;;  %v13372_v6 = vpack.i.bf16 %v14401_v21, %v14399_v20  ;;  %v13357_v32 = vpack.i.bf16 %v14405_v53, %v14403_v33  ;;  %v1236_v34 = vrot.slane %v1235_v9, 1  ;;  %v1253_v15 = vrot.slane %v1252_v19, 4 }
 0x1b5   :  { %16502 = vst [vmem:[#allocation31_spill] sm:$0xff] %v14385_v54  ;;  %v14407_v58 = vld.sshfl [vmem:[#allocation1 + $0x20] sm:$0xff pattern:$0x73625140]  ;;  %v1319_v29 = vmax.f32 %v1317_v42, %v1318_v13  ;;  %v1220_v2 = vrot.slane %v1219_v62, 2  ;;  %v1304_v7 = vrot.slane %v1303_v5, 2 }
 0x1b6   :  { %1113 = vst [vmem:[#allocation1] ss:$4 sm:$0xff] %v14311_v27  ;;  %v14409_v27 = vld.sshfl [vmem:[#allocation1 + $0x28] sm:$0xff pattern:$0x73625140]  ;;  %13373 = vrot.lane.b32.xlu2 %v13372_v6, %s13883_s8  ;;  %13358 = vrot.lane.b32.xlu1 %v13357_v32, %s13883_s8  ;;  %v1259_v51 = vsel %vm16479_vm8, %v14265_v49, -inf  ;;  %v1254_v6 = vmax.f32 %v1252_v19, %v1253_v15  ;;  %v1057_v49 = vsel %vm16479_vm8, %v14285_v61, %v14325_v48 }
 0x1b7   :  { %16503 = vst [vmem:[#allocation32_spill] sm:$0xff] %v14407_v58  ;;  %v14414_v46 = vld.sshfl [vmem:[#allocation1 + $0x30] sm:$0xff pattern:$0x73625140]  ;;  %v1320_v52 = vrot.slane %v1319_v29, 1  ;;  %v1266_v8 = vsel %vm16479_vm8, %v14267_v59, -inf  ;;  %v1221_v16 = vmax.f32 %v1219_v62, %v1220_v2  ;;  %v1305_v18 = vmax.f32 %v1303_v5, %v1304_v7 }
 0x1b8   :  { %16504 = vst [vmem:[#allocation33_spill] sm:$0xff] %v14409_v27  ;;  %v14416_v60 = vld.sshfl [vmem:[#allocation1 + $0x38] sm:$0xff pattern:$0x73625140]  ;;  %v14448_v59 = vmax.f32 %v1235_v9, %v1236_v34  ;;  %v1260_v2 = vrot.slane %v1259_v51, 4  ;;  %v1267_v7 = vrot.slane %v1266_v8, 4 }
 0x1b9   :  { %1118 = vst [vmem:[#allocation1 + $0x20] ss:$4 sm:$0xff] %v1048_v37  ;;  %v1245_v37 = vsel %vm16479_vm8, %v14259_v47, -inf  ;;  %v14436_v13 = vmax.f32 %v1319_v29, %v1320_v52  ;;  %v1058_v47 = vsel %vm16477_vm9, %v14336_v44, %v14346_v17  ;;  %v1222_v62 = vrot.slane %v1221_v16, 1 }
 0x1ba   :  { %v1306_v5 = vrot.slane %v1305_v18, 1  ;;  %v1255_v52 = vrot.slane %v1254_v6, 2  ;;  %v1246_v15 = vrot.slane %v1245_v37, 4  ;;  %v1059_v61 = vsel %vm16469_vm12, %v1057_v49, %v1058_v47 }
 0x1bb   :  { %v13362_v48 = vpack.i.bf16 %v14436_v13, %v14448_v59  ;;  %v14457_v44 = vmax.f32 %v1221_v16, %v1222_v62  ;;  %v1261_v19 = vmax.f32 %v1259_v51, %v1260_v2  ;;  %v1268_v62 = vmax.f32 %v1266_v8, %v1267_v7 }
 0x1bc   :  { %v14459_v17 = vmax.f32 %v1305_v18, %v1306_v5  ;;  %v1256_v9 = vmax.f32 %v1254_v6, %v1255_v52  ;;  %v1247_v2 = vmax.f32 %v1245_v37, %v1246_v15  ;;  %vm16470_vm13 = vcmask 1047559  }
 0x1bd   :  { %v14432_v42 = vld.sshfl [vmem:[#allocation1] sm:$0xff pattern:$0x73625140]  ;;  %v14434_v1 = vld.sshfl [vmem:[#allocation1 + $0x8] sm:$0xff pattern:$0x73625140] }
 0x1be   :  { %v14438_v0 = vld.sshfl [vmem:[#allocation1 + $0x10] sm:$0xff pattern:$0x73625140]  ;;  %v14440_v32 = vld.sshfl [vmem:[#allocation1 + $0x18] sm:$0xff pattern:$0x73625140]  ;;  %v13367_v3 = vpack.i.bf16 %v14459_v17, %v14457_v44  ;;  %13363 = vrot.lane.b32.xlu1 %v13362_v48, %s13883_s8 }
 0x1bf   :  { %1123 = vst [vmem:[#allocation1] ss:$4 sm:$0xff] %v1052_v50  ;;  %v1257_v16 = vrot.slane %v1256_v9, 1  ;;  %v1262_v18 = vrot.slane %v1261_v19, 2  ;;  %v1269_v41 = vrot.slane %v1268_v62, 2  ;;  %v1248_v54 = vrot.slane %v1247_v2, 2 }
 0x1c0   :  { %v1120_v38 = vld.sshfl [vmem:[#allocation1 + $0x28] sm:$0xff pattern:$0x73625140]  ;;  %v1121_v50 = vld.sshfl [vmem:[#allocation1 + $0x30] sm:$0xff pattern:$0x73625140] }
 0x1c1   :  { %v1476_v34 = vsel %vm16479_vm8, %v1120_v38, -inf  ;;  %v1483_v10 = vsel %vm16479_vm8, %v1121_v50, -inf  ;;  %v1122_v29 = vld.sshfl [vmem:[#allocation1 + $0x38] sm:$0xff pattern:$0x73625140]  ;;  %v1258_v38 = vmax.f32 %v1256_v9, %v1257_v16  ;;  %v1263_v50 = vmax.f32 %v1261_v19, %v1262_v18 }
 0x1c2   :  { %v1477_v49 = vrot.slane %v1476_v34, 4  ;;  %v1484_v47 = vrot.slane %v1483_v10, 4  ;;  %v1119_v36 = vld.sshfl [vmem:[#allocation1 + $0x20] sm:$0xff pattern:$0x73625140]  ;;  %v1490_v6 = vsel %vm16479_vm8, %v1122_v29, -inf  ;;  %v1270_v28 = vmax.f32 %v1268_v62, %v1269_v41 }
 0x1c3   :  { %1128 = vst [vmem:[#allocation1 + $0x20] ss:$4 sm:$0xff] %v1056_v45  ;;  %v1491_v52 = vrot.slane %v1490_v6, 4  ;;  %v1469_v30 = vsel %vm16479_vm8, %v1119_v36, -inf  ;;  %v1920_v29 = vrot.slane %v1258_v38, 7  ;;  %v1264_v7 = vrot.slane %v1263_v50, 1 }
 0x1c4   :  { %v1478_v51 = vmax.f32 %v1476_v34, %v1477_v49  ;;  %v1485_v5 = vmax.f32 %v1483_v10, %v1484_v47  ;;  %v1470_v45 = vrot.slane %v1469_v30, 4  ;;  %v1249_v15 = vmax.f32 %v1247_v2, %v1248_v54 }
 0x1c5   :  { %v1492_v35 = vmax.f32 %v1490_v6, %v1491_v52  ;;  %v14474_v36 = vsel %vm16475_vm14, %v1920_v29, %v14403_v33  ;;  %v1265_v9 = vmax.f32 %v1263_v50, %v1264_v7  ;;  %v1271_v47 = vrot.slane %v1270_v28, 1 }
 0x1c6   :  { %v1125_v58 = vld.sshfl [vmem:[#allocation1 + $0x8] sm:$0xff pattern:$0x73625140]  ;;  %v1479_v27 = vrot.slane %v1478_v51, 2  ;;  %v1486_v48 = vrot.slane %v1485_v5, 2  ;;  %v1471_v16 = vmax.f32 %v1469_v30, %v1470_v45  ;;  %v1250_v24 = vrot.slane %v1249_v15, 1  ;;  %13368 = vrot.lane.b32.xlu1 %v13367_v3, %s13883_s8 }
 0x1c7   :  { %v14470_v8 = vld.sshfl [vmem:[#allocation1 + $0x18] sm:$0xff pattern:$0x73625140]  ;;  %v1124_v34 = vld.sshfl [vmem:[#allocation1] sm:$0xff pattern:$0x73625140] }
 0x1c8   :  { %v1480_v10 = vmax.f32 %v1478_v51, %v1479_v27  ;;  %v1487_v49 = vmax.f32 %v1485_v5, %v1486_v48  ;;  %v1493_v37 = vrot.slane %v1492_v35, 2  ;;  %v1126_v19 = vld.sshfl [vmem:[#allocation1 + $0x10] sm:$0xff pattern:$0x73625140]  ;;  %v1976_v41 = vrot.slane %v1265_v9, 7 }
 0x1c9   :  { %1133 = vst [vmem:[#allocation1] ss:$4 sm:$0xff] %v1059_v61  ;;  %v1272_v27 = vmax.f32 %v1270_v28, %v1271_v47  ;;  %v1472_v62 = vrot.slane %v1471_v16, 2  ;;  %v1280_v54 = vsel %vm16479_vm8, %v14298_v63, -inf  ;;  %v1251_v2 = vmax.f32 %v1249_v15, %v1250_v24 }
 0x1ca   :  { %v1481_v18 = vrot.slane %v1480_v10, 1  ;;  %v1488_v6 = vrot.slane %v1487_v49, 1  ;;  %v1494_v52 = vmax.f32 %v1492_v35, %v1493_v37  ;;  %v14485_v30 = vsel %vm16475_vm14, %v1976_v41, %v14448_v59  ;;  %v1130_v47 = vld.sshfl [vmem:[#allocation1 + $0x28] sm:$0xff pattern:$0x73625140] }
 0x1cb   :  { %v2032_v35 = vrot.slane %v1272_v27, 7  ;;  %v1473_v61 = vmax.f32 %v1471_v16, %v1472_v62  ;;  %v1281_v50 = vrot.slane %v1280_v54, 4  ;;  %v1857_v59 = vrot.slane %v1251_v2, 7 }
 0x1cc   :  { %v14479_v51 = vmax.f32 %v1480_v10, %v1481_v18  ;;  %v14481_v33 = vmax.f32 %v1487_v49, %v1488_v6  ;;  %v1495_v5 = vrot.slane %v1494_v52, 1  ;;  %v1504_v49 = vsel %vm16479_vm8, %v1125_v58, -inf }
 0x1cd   :  { %v14495_v24 = vsel %vm16475_vm14, %v2032_v35, %v14399_v20  ;;  %v1474_v28 = vrot.slane %v1473_v61, 1  ;;  %v1282_v10 = vmax.f32 %v1280_v54, %v1281_v50  ;;  %v1505_v18 = vrot.slane %v1504_v49, 4 }
 0x1ce   :  { %v13377_v29 = vpack.i.bf16 %v14479_v51, %v1258_v38  ;;  %v13382_v63 = vpack.i.bf16 %v14481_v33, %v1265_v9  ;;  %v14491_v7 = vmax.f32 %v1494_v52, %v1495_v5  ;;  %v1273_v38 = vsel %vm16479_vm8, %v14296_v23, -inf }
 0x1cf   :  { %v14505_v20 = vmax.f32 %v1473_v61, %v1474_v28  ;;  %v14509_v9 = vsel %vm16475_vm14, %v1857_v59, %v14457_v44  ;;  %v1283_v16 = vrot.slane %v1282_v10, 2  ;;  %v1274_v6 = vrot.slane %v1273_v38, 4 }
 0x1d0   :  { %13378 = vrot.lane.b32.xlu0 %v13377_v29, %s13883_s8  ;;  %13383 = vrot.lane.b32.xlu2 %v13382_v63, %s13883_s8  ;;  %v13392_v15 = vpack.i.bf16 %v14491_v7, %v1272_v27  ;;  %v1497_v52 = vsel %vm16479_vm8, %v1124_v34, -inf  ;;  %v1287_v41 = vsel %vm16479_vm8, %v14302_v39, -inf  ;;  %v1506_v62 = vmax.f32 %v1504_v49, %v1505_v18 }
 0x1d1   :  { %v13387_v23 = vpack.i.bf16 %v14505_v20, %v1251_v2  ;;  %v1498_v58 = vrot.slane %v1497_v52, 4  ;;  %v1284_v27 = vmax.f32 %v1282_v10, %v1283_v16  ;;  %v1275_v54 = vmax.f32 %v1273_v38, %v1274_v6 }
 0x1d2   :  { %13393 = vrot.lane.b32.xlu1 %v13392_v15, %s13883_s8  ;;  %v1288_v44 = vrot.slane %v1287_v41, 4  ;;  %v1511_v35 = vsel %vm16479_vm8, %v1126_v19, -inf  ;;  %v1448_v61 = vsel %vm16479_vm8, %v14434_v1, -inf  ;;  %v1532_v34 = vsel %vm16479_vm8, %v1130_v47, -inf }
 0x1d3   :  { %v1499_v5 = vmax.f32 %v1497_v52, %v1498_v58  ;;  %v1285_v50 = vrot.slane %v1284_v27, 1  ;;  %v1507_v29 = vrot.slane %v1506_v62, 2  ;;  %v1276_v2 = vrot.slane %v1275_v54, 2 }
 0x1d4   :  { %v1289_v63 = vmax.f32 %v1287_v41, %v1288_v44  ;;  %v1512_v59 = vrot.slane %v1511_v35, 4  ;;  %v1449_v15 = vrot.slane %v1448_v61, 4  ;;  %v1533_v39 = vrot.slane %v1532_v34, 4 }
 0x1d5   :  { %v1500_v28 = vrot.slane %v1499_v5, 2  ;;  %v1286_v10 = vmax.f32 %v1284_v27, %v1285_v50  ;;  %v1508_v49 = vmax.f32 %v1506_v62, %v1507_v29  ;;  %v1277_v38 = vmax.f32 %v1275_v54, %v1276_v2 }
 0x1d6   :  { %v1290_v16 = vrot.slane %v1289_v63, 2  ;;  %v1513_v18 = vmax.f32 %v1511_v35, %v1512_v59  ;;  %v1450_v6 = vmax.f32 %v1448_v61, %v1449_v15  ;;  %v1534_v1 = vmax.f32 %v1532_v34, %v1533_v39 }
 0x1d7   :  { %v1501_v19 = vmax.f32 %v1499_v5, %v1500_v28  ;;  %v1509_v52 = vrot.slane %v1508_v49, 1  ;;  %v1922_v47 = vrot.slane %v1286_v10, 6  ;;  %v1278_v58 = vrot.slane %v1277_v38, 1 }
 0x1d8   :  { %13388 = vrot.lane.b32.xlu0 %v13387_v23, %s13883_s8  ;;  %v1291_v37 = vmax.f32 %v1289_v63, %v1290_v16  ;;  %v1514_v41 = vrot.slane %v1513_v18, 2  ;;  %v1451_v44 = vrot.slane %v1450_v6, 2  ;;  %v1535_v3 = vrot.slane %v1534_v1, 2  ;;  %v1136_v63 = vld.sshfl [vmem:[#allocation1 + $0x10] sm:$0xff pattern:$0x73625140] }
 0x1d9   :  { %v1502_v48 = vrot.slane %v1501_v19, 1  ;;  %v1510_v45 = vmax.f32 %v1508_v49, %v1509_v52  ;;  %v14523_v23 = vsel %vm16474_vm15, %v1922_v47, %v14474_v36  ;;  %v1279_v27 = vmax.f32 %v1277_v38, %v1278_v58  ;;  %v1131_v38 = vld.sshfl [vmem:[#allocation1 + $0x30] sm:$0xff pattern:$0x73625140] }
 0x1da   :  { %v1292_v62 = vrot.slane %v1291_v37, 1  ;;  %v1515_v5 = vmax.f32 %v1513_v18, %v1514_v41  ;;  %v1452_v35 = vmax.f32 %v1450_v6, %v1451_v44  ;;  %v1536_v61 = vmax.f32 %v1534_v1, %v1535_v3  ;;  %v14542_v6 = vld.sshfl [vmem:[#allocation1 + $0x38] sm:$0xff pattern:$0x73625140] }
 0x1db   :  { %v14525_v54 = vmax.f32 %v1501_v19, %v1502_v48  ;;  %v2046_v34 = vrot.slane %v14491_v7, 7  ;;  %v13397_v50 = vpack.i.bf16 %v1510_v45, %v1286_v10  ;;  %v1860_v29 = vrot.slane %v1279_v27, 6 }
 0x1dc   :  { %v1293_v2 = vmax.f32 %v1291_v37, %v1292_v62  ;;  %v1936_v28 = vrot.slane %v1510_v45, 6  ;;  %v1516_v15 = vrot.slane %v1515_v5, 1  ;;  %v1453_v39 = vrot.slane %v1452_v35, 1  ;;  %v14551_v62 = vld.sshfl [vmem:[#allocation1 + $0x20] sm:$0xff pattern:$0x73625140] }
 0x1dd   :  { %v13407_v59 = vpack.i.bf16 %v14525_v54, %v1279_v27  ;;  %13398 = vrot.lane.b32.xlu1 %v13397_v50, %s13883_s8  ;;  %v14532_v36 = vsel %vm16474_vm15, %v1860_v29, %v14509_v9  ;;  %v1537_v49 = vrot.slane %v1536_v61, 1  ;;  %v1343_v45 = vsel %vm16479_vm8, %v14342_v14, -inf }
 0x1de   :  { %v1978_v48 = vrot.slane %v1293_v2, 6  ;;  %v14535_v3 = vmax.f32 %v1515_v5, %v1516_v15  ;;  %v1454_v37 = vmax.f32 %v1452_v35, %v1453_v39  ;;  %v1567_v10 = vsel %vm16479_vm8, %v1136_v63, -inf  ;;  %v1134_v15 = vld.sshfl [vmem:[#allocation1] sm:$0xff pattern:$0x73625140] }
 0x1df   :  { %13408 = vrot.lane.b32.xlu2 %v13407_v59, %s13883_s8  ;;  %v1538_v19 = vmax.f32 %v1536_v61, %v1537_v49  ;;  %v1344_v9 = vrot.slane %v1343_v45, 4  ;;  %v1568_v18 = vrot.slane %v1567_v10, 4  ;;  %v1878_v1 = vrot.slane %v14505_v20, 7 }
 0x1e0   :  { %v1979_v16 = vsel %vm16474_vm15, %v1978_v48, %v14485_v30  ;;  %v1880_v52 = vrot.slane %v14525_v54, 6  ;;  %v13402_v47 = vpack.i.bf16 %v14535_v3, %v1293_v2  ;;  %v16505_v58 = vrot.slane %v14479_v51, 7 }
 0x1e1   :  { %v1938_v41 = vrot.slane %v1538_v19, 5  ;;  %v13417_v44 = vpack.i.bf16 %v1538_v19, %v1454_v37  ;;  %v1345_v30 = vmax.f32 %v1343_v45, %v1344_v9  ;;  %v1569_v5 = vmax.f32 %v1567_v10, %v1568_v18 }
 0x1e2   :  { %v1935_v14 = vsel %vm16475_vm14, %v16505_v58, %v1454_v37  ;;  %13403 = vrot.lane.b32.xlu0 %v13402_v47, %s13883_s8  ;;  %v16506_v35 = vrot.slane %v14436_v13, 5  ;;  %v1294_v51 = vsel %vm16479_vm8, %v14304_v56, -inf  ;;  %v1518_v50 = vsel %vm16479_vm8, %v14470_v8, -inf }
 0x1e3   :  { %v1937_v27 = vsel %vm16474_vm15, %v1936_v28, %v1935_v14  ;;  %v16507_v29 = vrot.slane %v14363_v43, 2  ;;  %v1346_v63 = vrot.slane %v1345_v30, 2  ;;  %v1295_v28 = vrot.slane %v1294_v51, 4 }
 0x1e4   :  { %v1981_v61 = vsel %vm16473_vm2, %v16506_v35, %v1979_v16  ;;  %v14564_v2 = vsel %vm16473_vm2, %v1938_v41, %v1937_v27  ;;  %v1519_v59 = vrot.slane %v1518_v50, 4  ;;  %v1570_v39 = vrot.slane %v1569_v5, 2 }
 0x1e5   :  { %1138 = vst [vmem:[#allocation1 + $0x20] ss:$4 sm:$0xff] %v16507_v29  ;;  %v1455_v13 = vsel %vm16479_vm8, %v14438_v0, -inf  ;;  %v1539_v48 = vsel %vm16479_vm8, %v1131_v38, -inf  ;;  %v1329_v56 = vsel %vm16479_vm8, %v14338_v11, -inf  ;;  %v1347_v8 = vmax.f32 %v1345_v30, %v1346_v63 }
 0x1e6   :  { %v1296_v49 = vmax.f32 %v1294_v51, %v1295_v28  ;;  %v1520_v43 = vmax.f32 %v1518_v50, %v1519_v59  ;;  %v1456_v37 = vrot.slane %v1455_v13, 4  ;;  %v1571_v45 = vmax.f32 %v1569_v5, %v1570_v39  ;;  %v1137_v29 = vld.sshfl [vmem:[#allocation1 + $0x18] sm:$0xff pattern:$0x73625140] }
 0x1e7   :  { %13418 = vrot.lane.b32.xlu2 %v13417_v44, %s13883_s8  ;;  %v1540_v10 = vrot.slane %v1539_v48, 4  ;;  %v1330_v16 = vrot.slane %v1329_v56, 4  ;;  %v1553_v19 = vsel %vm16479_vm8, %v1134_v15, -inf  ;;  %v1348_v9 = vrot.slane %v1347_v8, 1 }
 0x1e8   :  { %v1297_v18 = vrot.slane %v1296_v49, 2  ;;  %v1521_v47 = vrot.slane %v1520_v43, 2  ;;  %v1457_v0 = vmax.f32 %v1455_v13, %v1456_v37  ;;  %v1572_v58 = vrot.slane %v1571_v45, 1 }
 0x1e9   :  { %v1541_v38 = vmax.f32 %v1539_v48, %v1540_v10  ;;  %v1331_v14 = vmax.f32 %v1329_v56, %v1330_v16  ;;  %v1554_v41 = vrot.slane %v1553_v19, 4  ;;  %v1349_v11 = vmax.f32 %v1347_v8, %v1348_v9  ;;  %v14577_v8 = vld.sshfl [vmem:[#allocation1 + $0x8] sm:$0xff pattern:$0x73625140] }
 0x1ea   :  { %v1298_v27 = vmax.f32 %v1296_v49, %v1297_v18  ;;  %v1522_v30 = vmax.f32 %v1520_v43, %v1521_v47  ;;  %v1458_v35 = vrot.slane %v1457_v0, 2  ;;  %v14573_v51 = vmax.f32 %v1571_v45, %v1572_v58 }
 0x1eb   :  { %v1542_v44 = vrot.slane %v1541_v38, 2  ;;  %v1332_v5 = vrot.slane %v1331_v14, 2  ;;  %v1555_v50 = vmax.f32 %v1553_v19, %v1554_v41  ;;  %v1982_v63 = vrot.slane %v1349_v11, 4 }
 0x1ec   :  { %v1299_v28 = vrot.slane %v1298_v27, 1  ;;  %v1523_v59 = vrot.slane %v1522_v30, 1  ;;  %v1459_v15 = vmax.f32 %v1457_v0, %v1458_v35  ;;  %v1992_v39 = vrot.slane %v14535_v3, 6 }
 0x1ed   :  { %v13442_v13 = vpack.i.bf16 %v14573_v51, %v1349_v11  ;;  %v1543_v48 = vmax.f32 %v1541_v38, %v1542_v44  ;;  %v1333_v56 = vmax.f32 %v1331_v14, %v1332_v5  ;;  %v14580_v49 = vsel %vm16483_vm4, %v1982_v63, %v1981_v61 }
 0x1ee   :  { %v1300_v43 = vmax.f32 %v1298_v27, %v1299_v28  ;;  %v14582_v37 = vmax.f32 %v1522_v30, %v1523_v59  ;;  %v1460_v45 = vrot.slane %v1459_v15, 1  ;;  %v16508_v10 = vrot.slane %v14391_v40, 4 }
 0x1ef   :  { %13443 = vrot.lane.b32.xlu1 %v13442_v13, %s13883_s8  ;;  %v1544_v16 = vrot.slane %v1543_v48, 1  ;;  %v1334_v3 = vrot.slane %v1333_v56, 1  ;;  %v1556_v19 = vrot.slane %v1555_v50, 2  ;;  %v16509_v9 = vrot.slane %v14459_v17, 5 }
 0x1f0   :  { %1143 = vst [vmem:[#allocation1] ss:$4 sm:$0xff] %v16508_v10  ;;  %v2034_v47 = vrot.slane %v1300_v43, 6  ;;  %v13412_v61 = vpack.i.bf16 %v14582_v37, %v1300_v43  ;;  %v2048_v0 = vrot.slane %v14582_v37, 6  ;;  %v1461_v58 = vmax.f32 %v1459_v15, %v1460_v45 }
 0x1f1   :  { %v1865_v18 = vsel %vm16473_vm2, %v16509_v9, %v14532_v36  ;;  %v1545_v38 = vmax.f32 %v1543_v48, %v1544_v16  ;;  %v1335_v14 = vmax.f32 %v1333_v56, %v1334_v3  ;;  %v1557_v40 = vmax.f32 %v1555_v50, %v1556_v19 }
 0x1f2   :  { %v1462_v41 = vsel %vm16479_vm8, %v14440_v32, -inf  ;;  %v2035_v11 = vsel %vm16474_vm15, %v2034_v47, %v14495_v24  ;;  %13413 = vrot.lane.b32.xlu0 %v13412_v61, %s13883_s8  ;;  %v16510_v17 = vrot.slane %v14481_v33, 7  ;;  %v1546_v30 = vsel %vm16479_vm8, %v14542_v6, -inf  ;;  %v1139_v47 = vld.sshfl [vmem:[#allocation1 + $0x20] sm:$0xff pattern:$0x73625140] }
 0x1f3   :  { %v1463_v27 = vrot.slane %v1462_v41, 4  ;;  %v1994_v35 = vrot.slane %v1545_v38, 5  ;;  %v13422_v44 = vpack.i.bf16 %v1545_v38, %v1461_v58  ;;  %v1558_v50 = vrot.slane %v1557_v40, 1 }
 0x1f4   :  { %v1991_v36 = vsel %vm16475_vm14, %v16510_v17, %v1461_v58  ;;  %v1866_v63 = vrot.slane %v1335_v14, 4  ;;  %v1547_v28 = vrot.slane %v1546_v30, 4  ;;  %v1441_v24 = vsel %vm16479_vm8, %v14432_v42, -inf }
 0x1f5   :  { %v1993_v5 = vsel %vm16474_vm15, %v1992_v39, %v1991_v36  ;;  %v1464_v32 = vmax.f32 %v1462_v41, %v1463_v27  ;;  %13423 = vrot.lane.b32.xlu2 %v13422_v44, %s13883_s8  ;;  %v14610_v33 = vmax.f32 %v1557_v40, %v1558_v50  ;;  %v1442_v15 = vrot.slane %v1441_v24, 4 }
 0x1f6   :  { %v14607_v59 = vsel %vm16473_vm2, %v1994_v35, %v1993_v5  ;;  %v1525_v6 = vsel %vm16479_vm8, %v14551_v62, -inf  ;;  %v14615_v39 = vsel %vm16483_vm4, %v1866_v63, %v1865_v18  ;;  %v1548_v48 = vmax.f32 %v1546_v30, %v1547_v28 }
 0x1f7   :  { %v1465_v13 = vrot.slane %v1464_v32, 2  ;;  %v1526_v56 = vrot.slane %v1525_v6, 4  ;;  %v13447_v43 = vpack.i.bf16 %v14610_v33, %v1335_v14  ;;  %v1884_v42 = vrot.slane %v14610_v33, 4 }
 0x1f8   :  { %v1443_v45 = vmax.f32 %v1441_v24, %v1442_v15  ;;  %v1350_v10 = vsel %vm16479_vm8, %v14344_v4, -inf  ;;  %v1549_v3 = vrot.slane %v1548_v48, 2  ;;  %v1574_v18 = vsel %vm16479_vm8, %v1137_v29, -inf }
 0x1f9   :  { %v1466_v16 = vmax.f32 %v1464_v32, %v1465_v13  ;;  %v1527_v19 = vmax.f32 %v1525_v6, %v1526_v56  ;;  %v1351_v9 = vrot.slane %v1350_v10, 4  ;;  %13448 = vrot.lane.b32.xlu1 %v13447_v43, %s13883_s8  ;;  %v16511_v61 = vrot.slane %v14401_v21, 5  ;;  %v14629_v32 = vld.sshfl [vmem:[#allocation1 + $0x38] sm:$0xff pattern:$0x73625140] }
 0x1fa   :  { %v1444_v62 = vrot.slane %v1443_v45, 2  ;;  %v1357_v38 = vsel %vm16479_vm8, %v14348_v22, -inf  ;;  %v1550_v40 = vmax.f32 %v1548_v48, %v1549_v3  ;;  %v1575_v36 = vrot.slane %v1574_v18, 4  ;;  %v14634_v6 = vld.sshfl [vmem:[#allocation1 + $0x28] sm:$0xff pattern:$0x73625140] }
 0x1fb   :  { %v2037_v58 = vsel %vm16473_vm2, %v16511_v61, %v2035_v11  ;;  %v1467_v14 = vrot.slane %v1466_v16, 1  ;;  %v1528_v4 = vrot.slane %v1527_v19, 2  ;;  %v1352_v41 = vmax.f32 %v1350_v10, %v1351_v9 }
 0x1fc   :  { %v1445_v17 = vmax.f32 %v1443_v45, %v1444_v62  ;;  %v1358_v27 = vrot.slane %v1357_v38, 4  ;;  %v1581_v30 = vsel %vm16479_vm8, %v1139_v47, -inf  ;;  %v1551_v44 = vrot.slane %v1550_v40, 1 }
 0x1fd   :  { %v1468_v35 = vmax.f32 %v1466_v16, %v1467_v14  ;;  %v1529_v5 = vmax.f32 %v1527_v19, %v1528_v4  ;;  %v1353_v29 = vrot.slane %v1352_v41, 2  ;;  %v1576_v21 = vmax.f32 %v1574_v18, %v1575_v36  ;;  %v14639_v19 = vld.sshfl [vmem:[#allocation1 + $0x30] sm:$0xff pattern:$0x73625140] }
 0x1fe   :  { %v1446_v50 = vrot.slane %v1445_v17, 1  ;;  %v1359_v63 = vmax.f32 %v1357_v38, %v1358_v27  ;;  %v1582_v11 = vrot.slane %v1581_v30, 4  ;;  %v1552_v22 = vmax.f32 %v1550_v40, %v1551_v44 }
 0x1ff   :  { %v2047_v28 = vsel %vm16475_vm14, %v2046_v34, %v1468_v35  ;;  %v1530_v24 = vrot.slane %v1529_v5, 1  ;;  %v1354_v15 = vmax.f32 %v1352_v41, %v1353_v29  ;;  %v1577_v56 = vrot.slane %v1576_v21, 2 }
 0x200   :  { %v2049_v13 = vsel %vm16474_vm15, %v2048_v0, %v2047_v28  ;;  %v1447_v48 = vmax.f32 %v1445_v17, %v1446_v50  ;;  %v1360_v43 = vrot.slane %v1359_v63, 2  ;;  %v2050_v45 = vrot.slane %v1552_v22, 5 }
 0x201   :  { %v13432_v10 = vpack.i.bf16 %v1552_v22, %v1468_v35  ;;  %v1531_v16 = vmax.f32 %v1529_v5, %v1530_v24  ;;  %v1355_v3 = vrot.slane %v1354_v15, 1  ;;  %v1578_v34 = vmax.f32 %v1576_v21, %v1577_v56  ;;  %v1146_v5 = vld.sshfl [vmem:[#allocation1 + $0x10] sm:$0xff pattern:$0x73625140] }
 0x202   :  { %v1879_v7 = vsel %vm16475_vm14, %v1878_v1, %v1447_v48  ;;  %v1361_v9 = vmax.f32 %v1359_v63, %v1360_v43  ;;  %v1583_v47 = vmax.f32 %v1581_v30, %v1582_v11  ;;  %v16512_v37 = vrot.slane %v14412_v31, 6 }
 0x203   :  { %v2051_v0 = vsel %vm16473_vm2, %v2050_v45, %v2049_v13  ;;  %13433 = vrot.lane.b32.xlu0 %v13432_v10, %s13883_s8  ;;  %v1882_v62 = vrot.slane %v1531_v16, 5  ;;  %v13427_v18 = vpack.i.bf16 %v1531_v16, %v1447_v48  ;;  %v1881_v61 = vsel %vm16474_vm15, %v1880_v52, %v1879_v7 }
 0x204   :  { %1148 = vst [vmem:[#allocation1 + $0x20] ss:$4 sm:$0xff] %v16512_v37  ;;  %v1356_v38 = vmax.f32 %v1354_v15, %v1355_v3  ;;  %v1579_v20 = vrot.slane %v1578_v34, 1  ;;  %v1362_v14 = vrot.slane %v1361_v9, 1  ;;  %v1584_v1 = vrot.slane %v1583_v47, 2 }
 0x205   :  { %13428 = vrot.lane.b32.xlu2 %v13427_v18, %s13883_s8  ;;  %v1883_v40 = vsel %vm16473_vm2, %v1882_v62, %v1881_v61  ;;  %v1336_v31 = vsel %vm16479_vm8, %v14340_v57, -inf  ;;  %v1560_v4 = vsel %vm16479_vm8, %v14577_v8, -inf  ;;  %v16513_v35 = vrot.slane %v14405_v53, 5 }
 0x206   :  { %v1580_v41 = vmax.f32 %v1578_v34, %v1579_v20  ;;  %v2038_v17 = vrot.slane %v1356_v38, 4  ;;  %v1363_v54 = vmax.f32 %v1361_v9, %v1362_v14  ;;  %v1585_v36 = vmax.f32 %v1583_v47, %v1584_v1 }
 0x207   :  { %v1885_v52 = vsel %vm16483_vm4, %v1884_v42, %v1883_v40  ;;  %v1337_v27 = vrot.slane %v1336_v31, 4  ;;  %v1561_v30 = vrot.slane %v1560_v4, 4  ;;  %v1925_v44 = vsel %vm16473_vm2, %v16513_v35, %v14523_v23 }
 0x208   :  { %v14665_v57 = vsel %vm16483_vm4, %v2038_v17, %v2037_v58  ;;  %v13452_v8 = vpack.i.bf16 %v1580_v41, %v1356_v38  ;;  %v2052_v29 = vrot.slane %v1580_v41, 4  ;;  %v1586_v50 = vrot.slane %v1585_v36, 1 }
 0x209   :  { %v1869_v21 = vrot.slane %v1363_v54, 3  ;;  %v1338_v63 = vmax.f32 %v1336_v31, %v1337_v27  ;;  %v1562_v11 = vmax.f32 %v1560_v4, %v1561_v30  ;;  %v1399_v33 = vsel %vm16479_vm8, %v14383_v12, -inf }
 0x20a   :  { %v14670_v42 = vsel %vm16483_vm4, %v2052_v29, %v2051_v0  ;;  %13453 = vrot.lane.b32.xlu1 %v13452_v8, %s13883_s8  ;;  %v1587_v53 = vmax.f32 %v1585_v36, %v1586_v50  ;;  %v1400_v23 = vrot.slane %v1399_v33, 4  ;;  %v1623_v22 = vsel %vm16479_vm8, %v1146_v5, -inf }
 0x20b   :  { %v14676_v58 = vsel %vm16472_vm6, %v1869_v21, %v14615_v39  ;;  %v1339_v28 = vrot.slane %v1338_v63, 2  ;;  %v1563_v24 = vrot.slane %v1562_v11, 2  ;;  %v1624_v15 = vrot.slane %v1623_v22, 4 }
 0x20c   :  { %v13467_v13 = vpack.i.bf16 %v1587_v53, %v1363_v54  ;;  %v1886_v48 = vrot.slane %v1587_v53, 3  ;;  %v1401_v56 = vmax.f32 %v1399_v33, %v1400_v23  ;;  %v1378_v12 = vsel %vm16479_vm8, %v14365_v26, -inf }
 0x20d   :  { %v1340_v43 = vmax.f32 %v1338_v63, %v1339_v28  ;;  %v1564_v45 = vmax.f32 %v1562_v11, %v1563_v24  ;;  %v1625_v10 = vmax.f32 %v1623_v22, %v1624_v15  ;;  %v1379_v16 = vrot.slane %v1378_v12, 4  ;;  %v1151_v11 = vld.sshfl [vmem:[#allocation1 + $0x30] sm:$0xff pattern:$0x73625140] }
 0x20e   :  { %13468 = vrot.lane.b32.xlu2 %v13467_v13, %s13883_s8  ;;  %v14682_v3 = vsel %vm16472_vm6, %v1886_v48, %v1885_v52  ;;  %v1402_v39 = vrot.slane %v1401_v56, 2  ;;  %v1602_v7 = vsel %vm16479_vm8, %v14629_v32, -inf  ;;  %v1364_v34 = vsel %vm16479_vm8, %v14356_v55, -inf }
 0x20f   :  { %v1341_v9 = vrot.slane %v1340_v43, 1  ;;  %v1565_v47 = vrot.slane %v1564_v45, 1  ;;  %v1626_v37 = vrot.slane %v1625_v10, 2  ;;  %v1380_v26 = vmax.f32 %v1378_v12, %v1379_v16 }
 0x210   :  { %v1403_v0 = vmax.f32 %v1401_v56, %v1402_v39  ;;  %v1603_v62 = vrot.slane %v1602_v7, 4  ;;  %v1365_v18 = vrot.slane %v1364_v34, 4  ;;  %v1588_v61 = vsel %vm16479_vm8, %v14634_v6, -inf }
 0x211   :  { %v1342_v38 = vmax.f32 %v1340_v43, %v1341_v9  ;;  %v1566_v20 = vmax.f32 %v1564_v45, %v1565_v47  ;;  %v1627_v14 = vmax.f32 %v1625_v10, %v1626_v37  ;;  %v1381_v1 = vrot.slane %v1380_v26, 2 }
 0x212   :  { %v1404_v40 = vrot.slane %v1403_v0, 1  ;;  %v1604_v31 = vmax.f32 %v1602_v7, %v1603_v62  ;;  %v1366_v32 = vmax.f32 %v1364_v34, %v1365_v18  ;;  %v1589_v4 = vrot.slane %v1588_v61, 4 }
 0x213   :  { %v1926_v41 = vrot.slane %v1342_v38, 4  ;;  %v13437_v55 = vpack.i.bf16 %v1566_v20, %v1342_v38  ;;  %v1940_v17 = vrot.slane %v1566_v20, 4  ;;  %v1628_v54 = vrot.slane %v1627_v14, 1 }
 0x214   :  { %v14690_v36 = vmax.f32 %v1403_v0, %v1404_v40  ;;  %v1382_v52 = vmax.f32 %v1380_v26, %v1381_v1  ;;  %v1605_v27 = vrot.slane %v1604_v31, 2  ;;  %v1367_v30 = vrot.slane %v1366_v32, 2  ;;  %v1152_v1 = vld.sshfl [vmem:[#allocation1 + $0x38] sm:$0xff pattern:$0x73625140] }
 0x215   :  { %v1927_v35 = vsel %vm16483_vm4, %v1926_v41, %v1925_v44  ;;  %13438 = vrot.lane.b32.xlu0 %v13437_v55, %s13883_s8  ;;  %v1941_v6 = vsel %vm16483_vm4, %v1940_v17, %v14564_v2  ;;  %v14696_v5 = vmax.f32 %v1627_v14, %v1628_v54  ;;  %v1590_v8 = vmax.f32 %v1588_v61, %v1589_v4 }
 0x216   :  { %v1996_v29 = vrot.slane %v14573_v51, 4  ;;  %v1383_v50 = vrot.slane %v1382_v52, 1  ;;  %v1606_v21 = vmax.f32 %v1604_v31, %v1605_v27  ;;  %v1368_v63 = vmax.f32 %v1366_v32, %v1367_v30  ;;  %v1145_v30 = vld.sshfl [vmem:[#allocation1 + $0x8] sm:$0xff pattern:$0x73625140] }
 0x217   :  { %v1986_v33 = vrot.slane %v14690_v36, 2  ;;  %v13482_v53 = vpack.i.bf16 %v14696_v5, %v14690_v36  ;;  %v1591_v44 = vrot.slane %v1590_v8, 2  ;;  %v1427_v23 = vsel %vm16479_vm8, %v14414_v46, -inf  ;;  %v14756_v36 = vpop.permute.xlu2 %13373 }
 0x218   :  { %v1384_v22 = vmax.f32 %v1382_v52, %v1383_v50  ;;  %v1607_v2 = vrot.slane %v1606_v21, 1  ;;  %v1369_v28 = vrot.slane %v1368_v63, 1  ;;  %v1428_v24 = vrot.slane %v1427_v23, 4 }
 0x219   :  { %13483 = vrot.lane.b32.xlu1 %v13482_v53, %s13883_s8  ;;  %v1592_v51 = vmax.f32 %v1590_v8, %v1591_v44  ;;  %v1651_v15 = vsel %vm16479_vm8, %v1151_v11, -inf  ;;  %v1371_v13 = vsel %vm16479_vm8, %v14358_v25, -inf  ;;  %v1595_v48 = vsel %vm16479_vm8, %v14639_v19, -inf  ;;  %v16514_v8 = vld [vmem:[#allocation30_spill] sm:$0xff] }
 0x21a   :  { %v1608_v56 = vmax.f32 %v1606_v21, %v1607_v2  ;;  %v2040_v12 = vrot.slane %v1384_v22, 3  ;;  %v1370_v43 = vmax.f32 %v1368_v63, %v1369_v28  ;;  %v1429_v45 = vmax.f32 %v1427_v23, %v1428_v24 }
 0x21b   :  { %v1593_v46 = vrot.slane %v1592_v51, 1  ;;  %v1652_v10 = vrot.slane %v1651_v15, 4  ;;  %v1372_v16 = vrot.slane %v1371_v13, 4  ;;  %v1596_v39 = vrot.slane %v1595_v48, 4 }
 0x21c   :  { %v13472_v7 = vpack.i.bf16 %v1608_v56, %v1384_v22  ;;  %v14712_v34 = vsel %vm16472_vm6, %v2040_v12, %v14665_v57  ;;  %v2054_v9 = vrot.slane %v1608_v56, 3  ;;  %v1928_v47 = vrot.slane %v1370_v43, 3 }
 0x21d   :  { %v1594_v37 = vmax.f32 %v1592_v51, %v1593_v46  ;;  %v1430_v25 = vrot.slane %v1429_v45, 2  ;;  %v1653_v26 = vmax.f32 %v1651_v15, %v1652_v10  ;;  %v1373_v0 = vmax.f32 %v1371_v13, %v1372_v16  ;;  %v16515_v16 = vld [vmem:[#allocation31_spill] sm:$0xff] }
 0x21e   :  { %v2000_v19 = vrot.slane %v14696_v5, 2  ;;  %13473 = vrot.lane.b32.xlu2 %v13472_v7, %s13883_s8  ;;  %v14718_v62 = vsel %vm16472_vm6, %v2054_v9, %v14670_v42  ;;  %v14721_v18 = vsel %vm16472_vm6, %v1928_v47, %v1927_v35  ;;  %v1597_v61 = vmax.f32 %v1595_v48, %v1596_v39 }
 0x21f   :  { %v13457_v57 = vpack.i.bf16 %v1594_v37, %v1370_v43  ;;  %v1942_v38 = vrot.slane %v1594_v37, 3  ;;  %v1431_v20 = vmax.f32 %v1429_v45, %v1430_v25  ;;  %v1654_v14 = vrot.slane %v1653_v26, 2 }
 0x220   :  { %v1374_v40 = vrot.slane %v1373_v0, 2  ;;  %v1598_v31 = vrot.slane %v1597_v61, 2  ;;  %v1997_v32 = vsel %vm16483_vm4, %v1996_v29, %v14607_v59  ;;  %v1434_v55 = vsel %vm16479_vm8, %v14416_v60, -inf }
 0x221   :  { %13458 = vrot.lane.b32.xlu0 %v13457_v57, %s13883_s8  ;;  %v14727_v42 = vsel %vm16472_vm6, %v1942_v38, %v1941_v6  ;;  %v1432_v4 = vrot.slane %v1431_v20, 1  ;;  %v1655_v41 = vmax.f32 %v1653_v26, %v1654_v14  ;;  %v1435_v52 = vrot.slane %v1434_v55, 4  ;;  %v1147_v57 = vld.sshfl [vmem:[#allocation1 + $0x18] sm:$0xff pattern:$0x73625140] }
 0x222   :  { %v1375_v17 = vmax.f32 %v1373_v0, %v1374_v40  ;;  %v1599_v54 = vmax.f32 %v1597_v61, %v1598_v31  ;;  %v1658_v27 = vsel %vm16479_vm8, %v1152_v1, -inf  ;;  %v1392_v29 = vsel %vm16479_vm8, %v16514_v8, -inf }
 0x223   :  { %v1433_v35 = vmax.f32 %v1431_v20, %v1432_v4  ;;  %v1656_v5 = vrot.slane %v1655_v41, 1  ;;  %v1659_v59 = vrot.slane %v1658_v27, 4  ;;  %v1436_v21 = vmax.f32 %v1434_v55, %v1435_v52 }
 0x224   :  { %v1376_v6 = vrot.slane %v1375_v17, 1  ;;  %v1600_v50 = vrot.slane %v1599_v54, 1  ;;  %v1393_v63 = vrot.slane %v1392_v29, 4  ;;  %v1616_v60 = vsel %vm16479_vm8, %v1145_v30, -inf }
 0x225   :  { %v1657_v11 = vmax.f32 %v1655_v41, %v1656_v5  ;;  %v1988_v53 = vrot.slane %v1433_v35, 1  ;;  %v1660_v44 = vmax.f32 %v1658_v27, %v1659_v59  ;;  %v1437_v2 = vrot.slane %v1436_v21, 2  ;;  %v16516_v27 = vld [vmem:[#allocation29_spill] sm:$0xff] }
 0x226   :  { %v1377_v23 = vmax.f32 %v1375_v17, %v1376_v6  ;;  %v1601_v22 = vmax.f32 %v1599_v54, %v1600_v50  ;;  %v1394_v28 = vmax.f32 %v1392_v29, %v1393_v63  ;;  %v1617_v13 = vrot.slane %v1616_v60, 4 }
 0x227   :  { %v13502_v24 = vpack.i.bf16 %v1657_v11, %v1433_v35  ;;  %v2002_v51 = vrot.slane %v1657_v11, 1  ;;  %v1661_v15 = vrot.slane %v1660_v44, 2  ;;  %v1438_v43 = vmax.f32 %v1436_v21, %v1437_v2 }
 0x228   :  { %v1984_v48 = vrot.slane %v1377_v23, 3  ;;  %v13462_v56 = vpack.i.bf16 %v1601_v22, %v1377_v23  ;;  %v1998_v12 = vrot.slane %v1601_v22, 3  ;;  %v1395_v46 = vrot.slane %v1394_v28, 2 }
 0x229   :  { %13503 = vrot.lane.b32.xlu1 %v13502_v24, %s13883_s8  ;;  %v1662_v45 = vmax.f32 %v1660_v44, %v1661_v15  ;;  %v1618_v10 = vmax.f32 %v1616_v60, %v1617_v13  ;;  %v1406_v39 = vsel %vm16479_vm8, %v16515_v16, -inf  ;;  %v1439_v47 = vrot.slane %v1438_v43, 1  ;;  %v16517_v13 = vld [vmem:[#allocation33_spill] sm:$0xff] }
 0x22a   :  { %v1985_v7 = vsel %vm16472_vm6, %v1984_v48, %v14580_v49  ;;  %v1999_v9 = vsel %vm16472_vm6, %v1998_v12, %v1997_v32  ;;  %13463 = vrot.lane.b32.xlu0 %v13462_v56, %s13883_s8  ;;  %v1407_v37 = vrot.slane %v1406_v39, 4  ;;  %v1396_v61 = vmax.f32 %v1394_v28, %v1395_v46  ;;  %v1144_v32 = vld.sshfl [vmem:[#allocation1] sm:$0xff pattern:$0x73625140]  ;;  %v14775_v56 = vpop.permute.xlu2 %13383 }
 0x22b   :  { %v1987_v25 = vsel %vm16471_vm0, %v1986_v33, %v1985_v7  ;;  %v2001_v26 = vsel %vm16471_vm0, %v2000_v19, %v1999_v9  ;;  %v1663_v0 = vrot.slane %v1662_v45, 1  ;;  %v1619_v20 = vrot.slane %v1618_v10, 2  ;;  %v1150_v28 = vld.sshfl [vmem:[#allocation1 + $0x28] sm:$0xff pattern:$0x73625140] }
 0x22c   :  { %v14747_v38 = vsel %vm16470_vm13, %v1988_v53, %v1987_v25  ;;  %v14750_v49 = vsel %vm16470_vm13, %v2002_v51, %v2001_v26  ;;  %v14752_v14 = vmax.f32 %v1438_v43, %v1439_v47  ;;  %v1397_v40 = vrot.slane %v1396_v61, 1  ;;  %v1149_v26 = vld.sshfl [vmem:[#allocation1 + $0x20] sm:$0xff pattern:$0x73625140] }
 0x22d   :  { %v14754_v1 = vmax.f32 %v1662_v45, %v1663_v0  ;;  %v1620_v33 = vmax.f32 %v1618_v10, %v1619_v20  ;;  %v1408_v31 = vmax.f32 %v1406_v39, %v1407_v37  ;;  %v1630_v19 = vsel %vm16479_vm8, %v1147_v57, -inf  ;;  %v16518_v39 = vld [vmem:[#allocation32_spill] sm:$0xff] }
 0x22e   :  { %v1398_v41 = vmax.f32 %v1396_v61, %v1397_v40  ;;  %v1631_v55 = vrot.slane %v1630_v19, 4  ;;  %v2131_v17 = vrot.slane %v14747_v38, 4  ;;  %v1385_v30 = vsel %vm16479_vm8, %v16516_v27, -inf  ;;  %v14787_v40 = vpop.permute.xlu1 %13358 }
 0x22f   :  { %v13512_v4 = vpack.i.bf16 %v14754_v1, %v14752_v14  ;;  %v1621_v54 = vrot.slane %v1620_v33, 1  ;;  %v1409_v52 = vrot.slane %v1408_v31, 2  ;;  %v1386_v59 = vrot.slane %v1385_v30, 4 }
 0x230   :  { %v1930_v35 = vrot.slane %v1398_v41, 2  ;;  %v1632_v5 = vmax.f32 %v1630_v19, %v1631_v55  ;;  %v1609_v8 = vsel %vm16479_vm8, %v1144_v32, -inf  ;;  %v2243_v29 = vrot.slane %v14750_v49, 4 }
 0x231   :  { %13513 = vrot.lane.b32.xlu1 %v13512_v4, %s13883_s8  ;;  %v1622_v6 = vmax.f32 %v1620_v33, %v1621_v54  ;;  %v1410_v50 = vmax.f32 %v1408_v31, %v1409_v52  ;;  %v1610_v21 = vrot.slane %v1609_v8, 4  ;;  %v2044_v63 = vrot.slane %v14752_v14, 1 }
 0x232   :  { %v14770_v11 = vsel %vm16471_vm0, %v1930_v35, %v14721_v18  ;;  %v1633_v53 = vrot.slane %v1632_v5, 2  ;;  %v1387_v44 = vmax.f32 %v1385_v30, %v1386_v59  ;;  %v2058_v24 = vrot.slane %v14754_v1, 1 }
 0x233   :  { %v13477_v60 = vpack.i.bf16 %v1622_v6, %v1398_v41  ;;  %v1944_v23 = vrot.slane %v1622_v6, 2  ;;  %v1411_v22 = vrot.slane %v1410_v50, 1  ;;  %v1611_v2 = vmax.f32 %v1609_v8, %v1610_v21 }
 0x234   :  { %v1634_v51 = vmax.f32 %v1632_v5, %v1633_v53  ;;  %v1388_v15 = vrot.slane %v1387_v44, 2  ;;  %v1420_v48 = vsel %vm16479_vm8, %v16517_v13, -inf  ;;  %v1644_v16 = vsel %vm16479_vm8, %v1150_v28, -inf }
 0x235   :  { %13478 = vrot.lane.b32.xlu2 %v13477_v60, %s13883_s8  ;;  %v14780_v18 = vsel %vm16471_vm0, %v1944_v23, %v14727_v42  ;;  %v1412_v12 = vmax.f32 %v1410_v50, %v1411_v22  ;;  %v1612_v43 = vrot.slane %v1611_v2, 2  ;;  %v1421_v45 = vrot.slane %v1420_v48, 4 }
 0x236   :  { %v1635_v46 = vrot.slane %v1634_v51, 1  ;;  %v1389_v10 = vmax.f32 %v1387_v44, %v1388_v15  ;;  %v1413_v7 = vsel %vm16479_vm8, %v16518_v39, -inf  ;;  %v1645_v25 = vrot.slane %v1644_v16, 4  ;;  %v14818_v15 = vpop.permute.xlu1 %13363 }
 0x237   :  { %v2042_v9 = vrot.slane %v1412_v12, 2  ;;  %v1613_v47 = vmax.f32 %v1611_v2, %v1612_v43  ;;  %v1422_v37 = vmax.f32 %v1420_v48, %v1421_v45  ;;  %vm2105_vm12 = vcmask 1047556  }
 0x238   :  { %v1636_v0 = vmax.f32 %v1634_v51, %v1635_v46  ;;  %v1390_v61 = vrot.slane %v1389_v10, 1  ;;  %v1414_v42 = vrot.slane %v1413_v7, 4  ;;  %v1646_v1 = vmax.f32 %v1644_v16, %v1645_v25 }
 0x239   :  { %v2043_v57 = vsel %vm16471_vm0, %v2042_v9, %v14712_v34  ;;  %v1614_v20 = vrot.slane %v1613_v47, 1  ;;  %v1423_v14 = vrot.slane %v1422_v37, 2  ;;  %v1637_v32 = vsel %vm16479_vm8, %v1149_v26, -inf }
 0x23a   :  { %v14790_v33 = vsel %vm16470_vm13, %v2044_v63, %v2043_v57  ;;  %v2056_v31 = vrot.slane %v1636_v0, 2  ;;  %v1391_v19 = vmax.f32 %v1389_v10, %v1390_v61  ;;  %v13492_v41 = vpack.i.bf16 %v1636_v0, %v1412_v12 }
 0x23b   :  { %v14795_v4 = vsel %vm2105_vm12, %v14790_v33, %v2131_v17  ;;  %v1615_v55 = vmax.f32 %v1613_v47, %v1614_v20  ;;  %v1424_v54 = vmax.f32 %v1422_v37, %v1423_v14  ;;  %v1647_v27 = vrot.slane %v1646_v1, 2 }
 0x23c   :  { %v2057_v34 = vsel %vm16471_vm0, %v2056_v31, %v14718_v62  ;;  %v1872_v52 = vrot.slane %v1391_v19, 2  ;;  %v1415_v30 = vmax.f32 %v1413_v7, %v1414_v42  ;;  %v14809_v62 = vpop.permute.xlu2 %13408  ;;  %v1638_v44 = vrot.slane %v1637_v32, 4 }
 0x23d   :  { %v14800_v35 = vsel %vm16470_vm13, %v2058_v24, %v2057_v34  ;;  %13493 = vrot.lane.b32.xlu2 %v13492_v41, %s13883_s8  ;;  %v13487_v5 = vpack.i.bf16 %v1615_v55, %v1391_v19  ;;  %v1888_v59 = vrot.slane %v1615_v55, 2  ;;  %v1425_v8 = vrot.slane %v1424_v54, 1 }
 0x23e   :  { %v14805_v17 = vsel %vm2105_vm12, %v14800_v35, %v2243_v29  ;;  %v1874_v6 = vsel %vm16471_vm0, %v1872_v52, %v14676_v58  ;;  %v1648_v50 = vmax.f32 %v1646_v1, %v1647_v27  ;;  %v1416_v53 = vrot.slane %v1415_v30, 2  ;;  %v13369_v61 = vpop.permute.xlu1 %13368 }
 0x23f   :  { %13488 = vrot.lane.b32.xlu0 %v13487_v5, %s13883_s8  ;;  %v1889_v21 = vsel %vm16471_vm0, %v1888_v59, %v14682_v3  ;;  %v1426_v63 = vmax.f32 %v1424_v54, %v1425_v8  ;;  %v1639_v2 = vmax.f32 %v1637_v32, %v1638_v44  ;;  %v13360_v20 = vunpack.i.l.bf16 %v14787_v40 }
 0x240   :  { %v1649_v60 = vrot.slane %v1648_v50, 1  ;;  %v1417_v29 = vmax.f32 %v1415_v30, %v1416_v53  ;;  %v2241_v1 = vrot.slane %v14800_v35, 4  ;;  %v13370_v19 = vunpack.i.l.bf16 %v13369_v61 }
 0x241   :  { %v1932_v22 = vrot.slane %v1426_v63, 1  ;;  %v1640_v51 = vrot.slane %v1639_v2, 2  ;;  %v13410_v41 = vunpack.i.l.bf16 %v14809_v62  ;;  %v13386_v27 = vunpack.i.h.bf16 %v14775_v56 }
 0x242   :  { %v14814_v23 = vpop.permute.xlu0 %13378  ;;  %v1650_v28 = vmax.f32 %v1648_v50, %v1649_v60  ;;  %v1418_v24 = vrot.slane %v1417_v29, 1  ;;  %v13371_v30 = vunpack.i.h.bf16 %v13369_v61  ;;  %v14856_v5 = vsel %vm2105_vm12, %v2241_v1, %v14750_v49 }
 0x243   :  { %v1933_v58 = vsel %vm16470_vm13, %v1932_v22, %v14770_v11  ;;  %v1641_v12 = vmax.f32 %v1639_v2, %v1640_v51  ;;  %v13380_v25 = vunpack.i.l.bf16 %v14814_v23  ;;  %v1894_v59 = vrot.slane %v13410_v41, 6 }
 0x244   :  { %v1946_v13 = vrot.slane %v1650_v28, 1  ;;  %v13497_v48 = vpack.i.bf16 %v1650_v28, %v1426_v63  ;;  %v1419_v3 = vmax.f32 %v1417_v29, %v1418_v24  ;;  %v2104_v45 = vrot.slane %v1933_v58, 4  ;;  %v14823_v16 = vpop.permute.xlu2 %13418 }
 0x245   :  { %v1642_v46 = vrot.slane %v1641_v12, 1  ;;  %v1948_v14 = vrot.slane %v13380_v25, 7  ;;  %v1896_v53 = vrot.slane %v13371_v30, 5  ;;  %v13361_v24 = vunpack.i.h.bf16 %v14787_v40 }
 0x246   :  { %v1947_v43 = vsel %vm16470_vm13, %v1946_v13, %v14780_v18  ;;  %v1875_v10 = vrot.slane %v1419_v3, 1  ;;  %v2129_v18 = vrot.slane %v14790_v33, 4  ;;  %v13394_v22 = vpop.permute.xlu1 %13393  ;;  %v13884_v1 = vmov 1983009808  }
 0x247   :  { %13498 = vrot.lane.b32.xlu0 %v13497_v48, %s13883_s8  ;;  %v1643_v39 = vmax.f32 %v1641_v12, %v1642_v46  ;;  %v2217_v7 = vrot.slane %v1947_v43, 4  ;;  %v1949_v33 = vsel %vm16475_vm14, %v1948_v14, %v13360_v20  ;;  %v1952_v13 = vrot.slane %v13361_v24, 5 }
 0x248   :  { %v1877_v11 = vsel %vm16470_vm13, %v1875_v10, %v1874_v6  ;;  %v14845_v55 = vsel %vm2105_vm12, %v2129_v18, %v14747_v38  ;;  %v13396_v20 = vunpack.i.h.bf16 %v13394_v22  ;;  %vm2717_vm9 = vsmask.f32 7954 }
 0x249   :  { %v14827_v9 = vsel %vm2105_vm12, %v2104_v45, %v1877_v11  ;;  %v1890_v37 = vrot.slane %v1643_v39, 1  ;;  %v13507_v26 = vpack.i.bf16 %v1643_v39, %v1419_v3  ;;  %v2107_v31 = vrot.slane %v1877_v11, 4 }
 0x24a   :  { %v14829_v47 = vpop.permute.xlu0 %13388  ;;  %vm2681_vm10 = vcmask 261120   ;;  %vm16484_vm8 = vcmask 523264  }
 0x24b   :  { %v1891_v0 = vsel %vm16470_vm13, %v1890_v37, %v1889_v21  ;;  %v13390_v42 = vunpack.i.l.bf16 %v14829_v47  ;;  %v14852_v35 = vsel %vm2105_vm12, %v1933_v58, %v2107_v31  ;;  %v2018_v21 = vrot.slane %v13386_v27, 7 }
 0x24c   :  { %v14836_v57 = vsel %vm2105_vm12, %v2217_v7, %v1891_v0  ;;  %v2219_v54 = vrot.slane %v1891_v0, 4  ;;  %v13385_v37 = vunpack.i.l.bf16 %v14775_v56  ;;  %v13395_v0 = vunpack.i.l.bf16 %v13394_v22 }
 0x24d   :  { %v1892_v32 = vrot.slane %v13390_v42, 7  ;;  %v13376_v42 = vunpack.i.h.bf16 %v14756_v36  ;;  %v2110_v31 = vunpack.c.l.s4 %v13884_v1 }
 0x24e   :  { %v14860_v50 = vsel %vm2105_vm12, %v1947_v43, %v2219_v54  ;;  %v13375_v54 = vunpack.i.l.bf16 %v14756_v36  ;;  %v2060_v27 = vrot.slane %v13395_v0, 7 }
 0x24f   :  { %13508 = vrot.lane.b32.xlu0 %v13507_v26, %s13883_s8  ;;  %v14847_v34 = vpop.permute.xlu2 %13423  ;;  %v1893_v52 = vsel %vm16475_vm14, %v1892_v32, %v13370_v19  ;;  %v14868_v2 = vpop.permute.xlu1 %13398  ;;  %v13365_v26 = vunpack.i.l.bf16 %v14818_v15  ;;  %v2004_v19 = vrot.slane %v13385_v37, 7 }
 0x250   :  { %v13425_v8 = vunpack.i.l.bf16 %v14847_v34  ;;  %v1895_v63 = vsel %vm16474_vm15, %v1894_v59, %v1893_v52  ;;  %v13400_v28 = vunpack.i.l.bf16 %v14868_v2  ;;  %v13426_v56 = vunpack.i.h.bf16 %v14847_v34 }
 0x251   :  { %v14866_v49 = vsel %vm16473_vm2, %v1896_v53, %v1895_v63  ;;  %v2005_v52 = vsel %vm16475_vm14, %v2004_v19, %v13365_v26  ;;  %v2074_v59 = vrot.slane %v13396_v20, 7  ;;  %v14900_v63 = vunpack.c.0.s8 %v2110_v31 }
 0x252   :  { %v2019_v60 = vsel %vm16475_vm14, %v2018_v21, %v13425_v8  ;;  %v1950_v58 = vrot.slane %v13400_v28, 6  ;;  %v2064_v21 = vrot.slane %v13376_v42, 5  ;;  %v2061_v36 = vsel %vm16475_vm14, %v2060_v27, %v13375_v54 }
 0x254   :  { %v13404_v38 = vpop.permute.xlu0 %13403  ;;  %v1951_v51 = vsel %vm16474_vm15, %v1950_v58, %v1949_v33  ;;  %v13366_v33 = vunpack.i.h.bf16 %v14818_v15  ;;  %v2022_v15 = vrot.slane %v13426_v56, 5 }
 0x255   :  { %v13406_v6 = vunpack.i.h.bf16 %v13404_v38  ;;  %v14874_v3 = vsel %vm16473_vm2, %v1952_v13, %v1951_v51  ;;  %v13405_v40 = vunpack.i.l.bf16 %v13404_v38 }
 0x256   :  { %v2008_v53 = vrot.slane %v13366_v33, 5 }
 0x257   :  { %v2020_v44 = vrot.slane %v13406_v6, 6  ;;  %v2006_v14 = vrot.slane %v13405_v40, 6 }
 0x259   :  { %v2021_v29 = vsel %vm16474_vm15, %v2020_v44, %v2019_v60  ;;  %v2007_v8 = vsel %vm16474_vm15, %v2006_v14, %v2005_v52 }
 0x25a   :  { %v2009_v28 = vsel %vm16473_vm2, %v2008_v53, %v2007_v8  ;;  %v2023_v13 = vsel %vm16473_vm2, %v2022_v15, %v2021_v29 }
 0x25f   :  { %v14876_v12 = vpop.permute.xlu2 %13428 }
 0x261   :  { %v13444_v48 = vpop.permute.xlu1 %13443 }
 0x262   :  { %v13446_v38 = vunpack.i.h.bf16 %v13444_v48  ;;  %v13445_v44 = vunpack.i.l.bf16 %v13444_v48 }
 0x264   :  { %v13414_v43 = vpop.permute.xlu0 %13413  ;;  %v2010_v14 = vrot.slane %v13445_v44, 4 }
 0x265   :  { %v13415_v32 = vunpack.i.l.bf16 %v13414_v43  ;;  %v13416_v30 = vunpack.i.h.bf16 %v13414_v43  ;;  %v2024_v43 = vrot.slane %v13446_v38, 4 }
 0x267   :  { %v2062_v34 = vrot.slane %v13415_v32, 6  ;;  %v2076_v58 = vrot.slane %v13416_v30, 6  ;;  %v2011_v32 = vsel %vm16483_vm4, %v2010_v14, %v2009_v28 }
 0x268   :  { %v14880_v46 = vpop.permute.xlu2 %13468 }
 0x269   :  { %v2063_v1 = vsel %vm16474_vm15, %v2062_v34, %v2061_v36 }
 0x26a   :  { %v2065_v27 = vsel %vm16473_vm2, %v2064_v21, %v2063_v1  ;;  %v2025_v21 = vsel %vm16483_vm4, %v2024_v43, %v2023_v13  ;;  %v13381_v1 = vunpack.i.h.bf16 %v14814_v23 }
 0x26b   :  { %v14878_v45 = vpop.permute.xlu1 %13448 }
 0x275   :  { %v13434_v10 = vpop.permute.xlu0 %13433 }
 0x276   :  { %v13435_v41 = vunpack.i.l.bf16 %v13434_v10  ;;  %v13436_v6 = vunpack.i.h.bf16 %v13434_v10 }
 0x278   :  { %v14882_v11 = vpop.permute.xlu2 %13473  ;;  %v2075_v60 = vsel %vm16475_vm14, %v2074_v59, %v13435_v41  ;;  %v2078_v10 = vrot.slane %v13436_v6, 5 }
 0x279   :  { %v2077_v48 = vsel %vm16474_vm15, %v2076_v58, %v2075_v60  ;;  %v13475_v31 = vunpack.i.l.bf16 %v14882_v11  ;;  %v13476_v41 = vunpack.i.h.bf16 %v14882_v11 }
 0x27a   :  { %v2079_v54 = vsel %vm16473_vm2, %v2078_v10, %v2077_v48 }
 0x27b   :  { %v2068_v38 = vrot.slane %v13475_v31, 3  ;;  %v2082_v36 = vrot.slane %v13476_v41, 3 }
 0x27c   :  { %v13454_v39 = vpop.permute.xlu1 %13453 }
 0x27d   :  { %v13455_v22 = vunpack.i.l.bf16 %v13454_v39  ;;  %v13456_v24 = vunpack.i.h.bf16 %v13454_v39 }
 0x27f   :  { %v2066_v39 = vrot.slane %v13455_v22, 4  ;;  %v2080_v19 = vrot.slane %v13456_v24, 4 }
 0x281   :  { %v2067_v6 = vsel %vm16483_vm4, %v2066_v39, %v2065_v27  ;;  %v2081_v44 = vsel %vm16483_vm4, %v2080_v19, %v2079_v54  ;;  %v13411_v54 = vunpack.i.h.bf16 %v14809_v62  ;;  %v1962_v27 = vrot.slane %v13381_v1, 7 }
 0x282   :  { %v2069_v24 = vsel %vm16472_vm6, %v2068_v38, %v2067_v6 }
 0x287   :  { %v14884_v7 = vpop.permute.xlu0 %13438 }
 0x28b   :  { %v14887_v25 = vpop.permute.xlu1 %13483 }
 0x28c   :  { %v13485_v40 = vunpack.i.l.bf16 %v14887_v25  ;;  %v13486_v53 = vunpack.i.h.bf16 %v14887_v25 }
 0x28e   :  { %v2014_v52 = vrot.slane %v13485_v40, 2 }
 0x28f   :  { %v14889_v18 = vpop.permute.xlu2 %13478 }
 0x293   :  { %v14892_v61 = vpop.permute.xlu0 %13458 }
 0x297   :  { %v13494_v37 = vpop.permute.xlu2 %13493 }
 0x298   :  { %v13496_v33 = vunpack.i.h.bf16 %v13494_v37  ;;  %v13495_v29 = vunpack.i.l.bf16 %v13494_v37  ;;  %v2028_v37 = vrot.slane %v13486_v53, 2  ;;  %v13420_v53 = vunpack.i.l.bf16 %v14823_v16 }
 0x29a   :  { %v2084_v34 = vrot.slane %v13496_v33, 2  ;;  %v2070_v11 = vrot.slane %v13495_v29, 2  ;;  %v13401_v29 = vunpack.i.h.bf16 %v14868_v2  ;;  %v2140_v2 = vperm.slane %v14795_v4, %v14900_v63 }
 0x29b   :  { %v13504_v51 = vpop.permute.xlu1 %13503  ;;  %v14959_v4 = vperm.slane %v14836_v57, %v14900_v63 }
 0x29c   :  { %v13464_v26 = vpop.permute.xlu0 %13463  ;;  %v13505_v0 = vunpack.i.l.bf16 %v13504_v51  ;;  %v13506_v10 = vunpack.i.h.bf16 %v13504_v51  ;;  %v2136_v51 = vperm.slane %v14845_v55, %v14900_v63 }
 0x29d   :  { %v13466_v42 = vunpack.i.h.bf16 %v13464_v26  ;;  %v13465_v20 = vunpack.i.l.bf16 %v13464_v26  ;;  %v2083_v26 = vsel %vm16472_vm6, %v2082_v36, %v2081_v44 }
 0x29e   :  { %v2016_v30 = vrot.slane %v13505_v0, 1  ;;  %v2030_v31 = vrot.slane %v13506_v10, 1  ;;  %v2179_v23 = vrot.slane %v2136_v51, 4 }
 0x29f   :  { %v2012_v56 = vrot.slane %v13465_v20, 3  ;;  %v2026_v59 = vrot.slane %v13466_v42, 3  ;;  %v2085_v42 = vsel %vm16471_vm0, %v2084_v34, %v2083_v26  ;;  %v2071_v20 = vsel %vm16471_vm0, %v2070_v11, %v2069_v24 }
 0x2a0   :  { %v1908_v34 = vrot.slane %v13411_v54, 6  ;;  %v13441_v26 = vunpack.i.h.bf16 %v14884_v7 }
 0x2a1   :  { %v2013_v8 = vsel %vm16472_vm6, %v2012_v56, %v2011_v32  ;;  %v2027_v40 = vsel %vm16472_vm6, %v2026_v59, %v2025_v21  ;;  %v14943_v59 = vperm.slane %v14827_v9, %v14900_v63  ;;  %v2191_v21 = vrot.slane %v2140_v2, 4 }
 0x2a2   :  { %v2015_v15 = vsel %vm16471_vm0, %v2014_v52, %v2013_v8  ;;  %v2029_v13 = vsel %vm16471_vm0, %v2028_v37, %v2027_v40  ;;  %v13421_v52 = vunpack.i.h.bf16 %v14823_v16  ;;  %v13430_v37 = vunpack.i.l.bf16 %v14876_v12 }
 0x2a3   :  { %v2017_v60 = vsel %vm16470_vm13, %v2016_v30, %v2015_v15  ;;  %v13514_v22 = vpop.permute.xlu1 %13513  ;;  %v2031_v56 = vsel %vm16470_vm13, %v2030_v31, %v2029_v13  ;;  %v13391_v30 = vunpack.i.h.bf16 %v14829_v47  ;;  %v1964_v15 = vrot.slane %v13401_v29, 6 }
 0x2a4   :  { %v13516_v28 = vunpack.i.h.bf16 %v13514_v22  ;;  %v13515_v58 = vunpack.i.l.bf16 %v13514_v22  ;;  %v2143_v25 = vrot.slane %v2017_v60, 4  ;;  %v2255_v8 = vrot.slane %v2031_v56, 4 }
 0x2a5   :  { %v2248_v47 = vperm.slane %v14856_v5, %v14900_v63  ;;  %v1966_v9 = vrot.slane %v13421_v52, 5  ;;  %v1906_v16 = vrot.slane %v13391_v30, 7  ;;  %v2155_v5 = vrot.slane %v14943_v59, 4 }
 0x2a6   :  { %v2086_v48 = vrot.slane %v13516_v28, 1  ;;  %v2072_v0 = vrot.slane %v13515_v58, 1  ;;  %v14969_v58 = vperm.slane %v14852_v35, %v14900_v63  ;;  %v13440_v35 = vunpack.i.l.bf16 %v14884_v7 }
 0x2a7   :  { %v2291_v40 = vrot.slane %v2248_v47, 4  ;;  %v1907_v13 = vsel %vm16475_vm14, %v1906_v16, %v13430_v37  ;;  %v14998_v7 = vperm.slane %v14860_v50, %v14900_v63  ;;  %v13451_v31 = vunpack.i.h.bf16 %v14878_v45 }
 0x2a8   :  { %v2073_v43 = vsel %vm16470_vm13, %v2072_v0, %v2071_v20  ;;  %v2087_v14 = vsel %vm16470_vm13, %v2086_v48, %v2085_v42  ;;  %v2252_v48 = vperm.slane %v14805_v17, %v14900_v63  ;;  %v1968_v29 = vrot.slane %v13441_v26, 4 }
 0x2a9   :  { %v2141_v39 = vrot.slane %v2073_v43, 4  ;;  %v2144_v19 = vsel %vm2105_vm12, %v2073_v43, %v2143_v25  ;;  %v2253_v33 = vrot.slane %v2087_v14, 4  ;;  %v2256_v36 = vsel %vm2105_vm12, %v2087_v14, %v2255_v8 }
 0x2aa   :  { %v2152_v41 = vperm.slane %v2144_v19, %v14900_v63  ;;  %v13431_v25 = vunpack.i.h.bf16 %v14876_v12  ;;  %v2264_v0 = vperm.slane %v2256_v36, %v14900_v63  ;;  %v13460_v43 = vunpack.i.l.bf16 %v14892_v61 }
 0x2ab   :  { %v2142_v32 = vsel %vm2105_vm12, %v2141_v39, %v2017_v60  ;;  %v2254_v6 = vsel %vm2105_vm12, %v2253_v33, %v2031_v56  ;;  %v1963_v60 = vsel %vm16475_vm14, %v1962_v27, %v13420_v53  ;;  %v2167_v14 = vrot.slane %v14969_v58, 4 }
 0x2ac   :  { %v2148_v55 = vperm.slane %v2142_v32, %v14900_v63  ;;  %v2189_v44 = vrot.slane %v2152_v41, 4  ;;  %v2260_v22 = vperm.slane %v2254_v6, %v14900_v63  ;;  %v1965_v24 = vsel %vm16474_vm15, %v1964_v15, %v1963_v60 }
 0x2ad   :  { %v14976_v10 = vsel %vm2105_vm12, %v2152_v41, %v2191_v21  ;;  %v2267_v12 = vrot.slane %v14959_v4, 4  ;;  %v1910_v1 = vrot.slane %v13431_v25, 5  ;;  %v13450_v39 = vunpack.i.l.bf16 %v14878_v45 }
 0x2ae   :  { %v2177_v38 = vrot.slane %v2148_v55, 4  ;;  %v14949_v62 = vsel %vm2105_vm12, %v2148_v55, %v2179_v23  ;;  %v14973_v57 = vsel %vm2105_vm12, %v2189_v44, %v2140_v2  ;;  %v2289_v42 = vrot.slane %v2260_v22, 4 }
 0x2af   :  { %v14986_v20 = vsel %vm2105_vm12, %v2260_v22, %v2291_v40  ;;  %v2303_v19 = vrot.slane %v2252_v48, 4  ;;  %v1909_v33 = vsel %vm16474_vm15, %v1908_v34, %v1907_v13  ;;  %v1954_v56 = vrot.slane %v13440_v35, 4 }
 0x2b0   :  { %v14955_v11 = vsel %vm2105_vm12, %v2177_v38, %v2136_v51  ;;  %v13461_v51 = vunpack.i.h.bf16 %v14892_v61  ;;  %v14994_v17 = vsel %vm2105_vm12, %v2289_v42, %v2248_v47  ;;  %v2301_v32 = vrot.slane %v2264_v0, 4 }
 0x2b1   :  { %v14964_v28 = vpop.permute.xlu0 %13488  ;;  %v13471_v61 = vunpack.i.h.bf16 %v14880_v46  ;;  %v13470_v41 = vunpack.i.l.bf16 %v14880_v46  ;;  %v1956_v54 = vrot.slane %v13460_v43, 3  ;;  %v13885_v55 = vmov 1934713408  }
 0x2b2   :  { %v2158_v50 = vunpack.c.l.s4 %v13885_v55  ;;  %v13480_v23 = vunpack.i.l.bf16 %v14889_v18  ;;  %v1970_v27 = vrot.slane %v13461_v51, 3  ;;  %v1912_v45 = vrot.slane %v13451_v31, 4 }
 0x2b3   :  { %v1898_v8 = vrot.slane %v13450_v39, 4  ;;  %v13481_v38 = vunpack.i.h.bf16 %v14889_v18  ;;  %v1967_v6 = vsel %vm16473_vm2, %v1966_v9, %v1965_v24  ;;  %v1955_v46 = vsel %vm16483_vm4, %v1954_v56, %v14874_v3 }
 0x2b4   :  { %v1969_v53 = vsel %vm16483_vm4, %v1968_v29, %v1967_v6  ;;  %v2302_v15 = vsel %vm2105_vm12, %v2301_v32, %v2252_v48  ;;  %v2304_v44 = vsel %vm2105_vm12, %v2264_v0, %v2303_v19  ;;  %v1957_v47 = vsel %vm16472_vm6, %v1956_v54, %v1955_v46 }
 0x2b5   :  { %v13491_v34 = vunpack.i.h.bf16 %v14964_v28  ;;  %v13490_v60 = vunpack.i.l.bf16 %v14964_v28  ;;  %v15016_v22 = vunpack.c.0.s8 %v2158_v50  ;;  %v1958_v18 = vrot.slane %v13480_v23, 2 }
 0x2b6   :  { %v1971_v9 = vsel %vm16472_vm6, %v1970_v27, %v1969_v53  ;;  %v1911_v36 = vsel %vm16473_vm2, %v1910_v1, %v1909_v33  ;;  %v1914_v3 = vrot.slane %v13471_v61, 3  ;;  %v1972_v24 = vrot.slane %v13481_v38, 2 }
 0x2b7   :  { %v15022_v40 = vperm.slane %v14955_v11, %v15016_v22  ;;  %v1900_v25 = vrot.slane %v13470_v41, 3  ;;  %v1913_v37 = vsel %vm16483_vm4, %v1912_v45, %v1911_v36  ;;  %v1899_v28 = vsel %vm16483_vm4, %v1898_v8, %v14866_v49 }
 0x2b8   :  { %v1959_v26 = vsel %vm16471_vm0, %v1958_v18, %v1957_v47  ;;  %v1916_v48 = vrot.slane %v13491_v34, 2  ;;  %v1902_v35 = vrot.slane %v13490_v60, 2  ;;  %v1973_v0 = vsel %vm16471_vm0, %v1972_v24, %v1971_v9 }
 0x2b9   :  { %v13499_v52 = vpop.permute.xlu0 %13498  ;;  %v2188_v13 = vperm.slane %v14949_v62, %v15016_v22  ;;  %v1901_v31 = vsel %vm16472_vm6, %v1900_v25, %v1899_v28  ;;  %v1915_v49 = vsel %vm16472_vm6, %v1914_v3, %v1913_v37  ;;  %v2201_v39 = vrot.slane %v15022_v40, 4 }
 0x2ba   :  { %v13501_v30 = vunpack.i.h.bf16 %v13499_v52  ;;  %v13500_v2 = vunpack.i.l.bf16 %v13499_v52  ;;  %v2279_v19 = vrot.slane %v14998_v7, 4  ;;  %v2196_v56 = vperm.slane %v14973_v57, %v15016_v22 }
 0x2bb   :  { %v2200_v62 = vperm.slane %v14976_v10, %v15016_v22  ;;  %v1917_v32 = vsel %vm16471_vm0, %v1916_v48, %v1915_v49  ;;  %v1903_v61 = vsel %vm16471_vm0, %v1902_v35, %v1901_v31  ;;  %v2205_v50 = vrot.slane %v2188_v13, 4 }
 0x2bc   :  { %v1974_v21 = vrot.slane %v13501_v30, 1  ;;  %v1960_v16 = vrot.slane %v13500_v2, 1  ;;  %v2296_v23 = vperm.slane %v14994_v17, %v15016_v22  ;;  %v2209_v8 = vrot.slane %v2196_v56, 4 }
 0x2bd   :  { %v2213_v38 = vrot.slane %v2200_v62, 4  ;;  %v2300_v46 = vperm.slane %v14986_v20, %v15016_v22  ;;  %v15056_v17 = vperm.slane %v2302_v15, %v15016_v22  ;;  %v2312_v18 = vperm.slane %v2304_v44, %v15016_v22 }
 0x2be   :  { %v1975_v43 = vsel %vm16470_vm13, %v1974_v21, %v1973_v0  ;;  %v1961_v11 = vsel %vm16470_vm13, %v1960_v16, %v1959_v26  ;;  %v2313_v20 = vrot.slane %v2296_v23, 4  ;;  %vm16481_vm0 = vcmask 1040384  }
 0x2bf   :  { %v2229_v41 = vrot.slane %v1975_v43, 4  ;;  %v2117_v54 = vrot.slane %v1961_v11, 4  ;;  %vm15303_vm2 = vmand %vm16481_vm0, %vm16480_vm3  ;;  %vm2699_vm15 = vsmask.f32 4352 }
 0x2c0   :  { %vm15308_vm14 = vmand %vm16483_vm4, %vm2699_vm15 }
 0x2c1   :  { %v13509_v42 = vpop.permute.xlu0 %13508  ;;  %vm15317_vm11 = vmor %vm15308_vm14, %vm15303_vm2 }
 0x2c2   :  { %v13511_v51 = vunpack.i.h.bf16 %v13509_v42  ;;  %v13510_v1 = vunpack.i.l.bf16 %v13509_v42  ;;  %vm15329_vm15 = vmand %vm16481_vm0, %vm183_vm7 }
 0x2c4   :  { %v1918_v33 = vrot.slane %v13511_v51, 1  ;;  %v1904_v29 = vrot.slane %v13510_v1, 1 }
 0x2c6   :  { %v1905_v52 = vsel %vm16470_vm13, %v1904_v29, %v1903_v61  ;;  %v1919_v55 = vsel %vm16470_vm13, %v1918_v33, %v1917_v32  ;;  %v2317_v61 = vrot.slane %v2300_v46, 4  ;;  %vm16482_vm13 = vcmask 516096  }
 0x2c7   :  { %v2118_v27 = vsel %vm2105_vm12, %v2117_v54, %v1905_v52  ;;  %v2119_v57 = vrot.slane %v1905_v52, 4  ;;  %v2230_v30 = vsel %vm2105_vm12, %v2229_v41, %v1919_v55  ;;  %v2231_v10 = vrot.slane %v1919_v55, 4  ;;  %vm15297_vm6 = vmand %vm16482_vm13, %vm16480_vm3 }
 0x2c8   :  { %v2124_v2 = vperm.slane %v2118_v27, %v14900_v63  ;;  %v2236_v45 = vperm.slane %v2230_v30, %v14900_v63  ;;  %v2325_v55 = vrot.slane %v2312_v18, 4  ;;  %vm2718_vm3 = vmand %vm16483_vm4, %vm2717_vm9  ;;  %vm2733_vm13 = vcmask 257024  }
 0x2c9   :  { %v2120_v6 = vsel %vm2105_vm12, %v1961_v11, %v2119_v57  ;;  %v2232_v53 = vsel %vm2105_vm12, %v1975_v43, %v2231_v10  ;;  %vm2719_vm0 = vmor %vm2718_vm3, %vm15329_vm15  ;;  %vm2687_vm4 = vcmask 785408   ;;  %vm2739_vm3 = vcmask 519424  }
 0x2ca   :  { %v2128_v47 = vperm.slane %v2120_v6, %v14900_v63  ;;  %v2153_v34 = vrot.slane %v2124_v2, 4  ;;  %v2265_v60 = vrot.slane %v2236_v45, 4  ;;  %v2240_v9 = vperm.slane %v2232_v53, %v14900_v63 }
 0x2cb   :  { %v2156_v21 = vsel %vm2105_vm12, %v2124_v2, %v2155_v5  ;;  %v2268_v16 = vsel %vm2105_vm12, %v2236_v45, %v2267_v12  ;;  %vm2741_vm15 = vcmask 516352  }
 0x2cc   :  { %v2154_v15 = vsel %vm2105_vm12, %v2153_v34, %v14943_v59  ;;  %v2164_v36 = vperm.slane %v2156_v21, %v15016_v22  ;;  %v2165_v3 = vrot.slane %v2128_v47, 4  ;;  %v2168_v44 = vsel %vm2105_vm12, %v2128_v47, %v2167_v14 }
 0x2cd   :  { %v2160_v24 = vperm.slane %v2154_v15, %v15016_v22  ;;  %v2176_v25 = vperm.slane %v2168_v44, %v15016_v22  ;;  %v2266_v5 = vsel %vm2105_vm12, %v2265_v60, %v14959_v4  ;;  %v2276_v12 = vperm.slane %v2268_v16, %v15016_v22 }
 0x2ce   :  { %v15079_v37 = vsel %vm2105_vm12, %v2205_v50, %v2164_v36  ;;  %v2166_v59 = vsel %vm2105_vm12, %v2165_v3, %v14969_v58  ;;  %v2207_v28 = vrot.slane %v2164_v36, 4  ;;  %v2272_v26 = vperm.slane %v2266_v5, %v15016_v22 }
 0x2cf   :  { %v15085_v14 = vsel %vm2105_vm12, %v2201_v39, %v2160_v24  ;;  %v2172_v48 = vperm.slane %v2166_v59, %v15016_v22  ;;  %v15089_v35 = vsel %vm2105_vm12, %v2213_v38, %v2176_v25  ;;  %v2203_v4 = vrot.slane %v2160_v24, 4 }
 0x2d0   :  { %v13527_v0 = vpack.i.bf16 %v15079_v37, %v15085_v14  ;;  %v2208_v42 = vsel %vm2105_vm12, %v2188_v13, %v2207_v28  ;;  %v2315_v43 = vrot.slane %v2272_v26, 4  ;;  %v2319_v11 = vrot.slane %v2276_v12, 4 }
 0x2d1   :  { %v15095_v58 = vsel %vm2105_vm12, %v2209_v8, %v2172_v48  ;;  %v2204_v51 = vsel %vm2105_vm12, %v15022_v40, %v2203_v4  ;;  %v2211_v1 = vrot.slane %v2172_v48, 4  ;;  %v2215_v31 = vrot.slane %v2176_v25, 4 }
 0x2d2   :  { %13528 = vrot.lane.b32.xlu0 %v13527_v0, %s13886_s22  ;;  %v13522_v49 = vpack.i.bf16 %v15089_v35, %v15095_v58  ;;  %v13517_v39 = vpack.i.bf16 %v2208_v42, %v2204_v51  ;;  %v15103_v33 = vsel %vm2105_vm12, %v2296_v23, %v2315_v43  ;;  %v15106_v13 = vsel %vm2105_vm12, %v2300_v46, %v2319_v11 }
 0x2d3   :  { %v15109_v29 = vsel %vm2105_vm12, %v2196_v56, %v2211_v1  ;;  %v15112_v40 = vsel %vm2105_vm12, %v2200_v62, %v2215_v31  ;;  %v2277_v32 = vrot.slane %v2240_v9, 4  ;;  %v2280_v41 = vsel %vm2105_vm12, %v2240_v9, %v2279_v19 }
 0x2d4   :  { %13523 = vrot.lane.b32.xlu1 %v13522_v49, %s13886_s22  ;;  %13518 = vrot.lane.b32.xlu2 %v13517_v39, %s13886_s22  ;;  %v2314_v54 = vsel %vm2105_vm12, %v2313_v20, %v2272_v26  ;;  %v2288_v56 = vperm.slane %v2280_v41, %v15016_v22  ;;  %v2318_v62 = vsel %vm2105_vm12, %v2317_v61, %v2276_v12  ;;  %v2321_v23 = vrot.slane %v15056_v17, 4 }
 0x2d5   :  { %v2278_v52 = vsel %vm2105_vm12, %v2277_v32, %v14998_v7  ;;  %v13537_v19 = vpack.i.bf16 %v15106_v13, %v15103_v33  ;;  %v13532_v2 = vpack.i.bf16 %v15112_v40, %v15109_v29  ;;  %v13547_v6 = vpack.i.bf16 %v2318_v62, %v2314_v54 }
 0x2d6   :  { %v2284_v50 = vperm.slane %v2278_v52, %v15016_v22  ;;  %v2326_v27 = vsel %vm2105_vm12, %v2325_v55, %v2288_v56  ;;  %v2327_v57 = vrot.slane %v2288_v56, 4 }
 0x2d8   :  { %v2322_v30 = vsel %vm2105_vm12, %v2321_v23, %v2284_v50  ;;  %v2323_v10 = vrot.slane %v2284_v50, 4  ;;  %v15131_v7 = vsel %vm2105_vm12, %v2312_v18, %v2327_v57 }
 0x2d9   :  { %v13542_v45 = vpack.i.bf16 %v2326_v27, %v2322_v30 }
 0x2da   :  { %13538 = vrot.lane.b32.xlu0 %v13537_v19, %s13886_s22  ;;  %v15138_v8 = vsel %vm2105_vm12, %v15056_v17, %v2323_v10 }
 0x2db   :  { %v13552_v38 = vpack.i.bf16 %v15131_v7, %v15138_v8 }
 0x2dc   :  { %13533 = vrot.lane.b32.xlu1 %v13532_v2, %s13886_s22  ;;  %13543 = vrot.lane.b32.xlu2 %v13542_v45, %s13886_s22 }
 0x2e2   :  { %13553 = vrot.lane.b32.xlu0 %v13552_v38, %s13886_s22 }
 0x2e4   :  { %13548 = vrot.lane.b32.xlu2 %v13547_v6, %s13886_s22 }
 0x32e   :  { %v13519_v53 = vpop.permute.xlu2 %13518 }
 0x32f   :  { %v13521_v47 = vunpack.i.h.bf16 %v13519_v53  ;;  %v13520_v34 = vunpack.i.l.bf16 %v13519_v53 }
 0x331   :  { %v2396_v17 = vmax.f32 %v2208_v42, %v13521_v47  ;;  %v2394_v9 = vmax.f32 %v2204_v51, %v13520_v34 }
 0x333   :  { %v2421_v3 = vrot.slane %v2396_v17, 4  ;;  %v2423_v44 = vrot.slane %v2394_v9, 4 }
 0x335   :  { %v2422_v28 = vsel %vm2105_vm12, %v2421_v3, %v2394_v9  ;;  %v2424_v26 = vsel %vm2105_vm12, %v2396_v17, %v2423_v44 }
 0x336   :  { %v13544_v46 = vpop.permute.xlu2 %13543  ;;  %v15151_v49 = vperm.slane %v2422_v28, %v14900_v63  ;;  %v15154_v39 = vperm.slane %v2424_v26, %v14900_v63 }
 0x337   :  { %v13546_v60 = vunpack.i.h.bf16 %v13544_v46  ;;  %v13545_v18 = vunpack.i.l.bf16 %v13544_v46 }
 0x338   :  { %v2457_v23 = vrot.slane %v15151_v49, 4 }
 0x339   :  { %v2407_v15 = vmax.f32 %v2326_v27, %v13546_v60  ;;  %v2405_v36 = vmax.f32 %v2322_v30, %v13545_v18  ;;  %v2469_v27 = vrot.slane %v15154_v39, 4 }
 0x33b   :  { %v2545_v5 = vrot.slane %v2407_v15, 4  ;;  %v2547_v12 = vrot.slane %v2405_v36, 4 }
 0x33d   :  { %v2546_v32 = vsel %vm2105_vm12, %v2545_v5, %v2405_v36  ;;  %v2548_v61 = vsel %vm2105_vm12, %v2407_v15, %v2547_v12 }
 0x33e   :  { %v13549_v21 = vpop.permute.xlu2 %13548  ;;  %v15166_v57 = vperm.slane %v2546_v32, %v14900_v63  ;;  %v15169_v19 = vperm.slane %v2548_v61, %v14900_v63 }
 0x33f   :  { %v13551_v16 = vunpack.i.h.bf16 %v13549_v21  ;;  %v13550_v20 = vunpack.i.l.bf16 %v13549_v21 }
 0x340   :  { %v2595_v17 = vrot.slane %v15166_v57, 4  ;;  %v2607_v9 = vrot.slane %v15169_v19, 4 }
 0x341   :  { %v2403_v24 = vmax.f32 %v2318_v62, %v13551_v16  ;;  %v2401_v25 = vmax.f32 %v2314_v54, %v13550_v20 }
 0x343   :  { %v2521_v0 = vrot.slane %v2403_v24, 4  ;;  %v2523_v42 = vrot.slane %v2401_v25, 4 }
 0x344   :  { %v13529_v59 = vpop.permute.xlu0 %13528 }
 0x345   :  { %v13531_v48 = vunpack.i.h.bf16 %v13529_v59  ;;  %v13530_v4 = vunpack.i.l.bf16 %v13529_v59  ;;  %v2524_v56 = vsel %vm2105_vm12, %v2403_v24, %v2523_v42 }
 0x346   :  { %v13524_v43 = vpop.permute.xlu1 %13523  ;;  %v15177_v38 = vperm.slane %v2524_v56, %v14900_v63 }
 0x347   :  { %v2395_v11 = vmax.f32 %v15079_v37, %v13531_v48  ;;  %v2393_v51 = vmax.f32 %v15085_v14, %v13530_v4  ;;  %v13526_v1 = vunpack.i.h.bf16 %v13524_v43  ;;  %v13525_v31 = vunpack.i.l.bf16 %v13524_v43 }
 0x348   :  { %v2522_v14 = vsel %vm2105_vm12, %v2521_v0, %v2401_v25 }
 0x349   :  { %v2409_v41 = vrot.slane %v2395_v11, 4  ;;  %v2411_v54 = vrot.slane %v2393_v51, 4  ;;  %v2399_v52 = vmax.f32 %v15089_v35, %v13526_v1  ;;  %v2397_v37 = vmax.f32 %v15095_v58, %v13525_v31 }
 0x34a   :  { %v15174_v45 = vperm.slane %v2522_v14, %v14900_v63 }
 0x34b   :  { %v2410_v55 = vsel %vm2105_vm12, %v2409_v41, %v2393_v51  ;;  %v2433_v62 = vrot.slane %v2399_v52, 4  ;;  %v2435_v50 = vrot.slane %v2397_v37, 4  ;;  %v2412_v58 = vsel %vm2105_vm12, %v2395_v11, %v2411_v54 }
 0x34c   :  { %v13539_v35 = vpop.permute.xlu0 %13538  ;;  %v2416_v6 = vperm.slane %v2410_v55, %v14900_v63  ;;  %v2420_v21 = vperm.slane %v2412_v58, %v14900_v63 }
 0x34d   :  { %v2434_v30 = vsel %vm2105_vm12, %v2433_v62, %v2397_v37  ;;  %v13541_v10 = vunpack.i.h.bf16 %v13539_v35  ;;  %v13540_v2 = vunpack.i.l.bf16 %v13539_v35  ;;  %v2436_v53 = vsel %vm2105_vm12, %v2399_v52, %v2435_v50 }
 0x34e   :  { %v13534_v46 = vpop.permute.xlu1 %13533  ;;  %v2440_v16 = vperm.slane %v2434_v30, %v14900_v63  ;;  %v2459_v44 = vrot.slane %v2416_v6, 4  ;;  %v15192_v24 = vperm.slane %v2436_v53, %v14900_v63  ;;  %v2470_v48 = vsel %vm2105_vm12, %v2469_v27, %v2420_v21 }
 0x34f   :  { %v2404_v47 = vmax.f32 %v15106_v13, %v13541_v10  ;;  %v2402_v34 = vmax.f32 %v15103_v33, %v13540_v2  ;;  %v13536_v60 = vunpack.i.h.bf16 %v13534_v46  ;;  %v13535_v18 = vunpack.i.l.bf16 %v13534_v46 }
 0x350   :  { %v2571_v13 = vrot.slane %v15174_v45, 4  ;;  %v2583_v33 = vrot.slane %v15177_v38, 4  ;;  %v2483_v28 = vrot.slane %v2440_v16, 4  ;;  %v2460_v31 = vsel %vm2105_vm12, %v15151_v49, %v2459_v44 }
 0x351   :  { %v2533_v20 = vrot.slane %v2404_v47, 4  ;;  %v2535_v15 = vrot.slane %v2402_v34, 4  ;;  %v2400_v36 = vmax.f32 %v15112_v40, %v13536_v60  ;;  %v2398_v3 = vmax.f32 %v15109_v29, %v13535_v18 }
 0x352   :  { %v2458_v54 = vsel %vm2105_vm12, %v2457_v23, %v2416_v6  ;;  %v2471_v52 = vrot.slane %v2420_v21, 4  ;;  %v2476_v14 = vperm.slane %v2470_v48, %v15016_v22  ;;  %v2495_v49 = vrot.slane %v15192_v24, 4 }
 0x353   :  { %v2534_v25 = vsel %vm2105_vm12, %v2533_v20, %v2402_v34  ;;  %v2536_v5 = vsel %vm2105_vm12, %v2404_v47, %v2535_v15  ;;  %v2445_v12 = vrot.slane %v2400_v36, 4  ;;  %v2447_v59 = vrot.slane %v2398_v3, 4 }
 0x354   :  { %v2540_v26 = vperm.slane %v2534_v25, %v14900_v63  ;;  %v2544_v40 = vperm.slane %v2536_v5, %v14900_v63  ;;  %v13554_v29 = vpop.permute.xlu0 %13553  ;;  %v15219_v23 = vperm.slane %v2458_v54, %v15016_v22  ;;  %v2515_v34 = vrot.slane %v2476_v14, 4 }
 0x355   :  { %v2446_v4 = vsel %vm2105_vm12, %v2445_v12, %v2398_v3  ;;  %v2448_v0 = vsel %vm2105_vm12, %v2400_v36, %v2447_v59  ;;  %v13556_v42 = vunpack.i.h.bf16 %v13554_v29  ;;  %v13555_v43 = vunpack.i.l.bf16 %v13554_v29 }
 0x356   :  { %v2581_v11 = vrot.slane %v2544_v40, 4  ;;  %v2452_v51 = vperm.slane %v2446_v4, %v14900_v63  ;;  %v2456_v1 = vperm.slane %v2448_v0, %v14900_v63  ;;  %v2569_v32 = vrot.slane %v2540_v26, 4 }
 0x357   :  { %v2408_v61 = vmax.f32 %v15131_v7, %v13556_v42  ;;  %v2406_v41 = vmax.f32 %v15138_v8, %v13555_v43  ;;  %v15216_v8 = vperm.slane %v2460_v31, %v15016_v22  ;;  %v2572_v46 = vsel %vm2105_vm12, %v2540_v26, %v2571_v13 }
 0x358   :  { %v2493_v37 = vrot.slane %v2456_v1, 4  ;;  %v2484_v56 = vsel %vm2105_vm12, %v2452_v51, %v2483_v28  ;;  %v2481_v55 = vrot.slane %v2452_v51, 4  ;;  %v2582_v27 = vsel %vm2105_vm12, %v2581_v11, %v15177_v38 }
 0x359   :  { %v2557_v62 = vrot.slane %v2408_v61, 4  ;;  %v2559_v50 = vrot.slane %v2406_v41, 4  ;;  %v2492_v30 = vperm.slane %v2484_v56, %v15016_v22  ;;  %v2570_v10 = vsel %vm2105_vm12, %v2569_v32, %v15174_v45 }
 0x35a   :  { %v2494_v7 = vsel %vm2105_vm12, %v2493_v37, %v15192_v24  ;;  %v15229_v53 = vperm.slane %v2582_v27, %v15016_v22  ;;  %v2482_v60 = vsel %vm2105_vm12, %v2481_v55, %v2440_v16  ;;  %v2472_v18 = vsel %vm2105_vm12, %v15154_v39, %v2471_v52 }
 0x35b   :  { %v2558_v35 = vsel %vm2105_vm12, %v2557_v62, %v2406_v41  ;;  %v2560_v58 = vsel %vm2105_vm12, %v2408_v61, %v2559_v50  ;;  %v2500_v47 = vperm.slane %v2494_v7, %v15016_v22  ;;  %v2576_v15 = vperm.slane %v2570_v10, %v15016_v22 }
 0x35c   :  { %v2564_v2 = vperm.slane %v2558_v35, %v14900_v63  ;;  %v2568_v6 = vperm.slane %v2560_v58, %v14900_v63  ;;  %v2509_v36 = vrot.slane %v2492_v30, 4  ;;  %v2580_v3 = vperm.slane %v2572_v46, %v15016_v22 }
 0x35d   :  { %v2507_v13 = vrot.slane %v15219_v23, 4  ;;  %v2627_v16 = vrot.slane %v15229_v53, 4  ;;  %v15245_v39 = vperm.slane %v2482_v60, %v15016_v22  ;;  %v2513_v25 = vrot.slane %v2500_v47, 4  ;;  %v12756_v60 = vld [vmem:[#allocation10 + $0x34c] sm:$0xf0] }
 0x35e   :  { %v2593_v21 = vrot.slane %v2564_v2, 4  ;;  %v2605_v20 = vrot.slane %v2568_v6, 4  ;;  %v2596_v45 = vsel %vm2105_vm12, %v2564_v2, %v2595_v17  ;;  %v2516_v28 = vsel %vm2105_vm12, %v2500_v47, %v2515_v34  ;;  %v12760_v2 = vld [vmem:[#allocation10 + $0x36c] sm:$0xf0]  ;;  %v9941_v47 = vld [vmem:[#allocation10 + $0x370] sm:$0xf0] }
 0x35f   :  { %v2604_v44 = vperm.slane %v2596_v45, %v15016_v22  ;;  %v2619_v26 = vrot.slane %v2576_v15, 4  ;;  %v2496_v29 = vsel %vm2105_vm12, %v2456_v1, %v2495_v49  ;;  %v2584_v48 = vsel %vm2105_vm12, %v2544_v40, %v2583_v33  ;;  %v9923_v34 = vld [vmem:[#allocation10 + $0x340] sm:$0xf]  ;;  %v12754_v45 = vld [vmem:[#allocation10 + $0x344] sm:$0xf] }
 0x360   :  { %v2606_v24 = vsel %vm2105_vm12, %v2605_v20, %v15169_v19  ;;  %v2594_v17 = vsel %vm2105_vm12, %v2593_v21, %v15166_v57  ;;  %v2510_v57 = vsel %vm2105_vm12, %v2509_v36, %v15216_v8  ;;  %v2608_v42 = vsel %vm2105_vm12, %v2568_v6, %v2607_v9  ;;  %v12758_v6 = vld [vmem:[#allocation10 + $0x364] sm:$0xf]  ;;  %v9925_v36 = vld [vmem:[#allocation10 + $0x350] sm:$0xf0] }
 0x361   :  { %v15250_v5 = vperm.slane %v2606_v24, %v15016_v22  ;;  %v2621_v12 = vrot.slane %v2604_v44, 4  ;;  %v2600_v59 = vperm.slane %v2594_v17, %v15016_v22  ;;  %v2508_v51 = vsel %vm2105_vm12, %v15245_v39, %v2507_v13  ;;  %v2702_v24 = vld [vmem:[#allocation3] sm:$0x11]  ;;  %v5572_v13 = vld [vmem:[#allocation4 + $0xc] sm:$0x44] }
 0x362   :  { %v2480_v40 = vperm.slane %v2472_v18, %v15016_v22  ;;  %v2504_v1 = vperm.slane %v2496_v29, %v15016_v22  ;;  %v2592_v31 = vperm.slane %v2584_v48, %v15016_v22  ;;  %v2616_v19 = vperm.slane %v2608_v42, %v15016_v22  ;;  %v2720_v48 = vld [vmem:[#allocation3 + $0xc] sm:$0x11] }
 0x363   :  { %v2628_v4 = vsel %vm2105_vm12, %v15250_v5, %v2627_v16  ;;  %v2622_v0 = vsel %vm2105_vm12, %v2621_v12, %v2580_v3  ;;  %v2620_v38 = vsel %vm2105_vm12, %v2600_v59, %v2619_v26  ;;  %v15276_v9 = vsel %vm2105_vm12, %v2513_v25, %v2476_v14  ;;  %v2710_v16 = vld [vmem:[#allocation3 + $0x18] sm:$0x11]  ;;  %v2713_v12 = vld [vmem:[#allocation3 + $0x20] sm:$0x1]  ;;  %v12748_v26 = vld [vmem:[#allocation10 + $0x30c] sm:$0xf0] }
 0x364   :  { %v13567_v43 = vpack.i.bf16 %v2628_v4, %v2516_v28  ;;  %v13562_v11 = vpack.i.bf16 %v2622_v0, %v2510_v57  ;;  %v13557_v33 = vpack.i.bf16 %v2620_v38, %v2508_v51  ;;  %v2623_v32 = vrot.slane %v2580_v3, 4  ;;  %v2727_v0 = vld [vmem:[#allocation3 + $0x24] sm:$0x11]  ;;  %v9875_v57 = vld [vmem:[#allocation10 + $0x2e0] sm:$0xf] }
 0x365   :  { %v2631_v61 = vrot.slane %v2592_v31, 4  ;;  %v2517_v41 = vrot.slane %v2504_v1, 4  ;;  %v2629_v54 = vrot.slane %v2616_v19, 4  ;;  %v2511_v52 = vrot.slane %v15216_v8, 4 }
 0x366   :  { %13568 = vrot.lane.b32.xlu2 %v13567_v43, %s13887_s23  ;;  %13563 = vrot.lane.b32.xlu0 %v13562_v11, %s13883_s8  ;;  %v2624_v37 = vsel %vm2105_vm12, %v2604_v44, %v2623_v32  ;;  %v2519_v56 = vrot.slane %v2480_v40, 4  ;;  %v2617_v8 = vrot.slane %v2600_v59, 4  ;;  %v2505_v18 = vrot.slane %v15245_v39, 4  ;;  %v5553_v32 = vld [vmem:[#allocation4 + $0xc] sm:$0x11] }
 0x367   :  { %13558 = vrot.lane.b32.xlu1 %v13557_v33, %s13887_s23  ;;  %v2632_v55 = vsel %vm2105_vm12, %v2616_v19, %v2631_v61  ;;  %v2630_v62 = vsel %vm2105_vm12, %v2629_v54, %v2592_v31  ;;  %v2512_v50 = vsel %vm2105_vm12, %v2492_v30, %v2511_v52  ;;  %v2518_v7 = vsel %vm2105_vm12, %v2517_v41, %v2480_v40  ;;  %v9939_v30 = vld [vmem:[#allocation10 + $0x360] sm:$0xf]  ;;  %v5547_v33 = vld [vmem:[#allocation4] sm:$0x11] }
 0x368   :  { %v2520_v14 = vsel %vm2105_vm12, %v2504_v1, %v2519_v56  ;;  %v13577_v27 = vpack.i.bf16 %v2624_v37, %v2512_v50  ;;  %v13572_v35 = vpack.i.bf16 %v2630_v62, %v2518_v7  ;;  %v2618_v58 = vsel %vm2105_vm12, %v2617_v8, %v2576_v15 }
 0x369   :  { %v13582_v49 = vpack.i.bf16 %v2632_v55, %v2520_v14  ;;  %v9940_v46 = vor.u32 %v12760_v2, %v9939_v30  ;;  %v9944_v20 = vor.u32 %v12758_v6, %v9941_v47  ;;  %v9924_v44 = vor.u32 %v12756_v60, %v9923_v34 }
 0x36a   :  { %v9928_v17 = vor.u32 %v12754_v45, %v9925_v36  ;;  %v2625_v59 = vrot.slane %v15250_v5, 4  ;;  %v2714_v29 = vsel %vm15297_vm6, 0, %v2713_v12  ;;  %v2703_v4 = vsel %vm15317_vm11, 0, %v2702_v24 }
 0x36b   :  { %3463 = vmatpush.bf16.msrb.mxu0 %v9940_v46  ;;  %3505 = vmatpush.bf16.msrb.mxu3 %v9944_v20  ;;  %v2711_v5 = vsel %vm15317_vm11, 0, %v2710_v16  ;;  %2715 = vst [vmem:[#allocation3 + $0x20] sm:$0x1] %v2714_v29  ;;  %v2506_v43 = vsel %vm2105_vm12, %v2505_v18, %v15219_v23  ;;  %v2721_v1 = vsel %vm2719_vm0, 0, %v2720_v48  ;;  %v2728_v31 = vsel %vm2719_vm0, 0, %v2727_v0 }
 0x36c   :  { %2704 = vst [vmem:[#allocation3] sm:$0x11] %v2703_v4  ;;  %v16529_v19 = vmov 0   ;;  %v2626_v61 = vsel %vm2105_vm12, %v2625_v59, %v15229_v53  ;;  %v5548_v62 = vsel %vm15317_vm11, 0, %v5547_v33  ;;  %v5554_v53 = vsel %vm15317_vm11, 0, %v5553_v32 }
 0x36d   :  { %2712 = vst [vmem:[#allocation3 + $0x18] sm:$0x11] %v2711_v5  ;;  %v9907_v16 = vld [vmem:[#allocation10 + $0x320] sm:$0xf]  ;;  %v9909_v59 = vld [vmem:[#allocation10 + $0x330] sm:$0xf0] }
 0x36e   :  { %13578 = vrot.lane.b32.xlu2 %v13577_v27, %s13886_s22  ;;  %13583 = vrot.lane.b32.xlu0 %v13582_v49, %s13886_s22  ;;  %2734 = vst.msk [vmem:[#allocation3] sm:$0xf] %vm2733_vm13, %v16529_v19  ;;  %v12746_v48 = vld [vmem:[#allocation10 + $0x304] sm:$0xf]  ;;  %v9893_v4 = vld [vmem:[#allocation10 + $0x310] sm:$0xf0] }
 0x36f   :  { %13573 = vrot.lane.b32.xlu1 %v13572_v35, %s13883_s8  ;;  %3464 = vmatpush.bf16.msrb.mxu0 %v9924_v44  ;;  %2722 = vst [vmem:[#allocation3 + $0xc] sm:$0x11] %v2721_v1  ;;  %v12744_v0 = vld [vmem:[#allocation10 + $0x2ec] sm:$0xf0]  ;;  %v9877_v33 = vld [vmem:[#allocation10 + $0x2f0] sm:$0xf0] }
 0x370   :  { %3506 = vmatpush.bf16.msrb.mxu3 %v9928_v17  ;;  %2729 = vst [vmem:[#allocation3 + $0x24] sm:$0x11] %v2728_v31  ;;  %v12750_v17 = vld [vmem:[#allocation10 + $0x324] sm:$0xf]  ;;  %v10115_v31 = vld [vmem:[#allocation10 + $0x4c0] sm:$0xf]  ;;  %v9876_v32 = vor.u32 %v12744_v0, %v9875_v57 }
 0x371   :  { %2737 = vst.msk [vmem:[#allocation3 + $0x18] sm:$0xf] %vm2733_vm13, %v16529_v19  ;;  %v9912_v29 = vor.u32 %v12750_v17, %v9909_v59  ;;  %vm16530_vm0 = vcmask 516096   ;;  %v12790_v59 = vld [vmem:[#allocation10 + $0x464] sm:$0xf] }
 0x372   :  { %2743 = vst.msk [vmem:[#allocation3 + $0x20] sm:$0xf] %vm2739_vm3, %v16529_v19  ;;  %vm15374_vm11 = vmand %vm16530_vm0, %vm183_vm7  ;;  %vm2788_vm0 = vcmask 1043712   ;;  %v10083_v57 = vld [vmem:[#allocation10 + $0x480] sm:$0xf] }
 0x373   :  { %5549 = vst [vmem:[#allocation4] sm:$0x11] %v5548_v62  ;;  %v12796_v0 = vld [vmem:[#allocation10 + $0x48c] sm:$0xf0] }
 0x374   :  { %5555 = vst [vmem:[#allocation4 + $0xc] sm:$0x11] %v5554_v53  ;;  %3507 = vmatpush.bf16.msrb.mxu3 %v9912_v29  ;;  %v12800_v53 = vld [vmem:[#allocation10 + $0x4ac] sm:$0xf0]  ;;  %v10075_v29 = vld [vmem:[#allocation10 + $0x468] sm:$0xf] }
 0x3c0   :  { %v15290_v10 = vpop.permute.xlu2 %13568 }
 0x3c1   :  { %v13571_v11 = vunpack.i.h.bf16 %v15290_v10  ;;  %v13570_v23 = vunpack.i.l.bf16 %v15290_v10 }
 0x3c3   :  { %v2690_v49 = vsel %vm2681_vm10, %v15276_v9, %v13570_v23  ;;  %v2691_v7 = vsel %vm2681_vm10, %v2626_v61, %v13571_v11  ;;  %v12808_v11 = vld [vmem:[#allocation10 + $0x4ec] sm:$0xf0] }
 0x3c4   :  { %v12804_v61 = vld [vmem:[#allocation10 + $0x4cc] sm:$0xf0] }
 0x3c5   :  { %v10116_v62 = vor.u32 %v12804_v61, %v10115_v31  ;;  %v10053_v31 = vld [vmem:[#allocation10 + $0x450] sm:$0xf0] }
 0x3c8   :  { %v13579_v41 = vpop.permute.xlu2 %13578 }
 0x3c9   :  { %v13581_v35 = vunpack.i.h.bf16 %v13579_v41  ;;  %v13580_v8 = vunpack.i.l.bf16 %v13579_v41  ;;  %v10051_v41 = vld [vmem:[#allocation10 + $0x440] sm:$0xf] }
 0x3d8   :  { %v15293_v21 = vpop.permute.xlu0 %13563 }
 0x3d9   :  { %v13559_v3 = vpop.permute.xlu1 %13558  ;;  %v13565_v42 = vunpack.i.l.bf16 %v15293_v21  ;;  %v13566_v51 = vunpack.i.h.bf16 %v15293_v21 }
 0x3da   :  { %v13560_v39 = vunpack.i.l.bf16 %v13559_v3  ;;  %v13561_v28 = vunpack.i.h.bf16 %v13559_v3 }
 0x3dc   :  { %v2682_v38 = vsel %vm2681_vm10, %v2506_v43, %v13560_v39  ;;  %v2683_v40 = vsel %vm2681_vm10, %v2618_v58, %v13561_v28  ;;  %v12752_v39 = vld [vmem:[#allocation10 + $0x32c] sm:$0xf0]  ;;  %v9891_v28 = vld [vmem:[#allocation10 + $0x300] sm:$0xf] }
 0x3dd   :  { %v2685_v52 = vsel %vm16484_vm8, %v2682_v38, %v13565_v42  ;;  %v2686_v50 = vsel %vm16484_vm8, %v2683_v40, %v13566_v51  ;;  %v9908_v12 = vor.u32 %v12752_v39, %v9907_v16  ;;  %v9892_v5 = vor.u32 %v12748_v26, %v9891_v28  ;;  %v10131_v43 = vld [vmem:[#allocation10 + $0x4e0] sm:$0xf]  ;;  %v12742_v38 = vld [vmem:[#allocation10 + $0x2e4] sm:$0xf]  ;;  %v12792_v40 = vld [vmem:[#allocation10 + $0x46c] sm:$0xf0] }
 0x3de   :  { %v2688_v6 = vsel %vm2687_vm4, %v2685_v52, %v13580_v8  ;;  %v2689_v9 = vsel %vm2687_vm4, %v2686_v50, %v13581_v35  ;;  %v9896_v42 = vor.u32 %v12746_v48, %v9893_v4  ;;  %v10067_v51 = vld [vmem:[#allocation10 + $0x460] sm:$0xf]  ;;  %v10132_v23 = vor.u32 %v12808_v11, %v10131_v43  ;;  %v12784_v35 = vld [vmem:[#allocation10 + $0x42c] sm:$0xf0]  ;;  %v2707_v39 = vld [vmem:[#allocation3 + $0x8] sm:$0x1] }
 0x3df   :  { %3465 = vmatpush.bf16.msrb.mxu0 %v9908_v12  ;;  %v10068_v1 = vor.u32 %v12792_v40, %v10067_v51  ;;  %v9880_v52 = vor.u32 %v12742_v38, %v9877_v33  ;;  %v2708_v17 = vsel %vm15297_vm6, 0, %v2707_v39  ;;  %v2815_v12 = vld [vmem:[#allocation3 + $0x20] sm:$0xf]  ;;  %v10069_v28 = vld [vmem:[#allocation10 + $0x470] sm:$0xf0]  ;;  %v2812_v43 = vld [vmem:[#allocation3 + $0x18] sm:$0xff]  ;;  %v10084_v51 = vor.u32 %v12796_v0, %v10083_v57 }
 0x3e0   :  { %v13584_v54 = vpop.permute.xlu0 %13583  ;;  %3495 = vmatpush.bf16.msrb.mxu2 %v10132_v23  ;;  %3508 = vmatpush.bf16.msrb.mxu3 %v9896_v42  ;;  %2709 = vst [vmem:[#allocation3 + $0x8] sm:$0x1] %v2708_v17  ;;  %v10072_v15 = vor.u32 %v12790_v59, %v10069_v28  ;;  %v12793_v48 = vld [vmem:[#allocation10 + $0x474] sm:$0xf0]  ;;  %v10019_v42 = vld [vmem:[#allocation10 + $0x400] sm:$0xf] }
 0x3e1   :  { %v13586_v37 = vunpack.i.h.bf16 %v13584_v54  ;;  %v13585_v56 = vunpack.i.l.bf16 %v13584_v54  ;;  %v13574_v55 = vpop.permute.xlu1 %13573  ;;  %v12788_v54 = vld [vmem:[#allocation10 + $0x44c] sm:$0xf0]  ;;  %3477 = vmatpush.bf16.msrb.mxu1 %v10068_v1  ;;  %2740 = vst.msk [vmem:[#allocation3 + $0x8] sm:$0xf] %vm2739_vm3, %v16529_v19  ;;  %v9947_v33 = vld [vmem:[#allocation10 + $0x368] sm:$0xf] }
 0x3e2   :  { %v13576_v14 = vunpack.i.h.bf16 %v13574_v55  ;;  %v13575_v27 = vunpack.i.l.bf16 %v13574_v55  ;;  %v12738_v55 = vld [vmem:[#allocation10 + $0x2c4] sm:$0xf]  ;;  %v10052_v50 = vor.u32 %v12788_v54, %v10051_v41  ;;  %v12780_v38 = vld [vmem:[#allocation10 + $0x40c] sm:$0xf0]  ;;  %v12761_v40 = vld [vmem:[#allocation10 + $0x374] sm:$0xf0] }
 0x3e3   :  { %3466 = vmatpush.bf16.msrb.mxu0 %v9892_v5  ;;  %v10076_v5 = vor.u32 %v12793_v48, %v10075_v29  ;;  %v10020_v23 = vor.u32 %v12780_v38, %v10019_v42  ;;  %v12786_v1 = vld [vmem:[#allocation10 + $0x444] sm:$0xf]  ;;  %v9948_v41 = vor.u32 %v12761_v40, %v9947_v33  ;;  %v12768_v17 = vld [vmem:[#allocation10 + $0x3ac] sm:$0xf0]  ;;  %v12749_v59 = vld [vmem:[#allocation10 + $0x314] sm:$0xf0] }
 0x3e4   :  { %v2693_v58 = vsel %vm16484_vm8, %v2691_v7, %v13576_v14  ;;  %v2692_v10 = vsel %vm16484_vm8, %v2690_v49, %v13575_v27  ;;  %v9861_v14 = vld [vmem:[#allocation10 + $0x2d0] sm:$0xf0]  ;;  %v10099_v27 = vld [vmem:[#allocation10 + $0x4a0] sm:$0xf]  ;;  %3496 = vmatpush.bf16.msrb.mxu2 %v10116_v62  ;;  %3509 = vmatpush.bf16.msrb.mxu3 %v9880_v52  ;;  %vm15387_vm8 = vmand %vm2788_vm0, %vm183_vm7  ;;  %v10056_v54 = vor.u32 %v12786_v1, %v10053_v31  ;;  %vm16540_vm6 = vcmask 253952  }
 0x3e5   :  { %v2695_v30 = vsel %vm2687_vm4, %v2693_v58, %v13586_v37  ;;  %v2694_v2 = vsel %vm2687_vm4, %v2692_v10, %v13585_v56  ;;  %v9859_v37 = vld [vmem:[#allocation10 + $0x2c0] sm:$0xf]  ;;  %v12740_v56 = vld [vmem:[#allocation10 + $0x2cc] sm:$0xf0]  ;;  %3478 = vmatpush.bf16.msrb.mxu1 %v10052_v50  ;;  %vm16485_vm4 = vcmask 253952  }
 0x3e6   :  { %v2745_v46 = vpack.c.bf16 %v2694_v2, %v2688_v6  ;;  %v2746_v47 = vpack.c.bf16 %v2695_v30, %v2689_v9  ;;  %v10035_v7 = vld [vmem:[#allocation10 + $0x420] sm:$0xf]  ;;  %v9860_v8 = vor.u32 %v12740_v56, %v9859_v37  ;;  %v12736_v10 = vld [vmem:[#allocation10 + $0x2ac] sm:$0xf0]  ;;  %v10100_v30 = vor.u32 %v12800_v53, %v10099_v27  ;;  %v12734_v6 = vld [vmem:[#allocation10 + $0x2a4] sm:$0xf] }
 0x3e7   :  { %3467 = vmatpush.bf16.msrb.mxu0 %v9876_v32  ;;  %v9843_v58 = vld [vmem:[#allocation10 + $0x2a0] sm:$0xf]  ;;  %v9864_v2 = vor.u32 %v12738_v55, %v9861_v14  ;;  %v10036_v9 = vor.u32 %v12784_v35, %v10035_v7  ;;  %2736 = vst.msk [vmem:[#allocation3 + $0xc] sm:$0x1] %vm16485_vm4, %v16529_v19  ;;  %v10059_v52 = vld [vmem:[#allocation10 + $0x448] sm:$0xf] }
 0x3e8   :  { %v2748_v34 = vshrl.u32 %v2745_v46, 16  ;;  %v2756_v60 = vshrl.u32 %v2746_v47, 16  ;;  %v2751_v21 = vshll.u32 %v2745_v46, 16  ;;  %v2759_v45 = vshll.u32 %v2746_v47, 16  ;;  %v2724_v46 = vld [vmem:[#allocation3 + $0x14] sm:$0x1]  ;;  %3497 = vmatpush.bf16.msrb.mxu2 %v10100_v30 }
 0x3e9   :  { %v9845_v47 = vld [vmem:[#allocation10 + $0x2b0] sm:$0xf0]  ;;  %2738 = vst.msk [vmem:[#allocation3 + $0x24] sm:$0x1] %vm16485_vm4, %v16529_v19  ;;  %3510 = vmatpush.bf16.msrb.mxu3 %v9864_v2  ;;  %3479 = vmatpush.bf16.msrb.mxu1 %v10036_v9  ;;  %vm15393_vm4 = vmand %vm2105_vm12, %vm2717_vm9  ;;  %v12789_v37 = vld [vmem:[#allocation10 + $0x454] sm:$0xf0] }
 0x3ea   :  { %v2750_v18 = vrot.slane %v2748_v34, 7  ;;  %v2758_v20 = vrot.slane %v2756_v60, 7  ;;  %v2725_v34 = vsel %vm15374_vm11, 0, %v2724_v46  ;;  %v9844_v60 = vor.u32 %v12736_v10, %v9843_v58  ;;  %vm2792_vm0 = vmor %vm15393_vm4, %vm15387_vm8  ;;  %v10003_v56 = vld [vmem:[#allocation10 + $0x3e0] sm:$0xf] }
 0x3eb   :  { %2726 = vst [vmem:[#allocation3 + $0x14] sm:$0x1] %v2725_v34  ;;  %3468 = vmatpush.bf16.msrb.mxu0 %v9860_v8  ;;  %vm15405_vm9 = vmand %vm2733_vm13, %vm183_vm7  ;;  %v10060_v62 = vor.u32 %v12789_v37, %v10059_v52  ;;  %v12776_v50 = vld [vmem:[#allocation10 + $0x3ec] sm:$0xf0]  ;;  %v9931_v14 = vld [vmem:[#allocation10 + $0x348] sm:$0xf] }
 0x3ec   :  { %v2754_v36 = vrot.slane %v2750_v18, 4  ;;  %v2753_v3 = vor.u32 %v2751_v21, %v2750_v18  ;;  %v2761_v44 = vor.u32 %v2759_v45, %v2758_v20  ;;  %v2762_v24 = vrot.slane %v2758_v20, 4  ;;  %v9827_v21 = vld [vmem:[#allocation10 + $0x280] sm:$0xf]  ;;  %v12732_v20 = vld [vmem:[#allocation10 + $0x28c] sm:$0xf0]  ;;  %3498 = vmatpush.bf16.msrb.mxu2 %v10084_v51 }
 0x3ed   :  { %v9848_v18 = vor.u32 %v12734_v6, %v9845_v47  ;;  %2742 = vst.msk [vmem:[#allocation3 + $0x14] sm:$0x1] %vm2741_vm15, %v16529_v19  ;;  %v12730_v45 = vld [vmem:[#allocation10 + $0x284] sm:$0xf]  ;;  %3480 = vmatpush.bf16.msrb.mxu1 %v10020_v23  ;;  %v10004_v27 = vor.u32 %v12776_v50, %v10003_v56  ;;  %v12757_v53 = vld [vmem:[#allocation10 + $0x354] sm:$0xf0] }
 0x3ee   :  { %2765 = vrot.lane.b32.xlu0 %v2754_v36, %s13887_s23  ;;  %2763 = vrot.lane.b32.xlu1 %v2753_v3, %s13887_s23  ;;  %v9829_v36 = vld [vmem:[#allocation10 + $0x290] sm:$0xf0]  ;;  %v9828_v3 = vor.u32 %v12732_v20, %v9827_v21  ;;  %v2730_v7 = vld [vmem:[#allocation3 + $0x2c] sm:$0x1]  ;;  %v9932_v35 = vor.u32 %v12757_v53, %v9931_v14  ;;  %v12782_v58 = vld [vmem:[#allocation10 + $0x424] sm:$0xf] }
 0x3ef   :  { %2767 = vrot.lane.b32.xlu2 %v2761_v44, %s13887_s23  ;;  %3469 = vmatpush.bf16.msrb.mxu0 %v9844_v60  ;;  %v9832_v44 = vor.u32 %v12730_v45, %v9829_v36  ;;  %v2731_v8 = vsel %vm15374_vm11, 0, %v2730_v7  ;;  %v10037_v10 = vld [vmem:[#allocation10 + $0x430] sm:$0xf0]  ;;  %v10043_v2 = vld [vmem:[#allocation10 + $0x428] sm:$0xf]  ;;  %vm2801_vm7 = vcmask 1040640  }
 0x3f0   :  { %3511 = vmatpush.bf16.msrb.mxu3 %v9848_v18  ;;  %3547 = vmatpush.bf16.msra.mxu2 %v9948_v41  ;;  %2732 = vst [vmem:[#allocation3 + $0x2c] sm:$0x1] %v2731_v8  ;;  %v10040_v30 = vor.u32 %v12782_v58, %v10037_v10  ;;  %v12785_v6 = vld [vmem:[#allocation10 + $0x434] sm:$0xf0]  ;;  %v9987_v46 = vld [vmem:[#allocation10 + $0x3c0] sm:$0xf] }
 0x3f1   :  { %3481 = vmatpush.bf16.msrb.mxu1 %v10004_v27  ;;  %2744 = vst.msk [vmem:[#allocation3 + $0x2c] sm:$0x1] %vm2741_vm15, %v16529_v19  ;;  %v10044_v9 = vor.u32 %v12785_v6, %v10043_v2  ;;  %v12772_v47 = vld [vmem:[#allocation10 + $0x3cc] sm:$0xf0]  ;;  %v9915_v34 = vld [vmem:[#allocation10 + $0x328] sm:$0xf] }
 0x3f2   :  { %v9988_v60 = vor.u32 %v12772_v47, %v9987_v46  ;;  %v12753_v18 = vld [vmem:[#allocation10 + $0x334] sm:$0xf0]  ;;  %v12778_v49 = vld [vmem:[#allocation10 + $0x404] sm:$0xf]  ;;  %v10021_v21 = vld [vmem:[#allocation10 + $0x410] sm:$0xf0] }
 0x3f3   :  { %3470 = vmatpush.bf16.msrb.mxu0 %v9828_v3  ;;  %v9916_v20 = vor.u32 %v12753_v18, %v9915_v34  ;;  %v10024_v45 = vor.u32 %v12778_v49, %v10021_v21  ;;  %v10027_v36 = vld [vmem:[#allocation10 + $0x408] sm:$0xf]  ;;  %v12781_v3 = vld [vmem:[#allocation10 + $0x414] sm:$0xf0]  ;;  %v12774_v29 = vld [vmem:[#allocation10 + $0x3e4] sm:$0xf] }
 0x3f4   :  { %3512 = vmatpush.bf16.msrb.mxu3 %v9832_v44  ;;  %3548 = vmatpush.bf16.msra.mxu2 %v9932_v35  ;;  %v9971_v44 = vld [vmem:[#allocation10 + $0x3a0] sm:$0xf]  ;;  %v10028_v39 = vor.u32 %v12781_v3, %v10027_v36  ;;  %v10005_v48 = vld [vmem:[#allocation10 + $0x3f0] sm:$0xf0]  ;;  %v12777_v57 = vld [vmem:[#allocation10 + $0x3f4] sm:$0xf0] }
 0x3f5   :  { %3482 = vmatpush.bf16.msrb.mxu1 %v9988_v60  ;;  %v9972_v28 = vor.u32 %v12768_v17, %v9971_v44  ;;  %v9955_v0 = vld [vmem:[#allocation10 + $0x380] sm:$0xf]  ;;  %v12764_v42 = vld [vmem:[#allocation10 + $0x38c] sm:$0xf0]  ;;  %vm16539_vm13 = vsmask.f32 256 }
 0x3f6   :  { %2769 = vrot.lane.b32.xlu1 %v2762_v24, %s13887_s23  ;;  %vm15428_vm3 = vmand %vm16540_vm6, %vm16539_vm13  ;;  %v9883_v51 = vld [vmem:[#allocation10 + $0x2e8] sm:$0xf]  ;;  %v12745_v38 = vld [vmem:[#allocation10 + $0x2f4] sm:$0xf0]  ;;  %v9956_v33 = vor.u32 %v12764_v42, %v9955_v0 }
 0x3f7   :  { %3519 = vmatpush.bf16.msra.mxu0 %v10072_v15  ;;  %v12806_v23 = vld [vmem:[#allocation10 + $0x4e4] sm:$0xf]  ;;  %v10133_v40 = vld [vmem:[#allocation10 + $0x4f0] sm:$0xf0]  ;;  %v9884_v31 = vor.u32 %v12745_v38, %v9883_v51  ;;  %v9995_v41 = vld [vmem:[#allocation10 + $0x3c8] sm:$0xf] }
 0x3f8   :  { %3561 = vmatpush.bf16.msra.mxu3 %v10076_v5  ;;  %3549 = vmatpush.bf16.msra.mxu2 %v9916_v20  ;;  %v10008_v5 = vor.u32 %v12774_v29, %v10005_v48  ;;  %v12770_v1 = vld [vmem:[#allocation10 + $0x3c4] sm:$0xf]  ;;  %v9867_v37 = vld [vmem:[#allocation10 + $0x2c8] sm:$0xf]  ;;  %v12741_v56 = vld [vmem:[#allocation10 + $0x2d4] sm:$0xf0] }
 0x3f9   :  { %3483 = vmatpush.bf16.msrb.mxu1 %v9972_v28  ;;  %v10117_v14 = vld [vmem:[#allocation10 + $0x4d0] sm:$0xf0]  ;;  %v12766_v27 = vld [vmem:[#allocation10 + $0x3a4] sm:$0xf]  ;;  %vm16543_vm11 = vmmov %vm16539_vm13  ;;  %v9868_v58 = vor.u32 %v12741_v56, %v9867_v37 }
 0x3fa   :  { %v9973_v53 = vld [vmem:[#allocation10 + $0x3b0] sm:$0xf0]  ;;  %vm15434_vm15 = vmand %vm2801_vm7, %vm16543_vm11  ;;  %v9979_v35 = vld [vmem:[#allocation10 + $0x3a8] sm:$0xf] }
 0x3fb   :  { %3520 = vmatpush.bf16.msra.mxu0 %v10056_v54  ;;  %v12773_v54 = vld [vmem:[#allocation10 + $0x3d4] sm:$0xf0]  ;;  %v12798_v6 = vld [vmem:[#allocation10 + $0x4a4] sm:$0xf]  ;;  %v9976_v46 = vor.u32 %v12766_v27, %v9973_v53  ;;  %v10101_v47 = vld [vmem:[#allocation10 + $0x4b0] sm:$0xf0] }
 0x3fc   :  { %3562 = vmatpush.bf16.msra.mxu3 %v10060_v62  ;;  %v12802_v62 = vld [vmem:[#allocation10 + $0x4c4] sm:$0xf]  ;;  %v9996_v50 = vor.u32 %v12773_v54, %v9995_v41  ;;  %v12769_v8 = vld [vmem:[#allocation10 + $0x3b4] sm:$0xf0]  ;;  %v9957_v60 = vld [vmem:[#allocation10 + $0x390] sm:$0xf0] }
 0x3fd   :  { %3484 = vmatpush.bf16.msrb.mxu1 %v9956_v33  ;;  %v10120_v10 = vor.u32 %v12802_v62, %v10117_v14  ;;  %v12737_v2 = vld [vmem:[#allocation10 + $0x2b4] sm:$0xf0]  ;;  %v12762_v34 = vld [vmem:[#allocation10 + $0x384] sm:$0xf]  ;;  %v9980_v20 = vor.u32 %v12769_v8, %v9979_v35  ;;  %vm2803_vm7 = vmor %vm15308_vm14, %vm15434_vm15  ;;  %vm16560_vm15 = vcmask 1041408  }
 0x3fe   :  { %v2809_v18 = vld [vmem:[#allocation3 + $0x14] sm:$0x1]  ;;  %v2793_v44 = vld [vmem:[#allocation3] sm:$0xff]  ;;  %v9960_v28 = vor.u32 %v12762_v34, %v9957_v60 }
 0x3ff   :  { %3521 = vmatpush.bf16.msra.mxu0 %v10040_v30  ;;  %v9851_v30 = vld [vmem:[#allocation10 + $0x2a8] sm:$0xf]  ;;  %v12765_v36 = vld [vmem:[#allocation10 + $0x394] sm:$0xf0]  ;;  %v12794_v33 = vld [vmem:[#allocation10 + $0x484] sm:$0xf] }
 0x400   :  { %3563 = vmatpush.bf16.msra.mxu3 %v10044_v9  ;;  %v2804_v9 = vld [vmem:[#allocation3 + $0xc] sm:$0x11] }
 0x403   :  { %3522 = vmatpush.bf16.msra.mxu0 %v10024_v45  ;;  %v9963_v45 = vld [vmem:[#allocation10 + $0x388] sm:$0xf] }
 0x404   :  { %3564 = vmatpush.bf16.msra.mxu3 %v10028_v39  ;;  %v2798_v39 = vld [vmem:[#allocation3 + $0x8] sm:$0xf] }
 0x407   :  { %3523 = vmatpush.bf16.msra.mxu0 %v10008_v5  ;;  %v9835_v5 = vld [vmem:[#allocation10 + $0x288] sm:$0xf] }
 0x449   :  { %v2768_v4 = vpop.permute.xlu2 %2767 }
 0x44a   :  { %v2773_v11 = vrot.slane %v2768_v4, 4 }
 0x44c   :  { %v2778_v32 = vsel %vm2681_vm10, %v2773_v11, %v2768_v4  ;;  %v2816_v61 = vsel %vm15405_vm9, %v2773_v11, %v2815_v12  ;;  %v9899_v12 = vld [vmem:[#allocation10 + $0x308] sm:$0xf] }
 0x44d   :  { %v15419_v55 = vsel %vm2792_vm0, %v2778_v32, %v2812_v43  ;;  %2817 = vst [vmem:[#allocation3 + $0x20] sm:$0xf] %v2816_v61  ;;  %v9900_v15 = vor.u32 %v12749_v59, %v9899_v12  ;;  %v10011_v4 = vld [vmem:[#allocation10 + $0x3e8] sm:$0xf]  ;;  %v10136_v32 = vor.u32 %v12806_v23, %v10133_v40  ;;  %v9989_v61 = vld [vmem:[#allocation10 + $0x3d0] sm:$0xf0]  ;;  %v9852_v12 = vor.u32 %v12737_v2, %v9851_v30 }
 0x44e   :  { %2814 = vst [vmem:[#allocation3 + $0x18] sm:$0xff] %v15419_v55  ;;  %v10012_v11 = vor.u32 %v12777_v57, %v10011_v4  ;;  %v9992_v52 = vor.u32 %v12770_v1, %v9989_v61  ;;  %v10104_v59 = vor.u32 %v12798_v6, %v10101_v47  ;;  %v9964_v4 = vor.u32 %v12765_v36, %v9963_v45  ;;  %v10085_v23 = vld [vmem:[#allocation10 + $0x490] sm:$0xf0]  ;;  %v2821_v40 = vld [vmem:[#allocation3 + $0x2c] sm:$0x1] }
 0x44f   :  { %3550 = vmatpush.bf16.msra.mxu2 %v9900_v15  ;;  %3537 = vmatpush.bf16.msra.mxu1 %v10136_v32  ;;  %v10088_v16 = vor.u32 %v12794_v33, %v10085_v23  ;;  %v2818_v1 = vld [vmem:[#allocation3 + $0x24] sm:$0x11]  ;;  %v2941_v54 = vshrl.u32 %v15419_v55, 16  ;;  %v2944_v56 = vshll.u32 %v15419_v55, 16 }
 0x450   :  { %3565 = vmatpush.bf16.msra.mxu3 %v10012_v11  ;;  %3524 = vmatpush.bf16.msra.mxu0 %v9992_v52  ;;  %v12733_v11 = vld [vmem:[#allocation10 + $0x294] sm:$0xf0] }
 0x451   :  { %v9836_v38 = vor.u32 %v12733_v11, %v9835_v5  ;;  %v2946_v30 = vrot.slane %v2944_v56, 5  ;;  %v10275_v5 = vld [vmem:[#allocation10 + $0xe0] sm:$0xf]  ;;  %v12680_v11 = vld [vmem:[#allocation10 + $0xec] sm:$0xf0] }
 0x452   :  { %v10259_v56 = vld [vmem:[#allocation10 + $0xc0] sm:$0xf] }
 0x453   :  { %3551 = vmatpush.bf16.msra.mxu2 %v9884_v31  ;;  %3538 = vmatpush.bf16.msra.mxu1 %v10120_v10 }
 0x454   :  { %3566 = vmatpush.bf16.msra.mxu3 %v9996_v50  ;;  %3525 = vmatpush.bf16.msra.mxu0 %v9976_v46  ;;  %v2827_v51 = vld [vmem:[#allocation3 + $0x20] sm:$0xf] }
 0x455   :  { %v2955_v26 = vshrl.u32 %v2827_v51, 16  ;;  %v2958_v41 = vshll.u32 %v2827_v51, 16  ;;  %v12807_v51 = vld [vmem:[#allocation10 + $0x4ec] sm:$0xf] }
 0x457   :  { %3552 = vmatpush.bf16.msra.mxu2 %v9868_v58  ;;  %3539 = vmatpush.bf16.msra.mxu1 %v10104_v59  ;;  %v2957_v14 = vrot.slane %v2955_v26, 4  ;;  %v2960_v43 = vrot.slane %v2958_v41, 5  ;;  %v2943_v58 = vrot.slane %v2941_v54, 4  ;;  %v10276_v41 = vor.u32 %v12680_v11, %v10275_v5  ;;  %v12791_v11 = vld [vmem:[#allocation10 + $0x46c] sm:$0xf] }
 0x458   :  { %3567 = vmatpush.bf16.msra.mxu3 %v9980_v20  ;;  %3526 = vmatpush.bf16.msra.mxu0 %v9960_v28 }
 0x459   :  { %v2961_v46 = vor.u32 %v2960_v43, %v2957_v14  ;;  %v12676_v14 = vld [vmem:[#allocation10 + $0xcc] sm:$0xf0]  ;;  %v12805_v43 = vld [vmem:[#allocation10 + $0x4d4] sm:$0xf0] }
 0x45b   :  { %3553 = vmatpush.bf16.msra.mxu2 %v9852_v12  ;;  %3540 = vmatpush.bf16.msra.mxu1 %v10088_v16 }
 0x45c   :  { %3568 = vmatpush.bf16.msra.mxu3 %v9964_v4  ;;  %v9949_v4 = vld [vmem:[#allocation10 + $0x378] sm:$0xf0] }
 0x45f   :  { %3554 = vmatpush.bf16.msra.mxu2 %v9836_v38  ;;  %v10141_v38 = vld [vmem:[#allocation10 + $0x4f8] sm:$0xf0] }
 0x460   :  { %v2766_v49 = vpop.permute.xlu0 %2765  ;;  %v2764_v21 = vpop.permute.xlu1 %2763  ;;  %v10144_v54 = vor.u32 %v12807_v51, %v10141_v38  ;;  %v10077_v51 = vld [vmem:[#allocation10 + $0x478] sm:$0xf0] }
 0x461   :  { %v2772_v3 = vrot.slane %v2766_v49, 4  ;;  %v2771_v17 = vrot.slane %v2764_v21, 4 }
 0x463   :  { %v2777_v15 = vsel %vm2681_vm10, %v2772_v3, %v2766_v49  ;;  %v2810_v29 = vsel %vm15428_vm3, %v2772_v3, %v2809_v18  ;;  %v2776_v48 = vsel %vm2681_vm10, %v2771_v17, %v2764_v21  ;;  %v2799_v42 = vsel %vm15405_vm9, %v2771_v17, %v2798_v39  ;;  %v12795_v17 = vld [vmem:[#allocation10 + $0x48c] sm:$0xf] }
 0x464   :  { %v2805_v57 = vsel %vm2803_vm7, %v2777_v15, %v2804_v9  ;;  %2811 = vst [vmem:[#allocation3 + $0x14] sm:$0x1] %v2810_v29  ;;  %v2794_v0 = vsel %vm2792_vm0, %v2776_v48, %v2793_v44  ;;  %v2947_v18 = vor.u32 %v2946_v30, %v2943_v58  ;;  %v2962_v44 = vrot.slane %v2961_v46, 4  ;;  %v12759_v48 = vld [vmem:[#allocation10 + $0x36c] sm:$0xf] }
 0x465   :  { %2806 = vst [vmem:[#allocation3 + $0xc] sm:$0x11] %v2805_v57  ;;  %v2913_v32 = vshrl.u32 %v2794_v0, 16  ;;  %v2916_v61 = vshll.u32 %v2794_v0, 16  ;;  %v9952_v26 = vor.u32 %v12759_v48, %v9949_v4  ;;  %v9917_v30 = vld [vmem:[#allocation10 + $0x338] sm:$0xf0] }
 0x466   :  { %2795 = vst [vmem:[#allocation3] sm:$0xff] %v2794_v0  ;;  %v2948_v28 = vrot.slane %v2947_v18, 4  ;;  %v10109_v46 = vld [vmem:[#allocation10 + $0x4b8] sm:$0xf0]  ;;  %v12712_v48 = vld [vmem:[#allocation10 + $0x1ec] sm:$0xf0] }
 0x467   :  { %2800 = vst [vmem:[#allocation3 + $0x8] sm:$0xf] %v2799_v42  ;;  %v2915_v27 = vrot.slane %v2913_v32, 4  ;;  %v2918_v53 = vrot.slane %v2916_v61, 5 }
 0x468   :  { %v2770_v24 = vpop.permute.xlu1 %2769 }
 0x469   :  { %v2774_v31 = vrot.slane %v2770_v24, 4  ;;  %v2919_v9 = vor.u32 %v2918_v53, %v2915_v27  ;;  %v12803_v27 = vld [vmem:[#allocation10 + $0x4cc] sm:$0xf]  ;;  %v10125_v53 = vld [vmem:[#allocation10 + $0x4d8] sm:$0xf0] }
 0x46b   :  { %v2779_v52 = vsel %vm2681_vm10, %v2774_v31, %v2770_v24  ;;  %v2822_v37 = vsel %vm15428_vm3, %v2774_v31, %v2821_v40  ;;  %v15470_v8 = vld [vmem:[#allocation3 + $0x14] sm:$0x1]  ;;  %v2920_v36 = vrot.slane %v2919_v9, 4  ;;  %v10139_v24 = vld [vmem:[#allocation10 + $0x4e8] sm:$0xf] }
 0x46c   :  { %v2819_v62 = vsel %vm2803_vm7, %v2779_v52, %v2818_v1  ;;  %2823 = vst [vmem:[#allocation3 + $0x2c] sm:$0x1] %v2822_v37  ;;  %v15468_v50 = vld [vmem:[#allocation3 + $0xc] sm:$0x11]  ;;  %v2936_v6 = vshll.u32 %v15470_v8, 16  ;;  %vm16561_vm7 = vcmask 1043458  }
 0x46d   :  { %2820 = vst [vmem:[#allocation3 + $0x24] sm:$0x11] %v2819_v62  ;;  %v2922_v25 = vshll.u32 %v15468_v50, 16  ;;  %v12809_v1 = vld [vmem:[#allocation10 + $0x4f4] sm:$0xf0] }
 0x46e   :  { %v2825_v35 = vld [vmem:[#allocation3 + $0x8] sm:$0xf]  ;;  %v2938_v45 = vrot.slane %v2936_v6, 5  ;;  %v9933_v37 = vld [vmem:[#allocation10 + $0x358] sm:$0xf0]  ;;  %v10140_v62 = vor.u32 %v12809_v1, %v10139_v24  ;;  %v10080_v1 = vor.u32 %v12791_v11, %v10077_v51 }
 0x46f   :  { %v2927_v10 = vshrl.u32 %v2825_v35, 16  ;;  %v2930_v55 = vshll.u32 %v2825_v35, 16  ;;  %v2924_v60 = vrot.slane %v2922_v25, 5  ;;  %v12755_v52 = vld [vmem:[#allocation10 + $0x34c] sm:$0xf] }
 0x470   :  { %v10123_v35 = vld [vmem:[#allocation10 + $0x4c8] sm:$0xf]  ;;  %v9936_v58 = vor.u32 %v12755_v52, %v9933_v37  ;;  %v12751_v25 = vld [vmem:[#allocation10 + $0x32c] sm:$0xf]  ;;  %v12672_v6 = vld [vmem:[#allocation10 + $0xac] sm:$0xf0] }
 0x471   :  { %v2929_v7 = vrot.slane %v2927_v10, 4  ;;  %v2932_v2 = vrot.slane %v2930_v55, 5  ;;  %v2925_v59 = vsel %vm14103_vm5, %v2920_v36, %v2924_v60  ;;  %v10260_v10 = vor.u32 %v12676_v14, %v10259_v56  ;;  %v12799_v9 = vld [vmem:[#allocation10 + $0x4ac] sm:$0xf]  ;;  %v12801_v60 = vld [vmem:[#allocation10 + $0x4b4] sm:$0xf0] }
 0x472   :  { %v3049_v33 = vunpack.c.l.b16 %v2925_v59  ;;  %v3050_v16 = vunpack.c.h.b16 %v2925_v59  ;;  %v10128_v55 = vor.u32 %v12803_v27, %v10125_v53  ;;  %v9920_v18 = vor.u32 %v12751_v25, %v9917_v30  ;;  %v9901_v36 = vld [vmem:[#allocation10 + $0x318] sm:$0xf0]  ;;  %v10091_v59 = vld [vmem:[#allocation10 + $0x488] sm:$0xf]  ;;  %v12787_v52 = vld [vmem:[#allocation10 + $0x44c] sm:$0xf] }
 0x473   :  { %v15474_v47 = vld [vmem:[#allocation3 + $0x2c] sm:$0x1]  ;;  %v2933_v34 = vor.u32 %v2932_v2, %v2929_v7  ;;  %v10243_v7 = vld [vmem:[#allocation10 + $0xa0] sm:$0xf]  ;;  %v10124_v2 = vor.u32 %v12805_v43, %v10123_v35  ;;  %v10061_v37 = vld [vmem:[#allocation10 + $0x458] sm:$0xf0] }
 0x474   :  { %v2964_v49 = vshll.u32 %v15474_v47, 16  ;;  %v15477_v21 = vld [vmem:[#allocation3 + $0x24] sm:$0x11]  ;;  %v12660_v14 = vld [vmem:[#allocation10 + $0x4c] sm:$0xf0]  ;;  %v10064_v43 = vor.u32 %v12787_v52, %v10061_v37 }
 0x475   :  { %v2934_v20 = vrot.slane %v2933_v34, 4  ;;  %v2950_v3 = vshll.u32 %v15477_v21, 16  ;;  %v10107_v34 = vld [vmem:[#allocation10 + $0x4a8] sm:$0xf]  ;;  %v10371_v27 = vld [vmem:[#allocation10 + $0x1a0] sm:$0xf] }
 0x476   :  { %v2966_v39 = vrot.slane %v2964_v49, 5  ;;  %v10244_v49 = vor.u32 %v12672_v6, %v10243_v7  ;;  %v12704_v53 = vld [vmem:[#allocation10 + $0x1ac] sm:$0xf0]  ;;  %v12783_v25 = vld [vmem:[#allocation10 + $0x42c] sm:$0xf] }
 0x477   :  { %v2939_v12 = vsel %vm14103_vm5, %v2934_v20, %v2938_v45  ;;  %v2952_v15 = vrot.slane %v2950_v3, 5  ;;  %v10112_v20 = vor.u32 %v12799_v9, %v10109_v46  ;;  %v12747_v45 = vld [vmem:[#allocation10 + $0x30c] sm:$0xf]  ;;  %v10227_v3 = vld [vmem:[#allocation10 + $0x80] sm:$0xf]  ;;  %v10372_v7 = vor.u32 %v12704_v53, %v10371_v27 }
 0x478   :  { %v2967_v29 = vsel %vm14103_vm5, %v2962_v44, %v2966_v39  ;;  %v3051_v57 = vunpack.c.l.b16 %v2939_v12  ;;  %v10108_v44 = vor.u32 %v12801_v60, %v10107_v34  ;;  %v12668_v39 = vld [vmem:[#allocation10 + $0x8c] sm:$0xf0]  ;;  %v10093_v12 = vld [vmem:[#allocation10 + $0x498] sm:$0xf0]  ;;  %v10355_v9 = vld [vmem:[#allocation10 + $0x180] sm:$0xf] }
 0x479   :  { %v3054_v0 = vunpack.c.l.b16 %v2967_v29  ;;  %v2953_v42 = vsel %vm14103_vm5, %v2948_v28, %v2952_v15  ;;  %vm16547_vm5 = vcmask 523264   ;;  %v12797_v28 = vld [vmem:[#allocation10 + $0x494] sm:$0xf0]  ;;  %v9904_v15 = vor.u32 %v12747_v45, %v9901_v36  ;;  %v10403_v29 = vld [vmem:[#allocation10 + $0x1e0] sm:$0xf] }
 0x47a   :  { %v3052_v23 = vunpack.c.l.b16 %v2953_v42  ;;  %v3053_v40 = vunpack.c.h.b16 %v2953_v42  ;;  %v10228_v4 = vor.u32 %v12668_v39, %v10227_v3  ;;  %v10096_v5 = vor.u32 %v12795_v17, %v10093_v12  ;;  %v9885_v42 = vld [vmem:[#allocation10 + $0x2f8] sm:$0xf0]  ;;  %vm16548_vm8 = vmmov %vm16547_vm5  ;;  %v12656_v6 = vld [vmem:[#allocation10 + $0x2c] sm:$0xf0] }
 0x47b   :  { %v15488_v31 = vpack.c.b16 %v3054_v0, %v3051_v57  ;;  %v12743_v57 = vld [vmem:[#allocation10 + $0x2ec] sm:$0xf]  ;;  %v10092_v0 = vor.u32 %v12797_v28, %v10091_v59  ;;  %v10404_v38 = vor.u32 %v12712_v48, %v10403_v29  ;;  %v10045_v30 = vld [vmem:[#allocation10 + $0x438] sm:$0xf0]  ;;  %v12700_v46 = vld [vmem:[#allocation10 + $0x18c] sm:$0xf0] }
 0x47c   :  { %v15490_v32 = vpack.c.b16 %v3052_v23, %v3049_v33  ;;  %v15492_v61 = vpack.c.b16 %v3053_v40, %v3050_v16  ;;  %v10211_v33 = vld [vmem:[#allocation10 + $0x60] sm:$0xf]  ;;  %v12664_v23 = vld [vmem:[#allocation10 + $0x6c] sm:$0xf0]  ;;  %v9888_v24 = vor.u32 %v12743_v57, %v9885_v42  ;;  %v10048_v60 = vor.u32 %v12783_v25, %v10045_v30  ;;  %v12779_v45 = vld [vmem:[#allocation10 + $0x40c] sm:$0xf] }
 0x47d   :  { %10145 = vmatmul.msk.bf16.vlgmr.msrb.gmra.mxu2 %vm16547_vm5, %v15488_v31  ;;  %v10387_v16 = vld [vmem:[#allocation10 + $0x1c0] sm:$0xf]  ;;  %v12708_v40 = vld [vmem:[#allocation10 + $0x1cc] sm:$0xf0]  ;;  %v10029_v36 = vld [vmem:[#allocation10 + $0x418] sm:$0xf0] }
 0x47e   :  { %3471 = vmatmul.bf16.vlgmr.msrb.gmra.mxu0 %v15490_v32  ;;  %3485 = vmatmul.bf16.vlgmr.msrb.gmra.mxu1 %v15492_v61  ;;  %v10388_v56 = vor.u32 %v12708_v40, %v10387_v16  ;;  %v10163_v3 = vld [vmem:[#allocation10] sm:$0xf]  ;;  %v12652_v39 = vld [vmem:[#allocation10 + $0xc] sm:$0xf0]  ;;  %v12710_v59 = vld [vmem:[#allocation10 + $0x1e4] sm:$0xf]  ;;  %v10032_v29 = vor.u32 %v12779_v45, %v10029_v36 }
 0x47f   :  { %3513 = vmatmul.bf16.vlgmr.msrb.gmra.mxu3 %v15490_v32  ;;  %3589 = vmatpush.bf16.msrb.mxu0 %v9952_v26  ;;  %v12739_v26 = vld [vmem:[#allocation10 + $0x2cc] sm:$0xf]  ;;  %v10467_v17 = vld [vmem:[#allocation10 + $0x260] sm:$0xf]  ;;  %v12728_v12 = vld [vmem:[#allocation10 + $0x26c] sm:$0xf0] }
 0x480   :  { %4049 = vmatpush.bf16.msrb.mxu3 %v10276_v41  ;;  %3621 = vmatpush.bf16.msrb.mxu2 %v10144_v54  ;;  %v10212_v41 = vor.u32 %v12664_v23, %v10211_v33  ;;  %v9869_v54 = vld [vmem:[#allocation10 + $0x2d8] sm:$0xf0]  ;;  %v10405_v28 = vld [vmem:[#allocation10 + $0x1f0] sm:$0xf0]  ;;  %v10339_v48 = vld [vmem:[#allocation10 + $0x160] sm:$0xf]  ;;  %v10468_v57 = vor.u32 %v12728_v12, %v10467_v17 }
 0x481   :  { %3579 = vmatpush.bf16.msrb.mxu1 %v10140_v62  ;;  %v10195_v62 = vld [vmem:[#allocation10 + $0x40] sm:$0xf]  ;;  %v9872_v35 = vor.u32 %v12739_v26, %v9869_v54  ;;  %v10013_v42 = vld [vmem:[#allocation10 + $0x3f8] sm:$0xf0]  ;;  %v10408_v11 = vor.u32 %v12710_v59, %v10405_v28  ;;  %v4231_v33 = vrot.slane %v15468_v50, 5  ;;  %vm16549_vm10 = vmmov %vm16547_vm5 }
 0x482   :  { %v10451_v51 = vld [vmem:[#allocation10 + $0x240] sm:$0xf]  ;;  %v12706_v16 = vld [vmem:[#allocation10 + $0x1c4] sm:$0xf]  ;;  %v10389_v40 = vld [vmem:[#allocation10 + $0x1d0] sm:$0xf0] }
 0x483   :  { %3590 = vmatpush.bf16.msrb.mxu0 %v9936_v58  ;;  %v12735_v58 = vld [vmem:[#allocation10 + $0x2ac] sm:$0xf]  ;;  %v10323_v26 = vld [vmem:[#allocation10 + $0x140] sm:$0xf]  ;;  %v12648_v54 = vld [vmem:[#allocation3 + $0x14] sm:$0xf0] }
 0x484   :  { %4050 = vmatpush.bf16.msrb.mxu3 %v10260_v10  ;;  %3622 = vmatpush.bf16.msrb.mxu2 %v10128_v55  ;;  %v10196_v10 = vor.u32 %v12660_v14, %v10195_v62  ;;  %v9853_v55 = vld [vmem:[#allocation10 + $0x2b8] sm:$0xf0]  ;;  %v12771_v37 = vld [vmem:[#allocation10 + $0x3cc] sm:$0xf]  ;;  %v10392_v62 = vor.u32 %v12706_v16, %v10389_v40  ;;  %v10435_v14 = vld [vmem:[#allocation10 + $0x220] sm:$0xf] }
 0x485   :  { %3580 = vmatpush.bf16.msrb.mxu1 %v10124_v2  ;;  %v10179_v2 = vld [vmem:[#allocation10 + $0x20] sm:$0xf]  ;;  %v9856_v34 = vor.u32 %v12735_v58, %v9853_v55  ;;  %v12720_v27 = vld [vmem:[#allocation10 + $0x22c] sm:$0xf0]  ;;  %v12702_v53 = vld [vmem:[#allocation10 + $0x1a4] sm:$0xf] }
 0x486   :  { %vm16550_vm14 = vmmov %vm16547_vm5  ;;  %v10373_v58 = vld [vmem:[#allocation10 + $0x1b0] sm:$0xf0]  ;;  %v12688_v55 = vld [vmem:[#allocation10 + $0x12c] sm:$0xf0] }
 0x487   :  { %3591 = vmatpush.bf16.msrb.mxu0 %v9920_v18  ;;  %v12731_v18 = vld [vmem:[#allocation10 + $0x28c] sm:$0xf]  ;;  %v9965_v36 = vld [vmem:[#allocation10 + $0x398] sm:$0xf0]  ;;  %v12678_v17 = vld [vmem:[#allocation10 + $0xe4] sm:$0xf] }
 0x488   :  { %4051 = vmatpush.bf16.msrb.mxu3 %v10244_v49  ;;  %3623 = vmatpush.bf16.msrb.mxu2 %v10112_v20  ;;  %v9837_v49 = vld [vmem:[#allocation10 + $0x298] sm:$0xf0]  ;;  %v10180_v20 = vor.u32 %v12656_v6, %v10179_v2  ;;  %v12767_v30 = vld [vmem:[#allocation10 + $0x3ac] sm:$0xf]  ;;  %v10419_v2 = vld [vmem:[#allocation10 + $0x200] sm:$0xf]  ;;  %v10436_v6 = vor.u32 %v12720_v27, %v10435_v14 }
 0x489   :  { %3581 = vmatpush.bf16.msrb.mxu1 %v10108_v44  ;;  %v10356_v44 = vor.u32 %v12700_v46, %v10355_v9  ;;  %v12716_v9 = vld [vmem:[#allocation10 + $0x20c] sm:$0xf0]  ;;  %v12698_v46 = vld [vmem:[#allocation10 + $0x184] sm:$0xf]  ;;  %v12763_v45 = vld [vmem:[#allocation10 + $0x38c] sm:$0xf] }
 0x48a   :  { %v10420_v12 = vor.u32 %v12716_v9, %v10419_v2  ;;  %v10277_v59 = vld [vmem:[#allocation10 + $0xf0] sm:$0xf0]  ;;  %v12694_v28 = vld [vmem:[#allocation10 + $0x164] sm:$0xf]  ;;  %v12677_v16 = vld [vmem:[#allocation10 + $0xd4] sm:$0xf0] }
 0x48b   :  { %3592 = vmatpush.bf16.msrb.mxu0 %v9904_v15  ;;  %v9840_v15 = vor.u32 %v12731_v18, %v9837_v49  ;;  %v10469_v18 = vld [vmem:[#allocation10 + $0x270] sm:$0xf0]  ;;  %v10291_v49 = vld [vmem:[#allocation10 + $0x100] sm:$0xf]  ;;  %v12674_v40 = vld [vmem:[#allocation10 + $0xc4] sm:$0xf] }
 0x48c   :  { %4052 = vmatpush.bf16.msrb.mxu3 %v10228_v4  ;;  %3624 = vmatpush.bf16.msrb.mxu2 %v10096_v5  ;;  %v12696_v4 = vld [vmem:[#allocation10 + $0x16c] sm:$0xf0]  ;;  %v10164_v5 = vor.u32 %v12652_v39, %v10163_v3  ;;  %v12681_v39 = vld [vmem:[#allocation10 + $0xf4] sm:$0xf0]  ;;  %v10325_v27 = vld [vmem:[#allocation10 + $0x150] sm:$0xf0] }
 0x48d   :  { %3555 = vmatmul.bf16.vlgmr.msra.gmra.mxu2 %v15490_v32  ;;  %3582 = vmatpush.bf16.msrb.mxu1 %v10092_v0  ;;  %v12775_v0 = vld [vmem:[#allocation10 + $0x3ec] sm:$0xf]  ;;  %v10340_v23 = vor.u32 %v12696_v4, %v10339_v48  ;;  %v12722_v4 = vld [vmem:[#allocation10 + $0x244] sm:$0xf]  ;;  %v10251_v2 = vld [vmem:[#allocation10 + $0xa8] sm:$0xf] }
 0x48e   :  { %3527 = vmatmul.bf16.vlgmr.msra.gmra.mxu0 %v15492_v61  ;;  %10146 = vmatmul.msk.bf16.vlgmr.msra.gmra.mxu1 %vm16548_vm8, %v15488_v31  ;;  %vm16552_vm4 = vmmov %vm16547_vm5  ;;  %vm16562_vm5 = vcmask 1045508   ;;  %vm16563_vm8 = vcmask 1045504  }
 0x48f   :  { %3569 = vmatmul.bf16.vlgmr.msra.gmra.mxu3 %v15492_v61  ;;  %3593 = vmatpush.bf16.msrb.mxu0 %v9888_v24  ;;  %v10016_v24 = vor.u32 %v12775_v0, %v10013_v42  ;;  %v12647_v42 = vld [vmem:[#allocation3 + $0x4] sm:$0xf] }
 0x490   :  { %4063 = vmatpush.bf16.msra.mxu2 %v10404_v38  ;;  %4053 = vmatpush.bf16.msrb.mxu3 %v10212_v41  ;;  %v12724_v38 = vld [vmem:[#allocation10 + $0x24c] sm:$0xf0] }
 0x491   :  { %3603 = vmatpush.bf16.msra.mxu1 %v10080_v1  ;;  %v10151_v1 = vld [vmem:[#allocation3] sm:$0xf]  ;;  %v12692_v41 = vld [vmem:[#allocation10 + $0x14c] sm:$0xf0]  ;;  %v10452_v52 = vor.u32 %v12724_v38, %v10451_v51  ;;  %v10267_v51 = vld [vmem:[#allocation10 + $0xc8] sm:$0xf]  ;;  %v9968_v38 = vor.u32 %v12763_v45, %v9965_v36 }
 0x493   :  { %3594 = vmatpush.bf16.msrb.mxu0 %v9872_v35  ;;  %v15509_v35 = vor.u32 %v12648_v54, %v10151_v1  ;;  %v10280_v1 = vor.u32 %v12678_v17, %v10277_v59  ;;  %v10261_v54 = vld [vmem:[#allocation10 + $0xd0] sm:$0xf0]  ;;  %v12713_v59 = vld [vmem:[#allocation10 + $0x1f4] sm:$0xf0] }
 0x494   :  { %4064 = vmatpush.bf16.msra.mxu2 %v10388_v56  ;;  %4054 = vmatpush.bf16.msrb.mxu3 %v10196_v10  ;;  %v9997_v56 = vld [vmem:[#allocation10 + $0x3d8] sm:$0xf0]  ;;  %v10307_v10 = vld [vmem:[#allocation10 + $0x120] sm:$0xf]  ;;  %v10264_v9 = vor.u32 %v12674_v40, %v10261_v54  ;;  %v10421_v17 = vld [vmem:[#allocation10 + $0x210] sm:$0xf0] }
 0x495   :  { %3604 = vmatpush.bf16.msra.mxu1 %v10064_v43  ;;  %v10324_v43 = vor.u32 %v12692_v41, %v10323_v26  ;;  %v10000_v25 = vor.u32 %v12771_v37, %v9997_v56  ;;  %v10153_v26 = vld [vmem:[#allocation3 + $0x18] sm:$0xf0]  ;;  %v12649_v41 = vld [vmem:[#allocation3 + $0x1c] sm:$0xf0]  ;;  %v4235_v56 = vrot.slane %v15470_v8, 5  ;;  %v10268_v8 = vor.u32 %v12677_v16, %v10267_v51 }
 0x496   :  { %v10229_v51 = vld [vmem:[#allocation10 + $0x90] sm:$0xf0]  ;;  %v12682_v16 = vld [vmem:[#allocation10 + $0x104] sm:$0xf]  ;;  %v10285_v54 = vld [vmem:[#allocation10 + $0xf8] sm:$0xf0] }
 0x497   :  { %3595 = vmatpush.bf16.msrb.mxu0 %v9856_v34  ;;  %v10376_v34 = vor.u32 %v12702_v53, %v10373_v58  ;;  %v12718_v53 = vld [vmem:[#allocation10 + $0x224] sm:$0xf]  ;;  %v10437_v58 = vld [vmem:[#allocation10 + $0x230] sm:$0xf0] }
 0x498   :  { %4065 = vmatpush.bf16.msra.mxu2 %v10372_v7  ;;  %4055 = vmatpush.bf16.msrb.mxu3 %v10180_v20  ;;  %v9981_v7 = vld [vmem:[#allocation10 + $0x3b8] sm:$0xf0]  ;;  %v10308_v20 = vor.u32 %v12688_v55, %v10307_v10  ;;  %v10293_v40 = vld [vmem:[#allocation10 + $0x110] sm:$0xf0] }
 0x499   :  { %3605 = vmatpush.bf16.msra.mxu1 %v10048_v60  ;;  %v12726_v60 = vld [vmem:[#allocation10 + $0x264] sm:$0xf]  ;;  %v9984_v3 = vor.u32 %v12767_v30, %v9981_v7  ;;  %v4219_v10 = vld [vmem:[#allocation3 + $0x18] sm:$0xee]  ;;  %v15515_v30 = vor.u32 %v12647_v42, %v10153_v26 }
 0x49a   :  { %v10472_v48 = vor.u32 %v12726_v60, %v10469_v18  ;;  %v10487_v36 = vrot.slane %v4219_v10, 9 }
 0x49b   :  { %3596 = vmatpush.bf16.msrb.mxu0 %v9840_v15  ;;  %v10341_v15 = vld [vmem:[#allocation10 + $0x170] sm:$0xf0] }
 0x49c   :  { %4066 = vmatpush.bf16.msra.mxu2 %v10356_v44  ;;  %4056 = vmatpush.bf16.msrb.mxu3 %v10164_v5  ;;  %v10283_v44 = vld [vmem:[#allocation10 + $0xe8] sm:$0xf]  ;;  %v10453_v5 = vld [vmem:[#allocation10 + $0x250] sm:$0xf0] }
 0x49d   :  { %3606 = vmatpush.bf16.msra.mxu1 %v10032_v29  ;;  %10148 = vmatmul.msk.bf16.vlgmr.msrb.gmra.mxu2 %vm16549_vm10, %v15488_v31  ;;  %v10456_v14 = vor.u32 %v12722_v4, %v10453_v5  ;;  %vm16564_vm10 = vmmov %vm16562_vm5 }
 0x49e   :  { %10147 = vmatmul.msk.bf16.vlgmr.msrb.gmra.mxu1 %vm16550_vm14, %v15488_v31  ;;  %3597 = vmatmul.bf16.vlgmr.msrb.gmra.mxu0 %v15490_v32  ;;  %v10357_v31 = vld [vmem:[#allocation10 + $0x190] sm:$0xf0]  ;;  %v12684_v32 = vld [vmem:[#allocation10 + $0x10c] sm:$0xf0]  ;;  %vm16565_vm14 = vmmov %vm16563_vm8 }
 0x49f   :  { %4081 = vmatpush.bf16.msra.mxu0 %v10468_v57  ;;  %4057 = vmatmul.bf16.vlgmr.msrb.gmra.mxu3 %v15509_v35  ;;  %v10360_v29 = vor.u32 %v12698_v46, %v10357_v31  ;;  %v4218_v57 = vld [vmem:[#allocation3 + $0x8] sm:$0xe]  ;;  %v10292_v0 = vor.u32 %v12684_v32, %v10291_v49  ;;  %v12670_v46 = vld [vmem:[#allocation10 + $0xa4] sm:$0xf]  ;;  %v10245_v31 = vld [vmem:[#allocation10 + $0xb0] sm:$0xf0] }
 0x4a0   :  { %4105 = vmatpush.bf16.msra.mxu3 %v10408_v11  ;;  %4067 = vmatpush.bf16.msra.mxu2 %v10340_v23  ;;  %v10159_v11 = vld [vmem:[#allocation3 + $0x8] sm:$0xf]  ;;  %v10284_v23 = vor.u32 %v12681_v39, %v10283_v44  ;;  %v10486_v37 = vrot.slane %v4218_v57, 9  ;;  %v4243_v49 = vrot.slane %v15474_v47, 5  ;;  %v12686_v32 = vld [vmem:[#allocation10 + $0x124] sm:$0xf]  ;;  %v10248_v50 = vor.u32 %v12670_v46, %v10245_v31 }
 0x4a1   :  { %3607 = vmatpush.bf16.msra.mxu1 %v10016_v24  ;;  %v4217_v24 = vld [vmem:[#allocation3] sm:$0xee]  ;;  %v15517_v7 = vor.u32 %v12649_v41, %v10159_v11  ;;  %v10309_v44 = vld [vmem:[#allocation10 + $0x130] sm:$0xf0]  ;;  %v12661_v31 = vld [vmem:[#allocation10 + $0x54] sm:$0xf0] }
 0x4a2   :  { %v10485_v55 = vrot.slane %v4217_v24, 9  ;;  %v4236_v60 = vsel %vm14067_vm1, %v10486_v37, %v4235_v56  ;;  %v12714_v39 = vld [vmem:[#allocation10 + $0x204] sm:$0xf]  ;;  %v12679_v24 = vld [vmem:[#allocation10 + $0xec] sm:$0xf] }
 0x4a3   :  { %4082 = vmatpush.bf16.msra.mxu0 %v10452_v52  ;;  %v12690_v52 = vld [vmem:[#allocation10 + $0x144] sm:$0xf]  ;;  %v10424_v42 = vor.u32 %v12714_v39, %v10421_v17  ;;  %v12709_v37 = vld [vmem:[#allocation10 + $0x1d4] sm:$0xf0]  ;;  %v10203_v46 = vld [vmem:[#allocation10 + $0x48] sm:$0xf] }
 0x4a4   :  { %4106 = vmatpush.bf16.msra.mxu3 %v10392_v62  ;;  %4068 = vmatpush.bf16.msra.mxu2 %v10324_v43  ;;  %v10344_v62 = vor.u32 %v12694_v28, %v10341_v15  ;;  %v4220_v43 = vld [vmem:[#allocation3 + $0x20] sm:$0xe]  ;;  %v4232_v45 = vsel %vm14067_vm1, %v10485_v55, %v4231_v33  ;;  %v4328_v33 = vunpack.c.l.b16 %v4236_v60  ;;  %v12675_v55 = vld [vmem:[#allocation10 + $0xcc] sm:$0xf]  ;;  %v10197_v60 = vld [vmem:[#allocation10 + $0x50] sm:$0xf0] }
 0x4a5   :  { %3608 = vmatpush.bf16.msra.mxu1 %v10000_v25  ;;  %v4239_v25 = vrot.slane %v15477_v21, 5  ;;  %v10488_v18 = vrot.slane %v4220_v43, 9  ;;  %v10328_v21 = vor.u32 %v12690_v52, %v10325_v27  ;;  %v4327_v5 = vunpack.c.h.b16 %v4232_v45  ;;  %v12666_v11 = vld [vmem:[#allocation10 + $0x84] sm:$0xf]  ;;  %v10395_v52 = vld [vmem:[#allocation10 + $0x1c8] sm:$0xf] }
 0x4a6   :  { %v10232_v56 = vor.u32 %v12666_v11, %v10229_v51  ;;  %v10296_v27 = vor.u32 %v12682_v16, %v10293_v40  ;;  %v10213_v43 = vld [vmem:[#allocation10 + $0x70] sm:$0xf0]  ;;  %v10396_v10 = vor.u32 %v12709_v37, %v10395_v52  ;;  %v12657_v39 = vld [vmem:[#allocation10 + $0x34] sm:$0xf0]  ;;  %v12654_v17 = vld [vmem:[#allocation10 + $0x24] sm:$0xf] }
 0x4a7   :  { %4083 = vmatpush.bf16.msra.mxu0 %v10436_v6  ;;  %v12673_v6 = vld [vmem:[#allocation10 + $0xb4] sm:$0xf0]  ;;  %v4244_v47 = vsel %vm14067_vm1, %v10488_v18, %v4243_v49  ;;  %v4240_v15 = vsel %vm14067_vm1, %v10487_v36, %v4239_v25  ;;  %vm16553_vm1 = vmmov %vm16552_vm4  ;;  %v10331_v37 = vld [vmem:[#allocation10 + $0x148] sm:$0xf] }
 0x4a8   :  { %4107 = vmatpush.bf16.msra.mxu3 %v10376_v34  ;;  %4069 = vmatpush.bf16.msra.mxu2 %v10308_v20  ;;  %v10440_v20 = vor.u32 %v12718_v53, %v10437_v58  ;;  %v4331_v28 = vunpack.c.l.b16 %v4244_v47  ;;  %v4329_v4 = vunpack.c.l.b16 %v4240_v15  ;;  %v4330_v57 = vunpack.c.h.b16 %v4240_v15  ;;  %v12662_v53 = vld [vmem:[#allocation10 + $0x64] sm:$0xf]  ;;  %v12701_v36 = vld [vmem:[#allocation10 + $0x194] sm:$0xf0]  ;;  %v10181_v47 = vld [vmem:[#allocation10 + $0x30] sm:$0xf0] }
 0x4a9   :  { %3609 = vmatpush.bf16.msra.mxu1 %v9984_v3  ;;  %v10252_v3 = vor.u32 %v12673_v6, %v10251_v2  ;;  %v10288_v58 = vor.u32 %v12679_v24, %v10285_v54  ;;  %v10379_v2 = vld [vmem:[#allocation10 + $0x1a8] sm:$0xf]  ;;  %v12705_v6 = vld [vmem:[#allocation10 + $0x1b4] sm:$0xf0]  ;;  %v12658_v34 = vld [vmem:[#allocation10 + $0x44] sm:$0xf] }
 0x4aa   :  { %v15538_v26 = vpack.c.b16 %v4330_v57, %v4327_v5  ;;  %v10380_v49 = vor.u32 %v12705_v6, %v10379_v2  ;;  %v10347_v15 = vld [vmem:[#allocation10 + $0x168] sm:$0xf]  ;;  %v12650_v5 = vld [vmem:[#allocation10 + $0x4] sm:$0xf]  ;;  %v10165_v57 = vld [vmem:[#allocation10 + $0x10] sm:$0xf0] }
 0x4ab   :  { %4084 = vmatpush.bf16.msra.mxu0 %v10420_v12  ;;  %v10411_v12 = vld [vmem:[#allocation10 + $0x1e8] sm:$0xf]  ;;  %v12729_v16 = vld [vmem:[#allocation10 + $0x274] sm:$0xf0]  ;;  %v12663_v24 = vld [vmem:[#allocation10 + $0x6c] sm:$0xf]  ;;  %v10168_v54 = vor.u32 %v12650_v5, %v10165_v57 }
 0x4ac   :  { %4108 = vmatpush.bf16.msra.mxu3 %v10360_v29  ;;  %4070 = vmatpush.bf16.msra.mxu2 %v10292_v0  ;;  %v12669_v29 = vld [vmem:[#allocation10 + $0x94] sm:$0xf0]  ;;  %v10312_v0 = vor.u32 %v12686_v32, %v10309_v44  ;;  %v10253_v32 = vld [vmem:[#allocation10 + $0xb8] sm:$0xf0]  ;;  %v10187_v44 = vld [vmem:[#allocation10 + $0x28] sm:$0xf] }
 0x4ad   :  { %3610 = vmatpush.bf16.msra.mxu1 %v9968_v38  ;;  %v15534_v38 = vpack.c.b16 %v4331_v28, %v4328_v33  ;;  %v10188_v33 = vor.u32 %v12657_v39, %v10187_v44  ;;  %v10237_v28 = vld [vmem:[#allocation10 + $0x98] sm:$0xf0]  ;;  %v10315_v2 = vld [vmem:[#allocation10 + $0x128] sm:$0xf]  ;;  %v12689_v6 = vld [vmem:[#allocation10 + $0x134] sm:$0xf0] }
 0x4ae   :  { %10481 = vmatmul.msk.bf16.vlgmr.msra.gmra.mxu0 %vm16552_vm4, %v15517_v7  ;;  %v12840_v44 = vld [vmem:[#allocation10 + $0x5ec] sm:$0xf0]  ;;  %v10413_v57 = vld [vmem:[#allocation10 + $0x1f8] sm:$0xf0]  ;;  %vm16554_vm0 = vmmov %vm16553_vm1 }
 0x4af   :  { %4123 = vmatpush.bf16.msrb.mxu0 %v10472_v48  ;;  %4071 = vmatmul.bf16.vlgmr.msra.gmra.mxu2 %v15515_v30  ;;  %v4326_v48 = vunpack.c.l.b16 %v4232_v45  ;;  %v10363_v45 = vld [vmem:[#allocation10 + $0x188] sm:$0xf]  ;;  %vm16555_vm9 = vmmov %vm16554_vm0 }
 0x4b0   :  { %4133 = vmatpush.bf16.msrb.mxu2 %v10284_v23  ;;  %4109 = vmatpush.bf16.msra.mxu3 %v10344_v62  ;;  %v10412_v23 = vor.u32 %v12713_v59, %v10411_v12  ;;  %v10219_v62 = vld [vmem:[#allocation10 + $0x68] sm:$0xf]  ;;  %v10364_v12 = vor.u32 %v12701_v36, %v10363_v45  ;;  %v12667_v59 = vld [vmem:[#allocation10 + $0x8c] sm:$0xf]  ;;  %v12685_v36 = vld [vmem:[#allocation10 + $0x114] sm:$0xf0] }
 0x4b1   :  { %4091 = vmatpush.bf16.msrb.mxu1 %v10280_v1  ;;  %v15536_v1 = vpack.c.b16 %v4329_v4, %v4326_v48  ;;  %v10171_v48 = vld [vmem:[#allocation10 + $0x8] sm:$0xf]  ;;  %v12653_v4 = vld [vmem:[#allocation10 + $0x14] sm:$0xf0]  ;;  %v10240_v11 = vor.u32 %v12667_v59, %v10237_v28  ;;  %v12872_v28 = vld [vmem:[#allocation10 + $0x6ec] sm:$0xf0] }
 0x4b2   :  { %3611 = vmatmul.bf16.vlgmr.msra.gmra.mxu1 %v15492_v61  ;;  %v10235_v61 = vld [vmem:[#allocation10 + $0x88] sm:$0xf]  ;;  %v10172_v40 = vor.u32 %v12653_v4, %v10171_v48  ;;  %v12717_v59 = vld [vmem:[#allocation10 + $0x214] sm:$0xf0]  ;;  %v12711_v48 = vld [vmem:[#allocation10 + $0x1ec] sm:$0xf] }
 0x4b3   :  { %4124 = vmatpush.bf16.msrb.mxu0 %v10456_v14  ;;  %v10236_v41 = vor.u32 %v12669_v29, %v10235_v61  ;;  %v12665_v14 = vld [vmem:[#allocation10 + $0x74] sm:$0xf0]  ;;  %v10184_v29 = vor.u32 %v12654_v17, %v10181_v47  ;;  %v12715_v17 = vld [vmem:[#allocation10 + $0x20c] sm:$0xf]  ;;  %v10429_v47 = vld [vmem:[#allocation10 + $0x218] sm:$0xf0] }
 0x4b4   :  { %4134 = vmatpush.bf16.msrb.mxu2 %v10268_v8  ;;  %4110 = vmatpush.bf16.msra.mxu3 %v10328_v21  ;;  %v10220_v25 = vor.u32 %v12665_v14, %v10219_v62  ;;  %v10269_v8 = vld [vmem:[#allocation10 + $0xd8] sm:$0xf0]  ;;  %v12671_v21 = vld [vmem:[#allocation10 + $0xac] sm:$0xf]  ;;  %v12697_v61 = vld [vmem:[#allocation10 + $0x174] sm:$0xf0]  ;;  %v10432_v5 = vor.u32 %v12715_v17, %v10429_v47 }
 0x4b5   :  { %4092 = vmatpush.bf16.msrb.mxu1 %v10264_v9  ;;  %v10216_v9 = vor.u32 %v12662_v53, %v10213_v43  ;;  %v10272_v18 = vor.u32 %v12675_v55, %v10269_v8  ;;  %v10348_v51 = vor.u32 %v12697_v61, %v10347_v15  ;;  %v12723_v14 = vld [vmem:[#allocation10 + $0x24c] sm:$0xf]  ;;  %v10459_v43 = vld [vmem:[#allocation10 + $0x248] sm:$0xf]  ;;  %v12824_v47 = vld [vmem:[#allocation10 + $0x56c] sm:$0xf0] }
 0x4b6   :  { %v12659_v55 = vld [vmem:[#allocation10 + $0x4c] sm:$0xf]  ;;  %vm16556_vm13 = vmmov %vm16554_vm0 }
 0x4b7   :  { %4125 = vmatpush.bf16.msrb.mxu0 %v10440_v20  ;;  %v10204_v20 = vor.u32 %v12661_v31, %v10203_v46  ;;  %v12719_v46 = vld [vmem:[#allocation10 + $0x22c] sm:$0xf]  ;;  %v10445_v31 = vld [vmem:[#allocation10 + $0x238] sm:$0xf0]  ;;  %vm16557_vm6 = vmmov %vm16554_vm0 }
 0x4b8   :  { %4135 = vmatpush.bf16.msrb.mxu2 %v10252_v3  ;;  %4111 = vmatpush.bf16.msra.mxu3 %v10312_v0  ;;  %v10200_v3 = vor.u32 %v12658_v34, %v10197_v60  ;;  %v12727_v0 = vld [vmem:[#allocation10 + $0x26c] sm:$0xf]  ;;  %v10443_v60 = vld [vmem:[#allocation10 + $0x228] sm:$0xf]  ;;  %v10448_v45 = vor.u32 %v12719_v46, %v10445_v31  ;;  %v10763_v46 = vld [vmem:[#allocation10 + $0x720] sm:$0xf] }
 0x4b9   :  { %4093 = vmatpush.bf16.msrb.mxu1 %v10248_v50  ;;  %v10256_v50 = vor.u32 %v12671_v21, %v10253_v32  ;;  %v12655_v21 = vld [vmem:[#allocation10 + $0x2c] sm:$0xf]  ;;  %v10299_v32 = vld [vmem:[#allocation10 + $0x108] sm:$0xf]  ;;  %v12880_v31 = vld [vmem:[#allocation10 + $0x72c] sm:$0xf0] }
 0x4ba   :  { %v10300_v15 = vor.u32 %v12685_v36, %v10299_v32  ;;  %v12651_v61 = vld [vmem:[#allocation10 + $0xc] sm:$0xf]  ;;  %v10764_v32 = vor.u32 %v12880_v31, %v10763_v46  ;;  %v10365_v36 = vld [vmem:[#allocation10 + $0x198] sm:$0xf0]  ;;  %v12886_v46 = vld [vmem:[#allocation10 + $0x764] sm:$0xf] }
 0x4bb   :  { %4126 = vmatpush.bf16.msrb.mxu0 %v10424_v42  ;;  %v10477_v42 = vld [vmem:[#allocation10 + $0x278] sm:$0xf0]  ;;  %v10797_v31 = vld [vmem:[#allocation10 + $0x770] sm:$0xf0]  ;;  %vm16558_vm3 = vmmov %vm16554_vm0 }
 0x4bc   :  { %4136 = vmatpush.bf16.msrb.mxu2 %v10236_v41  ;;  %4112 = vmatpush.bf16.msra.mxu3 %v10296_v27  ;;  %v10221_v41 = vld [vmem:[#allocation10 + $0x78] sm:$0xf0]  ;;  %v10480_v52 = vor.u32 %v12727_v0, %v10477_v42  ;;  %v10795_v0 = vld [vmem:[#allocation10 + $0x760] sm:$0xf]  ;;  %v12888_v42 = vld [vmem:[#allocation10 + $0x76c] sm:$0xf0] }
 0x4bd   :  { %4094 = vmatpush.bf16.msrb.mxu1 %v10232_v56  ;;  %v12693_v56 = vld [vmem:[#allocation10 + $0x154] sm:$0xf0]  ;;  %v10461_v27 = vld [vmem:[#allocation10 + $0x258] sm:$0xf0]  ;;  %v10224_v53 = vor.u32 %v12663_v24, %v10221_v41  ;;  %v10715_v24 = vld [vmem:[#allocation10 + $0x6c0] sm:$0xf] }
 0x4be   :  { %10482 = vmatmul.msk.bf16.vlgmr.msrb.gmra.mxu0 %vm16553_vm1, %v15517_v7  ;;  %v10464_v8 = vor.u32 %v12723_v14, %v10461_v27  ;;  %v12868_v41 = vld [vmem:[#allocation10 + $0x6cc] sm:$0xf0]  ;;  %v10779_v14 = vld [vmem:[#allocation10 + $0x740] sm:$0xf]  ;;  %vm16559_vm11 = vmmov %vm16554_vm0 }
 0x4bf   :  { %4147 = vmatpush.bf16.msra.mxu0 %v10412_v23  ;;  %4113 = vmatmul.bf16.vlgmr.msra.gmra.mxu3 %v15515_v30  ;;  %v10475_v23 = vld [vmem:[#allocation10 + $0x268] sm:$0xf]  ;;  %v12884_v27 = vld [vmem:[#allocation10 + $0x74c] sm:$0xf0]  ;;  %vm16566_vm4 = vmmov %vm16560_vm15 }
 0x4c0   :  { %4175 = vmatpush.bf16.msrb.mxu3 %v10288_v58  ;;  %4137 = vmatpush.bf16.msrb.mxu2 %v10220_v25  ;;  %v10476_v62 = vor.u32 %v12729_v16, %v10475_v23  ;;  %v12725_v58 = vld [vmem:[#allocation10 + $0x254] sm:$0xf0]  ;;  %v10205_v25 = vld [vmem:[#allocation10 + $0x58] sm:$0xf0]  ;;  %v10587_v23 = vld [vmem:[#allocation10 + $0x5c0] sm:$0xf] }
 0x4c1   :  { %4095 = vmatpush.bf16.msrb.mxu1 %v10216_v9  ;;  %v10460_v9 = vor.u32 %v12725_v58, %v10459_v43  ;;  %v10208_v34 = vor.u32 %v12659_v55, %v10205_v25  ;;  %v12836_v16 = vld [vmem:[#allocation10 + $0x5cc] sm:$0xf0]  ;;  %v10571_v43 = vld [vmem:[#allocation10 + $0x5a0] sm:$0xf]  ;;  %vm16567_vm1 = vmmov %vm16561_vm7 }
 0x4c2   :  { %v12832_v58 = vld [vmem:[#allocation10 + $0x5ac] sm:$0xf0] }
 0x4c3   :  { %4148 = vmatpush.bf16.msra.mxu0 %v10396_v10  ;;  %v10332_v10 = vor.u32 %v12693_v56, %v10331_v37  ;;  %v12707_v37 = vld [vmem:[#allocation10 + $0x1cc] sm:$0xf]  ;;  %v10588_v56 = vor.u32 %v12836_v16, %v10587_v23  ;;  %v12864_v55 = vld [vmem:[#allocation10 + $0x6ac] sm:$0xf0] }
 0x4c4   :  { %4176 = vmatpush.bf16.msrb.mxu3 %v10272_v18  ;;  %4138 = vmatpush.bf16.msrb.mxu2 %v10204_v20  ;;  %v12721_v18 = vld [vmem:[#allocation10 + $0x234] sm:$0xf0]  ;;  %v10189_v20 = vld [vmem:[#allocation10 + $0x38] sm:$0xf0] }
 0x4c5   :  { %4096 = vmatpush.bf16.msrb.mxu1 %v10200_v3  ;;  %v10603_v3 = vld [vmem:[#allocation10 + $0x5e0] sm:$0xf]  ;;  %v10444_v39 = vor.u32 %v12721_v18, %v10443_v60  ;;  %v12828_v18 = vld [vmem:[#allocation10 + $0x58c] sm:$0xf0] }
 0x4c6   :  { %v10604_v4 = vor.u32 %v12840_v44, %v10603_v3  ;;  %v10555_v60 = vld [vmem:[#allocation10 + $0x580] sm:$0xf]  ;;  %v12876_v44 = vld [vmem:[#allocation10 + $0x70c] sm:$0xf0] }
 0x4c7   :  { %4149 = vmatpush.bf16.msra.mxu0 %v10380_v49  ;;  %v10316_v49 = vor.u32 %v12689_v6, %v10315_v2  ;;  %v12703_v2 = vld [vmem:[#allocation10 + $0x1ac] sm:$0xf]  ;;  %v10572_v6 = vor.u32 %v12832_v58, %v10571_v43  ;;  %v10747_v3 = vld [vmem:[#allocation10 + $0x700] sm:$0xf] }
 0x4c8   :  { %4177 = vmatpush.bf16.msrb.mxu3 %v10256_v50  ;;  %4139 = vmatpush.bf16.msrb.mxu2 %v10188_v33  ;;  %v10427_v50 = vld [vmem:[#allocation10 + $0x208] sm:$0xf]  ;;  %v10731_v33 = vld [vmem:[#allocation10 + $0x6e0] sm:$0xf]  ;;  %v12687_v43 = vld [vmem:[#allocation10 + $0x12c] sm:$0xf] }
 0x4c9   :  { %4097 = vmatpush.bf16.msrb.mxu1 %v10184_v29  ;;  %v10173_v29 = vld [vmem:[#allocation10 + $0x18] sm:$0xf0] }
 0x4cb   :  { %4150 = vmatpush.bf16.msra.mxu0 %v10364_v12  ;;  %v10192_v12 = vor.u32 %v12655_v21, %v10189_v20  ;;  %v12860_v21 = vld [vmem:[#allocation10 + $0x68c] sm:$0xf0] }
 0x4cc   :  { %4178 = vmatpush.bf16.msrb.mxu3 %v10240_v11  ;;  %4140 = vmatpush.bf16.msrb.mxu2 %v10172_v40  ;;  %v10428_v11 = vor.u32 %v12717_v59, %v10427_v50  ;;  %v10176_v40 = vor.u32 %v12651_v61, %v10173_v29  ;;  %v12870_v50 = vld [vmem:[#allocation10 + $0x6e4] sm:$0xf]  ;;  %v10667_v59 = vld [vmem:[#allocation10 + $0x660] sm:$0xf] }
 0x4cd   :  { %4098 = vmatpush.bf16.msrb.mxu1 %v10168_v54  ;;  %v10416_v54 = vor.u32 %v12711_v48, %v10413_v57  ;;  %v10349_v48 = vld [vmem:[#allocation10 + $0x178] sm:$0xf0]  ;;  %v12820_v57 = vld [vmem:[#allocation10 + $0x54c] sm:$0xf0] }
 0x4cf   :  { %4151 = vmatpush.bf16.msra.mxu0 %v10348_v51  ;;  %4141 = vmatmul.bf16.vlgmr.msrb.gmra.mxu2 %v15509_v35  ;;  %v10732_v51 = vor.u32 %v12872_v28, %v10731_v33  ;;  %v12856_v33 = vld [vmem:[#allocation10 + $0x66c] sm:$0xf0] }
 0x4d0   :  { %4207 = vmatpush.bf16.msra.mxu2 %v10480_v52  ;;  %4179 = vmatpush.bf16.msrb.mxu3 %v10224_v53  ;;  %v10796_v52 = vor.u32 %v12888_v42, %v10795_v0  ;;  %v10716_v53 = vor.u32 %v12868_v41, %v10715_v24  ;;  %v12866_v0 = vld [vmem:[#allocation10 + $0x6c4] sm:$0xf]  ;;  %v10717_v42 = vld [vmem:[#allocation10 + $0x6d0] sm:$0xf0]  ;;  %v12691_v24 = vld [vmem:[#allocation10 + $0x14c] sm:$0xf] }
 0x4d1   :  { %4165 = vmatpush.bf16.msra.mxu1 %v10476_v62  ;;  %v10397_v62 = vld [vmem:[#allocation10 + $0x1d8] sm:$0xf0] }
 0x4d2   :  { %4099 = vmatmul.bf16.vlgmr.msrb.gmra.mxu1 %v15509_v35  ;;  %v10400_v25 = vor.u32 %v12707_v37, %v10397_v62  ;;  %v10333_v41 = vld [vmem:[#allocation10 + $0x158] sm:$0xf0]  ;;  %v12816_v37 = vld [vmem:[#allocation10 + $0x52c] sm:$0xf0]  ;;  %v10701_v62 = vld [vmem:[#allocation10 + $0x6b0] sm:$0xf0] }
 0x4d3   :  { %4152 = vmatpush.bf16.msra.mxu0 %v10332_v10  ;;  %v10699_v10 = vld [vmem:[#allocation10 + $0x6a0] sm:$0xf] }
 0x4d4   :  { %4208 = vmatpush.bf16.msra.mxu2 %v10464_v8  ;;  %4180 = vmatpush.bf16.msrb.mxu3 %v10208_v34  ;;  %v10780_v8 = vor.u32 %v12884_v27, %v10779_v14  ;;  %v10700_v34 = vor.u32 %v12864_v55, %v10699_v10  ;;  %v10635_v14 = vld [vmem:[#allocation10 + $0x620] sm:$0xf]  ;;  %v12848_v27 = vld [vmem:[#allocation10 + $0x62c] sm:$0xf0]  ;;  %v10317_v55 = vld [vmem:[#allocation10 + $0x138] sm:$0xf0] }
 0x4d5   :  { %4166 = vmatpush.bf16.msra.mxu1 %v10460_v9  ;;  %v10381_v9 = vld [vmem:[#allocation10 + $0x1b8] sm:$0xf0] }
 0x4d6   :  { %v10384_v20 = vor.u32 %v12703_v2, %v10381_v9  ;;  %v10636_v2 = vor.u32 %v12848_v27, %v10635_v14  ;;  %v10685_v9 = vld [vmem:[#allocation10 + $0x690] sm:$0xf0]  ;;  %v10739_v27 = vld [vmem:[#allocation10 + $0x6e8] sm:$0xf] }
 0x4d7   :  { %4153 = vmatpush.bf16.msra.mxu0 %v10316_v49  ;;  %v10683_v49 = vld [vmem:[#allocation10 + $0x680] sm:$0xf]  ;;  %v10749_v14 = vld [vmem:[#allocation10 + $0x710] sm:$0xf0] }
 0x4d8   :  { %4209 = vmatpush.bf16.msra.mxu2 %v10448_v45  ;;  %4181 = vmatpush.bf16.msrb.mxu3 %v10192_v12  ;;  %v12699_v45 = vld [vmem:[#allocation10 + $0x18c] sm:$0xf]  ;;  %v10684_v17 = vor.u32 %v12860_v21, %v10683_v49  ;;  %v10733_v12 = vld [vmem:[#allocation10 + $0x6f0] sm:$0xf0]  ;;  %v10611_v49 = vld [vmem:[#allocation10 + $0x5e8] sm:$0xf] }
 0x4d9   :  { %4167 = vmatpush.bf16.msra.mxu1 %v10444_v39  ;;  %v10539_v39 = vld [vmem:[#allocation10 + $0x560] sm:$0xf]  ;;  %v10368_v28 = vor.u32 %v12699_v45, %v10365_v36  ;;  %v10736_v29 = vor.u32 %v12870_v50, %v10733_v12  ;;  %v12841_v21 = vld [vmem:[#allocation10 + $0x5f4] sm:$0xf0]  ;;  %v12683_v45 = vld [vmem:[#allocation10 + $0x10c] sm:$0xf] }
 0x4da   :  { %v10540_v61 = vor.u32 %v12824_v47, %v10539_v39  ;;  %v10301_v36 = vld [vmem:[#allocation10 + $0x118] sm:$0xf0]  ;;  %v10605_v39 = vld [vmem:[#allocation10 + $0x5f0] sm:$0xf0]  ;;  %v10612_v50 = vor.u32 %v12841_v21, %v10611_v49  ;;  %v12882_v12 = vld [vmem:[#allocation10 + $0x744] sm:$0xf] }
 0x4db   :  { %4154 = vmatpush.bf16.msra.mxu0 %v10300_v15  ;;  %v10748_v15 = vor.u32 %v12876_v44, %v10747_v3  ;;  %v10800_v3 = vor.u32 %v12886_v46, %v10797_v31  ;;  %v10669_v47 = vld [vmem:[#allocation10 + $0x670] sm:$0xf0]  ;;  %v10723_v49 = vld [vmem:[#allocation10 + $0x6c8] sm:$0xf] }
 0x4dc   :  { %4210 = vmatpush.bf16.msra.mxu2 %v10432_v5  ;;  %4182 = vmatpush.bf16.msrb.mxu3 %v10176_v40  ;;  %v10668_v5 = vor.u32 %v12856_v33, %v10667_v59  ;;  %v10720_v40 = vor.u32 %v12866_v0, %v10717_v42  ;;  %v10781_v59 = vld [vmem:[#allocation10 + $0x750] sm:$0xf0]  ;;  %v10304_v33 = vor.u32 %v12683_v45, %v10301_v36  ;;  %v12878_v42 = vld [vmem:[#allocation10 + $0x724] sm:$0xf]  ;;  %v12825_v45 = vld [vmem:[#allocation10 + $0x574] sm:$0xf0] }
 0x4dd   :  { %4168 = vmatpush.bf16.msra.mxu1 %v10428_v11  ;;  %v10651_v11 = vld [vmem:[#allocation10 + $0x640] sm:$0xf] }
 0x4de   :  { %4155 = vmatmul.bf16.vlgmr.msra.gmra.mxu0 %v15515_v30 }
 0x4df   :  { %4740 = vmatpush.bf16.msrb.mxu0 %v10604_v4  ;;  %4183 = vmatmul.bf16.vlgmr.msrb.gmra.mxu3 %v15509_v35  ;;  %v10556_v35 = vor.u32 %v12828_v18, %v10555_v60  ;;  %v10523_v4 = vld [vmem:[#allocation10 + $0x540] sm:$0xf]  ;;  %v12844_v60 = vld [vmem:[#allocation10 + $0x60c] sm:$0xf0]  ;;  %v10320_v18 = vor.u32 %v12687_v43, %v10317_v55  ;;  %v10563_v43 = vld [vmem:[#allocation10 + $0x588] sm:$0xf] }
 0x4e0   :  { %4754 = vmatpush.bf16.msrb.mxu2 %v10732_v51  ;;  %4772 = vmatpush.bf16.msra.mxu3 %v10796_v52  ;;  %v12852_v51 = vld [vmem:[#allocation10 + $0x64c] sm:$0xf0]  ;;  %v10524_v16 = vor.u32 %v12820_v57, %v10523_v4  ;;  %v10589_v4 = vld [vmem:[#allocation10 + $0x5d0] sm:$0xf0] }
 0x4e1   :  { %4189 = vmatpush.bf16.msrb.mxu1 %v10416_v54  ;;  %10484 = vmatmul.msk.bf16.vlgmr.msra.gmra.mxu2 %vm16554_vm0, %v15517_v7  ;;  %v10507_v54 = vld [vmem:[#allocation10 + $0x520] sm:$0xf]  ;;  %v10652_v52 = vor.u32 %v12852_v51, %v10651_v11  ;;  %v10653_v57 = vld [vmem:[#allocation10 + $0x650] sm:$0xf0]  ;;  %v10579_v51 = vld [vmem:[#allocation10 + $0x5a8] sm:$0xf] }
 0x4e2   :  { %10483 = vmatmul.msk.bf16.vlgmr.msra.gmra.mxu1 %vm16555_vm9, %v15517_v7  ;;  %v12695_v7 = vld [vmem:[#allocation10 + $0x16c] sm:$0xf]  ;;  %v10508_v58 = vor.u32 %v12816_v37, %v10507_v54  ;;  %v10765_v11 = vld [vmem:[#allocation10 + $0x730] sm:$0xf0]  ;;  %vm16568_vm0 = vcmask 1043456   ;;  %vm16569_vm9 = vcmask 1045506  }
 0x4e3   :  { %4741 = vmatpush.bf16.msrb.mxu0 %v10588_v56  ;;  %v10352_v23 = vor.u32 %v12695_v7, %v10349_v48  ;;  %v12862_v56 = vld [vmem:[#allocation10 + $0x6a4] sm:$0xf]  ;;  %v10784_v48 = vor.u32 %v12882_v12, %v10781_v59  ;;  %v10573_v54 = vld [vmem:[#allocation10 + $0x5b0] sm:$0xf0]  ;;  %v10597_v12 = vld [vmem:[#allocation10 + $0x5d8] sm:$0xf0] }
 0x4e4   :  { %4755 = vmatpush.bf16.msrb.mxu2 %v10716_v53  ;;  %4773 = vmatpush.bf16.msra.mxu3 %v10780_v8  ;;  %v10336_v53 = vor.u32 %v12691_v24, %v10333_v41  ;;  %v10704_v10 = vor.u32 %v12862_v56, %v10701_v62  ;;  %v12812_v8 = vld [vmem:[#allocation10 + $0x50c] sm:$0xf0]  ;;  %v12834_v7 = vld [vmem:[#allocation10 + $0x5c4] sm:$0xf]  ;;  %v10768_v41 = vor.u32 %v12878_v42, %v10765_v11  ;;  %v10637_v37 = vld [vmem:[#allocation10 + $0x630] sm:$0xf0] }
 0x4e5   :  { %4190 = vmatpush.bf16.msrb.mxu1 %v10400_v25  ;;  %v10491_v25 = vld [vmem:[#allocation10 + $0x500] sm:$0xf]  ;;  %v12830_v24 = vld [vmem:[#allocation10 + $0x5a4] sm:$0xf]  ;;  %v10707_v59 = vld [vmem:[#allocation10 + $0x6a8] sm:$0xf] }
 0x4e6   :  { %v12874_v62 = vld [vmem:[#allocation10 + $0x704] sm:$0xf] }
 0x4e7   :  { %4742 = vmatpush.bf16.msrb.mxu0 %v10572_v6  ;;  %v12858_v6 = vld [vmem:[#allocation10 + $0x684] sm:$0xf] }
 0x4e8   :  { %4756 = vmatpush.bf16.msrb.mxu2 %v10700_v34  ;;  %4774 = vmatpush.bf16.msra.mxu3 %v10764_v32  ;;  %v10619_v34 = vld [vmem:[#allocation10 + $0x600] sm:$0xf]  ;;  %v10688_v32 = vor.u32 %v12858_v6, %v10685_v9  ;;  %v12842_v6 = vld [vmem:[#allocation10 + $0x604] sm:$0xf]  ;;  %v10621_v9 = vld [vmem:[#allocation10 + $0x610] sm:$0xf0] }
 0x4e9   :  { %4191 = vmatpush.bf16.msrb.mxu1 %v10384_v20  ;;  %v10492_v20 = vor.u32 %v12812_v8, %v10491_v25  ;;  %v10620_v44 = vor.u32 %v12844_v60, %v10619_v34  ;;  %v12826_v25 = vld [vmem:[#allocation10 + $0x584] sm:$0xf]  ;;  %v10752_v8 = vor.u32 %v12874_v62, %v10749_v14  ;;  %v12839_v60 = vld [vmem:[#allocation10 + $0x5ec] sm:$0xf]  ;;  %v10509_v62 = vld [vmem:[#allocation10 + $0x530] sm:$0xf0] }
 0x4eb   :  { %4743 = vmatpush.bf16.msrb.mxu0 %v10556_v35  ;;  %v12838_v35 = vld [vmem:[#allocation10 + $0x5e4] sm:$0xf] }
 0x4ec   :  { %4757 = vmatpush.bf16.msrb.mxu2 %v10684_v17  ;;  %4775 = vmatpush.bf16.msra.mxu3 %v10748_v15  ;;  %v12854_v17 = vld [vmem:[#allocation10 + $0x664] sm:$0xf]  ;;  %v12837_v15 = vld [vmem:[#allocation10 + $0x5d4] sm:$0xf0] }
 0x4ed   :  { %4192 = vmatpush.bf16.msrb.mxu1 %v10368_v28  ;;  %v10595_v28 = vld [vmem:[#allocation10 + $0x5c8] sm:$0xf] }
 0x4ee   :  { %v10596_v0 = vor.u32 %v12837_v15, %v10595_v28  ;;  %v12865_v28 = vld [vmem:[#allocation10 + $0x6b4] sm:$0xf0]  ;;  %v10531_v15 = vld [vmem:[#allocation10 + $0x548] sm:$0xf] }
 0x4ef   :  { %4744 = vmatpush.bf16.msrb.mxu0 %v10540_v61  ;;  %10809 = vmatmul.msk.bf16.vlgmr.msra.gmra.mxu3 %vm16556_vm13, %v15534_v38  ;;  %v10608_v61 = vor.u32 %v12838_v35, %v10605_v39  ;;  %v10624_v35 = vor.u32 %v12842_v6, %v10621_v9  ;;  %v10541_v39 = vld [vmem:[#allocation10 + $0x570] sm:$0xf0]  ;;  %v10708_v11 = vor.u32 %v12865_v28, %v10707_v59  ;;  %v12887_v6 = vld [vmem:[#allocation10 + $0x76c] sm:$0xf]  ;;  %v10805_v9 = vld [vmem:[#allocation10 + $0x778] sm:$0xf0] }
 0x4f0   :  { %4796 = vmatpush.bf16.msrb.mxu3 %v10736_v29  ;;  %4758 = vmatpush.bf16.msrb.mxu2 %v10668_v5  ;;  %v10672_v29 = vor.u32 %v12854_v17, %v10669_v47  ;;  %v12850_v5 = vld [vmem:[#allocation10 + $0x644] sm:$0xf]  ;;  %v10787_v28 = vld [vmem:[#allocation10 + $0x748] sm:$0xf]  ;;  %vm16570_vm13 = vmmov %vm16568_vm0 }
 0x4f1   :  { %4193 = vmatpush.bf16.msrb.mxu1 %v10352_v23  ;;  %v12833_v23 = vld [vmem:[#allocation10 + $0x5b4] sm:$0xf0] }
 0x4f2   :  { %v10580_v56 = vor.u32 %v12833_v23, %v10579_v51  ;;  %v12831_v23 = vld [vmem:[#allocation10 + $0x5ac] sm:$0xf] }
 0x4f3   :  { %4745 = vmatpush.bf16.msrb.mxu0 %v10524_v16  ;;  %v10592_v16 = vor.u32 %v12834_v7, %v10589_v4 }
 0x4f4   :  { %4797 = vmatpush.bf16.msrb.mxu3 %v10720_v40  ;;  %4759 = vmatpush.bf16.msrb.mxu2 %v10652_v52  ;;  %v10656_v40 = vor.u32 %v12850_v5, %v10653_v57  ;;  %v12846_v52 = vld [vmem:[#allocation10 + $0x624] sm:$0xf]  ;;  %v10525_v57 = vld [vmem:[#allocation10 + $0x550] sm:$0xf0] }
 0x4f5   :  { %4194 = vmatpush.bf16.msrb.mxu1 %v10336_v53  ;;  %v12873_v53 = vld [vmem:[#allocation10 + $0x6f4] sm:$0xf0]  ;;  %v10640_v55 = vor.u32 %v12846_v52, %v10637_v37  ;;  %v12818_v5 = vld [vmem:[#allocation10 + $0x544] sm:$0xf] }
 0x4f6   :  { %v10740_v31 = vor.u32 %v12873_v53, %v10739_v27  ;;  %v10528_v52 = vor.u32 %v12818_v5, %v10525_v57  ;;  %v12827_v53 = vld [vmem:[#allocation10 + $0x58c] sm:$0xf]  ;;  %v10643_v5 = vld [vmem:[#allocation10 + $0x628] sm:$0xf]  ;;  %v12849_v57 = vld [vmem:[#allocation10 + $0x634] sm:$0xf0] }
 0x4f7   :  { %4746 = vmatpush.bf16.msrb.mxu0 %v10508_v58  ;;  %v12829_v58 = vld [vmem:[#allocation10 + $0x594] sm:$0xf0] }
 0x4f8   :  { %4798 = vmatpush.bf16.msrb.mxu3 %v10704_v10  ;;  %4760 = vmatpush.bf16.msrb.mxu2 %v10636_v2  ;;  %v10576_v10 = vor.u32 %v12830_v24, %v10573_v54  ;;  %v10557_v2 = vld [vmem:[#allocation10 + $0x590] sm:$0xf0]  ;;  %v10564_v34 = vor.u32 %v12829_v58, %v10563_v43  ;;  %v12861_v24 = vld [vmem:[#allocation10 + $0x694] sm:$0xf0]  ;;  %v10565_v43 = vld [vmem:[#allocation10 + $0x598] sm:$0xf0] }
 0x4f9   :  { %4195 = vmatpush.bf16.msrb.mxu1 %v10320_v18  ;;  %v10613_v18 = vld [vmem:[#allocation10 + $0x5f8] sm:$0xf0]  ;;  %v10560_v36 = vor.u32 %v12826_v25, %v10557_v2  ;;  %v12817_v54 = vld [vmem:[#allocation10 + $0x534] sm:$0xf0]  ;;  %v10675_v58 = vld [vmem:[#allocation10 + $0x668] sm:$0xf] }
 0x4fa   :  { %v10499_v25 = vld [vmem:[#allocation10 + $0x508] sm:$0xf] }
 0x4fb   :  { %4747 = vmatpush.bf16.msrb.mxu0 %v10492_v20  ;;  %v3486_v46 = vpop.f32.mrf.mxu1  ;;  %v12869_v20 = vld [vmem:[#allocation10 + $0x6d4] sm:$0xf0] }
 0x4fc   :  { %4799 = vmatpush.bf16.msrb.mxu3 %v10688_v32  ;;  %4761 = vmatpush.bf16.msrb.mxu2 %v10620_v44  ;;  %v10547_v32 = vld [vmem:[#allocation10 + $0x568] sm:$0xf]  ;;  %v12822_v44 = vld [vmem:[#allocation10 + $0x564] sm:$0xf]  ;;  %v10724_v17 = vor.u32 %v12869_v20, %v10723_v49  ;;  %v12889_v20 = vld [vmem:[#allocation10 + $0x774] sm:$0xf0] }
 0x4fd   :  { %4196 = vmatpush.bf16.msrb.mxu1 %v10304_v33  ;;  %v10548_v47 = vor.u32 %v12825_v45, %v10547_v32  ;;  %v10544_v7 = vor.u32 %v12822_v44, %v10541_v39  ;;  %v12823_v32 = vld [vmem:[#allocation10 + $0x56c] sm:$0xf]  ;;  %v10549_v45 = vld [vmem:[#allocation10 + $0x578] sm:$0xf0]  ;;  %v12853_v44 = vld [vmem:[#allocation10 + $0x654] sm:$0xf0]  ;;  %v10808_v39 = vor.u32 %v12887_v6, %v10805_v9 }
 0x4fe   :  { %4748 = vmatmul.bf16.vlgmr.msrb.gmra.mxu0 %v15536_v1  ;;  %v10755_v9 = vld [vmem:[#allocation10 + $0x708] sm:$0xf] }
 0x4ff   :  { %4814 = vmatpush.bf16.msra.mxu0 %v10800_v3  ;;  %4762 = vmatmul.bf16.vlgmr.msrb.gmra.mxu2 %v15538_v26  ;;  %v10616_v3 = vor.u32 %v12839_v60, %v10613_v18  ;;  %v10803_v60 = vld [vmem:[#allocation10 + $0x768] sm:$0xf] }
 0x500   :  { %4824 = vmatpush.bf16.msra.mxu2 %v10612_v50  ;;  %4800 = vmatpush.bf16.msrb.mxu3 %v10672_v29  ;;  %v12835_v50 = vld [vmem:[#allocation10 + $0x5cc] sm:$0xf]  ;;  %v3500_v33 = vpop.f32.mrf.mxu2  ;;  %v10804_v59 = vor.u32 %v12889_v20, %v10803_v60  ;;  %v10501_v60 = vld [vmem:[#allocation10 + $0x518] sm:$0xf0] }
 0x501   :  { %4782 = vmatpush.bf16.msra.mxu1 %v10608_v61  ;;  %v12821_v61 = vld [vmem:[#allocation10 + $0x554] sm:$0xf0]  ;;  %v10600_v4 = vor.u32 %v12835_v50, %v10597_v12  ;;  %v10789_v50 = vld [vmem:[#allocation10 + $0x758] sm:$0xf0] }
 0x502   :  { %4197 = vmatmul.bf16.vlgmr.msrb.gmra.mxu1 %v15515_v30  ;;  %v3472_v30 = vpop.f32.mrf.mxu0  ;;  %v10532_v51 = vor.u32 %v12821_v61, %v10531_v15  ;;  %v12885_v61 = vld [vmem:[#allocation10 + $0x754] sm:$0xf0] }
 0x503   :  { %4815 = vmatpush.bf16.msra.mxu0 %v10784_v48  ;;  %v3487_v21 = vadd.f32 %v3486_v46, %v3472_v30  ;;  %v3514_v48 = vpop.f32.mrf.mxu3  ;;  %v15560_v42 = vpop.f32.mrf.mxu1  ;;  %v10568_v46 = vor.u32 %v12827_v53, %v10565_v43  ;;  %v10627_v53 = vld [vmem:[#allocation10 + $0x608] sm:$0xf]  ;;  %v12845_v43 = vld [vmem:[#allocation10 + $0x614] sm:$0xf0] }
 0x504   :  { %4825 = vmatpush.bf16.msra.mxu2 %v10596_v0  ;;  %4801 = vmatpush.bf16.msrb.mxu3 %v10656_v40  ;;  %v10691_v40 = vld [vmem:[#allocation10 + $0x688] sm:$0xf]  ;;  %v10628_v6 = vor.u32 %v12845_v43, %v10627_v53  ;;  %v12843_v53 = vld [vmem:[#allocation10 + $0x60c] sm:$0xf]  ;;  %v10629_v43 = vld [vmem:[#allocation10 + $0x618] sm:$0xf0] }
 0x505   :  { %4783 = vmatpush.bf16.msra.mxu1 %v10592_v16  ;;  %v15556_v29 = vadd.f32 %v3500_v33, %v3487_v21  ;;  %v10581_v16 = vld [vmem:[#allocation10 + $0x5b8] sm:$0xf0]  ;;  %v10692_v14 = vor.u32 %v12861_v24, %v10691_v40  ;;  %v10552_v33 = vor.u32 %v12823_v32, %v10549_v45  ;;  %v10788_v40 = vor.u32 %v12885_v61, %v10787_v28 }
 0x506   :  { %v10584_v37 = vor.u32 %v12831_v23, %v10581_v16  ;;  %v10773_v23 = vld [vmem:[#allocation10 + $0x738] sm:$0xf0] }
 0x507   :  { %4816 = vmatpush.bf16.msra.mxu0 %v10768_v41  ;;  %v10515_v41 = vld [vmem:[#allocation10 + $0x528] sm:$0xf] }
 0x508   :  { %4826 = vmatpush.bf16.msra.mxu2 %v10580_v56  ;;  %4802 = vmatpush.bf16.msrb.mxu3 %v10640_v55  ;;  %v12814_v56 = vld [vmem:[#allocation10 + $0x524] sm:$0xf]  ;;  %v10516_v27 = vor.u32 %v12817_v54, %v10515_v41  ;;  %v12857_v55 = vld [vmem:[#allocation10 + $0x674] sm:$0xf0]  ;;  %v10771_v41 = vld [vmem:[#allocation10 + $0x728] sm:$0xf] }
 0x509   :  { %4784 = vmatpush.bf16.msra.mxu1 %v10576_v10  ;;  %v15565_v10 = vpop.f32.mrf.mxu2  ;;  %v10512_v2 = vor.u32 %v12814_v56, %v10509_v62  ;;  %v10676_v49 = vor.u32 %v12857_v55, %v10675_v58  ;;  %v12881_v56 = vld [vmem:[#allocation10 + $0x734] sm:$0xf0]  ;;  %v12815_v62 = vld [vmem:[#allocation10 + $0x52c] sm:$0xf] }
 0x50a   :  { %v15558_v0 = vpop.f32.mrf.mxu0  ;;  %v12875_v55 = vld [vmem:[#allocation10 + $0x70c] sm:$0xf] }
 0x50b   :  { %4817 = vmatpush.bf16.msra.mxu0 %v10752_v8  ;;  %v12813_v8 = vld [vmem:[#allocation10 + $0x514] sm:$0xf0]  ;;  %v15567_v30 = vpop.f32.mrf.mxu3 }
 0x50c   :  { %4827 = vmatpush.bf16.msra.mxu2 %v10564_v34  ;;  %4803 = vmatpush.bf16.msrb.mxu3 %v10624_v35  ;;  %v10493_v34 = vld [vmem:[#allocation10 + $0x510] sm:$0xf0]  ;;  %v10500_v21 = vor.u32 %v12813_v8, %v10499_v25  ;;  %v3542_v35 = vpop.f32.mrf.mxu1  ;;  %v10757_v25 = vld [vmem:[#allocation10 + $0x718] sm:$0xf0]  ;;  %v10772_v8 = vor.u32 %v12881_v56, %v10771_v41 }
 0x50d   :  { %4785 = vmatpush.bf16.msra.mxu1 %v10560_v36  ;;  %v10645_v56 = vld [vmem:[#allocation10 + $0x638] sm:$0xf0] }
 0x50e   :  { %10810 = vmatmul.msk.bf16.vlgmr.msra.gmra.mxu0 %vm16557_vm6, %v15534_v38  ;;  %vm16571_vm6 = vmmov %vm16569_vm9 }
 0x50f   :  { %4838 = vmatpush.bf16.msrb.mxu0 %v10740_v31  ;;  %4804 = vmatmul.bf16.vlgmr.msrb.gmra.mxu3 %v15538_v26  ;;  %v12810_v31 = vld [vmem:[#allocation10 + $0x504] sm:$0xf] }
 0x510   :  { %4866 = vmatpush.bf16.msra.mxu3 %v10616_v3  ;;  %4828 = vmatpush.bf16.msra.mxu2 %v10548_v47  ;;  %v10659_v3 = vld [vmem:[#allocation10 + $0x648] sm:$0xf]  ;;  %v12883_v47 = vld [vmem:[#allocation10 + $0x74c] sm:$0xf] }
 0x511   :  { %4786 = vmatpush.bf16.msra.mxu1 %v10544_v7  ;;  %v10660_v15 = vor.u32 %v12853_v44, %v10659_v3  ;;  %v12819_v7 = vld [vmem:[#allocation10 + $0x54c] sm:$0xf]  ;;  %v10725_v44 = vld [vmem:[#allocation10 + $0x6d8] sm:$0xf0] }
 0x512   :  { %v3528_v18 = vpop.f32.mrf.mxu0  ;;  %v12867_v3 = vld [vmem:[#allocation10 + $0x6cc] sm:$0xf] }
 0x513   :  { %4839 = vmatpush.bf16.msrb.mxu0 %v10724_v17  ;;  %v3529_v36 = vadd.f32 %v3528_v18, %v3514_v48  ;;  %v10496_v17 = vor.u32 %v12810_v31, %v10493_v34  ;;  %v10533_v48 = vld [vmem:[#allocation10 + $0x558] sm:$0xf0]  ;;  %v3570_v16 = vpop.f32.mrf.mxu3  ;;  %v12811_v31 = vld [vmem:[#allocation10 + $0x50c] sm:$0xf] }
 0x514   :  { %4867 = vmatpush.bf16.msra.mxu3 %v10600_v4  ;;  %4829 = vmatpush.bf16.msra.mxu2 %v10532_v51  ;;  %v3556_v4 = vpop.f32.mrf.mxu2  ;;  %v12879_v51 = vld [vmem:[#allocation10 + $0x72c] sm:$0xf]  ;;  %v10536_v24 = vor.u32 %v12819_v7, %v10533_v48  ;;  %v10504_v45 = vor.u32 %v12811_v31, %v10501_v60  ;;  %v10693_v48 = vld [vmem:[#allocation10 + $0x698] sm:$0xf0] }
 0x515   :  { %4787 = vmatpush.bf16.msra.mxu1 %v10528_v52  ;;  %v15569_v12 = vadd.f32 %v3542_v35, %v3529_v36  ;;  %v3571_v54 = vadd.f32 %v3570_v16, %v3556_v4  ;;  %v10776_v58 = vor.u32 %v12879_v51, %v10773_v23  ;;  %v12871_v18 = vld [vmem:[#allocation10 + $0x6ec] sm:$0xf] }
 0x516   :  { %v12859_v7 = vld [vmem:[#allocation10 + $0x68c] sm:$0xf] }
 0x517   :  { %4840 = vmatpush.bf16.msrb.mxu0 %v10708_v11  ;;  %v10792_v11 = vor.u32 %v12883_v47, %v10789_v50  ;;  %v10728_v47 = vor.u32 %v12867_v3, %v10725_v44  ;;  %v12863_v50 = vld [vmem:[#allocation10 + $0x6ac] sm:$0xf] }
 0x518   :  { %4868 = vmatpush.bf16.msra.mxu3 %v10584_v37  ;;  %4830 = vmatpush.bf16.msra.mxu2 %v10516_v27  ;;  %v10644_v37 = vor.u32 %v12849_v57, %v10643_v5  ;;  %v15575_v27 = vpop.f32.mrf.mxu1  ;;  %v10696_v57 = vor.u32 %v12859_v7, %v10693_v48 }
 0x519   :  { %4788 = vmatpush.bf16.msra.mxu1 %v10512_v2 }
 0x51a   :  { %v15572_v52 = vpop.f32.mrf.mxu0 }
 0x51b   :  { %4841 = vmatpush.bf16.msrb.mxu0 %v10692_v14  ;;  %v10517_v14 = vld [vmem:[#allocation10 + $0x538] sm:$0xf0]  ;;  %v15579_v20 = vpop.f32.mrf.mxu3 }
 0x51c   :  { %4869 = vmatpush.bf16.msra.mxu3 %v10568_v46  ;;  %4831 = vmatpush.bf16.msra.mxu2 %v10500_v21  ;;  %v10520_v2 = vor.u32 %v12815_v62, %v10517_v14  ;;  %v12877_v46 = vld [vmem:[#allocation10 + $0x714] sm:$0xf0]  ;;  %v15577_v34 = vpop.f32.mrf.mxu2  ;;  %v10760_v21 = vor.u32 %v12875_v55, %v10757_v25  ;;  %v10632_v55 = vor.u32 %v12843_v53, %v10629_v43 }
 0x51d   :  { %4789 = vmatpush.bf16.msra.mxu1 %v10496_v17  ;;  %v10756_v32 = vor.u32 %v12877_v46, %v10755_v9 }
 0x51f   :  { %4842 = vmatpush.bf16.msrb.mxu0 %v10676_v49  ;;  %4832 = vmatmul.bf16.vlgmr.msra.gmra.mxu2 %v15536_v1  ;;  %v10741_v49 = vld [vmem:[#allocation10 + $0x6f8] sm:$0xf0] }
 0x520   :  { %4898 = vmatpush.bf16.msrb.mxu2 %v10808_v39  ;;  %4870 = vmatpush.bf16.msra.mxu3 %v10552_v33  ;;  %v10744_v36 = vor.u32 %v12871_v18, %v10741_v49  ;;  %v3584_v35 = vpop.f32.mrf.mxu1 }
 0x521   :  { %4856 = vmatpush.bf16.msrb.mxu1 %v10804_v59  ;;  %v15581_v39 = vadd.f32 %v3584_v35, %v3571_v54  ;;  %v10709_v59 = vld [vmem:[#allocation10 + $0x6b8] sm:$0xf0] }
 0x522   :  { %4790 = vmatmul.bf16.vlgmr.msra.gmra.mxu1 %v15536_v1  ;;  %v3598_v17 = vpop.f32.mrf.mxu0  ;;  %v10712_v28 = vor.u32 %v12863_v50, %v10709_v59 }
 0x523   :  { %4843 = vmatpush.bf16.msrb.mxu0 %v10660_v15  ;;  %v4058_v15 = vpop.f32.mrf.mxu3 }
 0x524   :  { %4899 = vmatpush.bf16.msrb.mxu2 %v10792_v11  ;;  %4871 = vmatpush.bf16.msra.mxu3 %v10536_v24  ;;  %v3626_v33 = vpop.f32.mrf.mxu2  ;;  %v4059_v4 = vadd.f32 %v4058_v15, %v15556_v29  ;;  %v10677_v11 = vld [vmem:[#allocation10 + $0x678] sm:$0xf0] }
 0x525   :  { %4857 = vmatpush.bf16.msrb.mxu1 %v10788_v40  ;;  %v12851_v40 = vld [vmem:[#allocation10 + $0x64c] sm:$0xf]  ;;  %v10661_v24 = vld [vmem:[#allocation10 + $0x658] sm:$0xf0] }
 0x526   :  { %v10664_v41 = vor.u32 %v12851_v40, %v10661_v24  ;;  %v15631_v24 = vld [vmem:[#allocation11] sm:$0xf] }
 0x527   :  { %4844 = vmatpush.bf16.msrb.mxu0 %v10644_v37  ;;  %v12847_v37 = vld [vmem:[#allocation10 + $0x62c] sm:$0xf] }
 0x528   :  { %4900 = vmatpush.bf16.msrb.mxu2 %v10776_v58  ;;  %4872 = vmatpush.bf16.msra.mxu3 %v10520_v2  ;;  %v15589_v61 = vpop.f32.mrf.mxu1  ;;  %v10648_v14 = vor.u32 %v12847_v37, %v10645_v56 }
 0x529   :  { %4858 = vmatpush.bf16.msrb.mxu1 %v10772_v8 }
 0x52a   :  { %v15592_v5 = vpop.f32.mrf.mxu0 }
 0x52b   :  { %4845 = vmatpush.bf16.msrb.mxu0 %v10628_v6  ;;  %v15603_v6 = vpop.f32.mrf.mxu3 }
 0x52c   :  { %4901 = vmatpush.bf16.msrb.mxu2 %v10760_v21  ;;  %4873 = vmatpush.bf16.msra.mxu3 %v10504_v45  ;;  %v15594_v51 = vpop.f32.mrf.mxu2 }
 0x52d   :  { %4859 = vmatpush.bf16.msrb.mxu1 %v10756_v32 }
 0x52e   :  { %4846 = vmatmul.bf16.vlgmr.msrb.gmra.mxu0 %v15538_v26 }
 0x52f   :  { %4874 = vmatmul.bf16.vlgmr.msra.gmra.mxu3 %v15536_v1  ;;  %10812 = vmatmul.msk.bf16.vlgmr.msrb.gmra.mxu2 %vm16558_vm3, %v15534_v38  ;;  %v12855_v1 = vld [vmem:[#allocation10 + $0x66c] sm:$0xf]  ;;  %vm16572_vm3 = vmmov %vm16563_vm8 }
 0x530   :  { %v10680_v23 = vor.u32 %v12855_v1, %v10677_v11  ;;  %v3612_v16 = vpop.f32.mrf.mxu1 }
 0x531   :  { %4880 = vmatpush.bf16.msra.mxu1 %v10744_v36 }
 0x532   :  { %10811 = vmatmul.msk.bf16.vlgmr.msrb.gmra.mxu1 %vm16559_vm11, %v15534_v38  ;;  %v3613_v38 = vadd.f32 %v3612_v16, %v3598_v17  ;;  %v4086_v54 = vpop.f32.mrf.mxu0  ;;  %vm16573_vm11 = vmmov %vm16567_vm1 }
 0x534   :  { %v4072_v29 = vpop.f32.mrf.mxu2  ;;  %v15598_v8 = vadd.f32 %v3626_v33, %v3613_v38 }
 0x535   :  { %4881 = vmatpush.bf16.msra.mxu1 %v10728_v47  ;;  %v4073_v62 = vadd.f32 %v4072_v29, %v4059_v4  ;;  %v4918_v29 = vperm.slane %v15631_v24, 0 }
 0x537   :  { %v4087_v58 = vadd.f32 %v4086_v54, %v4073_v62 }
 0x538   :  { %v15601_v2 = vpop.f32.mrf.mxu1 }
 0x539   :  { %4882 = vmatpush.bf16.msra.mxu1 %v10712_v28 }
 0x53a   :  { %v15596_v25 = vpop.f32.mrf.mxu0 }
 0x53c   :  { %v15606_v18 = vpop.f32.mrf.mxu2 }
 0x53d   :  { %4883 = vmatpush.bf16.msra.mxu1 %v10696_v57 }
 0x541   :  { %4884 = vmatpush.bf16.msra.mxu1 %v10680_v23 }
 0x542   :  { %v4128_v9 = vpop.f32.mrf.mxu0  ;;  %v4114_v60 = vpop.f32.mrf.mxu3 }
 0x545   :  { %4885 = vmatpush.bf16.msra.mxu1 %v10664_v41 }
 0x549   :  { %4886 = vmatpush.bf16.msra.mxu1 %v10648_v14  ;;  %v4919_v14 = vperm.slane %v15631_v24, 1 }
 0x54a   :  { %v15608_v21 = vpop.f32.mrf.mxu0  ;;  %v15611_v47 = vpop.f32.mrf.mxu3 }
 0x54d   :  { %4887 = vmatpush.bf16.msra.mxu1 %v10632_v55 }
 0x54f   :  { %v4100_v46 = vpop.f32.mrf.mxu1 }
 0x550   :  { %4888 = vmatmul.bf16.vlgmr.msra.gmra.mxu1 %v15538_v26  ;;  %v4101_v31 = vadd.f32 %v4100_v46, %v15569_v12 }
 0x552   :  { %v4115_v49 = vadd.f32 %v4114_v60, %v4101_v31  ;;  %v4142_v36 = vpop.f32.mrf.mxu2 }
 0x553   :  { %v4143_v26 = vadd.f32 %v4142_v36, %v15581_v39 }
 0x554   :  { %v4129_v32 = vadd.f32 %v4128_v9, %v4115_v49 }
 0x557   :  { %v4102_v45 = vpop.f32.mrf.mxu1 }
 0x55a   :  { %v15613_v59 = vpop.f32.mrf.mxu2 }
 0x55b   :  { %v4156_v35 = vpop.f32.mrf.mxu0 }
 0x55c   :  { %v4157_v3 = vadd.f32 %v4156_v35, %v4143_v26 }
 0x55f   :  { %v4170_v44 = vpop.f32.mrf.mxu1 }
 0x560   :  { %v4171_v17 = vadd.f32 %v4170_v44, %v4157_v3 }
 0x562   :  { %v4184_v50 = vpop.f32.mrf.mxu3 }
 0x563   :  { %v15617_v33 = vpop.f32.mrf.mxu0 }
 0x564   :  { %v15619_v28 = vpop.f32.mrf.mxu2 }
 0x567   :  { %v15621_v15 = vpop.f32.mrf.mxu1 }
 0x56a   :  { %v15615_v12 = vpop.f32.mrf.mxu3 }
 0x56c   :  { %v15623_v39 = vpop.f32.mrf.mxu2 }
 0x572   :  { %v4777_v7 = vpop.f32.mrf.mxu3 }
 0x57a   :  { %v15625_v57 = vpop.f32.mrf.mxu3 }
 0x57b   :  { %v4749_v48 = vpop.f32.mrf.mxu0 }
 0x57f   :  { %v4198_v4 = vpop.f32.mrf.mxu1 }
 0x582   :  { %v4763_v11 = vpop.f32.mrf.mxu2 }
 0x583   :  { %v15627_v1 = vpop.f32.mrf.mxu0  ;;  %v4764_v16 = vadd.f32 %v4763_v11, %v4749_v48 }
 0x585   :  { %v4778_v40 = vadd.f32 %v4777_v7, %v4764_v16  ;;  %v3531_v16 = vadd.f32 %v15572_v52, %v15567_v30 }
 0x587   :  { %v15629_v23 = vpop.f32.mrf.mxu1  ;;  %v4908_v56 = vadd.f32 %v4778_v40, %v4087_v58 }
 0x589   :  { %v4926_v43 = vadd.f32 %v4918_v29, %v4908_v56  ;;  %v4185_v56 = vadd.f32 %v4184_v50, %v15598_v8 }
 0x58a   :  { %v4765_v36 = vpop.f32.mrf.mxu2 }
 0x58b   :  { %v4819_v37 = vpop.f32.mrf.mxu0  ;;  %v4934_v46 = vmax.f32 %v4926_v43, 0.0  ;;  %v4199_v52 = vadd.f32 %v4198_v4, %v4185_v56 }
 0x592   :  { %v4805_v38 = vpop.f32.mrf.mxu3 }
 0x593   :  { %v4821_v3 = vpop.f32.mrf.mxu0 }
 0x59a   :  { %v4807_v48 = vpop.f32.mrf.mxu3 }
 0x59f   :  { %v4791_v41 = vpop.f32.mrf.mxu1 }
 0x5a0   :  { %v4806_v54 = vadd.f32 %v4805_v38, %v4791_v41 }
 0x5a2   :  { %v4820_v62 = vadd.f32 %v4819_v37, %v4806_v54  ;;  %v4833_v26 = vpop.f32.mrf.mxu2  ;;  %v3545_v54 = vadd.f32 %v15575_v27, %v3531_v16  ;;  %v3489_v37 = vadd.f32 %v15560_v42, %v15558_v0 }
 0x5a4   :  { %v4909_v53 = vadd.f32 %v4820_v62, %v4129_v32  ;;  %v3573_v62 = vadd.f32 %v15579_v20, %v15577_v34  ;;  %v4103_v43 = vadd.f32 %v4102_v45, %v3545_v54  ;;  %v3503_v30 = vadd.f32 %v15565_v10, %v3489_v37 }
 0x5a5   :  { %v4213_v45 = vadd.f32 %v15619_v28, %v4199_v52 }
 0x5a6   :  { %v4927_v55 = vadd.f32 %v4919_v14, %v4909_v53  ;;  %v3615_v53 = vadd.f32 %v15601_v2, %v15592_v5  ;;  %v4061_v50 = vadd.f32 %v15603_v6, %v3503_v30  ;;  %v4117_v20 = vadd.f32 %v15611_v47, %v4103_v43 }
 0x5a7   :  { %v4793_v35 = vpop.f32.mrf.mxu1 }
 0x5a8   :  { %v4935_v9 = vmax.f32 %v4927_v55, 0.0  ;;  %v4808_v0 = vadd.f32 %v4807_v48, %v4793_v35  ;;  %v3629_v2 = vadd.f32 %v15594_v51, %v3615_v53  ;;  %v4766_v35 = vadd.f32 %v4765_v36, %v15627_v1 }
 0x5a9   :  { %v4075_v47 = vadd.f32 %v15606_v18, %v4061_v50 }
 0x5aa   :  { %v4950_v31 = vrot.slane %v4935_v9, 6  ;;  %v4835_v11 = vpop.f32.mrf.mxu2  ;;  %v4187_v48 = vadd.f32 %v15615_v12, %v3629_v2 }
 0x5ab   :  { %v4847_v7 = vpop.f32.mrf.mxu0  ;;  %v4089_v18 = vadd.f32 %v15596_v25, %v4075_v47 }
 0x5ac   :  { %v15640_v60 = vsel %vm16560_vm15, %v4934_v46, %v4950_v31  ;;  %v15643_v58 = vsel %vm16561_vm7, %v4934_v46, %v4950_v31  ;;  %v15646_v49 = vsel %vm16562_vm5, %v4934_v46, %v4950_v31  ;;  %v15649_v32 = vsel %vm16563_vm8, %v4950_v31, %v4934_v46  ;;  %vm16574_vm15 = vmmov %vm16571_vm6 }
 0x5ad   :  { %v4848_v38 = vadd.f32 %v4847_v7, %v4833_v26  ;;  %v4920_v46 = vperm.slane %v15631_v24, 2  ;;  %v3587_v31 = vadd.f32 %v15589_v61, %v3573_v62  ;;  %v4921_v26 = vperm.slane %v15631_v24, 3  ;;  %vm16575_vm7 = vmmov %vm16566_vm4 }
 0x5ae   :  { %v4201_v16 = vadd.f32 %v15629_v23, %v4187_v48  ;;  %vm16576_vm5 = vmmov %vm16566_vm4 }
 0x5af   :  { %v4861_v44 = vpop.f32.mrf.mxu1  ;;  %v4145_v5 = vadd.f32 %v15613_v59, %v3587_v31  ;;  %v4131_v59 = vadd.f32 %v15608_v21, %v4117_v20  ;;  %vm16577_vm8 = vmmov %vm16566_vm4 }
 0x5b0   :  { %v4862_v41 = vadd.f32 %v4861_v44, %v4848_v38  ;;  %v4822_v44 = vadd.f32 %v4821_v3, %v4808_v0  ;;  %v4780_v38 = vadd.f32 %v15625_v57, %v4766_v35  ;;  %v4215_v12 = vadd.f32 %v15623_v39, %v4201_v16 }
 0x5b1   :  { %v4159_v61 = vadd.f32 %v15617_v33, %v4145_v5 }
 0x5b2   :  { %v4875_v55 = vpop.f32.mrf.mxu3  ;;  %v4910_v9 = vadd.f32 %v4862_v41, %v4171_v17  ;;  %v4903_v42 = vpop.f32.mrf.mxu2  ;;  %v4913_v33 = vadd.f32 %v4822_v44, %v4131_v59  ;;  %v4912_v56 = vadd.f32 %v4780_v38, %v4089_v18 }
 0x5b3   :  { %v4849_v27 = vpop.f32.mrf.mxu0  ;;  %v4173_v51 = vadd.f32 %v15621_v15, %v4159_v61 }
 0x5b4   :  { %v4850_v10 = vadd.f32 %v4849_v27, %v4835_v11  ;;  %v4928_v17 = vadd.f32 %v4920_v46, %v4910_v9  ;;  %v4931_v23 = vadd.f32 %v4919_v14, %v4913_v33 }
 0x5b6   :  { %v4936_v28 = vmax.f32 %v4928_v17, 0.0  ;;  %v4939_v27 = vmax.f32 %v4931_v23, 0.0 }
 0x5b7   :  { %v4863_v40 = vpop.f32.mrf.mxu1 }
 0x5b8   :  { %v4864_v6 = vadd.f32 %v4863_v40, %v4850_v10  ;;  %v4951_v21 = vrot.slane %v4936_v28, 4 }
 0x5ba   :  { %v4914_v41 = vadd.f32 %v4864_v6, %v4173_v51  ;;  %v4877_v1 = vpop.f32.mrf.mxu3  ;;  %v4905_v54 = vpop.f32.mrf.mxu2 }
 0x5bc   :  { %v4932_v62 = vadd.f32 %v4920_v46, %v4914_v41  ;;  %v4930_v46 = vadd.f32 %v4918_v29, %v4912_v56 }
 0x5be   :  { %v4940_v31 = vmax.f32 %v4932_v62, 0.0 }
 0x5cd   :  { %v4889_v8 = vpop.f32.mrf.mxu1 }
 0x5ce   :  { %v4890_v34 = vadd.f32 %v4889_v8, %v4875_v55  ;;  %v4953_v8 = vrot.slane %v4939_v27, 6 }
 0x5d0   :  { %v4904_v4 = vadd.f32 %v4903_v42, %v4890_v34  ;;  %v4938_v42 = vmax.f32 %v4930_v46, 0.0 }
 0x5d2   :  { %v4911_v7 = vadd.f32 %v4904_v4, %v4213_v45  ;;  %v4974_v17 = vsel %vm16573_vm11, %v4938_v42, %v4953_v8 }
 0x5d4   :  { %v4929_v11 = vadd.f32 %v4921_v26, %v4911_v7 }
 0x5d5   :  { %v4891_v36 = vpop.f32.mrf.mxu1 }
 0x5d6   :  { %v4937_v3 = vmax.f32 %v4929_v11, 0.0  ;;  %v4892_v40 = vadd.f32 %v4891_v36, %v4877_v1 }
 0x5d8   :  { %v4952_v37 = vrot.slane %v4937_v3, 2  ;;  %v4906_v15 = vadd.f32 %v4905_v54, %v4892_v40 }
 0x5da   :  { %v4957_v57 = vsel %vm16564_vm10, %v4951_v21, %v4952_v37  ;;  %v4960_v53 = vsel %vm16565_vm14, %v4952_v37, %v4951_v21  ;;  %v4964_v43 = vsel %vm16566_vm4, %v4951_v21, %v4952_v37  ;;  %v4968_v55 = vsel %vm16567_vm1, %v4951_v21, %v4952_v37  ;;  %vm16578_vm10 = vmmov %vm16566_vm4 }
 0x5db   :  { %v4958_v25 = vsel %vm16568_vm0, %v15640_v60, %v4957_v57  ;;  %v4961_v30 = vsel %vm16569_vm9, %v15643_v58, %v4960_v53  ;;  %v4965_v39 = vsel %vm16570_vm13, %v4964_v43, %v15646_v49  ;;  %v4969_v14 = vsel %vm16571_vm6, %v4968_v55, %v15649_v32  ;;  %vm16579_vm14 = vmmov %vm16566_vm4 }
 0x5dc   :  { %v4962_v52 = vrot.slane %v4961_v30, 2  ;;  %4986 = vst [vmem:[#allocation1] ss:$4 sm:$0xff] %v4958_v25  ;;  %v4915_v9 = vadd.f32 %v4906_v15, %v4215_v12  ;;  %v4954_v58 = vrot.slane %v4940_v31, 4  ;;  %v4966_v50 = vrot.slane %v4965_v39, 4  ;;  %vm16580_vm1 = vmmov %vm16566_vm4 }
 0x5dd   :  { %v4970_v24 = vrot.slane %v4969_v14, 6  ;;  %vm16581_vm0 = vcmask 1045508   ;;  %vm16582_vm9 = vmmov %vm16580_vm1 }
 0x5de   :  { %4992 = vst [vmem:[#allocation1 + $0x20] ss:$4 sm:$0xff] %v4962_v52  ;;  %v4933_v0 = vadd.f32 %v4921_v26, %v4915_v9  ;;  %vm16583_vm13 = vmmov %vm16580_vm1 }
 0x5df   :  { %vm16584_vm6 = vmmov %vm16573_vm11 }
 0x5e0   :  { %v4941_v60 = vmax.f32 %v4933_v0, 0.0  ;;  %vm16586_vm11 = vmmov %vm16581_vm0 }
 0x5e1   :  { %v4978_v37 = vsel %vm16586_vm11, %v4938_v42, %v4953_v8 }
 0x5e2   :  { %v4955_v34 = vrot.slane %v4941_v60, 2 }
 0x5e3   :  { %v4987_v49 = vld.sshfl [vmem:[#allocation1] sm:$0xff pattern:$0x73625140]  ;;  %v4988_v20 = vld.sshfl [vmem:[#allocation1 + $0x8] sm:$0xff pattern:$0x73625140] }
 0x5e4   :  { %v4989_v5 = vld.sshfl [vmem:[#allocation1 + $0x10] sm:$0xff pattern:$0x73625140]  ;;  %v4990_v32 = vld.sshfl [vmem:[#allocation1 + $0x18] sm:$0xff pattern:$0x73625140]  ;;  %v4975_v2 = vsel %vm16572_vm3, %v4955_v34, %v4954_v58  ;;  %v4972_v51 = vsel %vm16581_vm0, %v4954_v58, %v4955_v34  ;;  %v4979_v28 = vsel %vm16582_vm9, %v4954_v58, %v4955_v34  ;;  %v4983_v40 = vsel %vm16584_vm6, %v4954_v58, %v4955_v34  ;;  %vm16585_vm3 = vmmov %vm16580_vm1 }
 0x5e5   :  { %v4993_v10 = vld.sshfl [vmem:[#allocation1 + $0x20] sm:$0xff pattern:$0x73625140]  ;;  %v4994_v45 = vld.sshfl [vmem:[#allocation1 + $0x28] sm:$0xff pattern:$0x73625140]  ;;  %v4976_v26 = vsel %vm16574_vm15, %v4974_v17, %v4975_v2  ;;  %v4971_v21 = vsel %vm16585_vm3, %v4938_v42, %v4953_v8  ;;  %vm16594_vm0 = vmmov %vm16580_vm1 }
 0x5e6   :  { %v4995_v29 = vld.sshfl [vmem:[#allocation1 + $0x30] sm:$0xff pattern:$0x73625140]  ;;  %v4996_v4 = vld.sshfl [vmem:[#allocation1 + $0x38] sm:$0xff pattern:$0x73625140]  ;;  %vm16595_vm9 = vmmov %vm16594_vm0 }
 0x5e7   :  { %4997 = vst [vmem:[#allocation1] ss:$4 sm:$0xff] %v4966_v50  ;;  %v5059_v61 = vsel %vm16575_vm7, %v4987_v49, -inf  ;;  %v5066_v35 = vsel %vm16576_vm5, %v4988_v20, -inf  ;;  %v5073_v44 = vsel %vm16577_vm8, %v4989_v5, -inf  ;;  %v5080_v6 = vsel %vm16578_vm10, %v4990_v32, -inf  ;;  %vm16591_vm10 = vmmov %vm16580_vm1 }
 0x5e8   :  { %5002 = vst [vmem:[#allocation1 + $0x20] ss:$4 sm:$0xff] %v4970_v24  ;;  %v5087_v7 = vsel %vm16579_vm14, %v4993_v10, -inf  ;;  %v5094_v47 = vsel %vm16566_vm4, %v4994_v45, -inf  ;;  %v5101_v59 = vsel %vm16580_vm1, %v4995_v29, -inf  ;;  %v4977_v48 = vrot.slane %v4976_v26, 2  ;;  %vm16592_vm14 = vmmov %vm16580_vm1 }
 0x5e9   :  { %v5060_v11 = vrot.slane %v5059_v61, 4  ;;  %v5067_v16 = vrot.slane %v5066_v35, 4  ;;  %v5074_v38 = vrot.slane %v5073_v44, 4  ;;  %v5081_v33 = vrot.slane %v5080_v6, 4  ;;  %vm16593_vm4 = vmmov %vm16580_vm1 }
 0x5ea   :  { %v5088_v41 = vrot.slane %v5087_v7, 4  ;;  %v5095_v1 = vrot.slane %v5094_v47, 4  ;;  %v5102_v36 = vrot.slane %v5101_v59, 4  ;;  %v5108_v3 = vsel %vm16583_vm13, %v4996_v4, -inf  ;;  %vm16596_vm13 = vmmov %vm16594_vm0 }
 0x5eb   :  { %vm16587_vm15 = vcmask 1045504   ;;  %vm16588_vm7 = vcmask 1043456   ;;  %v5061_v43 = vmax.f32 %v5059_v61, %v5060_v11  ;;  %vm16590_vm8 = vcmask 1045506   ;;  %vm16597_vm6 = vmmov %vm16594_vm0 }
 0x5ec   :  { %v4982_v56 = vsel %vm16587_vm15, %v4953_v8, %v4938_v42  ;;  %v4973_v23 = vsel %vm16588_vm7, %v4971_v21, %v4972_v51  ;;  %vm16589_vm5 = vmmov %vm16588_vm7  ;;  %v5068_v39 = vmax.f32 %v5066_v35, %v5067_v16  ;;  %v5075_v14 = vmax.f32 %v5073_v44, %v5074_v38 }
 0x5ed   :  { %v4980_v62 = vsel %vm16589_vm5, %v4979_v28, %v4978_v37  ;;  %v4984_v55 = vsel %vm16590_vm8, %v4983_v40, %v4982_v56  ;;  %v5082_v52 = vmax.f32 %v5080_v6, %v5081_v33  ;;  %v5089_v9 = vmax.f32 %v5087_v7, %v5088_v41  ;;  %vm16598_vm3 = vmmov %vm16594_vm0 }
 0x5ee   :  { %v4998_v18 = vld.sshfl [vmem:[#allocation1] sm:$0xff pattern:$0x73625140]  ;;  %v4999_v54 = vld.sshfl [vmem:[#allocation1 + $0x8] sm:$0xff pattern:$0x73625140]  ;;  %v5096_v46 = vmax.f32 %v5094_v47, %v5095_v1  ;;  %v5103_v27 = vmax.f32 %v5101_v59, %v5102_v36  ;;  %vm16599_vm11 = vmmov %vm16594_vm0 }
 0x5ef   :  { %v5000_v15 = vld.sshfl [vmem:[#allocation1 + $0x10] sm:$0xff pattern:$0x73625140]  ;;  %v5001_v12 = vld.sshfl [vmem:[#allocation1 + $0x18] sm:$0xff pattern:$0x73625140]  ;;  %vm16600_vm15 = vmmov %vm16594_vm0 }
 0x5f0   :  { %v5003_v57 = vld.sshfl [vmem:[#allocation1 + $0x20] sm:$0xff pattern:$0x73625140]  ;;  %v5004_v53 = vld.sshfl [vmem:[#allocation1 + $0x28] sm:$0xff pattern:$0x73625140]  ;;  %vm16601_vm7 = vmmov %vm16594_vm0 }
 0x5f1   :  { %v5005_v25 = vld.sshfl [vmem:[#allocation1 + $0x30] sm:$0xff pattern:$0x73625140]  ;;  %v15716_v30 = vld.sshfl [vmem:[#allocation1 + $0x38] sm:$0xff pattern:$0x73625140]  ;;  %vm16602_vm5 = vmmov %vm16594_vm0 }
 0x5f2   :  { %5007 = vst [vmem:[#allocation1] ss:$4 sm:$0xff] %v4973_v23  ;;  %v5109_v31 = vrot.slane %v5108_v3, 4  ;;  %v4981_v0 = vrot.slane %v4980_v62, 4  ;;  %v4985_v60 = vrot.slane %v4984_v55, 6  ;;  %v5062_v42 = vrot.slane %v5061_v43, 2  ;;  %vm16603_vm8 = vmmov %vm16594_vm0 }
 0x5f3   :  { %5012 = vst [vmem:[#allocation1 + $0x20] ss:$4 sm:$0xff] %v4977_v48  ;;  %v5069_v8 = vrot.slane %v5068_v39, 2  ;;  %v5076_v58 = vrot.slane %v5075_v14, 2  ;;  %v5083_v50 = vrot.slane %v5082_v52, 2  ;;  %v5115_v49 = vsel %vm16591_vm10, %v4998_v18, -inf  ;;  %vm16604_vm10 = vmmov %vm16594_vm0 }
 0x5f4   :  { %v5110_v34 = vmax.f32 %v5108_v3, %v5109_v31  ;;  %v5122_v20 = vsel %vm16592_vm14, %v4999_v54, -inf  ;;  %v5129_v5 = vsel %vm16593_vm4, %v5000_v15, -inf  ;;  %v5136_v32 = vsel %vm16580_vm1, %v5001_v12, -inf  ;;  %vm16605_vm14 = vmmov %vm16594_vm0 }
 0x5f5   :  { %v5090_v2 = vrot.slane %v5089_v9, 2  ;;  %v5097_v10 = vrot.slane %v5096_v46, 2  ;;  %v5104_v45 = vrot.slane %v5103_v27, 2  ;;  %v5116_v29 = vrot.slane %v5115_v49, 4  ;;  %vm16606_vm4 = vmmov %vm16594_vm0 }
 0x5f6   :  { %v5111_v24 = vrot.slane %v5110_v34, 2  ;;  %v5123_v17 = vrot.slane %v5122_v20, 4  ;;  %v5130_v4 = vrot.slane %v5129_v5, 4  ;;  %v5137_v26 = vrot.slane %v5136_v32, 4  ;;  %vm16607_vm1 = vmmov %vm16594_vm0 }
 0x5f7   :  { %v5117_v7 = vmax.f32 %v5115_v49, %v5116_v29  ;;  %v5063_v11 = vmax.f32 %v5061_v43, %v5062_v42  ;;  %v5070_v16 = vmax.f32 %v5068_v39, %v5069_v8  ;;  %v5077_v38 = vmax.f32 %v5075_v14, %v5076_v58 }
 0x5f8   :  { %v5124_v47 = vmax.f32 %v5122_v20, %v5123_v17  ;;  %v5131_v59 = vmax.f32 %v5129_v5, %v5130_v4  ;;  %v5138_v51 = vmax.f32 %v5136_v32, %v5137_v26  ;;  %v5084_v1 = vmax.f32 %v5082_v52, %v5083_v50 }
 0x5f9   :  { %v15722_v61 = vld.sshfl [vmem:[#allocation1] sm:$0xff pattern:$0x73625140]  ;;  %v15724_v35 = vld.sshfl [vmem:[#allocation1 + $0x8] sm:$0xff pattern:$0x73625140]  ;;  %v5091_v36 = vmax.f32 %v5089_v9, %v5090_v2  ;;  %v5098_v3 = vmax.f32 %v5096_v46, %v5097_v10  ;;  %v5105_v40 = vmax.f32 %v5103_v27, %v5104_v45  ;;  %v5112_v18 = vmax.f32 %v5110_v34, %v5111_v24 }
 0x5fa   :  { %v15726_v44 = vld.sshfl [vmem:[#allocation1 + $0x10] sm:$0xff pattern:$0x73625140]  ;;  %v15728_v6 = vld.sshfl [vmem:[#allocation1 + $0x18] sm:$0xff pattern:$0x73625140] }
 0x5fb   :  { %v15730_v48 = vld.sshfl [vmem:[#allocation1 + $0x20] sm:$0xff pattern:$0x73625140]  ;;  %v15732_v28 = vld.sshfl [vmem:[#allocation1 + $0x28] sm:$0xff pattern:$0x73625140] }
 0x5fc   :  { %v15734_v33 = vld.sshfl [vmem:[#allocation1 + $0x30] sm:$0xff pattern:$0x73625140]  ;;  %v15736_v41 = vld.sshfl [vmem:[#allocation1 + $0x38] sm:$0xff pattern:$0x73625140] }
 0x5fd   :  { %5017 = vst [vmem:[#allocation1] ss:$4 sm:$0xff] %v4981_v0  ;;  %v5118_v54 = vrot.slane %v5117_v7, 2  ;;  %v5125_v21 = vrot.slane %v5124_v47, 2  ;;  %v5132_v37 = vrot.slane %v5131_v59, 2  ;;  %v5139_v15 = vrot.slane %v5138_v51, 2 }
 0x5fe   :  { %5022 = vst [vmem:[#allocation1 + $0x20] ss:$4 sm:$0xff] %v4985_v60  ;;  %v5143_v12 = vsel %vm16594_vm0, %v5003_v57, -inf  ;;  %v5150_v56 = vsel %vm16595_vm9, %v5004_v53, -inf  ;;  %v5157_v23 = vsel %vm16596_vm13, %v5005_v25, -inf  ;;  %v5064_v62 = vrot.slane %v5063_v11, 1  ;;  %vm16608_vm9 = vmmov %vm16594_vm0 }
 0x5ff   :  { %v5119_v43 = vmax.f32 %v5117_v7, %v5118_v54  ;;  %v5126_v55 = vmax.f32 %v5124_v47, %v5125_v21  ;;  %v5133_v39 = vmax.f32 %v5131_v59, %v5132_v37  ;;  %v5071_v14 = vrot.slane %v5070_v16, 1  ;;  %vm16609_vm13 = vmmov %vm16594_vm0 }
 0x600   :  { %v5144_v52 = vrot.slane %v5143_v12, 4  ;;  %v5151_v9 = vrot.slane %v5150_v56, 4  ;;  %v5158_v46 = vrot.slane %v5157_v23, 4  ;;  %v5078_v27 = vrot.slane %v5077_v38, 1 }
 0x601   :  { %v5085_v31 = vrot.slane %v5084_v1, 1  ;;  %v5092_v0 = vrot.slane %v5091_v36, 1  ;;  %v5164_v60 = vsel %vm16597_vm6, %v15716_v30, -inf  ;;  %v5099_v42 = vrot.slane %v5098_v3, 1  ;;  %vm16610_vm6 = vmmov %vm16594_vm0 }
 0x602   :  { %v5106_v57 = vrot.slane %v5105_v40, 1  ;;  %v5113_v8 = vrot.slane %v5112_v18, 1  ;;  %v5140_v53 = vmax.f32 %v5138_v51, %v5139_v15  ;;  %v5120_v58 = vrot.slane %v5119_v43, 1 }
 0x603   :  { %v5127_v25 = vrot.slane %v5126_v55, 1  ;;  %v5134_v50 = vrot.slane %v5133_v39, 1  ;;  %v5165_v34 = vrot.slane %v5164_v60, 4  ;;  %v15743_v49 = vmax.f32 %v5063_v11, %v5064_v62 }
 0x604   :  { %v5145_v20 = vmax.f32 %v5143_v12, %v5144_v52  ;;  %v5152_v5 = vmax.f32 %v5150_v56, %v5151_v9  ;;  %v5159_v32 = vmax.f32 %v5157_v23, %v5158_v46  ;;  %v15745_v2 = vmax.f32 %v5070_v16, %v5071_v14 }
 0x605   :  { %v15747_v10 = vmax.f32 %v5077_v38, %v5078_v27  ;;  %v15749_v45 = vmax.f32 %v5084_v1, %v5085_v31  ;;  %v5166_v30 = vmax.f32 %v5164_v60, %v5165_v34  ;;  %v15751_v24 = vmax.f32 %v5091_v36, %v5092_v0 }
 0x606   :  { %v15753_v29 = vmax.f32 %v5098_v3, %v5099_v42  ;;  %v15755_v17 = vmax.f32 %v5105_v40, %v5106_v57  ;;  %v15757_v4 = vmax.f32 %v5112_v18, %v5113_v8  ;;  %v15759_v26 = vmax.f32 %v5119_v43, %v5120_v58 }
 0x607   :  { %v15761_v7 = vmax.f32 %v5126_v55, %v5127_v25  ;;  %v15763_v47 = vmax.f32 %v5133_v39, %v5134_v50  ;;  %v5141_v59 = vrot.slane %v5140_v53, 1  ;;  %v5146_v51 = vrot.slane %v5145_v20, 2 }
 0x608   :  { %v5153_v11 = vrot.slane %v5152_v5, 2  ;;  %v5160_v16 = vrot.slane %v5159_v32, 2  ;;  %v5167_v38 = vrot.slane %v5166_v30, 2  ;;  %v5171_v1 = vsel %vm16598_vm3, %v15722_v61, -inf  ;;  %vm16611_vm3 = vmmov %vm16594_vm0 }
 0x609   :  { %v5178_v36 = vsel %vm16599_vm11, %v15724_v35, -inf  ;;  %v5185_v3 = vsel %vm16600_vm15, %v15726_v44, -inf  ;;  %v5192_v40 = vsel %vm16601_vm7, %v15728_v6, -inf  ;;  %v5147_v18 = vmax.f32 %v5145_v20, %v5146_v51  ;;  %v5018_v20 = vld.sshfl [vmem:[#allocation1] sm:$0xff pattern:$0x73625140]  ;;  %vm16612_vm11 = vmmov %vm16594_vm0 }
 0x60a   :  { %v5154_v54 = vmax.f32 %v5152_v5, %v5153_v11  ;;  %v5161_v21 = vmax.f32 %v5159_v32, %v5160_v16  ;;  %v5168_v37 = vmax.f32 %v5166_v30, %v5167_v38  ;;  %v5172_v15 = vrot.slane %v5171_v1, 4  ;;  %v5019_v51 = vld.sshfl [vmem:[#allocation1 + $0x8] sm:$0xff pattern:$0x73625140] }
 0x60b   :  { %v5179_v12 = vrot.slane %v5178_v36, 4  ;;  %v5186_v56 = vrot.slane %v5185_v3, 4  ;;  %v5193_v23 = vrot.slane %v5192_v40, 4  ;;  %v15773_v62 = vmax.f32 %v5140_v53, %v5141_v59  ;;  %v5020_v38 = vld.sshfl [vmem:[#allocation1 + $0x10] sm:$0xff pattern:$0x73625140] }
 0x60c   :  { %v5148_v61 = vrot.slane %v5147_v18, 1  ;;  %v5155_v43 = vrot.slane %v5154_v54, 1  ;;  %v5162_v55 = vrot.slane %v5161_v21, 1  ;;  %v5173_v35 = vmax.f32 %v5171_v1, %v5172_v15 }
 0x60d   :  { %v5180_v39 = vmax.f32 %v5178_v36, %v5179_v12  ;;  %v5187_v14 = vmax.f32 %v5185_v3, %v5186_v56  ;;  %v5194_v44 = vmax.f32 %v5192_v40, %v5193_v23  ;;  %v5169_v46 = vrot.slane %v5168_v37, 1 }
 0x60e   :  { %v15775_v52 = vmax.f32 %v5147_v18, %v5148_v61  ;;  %v15777_v6 = vmax.f32 %v5154_v54, %v5155_v43  ;;  %v15779_v9 = vmax.f32 %v5161_v21, %v5162_v55  ;;  %v5174_v27 = vrot.slane %v5173_v35, 2 }
 0x60f   :  { %v5181_v31 = vrot.slane %v5180_v39, 2  ;;  %v5188_v0 = vrot.slane %v5187_v14, 2  ;;  %v5195_v60 = vrot.slane %v5194_v44, 2  ;;  %v5199_v42 = vsel %vm16602_vm5, %v15730_v48, -inf }
 0x610   :  { %v5206_v57 = vsel %vm16603_vm8, %v15732_v28, -inf  ;;  %v5213_v8 = vsel %vm16604_vm10, %v15734_v33, -inf  ;;  %v5220_v53 = vsel %vm16605_vm14, %v15736_v41, -inf  ;;  %v5175_v58 = vmax.f32 %v5173_v35, %v5174_v27  ;;  %v5021_v33 = vld.sshfl [vmem:[#allocation1 + $0x18] sm:$0xff pattern:$0x73625140] }
 0x611   :  { %v5182_v25 = vmax.f32 %v5180_v39, %v5181_v31  ;;  %v5189_v50 = vmax.f32 %v5187_v14, %v5188_v0  ;;  %v5196_v34 = vmax.f32 %v5194_v44, %v5195_v60  ;;  %v5200_v5 = vrot.slane %v5199_v42, 4 }
 0x612   :  { %v5207_v32 = vrot.slane %v5206_v57, 4  ;;  %v5214_v30 = vrot.slane %v5213_v8, 4  ;;  %v5221_v59 = vrot.slane %v5220_v53, 4  ;;  %v15789_v48 = vmax.f32 %v5168_v37, %v5169_v46  ;;  %v5023_v46 = vld.sshfl [vmem:[#allocation1 + $0x20] sm:$0xff pattern:$0x73625140] }
 0x613   :  { %v5176_v11 = vrot.slane %v5175_v58, 1  ;;  %v5183_v28 = vrot.slane %v5182_v25, 1  ;;  %v5190_v16 = vrot.slane %v5189_v50, 1  ;;  %v5201_v1 = vmax.f32 %v5199_v42, %v5200_v5  ;;  %v5024_v42 = vld.sshfl [vmem:[#allocation1 + $0x28] sm:$0xff pattern:$0x73625140] }
 0x614   :  { %v5208_v36 = vmax.f32 %v5206_v57, %v5207_v32  ;;  %v5215_v41 = vmax.f32 %v5213_v8, %v5214_v30  ;;  %v5222_v3 = vmax.f32 %v5220_v53, %v5221_v59  ;;  %v5197_v21 = vrot.slane %v5196_v34, 1 }
 0x615   :  { %v15791_v40 = vmax.f32 %v5175_v58, %v5176_v11  ;;  %v15793_v18 = vmax.f32 %v5182_v25, %v5183_v28  ;;  %v15795_v54 = vmax.f32 %v5189_v50, %v5190_v16  ;;  %v5202_v15 = vrot.slane %v5201_v1, 2  ;;  %v5025_v25 = vld.sshfl [vmem:[#allocation1 + $0x30] sm:$0xff pattern:$0x73625140] }
 0x616   :  { %v5209_v12 = vrot.slane %v5208_v36, 2  ;;  %v5216_v37 = vrot.slane %v5215_v41, 2  ;;  %v5223_v56 = vrot.slane %v5222_v3, 2  ;;  %v5227_v23 = vsel %vm16606_vm4, %v5018_v20, -inf }
 0x617   :  { %v5234_v61 = vsel %vm16607_vm1, %v5019_v51, -inf  ;;  %v5241_v43 = vsel %vm16594_vm0, %v5020_v38, -inf  ;;  %v5248_v55 = vsel %vm16608_vm9, %v5021_v33, -inf  ;;  %v5203_v35 = vmax.f32 %v5201_v1, %v5202_v15  ;;  %v5026_v50 = vld.sshfl [vmem:[#allocation1 + $0x38] sm:$0xff pattern:$0x73625140] }
 0x618   :  { %v5210_v39 = vmax.f32 %v5208_v36, %v5209_v12  ;;  %v5217_v14 = vmax.f32 %v5215_v41, %v5216_v37  ;;  %v5224_v44 = vmax.f32 %v5222_v3, %v5223_v56  ;;  %v5228_v27 = vrot.slane %v5227_v23, 4 }
 0x619   :  { %v5235_v31 = vrot.slane %v5234_v61, 4  ;;  %v5242_v0 = vrot.slane %v5241_v43, 4  ;;  %v5249_v60 = vrot.slane %v5248_v55, 4  ;;  %v15801_v57 = vmax.f32 %v5196_v34, %v5197_v21 }
 0x61a   :  { %v5204_v8 = vrot.slane %v5203_v35, 1  ;;  %v5211_v53 = vrot.slane %v5210_v39, 1  ;;  %v5218_v58 = vrot.slane %v5217_v14, 1  ;;  %v5229_v20 = vmax.f32 %v5227_v23, %v5228_v27 }
 0x61b   :  { %v5236_v5 = vmax.f32 %v5234_v61, %v5235_v31  ;;  %v5243_v32 = vmax.f32 %v5241_v43, %v5242_v0  ;;  %v5250_v30 = vmax.f32 %v5248_v55, %v5249_v60  ;;  %v5225_v28 = vrot.slane %v5224_v44, 1 }
 0x61c   :  { %v15803_v59 = vmax.f32 %v5203_v35, %v5204_v8  ;;  %v15805_v51 = vmax.f32 %v5210_v39, %v5211_v53  ;;  %v15807_v11 = vmax.f32 %v5217_v14, %v5218_v58  ;;  %v5230_v16 = vrot.slane %v5229_v20, 2 }
 0x61d   :  { %v5237_v38 = vrot.slane %v5236_v5, 2  ;;  %v5244_v34 = vrot.slane %v5243_v32, 2  ;;  %v5251_v33 = vrot.slane %v5250_v30, 2  ;;  %v5255_v1 = vsel %vm16609_vm13, %v5023_v46, -inf }
 0x61e   :  { %v5262_v36 = vsel %vm16610_vm6, %v5024_v42, -inf  ;;  %v5269_v41 = vsel %vm16611_vm3, %v5025_v25, -inf  ;;  %v5276_v3 = vsel %vm16612_vm11, %v5026_v50, -inf  ;;  %v5231_v21 = vmax.f32 %v5229_v20, %v5230_v16 }
 0x61f   :  { %v5238_v15 = vmax.f32 %v5236_v5, %v5237_v38  ;;  %v5245_v12 = vmax.f32 %v5243_v32, %v5244_v34  ;;  %v5252_v37 = vmax.f32 %v5250_v30, %v5251_v33  ;;  %v5256_v56 = vrot.slane %v5255_v1, 4 }
 0x620   :  { %v5263_v23 = vrot.slane %v5262_v36, 4  ;;  %v5270_v61 = vrot.slane %v5269_v41, 4  ;;  %v5277_v43 = vrot.slane %v5276_v3, 4  ;;  %v5232_v55 = vrot.slane %v5231_v21, 1 }
 0x621   :  { %v5239_v35 = vrot.slane %v5238_v15, 1  ;;  %v5246_v39 = vrot.slane %v5245_v12, 1  ;;  %v5253_v14 = vrot.slane %v5252_v37, 1  ;;  %v5257_v27 = vmax.f32 %v5255_v1, %v5256_v56 }
 0x622   :  { %v5264_v46 = vmax.f32 %v5262_v36, %v5263_v23  ;;  %v5271_v31 = vmax.f32 %v5269_v41, %v5270_v61  ;;  %v5278_v0 = vmax.f32 %v5276_v3, %v5277_v43  ;;  %v15813_v60 = vmax.f32 %v5224_v44, %v5225_v28 }
 0x623   :  { %v5233_v42 = vmax.f32 %v5231_v21, %v5232_v55  ;;  %v5240_v8 = vmax.f32 %v5238_v15, %v5239_v35  ;;  %v15815_v53 = vmax.f32 %v5245_v12, %v5246_v39  ;;  %v5258_v58 = vrot.slane %v5257_v27, 2 }
 0x624   :  { %v5265_v25 = vrot.slane %v5264_v46, 2  ;;  %v5272_v50 = vrot.slane %v5271_v31, 2  ;;  %v5279_v20 = vrot.slane %v5278_v0, 2  ;;  %v15817_v5 = vmax.f32 %v5252_v37, %v5253_v14 }
 0x625   :  { %v5315_v32 = vrot.slane %v15751_v24, 7  ;;  %v5317_v30 = vrot.slane %v15759_v26, 6  ;;  %v5319_v16 = vrot.slane %v15775_v52, 5  ;;  %v5259_v38 = vmax.f32 %v5257_v27, %v5258_v58 }
 0x626   :  { %v5266_v34 = vmax.f32 %v5264_v46, %v5265_v25  ;;  %v5273_v44 = vmax.f32 %v5271_v31, %v5272_v50  ;;  %v5280_v28 = vmax.f32 %v5278_v0, %v5279_v20  ;;  %vm16613_vm15 = vcmask 1041409  }
 0x627   :  { %v5316_v33 = vsel %vm16613_vm15, %v5315_v32, %v15743_v49  ;;  %v5321_v1 = vrot.slane %v15791_v40, 4  ;;  %v5323_v36 = vrot.slane %v15803_v59, 3  ;;  %v5329_v41 = vrot.slane %v15753_v29, 7  ;;  %vm16615_vm5 = vmmov %vm16613_vm15 }
 0x628   :  { %v5260_v3 = vrot.slane %v5259_v38, 1  ;;  %v5267_v21 = vrot.slane %v5266_v34, 1  ;;  %v5274_v24 = vrot.slane %v5273_v44, 1  ;;  %v5325_v15 = vrot.slane %v5233_v42, 2  ;;  %vm16625_vm3 = vmmov %vm16615_vm5 }
 0x629   :  { %v5281_v26 = vrot.slane %v5280_v28, 1  ;;  %vm16614_vm7 = vcmask 1042434   ;;  %v5331_v12 = vrot.slane %v15761_v7, 6  ;;  %v5333_v37 = vrot.slane %v15777_v6, 5 }
 0x62a   :  { %v5318_v52 = vsel %vm16614_vm7, %v5317_v30, %v5316_v33  ;;  %v5261_v56 = vmax.f32 %v5259_v38, %v5260_v3  ;;  %v5268_v23 = vmax.f32 %v5266_v34, %v5267_v21  ;;  %v5275_v49 = vmax.f32 %v5273_v44, %v5274_v24  ;;  %vm16617_vm10 = vmmov %vm16614_vm7 }
 0x62b   :  { %v5330_v40 = vsel %vm16615_vm5, %v5329_v41, %v15745_v2  ;;  %vm16616_vm8 = vcmask 1043459   ;;  %v5335_v61 = vrot.slane %v15793_v18, 4  ;;  %v5337_v43 = vrot.slane %v15805_v51, 3  ;;  %vm16627_vm15 = vmmov %vm16614_vm7 }
 0x62c   :  { %v5320_v59 = vsel %vm16616_vm8, %v5319_v16, %v5318_v52  ;;  %v5332_v29 = vsel %vm16617_vm10, %v5331_v12, %v5330_v40  ;;  %vm16618_vm14 = vcmask 1044484   ;;  %v5327_v35 = vrot.slane %v5261_v56, 1  ;;  %vm16619_vm4 = vmmov %vm16616_vm8 }
 0x62d   :  { %v5322_v55 = vsel %vm16618_vm14, %v5321_v1, %v5320_v59  ;;  %v5334_v7 = vsel %vm16619_vm4, %v5333_v37, %v5332_v29  ;;  %v5339_v6 = vrot.slane %v5240_v8, 2  ;;  %v5282_v39 = vmax.f32 %v5280_v28, %v5281_v26  ;;  %vm16621_vm0 = vmmov %vm16618_vm14 }
 0x62e   :  { %vm16620_vm1 = vcmask 1045509   ;;  %v5336_v27 = vsel %vm16621_vm0, %v5335_v61, %v5334_v7  ;;  %v5343_v2 = vrot.slane %v15755_v17, 7  ;;  %vm16622_vm9 = vcmask 1046534   ;;  %vm16628_vm7 = vmmov %vm16619_vm4 }
 0x62f   :  { %v5324_v14 = vsel %vm16620_vm1, %v5323_v36, %v5322_v55  ;;  %v5341_v31 = vrot.slane %v5268_v23, 1  ;;  %v5345_v18 = vrot.slane %v15763_v47, 6  ;;  %v5347_v51 = vrot.slane %v15779_v9, 5  ;;  %vm16624_vm6 = vmmov %vm16620_vm1 }
 0x630   :  { %v5326_v46 = vsel %vm16622_vm9, %v5325_v15, %v5324_v14  ;;  %vm16623_vm13 = vcmask 1047559   ;;  %v5338_v42 = vsel %vm16624_vm6, %v5337_v43, %v5336_v27  ;;  %v5344_v8 = vsel %vm16625_vm3, %v5343_v2, %v15747_v10  ;;  %vm16626_vm11 = vmmov %vm16622_vm9 }
 0x631   :  { %v5328_v0 = vsel %vm16623_vm13, %v5327_v35, %v5326_v46  ;;  %v5349_v58 = vrot.slane %v15795_v54, 4  ;;  %v5340_v25 = vsel %vm16626_vm11, %v5339_v6, %v5338_v42  ;;  %v5346_v17 = vsel %vm16627_vm15, %v5345_v18, %v5344_v8  ;;  %vm16629_vm5 = vmmov %vm16621_vm0 }
 0x632   :  { %v5351_v50 = vrot.slane %v15807_v11, 3  ;;  %v5353_v20 = vrot.slane %v15815_v53, 2  ;;  %v5348_v47 = vsel %vm16628_vm7, %v5347_v51, %v5346_v17  ;;  %v5355_v9 = vrot.slane %v5275_v49, 1  ;;  %vm16630_vm8 = vmmov %vm16623_vm13 }
 0x633   :  { %v5357_v32 = vrot.slane %v15757_v4, 7  ;;  %v5359_v30 = vrot.slane %v15773_v62, 6  ;;  %v5350_v16 = vsel %vm16629_vm5, %v5349_v58, %v5348_v47  ;;  %v5361_v10 = vrot.slane %v15789_v48, 5  ;;  %vm16631_vm10 = vmmov %vm16620_vm1 }
 0x634   :  { %v5363_v54 = vrot.slane %v15801_v57, 4  ;;  %v5342_v38 = vsel %vm16630_vm8, %v5341_v31, %v5340_v25  ;;  %v5352_v34 = vsel %vm16631_vm10, %v5351_v50, %v5350_v16  ;;  %vm16632_vm14 = vmmov %vm16625_vm3  ;;  %v5365_v53 = vrot.slane %v15813_v60, 3 }
 0x635   :  { %v5358_v11 = vsel %vm16632_vm14, %v5357_v32, %v15749_v45  ;;  %vm16633_vm4 = vmmov %vm16622_vm9  ;;  %v5367_v62 = vrot.slane %v15817_v5, 2  ;;  %v5377_v28 = vrot.slane %v5328_v0, 4  ;;  %v5369_v33 = vrot.slane %v5282_v39, 1 }
 0x636   :  { %v5354_v44 = vsel %vm16633_vm4, %v5353_v20, %v5352_v34  ;;  %vm16634_vm1 = vmmov %vm16627_vm15  ;;  %v5389_v45 = vrot.slane %v5342_v38, 4  ;;  %vm5560_vm15 = vsmask.f32 7946 }
 0x637   :  { %v5360_v4 = vsel %vm16634_vm1, %v5359_v30, %v5358_v11  ;;  %vm16635_vm0 = vmmov %vm16630_vm8  ;;  %vm5563_vm8 = vsmask.f32 7962 }
 0x638   :  { %v5356_v48 = vsel %vm16635_vm0, %v5355_v9, %v5354_v44  ;;  %vm16636_vm9 = vmmov %vm16628_vm7 }
 0x639   :  { %v5362_v57 = vsel %vm16636_vm9, %v5361_v10, %v5360_v4  ;;  %vm16637_vm13 = vmmov %vm16629_vm5  ;;  %v5375_v36 = vrot.slane %v5356_v48, 4  ;;  %v5378_v41 = vsel %vm2105_vm12, %v5356_v48, %v5377_v28 }
 0x63a   :  { %v5364_v1 = vsel %vm16637_vm13, %v5363_v54, %v5362_v57  ;;  %v5386_v3 = vperm.slane %v5378_v41, %v14900_v63  ;;  %vm16638_vm3 = vmmov %vm16633_vm4 }
 0x63b   :  { %v5366_v60 = vsel %vm16624_vm6, %v5365_v53, %v5364_v1  ;;  %v5376_v5 = vsel %vm2105_vm12, %v5375_v36, %v5328_v0  ;;  %vm16639_vm11 = vmmov %vm16635_vm0  ;;  %vm16644_vm0 = vcmask 523264  }
 0x63c   :  { %v5368_v21 = vsel %vm16638_vm3, %v5367_v62, %v5366_v60  ;;  %v5413_v15 = vrot.slane %v5386_v3, 4  ;;  %v5382_v26 = vperm.slane %v5376_v5, %v14900_v63  ;;  %vm16640_vm7 = vmmov %vm16634_vm1  ;;  %vm5581_vm1 = vcmask 1042944  }
 0x63d   :  { %v5370_v24 = vsel %vm16639_vm11, %v5369_v33, %v5368_v21  ;;  %vm15936_vm5 = vmand %vm16640_vm7, %vm5560_vm15  ;;  %vm5616_vm11 = vsmask.f32 6418  ;;  %vm16650_vm7 = vcmask 1046532  }
 0x63e   :  { %v5387_v52 = vrot.slane %v5370_v24, 4  ;;  %v5390_v12 = vsel %vm2105_vm12, %v5370_v24, %v5389_v45  ;;  %v5401_v56 = vrot.slane %v5382_v26, 4  ;;  %vm16643_vm10 = vmmov %vm16638_vm3  ;;  %vm5614_vm3 = vsmask.f32 2306 }
 0x63f   :  { %v5398_v37 = vperm.slane %v5390_v12, %v14900_v63  ;;  %vm5564_vm14 = vmand %vm16643_vm10, %vm5563_vm8 }
 0x640   :  { %v5388_v23 = vsel %vm2105_vm12, %v5387_v52, %v5342_v38  ;;  %vm5565_vm4 = vmor %vm5564_vm14, %vm15936_vm5 }
 0x641   :  { %v5414_v49 = vsel %vm2105_vm12, %v5398_v37, %v5413_v15  ;;  %v5394_v40 = vperm.slane %v5388_v23, %v14900_v63  ;;  %v5411_v59 = vrot.slane %v5398_v37, 4  ;;  %vm16645_vm9 = vmmov %vm16644_vm0 }
 0x642   :  { %v5422_v29 = vperm.slane %v5414_v49, %v15016_v22  ;;  %vm16646_vm13 = vmmov %vm16644_vm0 }
 0x643   :  { %v5402_v61 = vsel %vm2105_vm12, %v5394_v40, %v5401_v56  ;;  %v5399_v43 = vrot.slane %v5394_v40, 4  ;;  %v5412_v55 = vsel %vm2105_vm12, %v5411_v59, %v5386_v3  ;;  %vm16647_vm6 = vmmov %vm16644_vm0 }
 0x644   :  { %v5429_v35 = vrot.slane %v5422_v29, 4  ;;  %v5410_v7 = vperm.slane %v5402_v61, %v15016_v22  ;;  %v5418_v2 = vperm.slane %v5412_v55, %v15016_v22  ;;  %vm15966_vm15 = vmand %vm5581_vm1, %vm5614_vm3 }
 0x645   :  { %v5400_v6 = vsel %vm2105_vm12, %v5399_v43, %v5382_v26  ;;  %vm16655_vm14 = vmmov %vm16644_vm0 }
 0x646   :  { %v5430_v39 = vsel %vm2105_vm12, 0.0, %v5429_v35  ;;  %v5425_v14 = vrot.slane %v5410_v7, 4  ;;  %v5406_v27 = vperm.slane %v5400_v6, %v15016_v22  ;;  %v5427_v42 = vrot.slane %v5418_v2, 4 }
 0x647   :  { %v13592_v46 = vpack.i.bf16 %v5430_v39, %v5422_v29 }
 0x648   :  { %v5426_v31 = vsel %vm2105_vm12, 0.0, %v5425_v14  ;;  %v5423_v18 = vrot.slane %v5406_v27, 4  ;;  %v5428_v58 = vsel %vm2105_vm12, 0.0, %v5427_v42  ;;  %v11055_v42 = vld [vmem:[#allocation13 + $0x4e0] sm:$0xf] }
 0x649   :  { %13593 = vrot.lane.b32.xlu0 %v13592_v46, %s13883_s8  ;;  %v13587_v51 = vpack.i.bf16 %v5426_v31, %v5410_v7  ;;  %v13602_v25 = vpack.i.bf16 %v5428_v58, %v5418_v2 }
 0x64a   :  { %v5424_v0 = vsel %vm2105_vm12, 0.0, %v5423_v18 }
 0x64b   :  { %13588 = vrot.lane.b32.xlu2 %v13587_v51, %s13883_s8  ;;  %v13597_v8 = vpack.i.bf16 %v5424_v0, %v5406_v27  ;;  %v10927_v51 = vld [vmem:[#allocation13 + $0x3e0] sm:$0xf] }
 0x64d   :  { %13598 = vrot.lane.b32.xlu1 %v13597_v8, %s13883_s8 }
 0x653   :  { %13603 = vrot.lane.b32.xlu2 %v13602_v25, %s13883_s8  ;;  %v11183_v25 = vld [vmem:[#allocation13 + $0x5e0] sm:$0xf] }
 0x6a5   :  { %v13589_v17 = vpop.permute.xlu2 %13588 }
 0x6a6   :  { %v13591_v20 = vunpack.i.h.bf16 %v13589_v17  ;;  %v13590_v47 = vunpack.i.l.bf16 %v13589_v17  ;;  %v13080_v17 = vld [vmem:[#allocation13 + $0x5ec] sm:$0xf0] }
 0x6a8   :  { %v5466_v54 = vmax.f32 %v5426_v31, %v13591_v20  ;;  %v5465_v38 = vmax.f32 %v5410_v7, %v13590_v47  ;;  %v11184_v20 = vor.u32 %v13080_v17, %v11183_v25  ;;  %v13014_v47 = vld [vmem:[#allocation13 + $0x3e4] sm:$0xf]  ;;  %v11151_v25 = vld [vmem:[#allocation13 + $0x5a0] sm:$0xf]  ;;  %v13072_v17 = vld [vmem:[#allocation13 + $0x5ac] sm:$0xf0] }
 0x6aa   :  { %v5477_v33 = vrot.slane %v5466_v54, 4  ;;  %v5471_v1 = vrot.slane %v5465_v38, 4  ;;  %6442 = vmatpush.bf16.msrb.mxu3 %v11184_v20  ;;  %v13036_v38 = vld [vmem:[#allocation13 + $0x48c] sm:$0xf0] }
 0x6ad   :  { %v13604_v50 = vpop.permute.xlu2 %13603 }
 0x6ae   :  { %v13606_v9 = vunpack.i.h.bf16 %v13604_v50  ;;  %v13605_v32 = vunpack.i.l.bf16 %v13604_v50 }
 0x6b0   :  { %v5468_v53 = vmax.f32 %v5428_v58, %v13606_v9  ;;  %v5467_v44 = vmax.f32 %v5418_v2, %v13605_v32  ;;  %v13048_v58 = vld [vmem:[#allocation13 + $0x4ec] sm:$0xf0]  ;;  %v10929_v9 = vld [vmem:[#allocation13 + $0x3f0] sm:$0xf0]  ;;  %v5550_v32 = vld [vmem:[#allocation4 + $0x8] sm:$0x1] }
 0x6b1   :  { %v11056_v50 = vor.u32 %v13048_v58, %v11055_v42 }
 0x6b3   :  { %6429 = vmatpush.bf16.msra.mxu2 %v11056_v50  ;;  %v13006_v50 = vld [vmem:[#allocation13 + $0x3a4] sm:$0xf] }
 0x6bb   :  { %v13594_v30 = vpop.permute.xlu0 %13593 }
 0x6bc   :  { %v13596_v16 = vunpack.i.h.bf16 %v13594_v30  ;;  %v13595_v10 = vunpack.i.l.bf16 %v13594_v30  ;;  %v10932_v30 = vor.u32 %v13014_v47, %v10929_v9  ;;  %v11152_v47 = vor.u32 %v13072_v17, %v11151_v25  ;;  %v10897_v9 = vld [vmem:[#allocation13 + $0x3b0] sm:$0xf0] }
 0x6be   :  { %v5470_v34 = vmax.f32 %v5430_v39, %v13596_v16  ;;  %v5469_v11 = vmax.f32 %v5422_v29, %v13595_v10  ;;  %v5551_v16 = vsel %vm15303_vm2, 0, %v5550_v32  ;;  %v5556_v10 = vld [vmem:[#allocation4 + $0x14] sm:$0x1]  ;;  %6455 = vmatpush.bf16.msrb.mxu1 %v10932_v30  ;;  %v10879_v32 = vld [vmem:[#allocation13 + $0x380] sm:$0xf] }
 0x6bf   :  { %v13599_v4 = vpop.permute.xlu1 %13598  ;;  %5552 = vst [vmem:[#allocation4 + $0x8] sm:$0x1] %v5551_v16  ;;  %v5557_v54 = vsel %vm15303_vm2, 0, %v5556_v10  ;;  %vm5578_vm2 = vcmask 518144   ;;  %v13004_v30 = vld [vmem:[#allocation13 + $0x38c] sm:$0xf0]  ;;  %v10900_v10 = vor.u32 %v13006_v50, %v10897_v9 }
 0x6c0   :  { %v5505_v62 = vrot.slane %v5470_v34, 4  ;;  %v5499_v28 = vrot.slane %v5469_v11, 4  ;;  %v13601_v48 = vunpack.i.h.bf16 %v13599_v4  ;;  %v13600_v57 = vunpack.i.l.bf16 %v13599_v4  ;;  %5558 = vst [vmem:[#allocation4 + $0x14] sm:$0x1] %v5557_v54  ;;  %v5566_v34 = vld [vmem:[#allocation4] sm:$0x44]  ;;  %vm15976_vm8 = vmand %vm5578_vm2, %vm5614_vm3 }
 0x6c1   :  { %v5569_v11 = vld [vmem:[#allocation4 + $0x8] sm:$0x4]  ;;  %v5567_v4 = vsel %vm5565_vm4, 0, %v5566_v34  ;;  %v11007_v54 = vld [vmem:[#allocation13 + $0x480] sm:$0xf]  ;;  %vm16659_vm3 = vcmask 1043456  }
 0x6c2   :  { %v5500_v36 = vsel %vm2105_vm12, %v5499_v28, %v5467_v44  ;;  %v5506_v41 = vsel %vm2105_vm12, %v5505_v62, %v5468_v53  ;;  %v5464_v45 = vmax.f32 %v5424_v0, %v13601_v48  ;;  %v5463_v60 = vmax.f32 %v5406_v27, %v13600_v57  ;;  %v13016_v0 = vld [vmem:[#allocation13 + $0x3ec] sm:$0xf0]  ;;  %v5575_v44 = vld [vmem:[#allocation4 + $0x14] sm:$0x4]  ;;  %5568 = vst [vmem:[#allocation4] sm:$0x44] %v5567_v4 }
 0x6c3   :  { %v5504_v3 = vperm.slane %v5500_v36, %v14900_v63  ;;  %v5510_v21 = vperm.slane %v5506_v41, %v14900_v63  ;;  %v10928_v8 = vor.u32 %v13016_v0, %v10927_v51  ;;  %v5570_v53 = vsel %vm15936_vm5, 0, %v5569_v11  ;;  %5579 = vst.msk [vmem:[#allocation4] sm:$0x7] %vm5578_vm2, %v16529_v19  ;;  %v11023_v51 = vld [vmem:[#allocation13 + $0x4a0] sm:$0xf] }
 0x6c4   :  { %v5478_v5 = vsel %vm2105_vm12, %v5477_v33, %v5464_v45  ;;  %v5472_v24 = vsel %vm2105_vm12, %v5471_v1, %v5463_v60  ;;  %5571 = vst [vmem:[#allocation4 + $0x8] sm:$0x4] %v5570_v53  ;;  %v5573_v62 = vsel %vm5565_vm4, 0, %v5572_v13  ;;  %v5576_v28 = vsel %vm15936_vm5, 0, %v5575_v44  ;;  %vm15971_vm5 = vmand %vm16650_vm7, %vm5616_vm11  ;;  %v13040_v0 = vld [vmem:[#allocation13 + $0x4ac] sm:$0xf0] }
 0x6c5   :  { %v5511_v15 = vrot.slane %v5510_v21, 4  ;;  %v5513_v26 = vrot.slane %v5504_v3, 4  ;;  %v5482_v52 = vperm.slane %v5478_v5, %v14900_v63  ;;  %v5476_v12 = vperm.slane %v5472_v24, %v14900_v63  ;;  %6416 = vmatpush.bf16.msra.mxu0 %v10928_v8  ;;  %5574 = vst [vmem:[#allocation4 + $0xc] sm:$0x44] %v5573_v62  ;;  %v11135_v34 = vld [vmem:[#allocation13 + $0x580] sm:$0xf]  ;;  %vm5618_vm10 = vmor %vm15971_vm5, %vm15966_vm15 }
 0x6c6   :  { %5577 = vst [vmem:[#allocation4 + $0x14] sm:$0x4] %v5576_v28  ;;  %v11024_v58 = vor.u32 %v13040_v0, %v11023_v51  ;;  %v10880_v53 = vor.u32 %v13004_v30, %v10879_v32  ;;  %v13068_v13 = vld [vmem:[#allocation13 + $0x58c] sm:$0xf0]  ;;  %v13002_v44 = vld [vmem:[#allocation13 + $0x384] sm:$0xf]  ;;  %v11008_v4 = vor.u32 %v13036_v38, %v11007_v54 }
 0x6c7   :  { %v5483_v37 = vrot.slane %v5482_v52, 4  ;;  %v5485_v56 = vrot.slane %v5476_v12, 4  ;;  %v5514_v23 = vsel %vm2105_vm12, %v5510_v21, %v5513_v26  ;;  %v5512_v49 = vsel %vm2105_vm12, %v5511_v15, %v5504_v3  ;;  %5580 = vst.msk [vmem:[#allocation4 + $0xc] sm:$0x7] %vm5578_vm2, %v16529_v19  ;;  %v10881_v28 = vld [vmem:[#allocation13 + $0x390] sm:$0xf0] }
 0x6c8   :  { %v15908_v40 = vperm.slane %v5514_v23, %v15016_v22  ;;  %v15911_v59 = vperm.slane %v5512_v49, %v15016_v22  ;;  %5582 = vst.msk [vmem:[#allocation4 + $0x8] sm:$0x7] %vm5581_vm1, %v16529_v19  ;;  %v11136_v62 = vor.u32 %v13068_v13, %v11135_v34  ;;  %vm5795_vm4 = vsmask.f32 1280  ;;  %v13056_v51 = vld [vmem:[#allocation13 + $0x52c] sm:$0xf0] }
 0x6c9   :  { %v5486_v29 = vsel %vm2105_vm12, %v5482_v52, %v5485_v56  ;;  %v5484_v61 = vsel %vm2105_vm12, %v5483_v37, %v5476_v12  ;;  %5583 = vst.msk [vmem:[#allocation4 + $0x14] sm:$0x7] %vm5581_vm1, %v16529_v19  ;;  %vm5796_vm2 = vsmask.f32 3336  ;;  %vm16660_vm11 = vcmask 1045504  }
 0x6ca   :  { %v15916_v43 = vperm.slane %v5486_v29, %v15016_v22  ;;  %v5525_v55 = vrot.slane %v15908_v40, 4  ;;  %v15920_v35 = vperm.slane %v5484_v61, %v15016_v22  ;;  %v5523_v7 = vrot.slane %v15911_v59, 4  ;;  %v10911_v29 = vld [vmem:[#allocation13 + $0x3c0] sm:$0xf]  ;;  %v13012_v61 = vld [vmem:[#allocation13 + $0x3cc] sm:$0xf0]  ;;  %vm5797_vm1 = vmor %vm5795_vm4, %vm5796_vm2 }
 0x6cb   :  { %v5619_v20 = vld [vmem:[#allocation4] sm:$0x77]  ;;  %vm16663_vm4 = vcmask 1045506  }
 0x6cc   :  { %v5497_v6 = vrot.slane %v15916_v43, 4  ;;  %v5526_v39 = vsel %vm2105_vm12, 0.0, %v5525_v55  ;;  %v5495_v14 = vrot.slane %v15920_v35, 4  ;;  %v5524_v27 = vsel %vm2105_vm12, 0.0, %v5523_v7  ;;  %v11167_v7 = vld [vmem:[#allocation13 + $0x5c0] sm:$0xf] }
 0x6cd   :  { %v10912_v55 = vor.u32 %v13012_v61, %v10911_v29  ;;  %v11103_v29 = vld [vmem:[#allocation13 + $0x540] sm:$0xf]  ;;  %v13060_v61 = vld [vmem:[#allocation13 + $0x54c] sm:$0xf0]  ;;  %v11153_v38 = vld [vmem:[#allocation13 + $0x5b0] sm:$0xf0] }
 0x6ce   :  { %v5498_v2 = vsel %vm2105_vm12, 0.0, %v5497_v6  ;;  %v5496_v46 = vsel %vm2105_vm12, 0.0, %v5495_v14  ;;  %v13076_v6 = vld [vmem:[#allocation13 + $0x5cc] sm:$0xf0] }
 0x6cf   :  { %v13612_v31 = vpack.i.bf16 %v5526_v39, %v5498_v2  ;;  %v13607_v18 = vpack.i.bf16 %v5524_v27, %v5496_v46  ;;  %v11168_v14 = vor.u32 %v13076_v6, %v11167_v7  ;;  %v13010_v27 = vld [vmem:[#allocation13 + $0x3c4] sm:$0xf]  ;;  %v10913_v2 = vld [vmem:[#allocation13 + $0x3d0] sm:$0xf0]  ;;  %v10895_v46 = vld [vmem:[#allocation13 + $0x3a0] sm:$0xf]  ;;  %6417 = vmatpush.bf16.msra.mxu0 %v10912_v55 }
 0x6d0   :  { %v5624_v42 = vld [vmem:[#allocation4 + $0x8] sm:$0x7]  ;;  %v10849_v55 = vld [vmem:[#allocation13 + $0x350] sm:$0xf0]  ;;  %v10831_v7 = vld [vmem:[#allocation13 + $0x320] sm:$0xf] }
 0x6d1   :  { %13613 = vrot.lane.b32.xlu1 %v13612_v31, %s13883_s8  ;;  %13608 = vrot.lane.b32.xlu0 %v13607_v18, %s13883_s8  ;;  %v10916_v31 = vor.u32 %v13010_v27, %v10913_v2  ;;  %v13008_v18 = vld [vmem:[#allocation13 + $0x3ac] sm:$0xf0]  ;;  %v10959_v27 = vld [vmem:[#allocation13 + $0x420] sm:$0xf] }
 0x6d2   :  { %6443 = vmatpush.bf16.msrb.mxu3 %v11168_v14  ;;  %v10896_v8 = vor.u32 %v13008_v18, %v10895_v46  ;;  %v12992_v14 = vld [vmem:[#allocation13 + $0x32c] sm:$0xf0]  ;;  %v11087_v18 = vld [vmem:[#allocation13 + $0x520] sm:$0xf] }
 0x6d3   :  { %6456 = vmatpush.bf16.msrb.mxu1 %v10916_v31  ;;  %v13024_v2 = vld [vmem:[#allocation13 + $0x42c] sm:$0xf0]  ;;  %v10832_v50 = vor.u32 %v12992_v14, %v10831_v7  ;;  %v13017_v7 = vld [vmem:[#allocation13 + $0x3f4] sm:$0xf0] }
 0x6d4   :  { %6418 = vmatpush.bf16.msra.mxu0 %v10896_v8  ;;  %v10833_v8 = vld [vmem:[#allocation13 + $0x330] sm:$0xf0] }
 0x6d6   :  { %6444 = vmatpush.bf16.msrb.mxu3 %v11152_v47  ;;  %v11088_v47 = vor.u32 %v13056_v51, %v11087_v18  ;;  %v11041_v18 = vld [vmem:[#allocation13 + $0x4d0] sm:$0xf0]  ;;  %v13074_v51 = vld [vmem:[#allocation13 + $0x5c4] sm:$0xf] }
 0x6d7   :  { %6457 = vmatpush.bf16.msrb.mxu1 %v10900_v10 }
 0x6d8   :  { %6419 = vmatpush.bf16.msra.mxu0 %v10880_v53 }
 0x6da   :  { %6445 = vmatpush.bf16.msrb.mxu3 %v11136_v62 }
 0x743   :  { %v13614_v48 = vpop.permute.xlu1 %13613  ;;  %v13609_v57 = vpop.permute.xlu0 %13608 }
 0x744   :  { %v13616_v33 = vunpack.i.h.bf16 %v13614_v48  ;;  %v13615_v1 = vunpack.i.l.bf16 %v13614_v48  ;;  %v13611_v36 = vunpack.i.h.bf16 %v13609_v57  ;;  %v13610_v41 = vunpack.i.l.bf16 %v13609_v57  ;;  %v10863_v48 = vld [vmem:[#allocation13 + $0x360] sm:$0xf]  ;;  %v13000_v57 = vld [vmem:[#allocation13 + $0x36c] sm:$0xf0] }
 0x746   :  { %v5546_v45 = vsel %vm16644_vm0, %v15908_v40, %v13616_v33  ;;  %v5545_v60 = vsel %vm16645_vm9, %v15916_v43, %v13615_v1  ;;  %v5544_v3 = vsel %vm16646_vm13, %v15911_v59, %v13611_v36  ;;  %v5543_v21 = vsel %vm16647_vm6, %v15920_v35, %v13610_v41  ;;  %v11039_v43 = vld [vmem:[#allocation13 + $0x4c0] sm:$0xf]  ;;  %v13044_v35 = vld [vmem:[#allocation13 + $0x4cc] sm:$0xf0]  ;;  %v10903_v40 = vld [vmem:[#allocation13 + $0x3a8] sm:$0xf] }
 0x747   :  { %v5585_v5 = vpack.c.bf16 %v5546_v45, %v5544_v3  ;;  %v5584_v19 = vpack.c.bf16 %v5545_v60, %v5543_v21  ;;  %v11040_v39 = vor.u32 %v13044_v35, %v11039_v43  ;;  %v10884_v36 = vor.u32 %v13002_v44, %v10881_v28  ;;  %v10991_v41 = vld [vmem:[#allocation13 + $0x460] sm:$0xf]  ;;  %v13032_v45 = vld [vmem:[#allocation13 + $0x46c] sm:$0xf0]  ;;  %v12994_v43 = vld [vmem:[#allocation13 + $0x344] sm:$0xf] }
 0x748   :  { %v11119_v60 = vld [vmem:[#allocation13 + $0x560] sm:$0xf]  ;;  %v13064_v21 = vld [vmem:[#allocation13 + $0x56c] sm:$0xf0]  ;;  %v10852_v31 = vor.u32 %v12994_v43, %v10849_v55  ;;  %vm5798_vm0 = vsmask.f32 5392 }
 0x749   :  { %v5594_v24 = vshrl.u32 %v5585_v5, 16  ;;  %v5587_v15 = vshrl.u32 %v5584_v19, 16  ;;  %v5597_v52 = vshll.u32 %v5585_v5, 16  ;;  %v5590_v37 = vshll.u32 %v5584_v19, 16  ;;  %6430 = vmatpush.bf16.msra.mxu2 %v11040_v39  ;;  %v12998_v5 = vld [vmem:[#allocation13 + $0x364] sm:$0xf]  ;;  %6458 = vmatpush.bf16.msrb.mxu1 %v10884_v36  ;;  %vm15999_vm7 = vmor %vm5797_vm1, %vm5798_vm0 }
 0x74a   :  { %v10864_v19 = vor.u32 %v13000_v57, %v10863_v48  ;;  %v11104_v39 = vor.u32 %v13060_v61, %v11103_v29  ;;  %vm16656_vm9 = vcmask 1041408   ;;  %vm16657_vm13 = vcmask 1045508   ;;  %v10815_v44 = vld [vmem:[#allocation13 + $0x300] sm:$0xf]  ;;  %v13020_v36 = vld [vmem:[#allocation13 + $0x40c] sm:$0xf0]  ;;  %vm16671_vm0 = vmmov %vm16660_vm11 }
 0x74b   :  { %v5596_v26 = vrot.slane %v5594_v24, 7  ;;  %v5589_v12 = vrot.slane %v5587_v15, 7  ;;  %v10865_v24 = vld [vmem:[#allocation13 + $0x370] sm:$0xf0]  ;;  %v10992_v15 = vor.u32 %v13032_v45, %v10991_v41  ;;  %vm16658_vm6 = vcmask 1043458   ;;  %vm16667_vm15 = vmmov %vm16656_vm9 }
 0x74c   :  { %6420 = vmatpush.bf16.msra.mxu0 %v10864_v19  ;;  %v10943_v48 = vld [vmem:[#allocation13 + $0x400] sm:$0xf]  ;;  %v5630_v19 = vld [vmem:[#allocation4 + $0x14] sm:$0x7]  ;;  %v11185_v61 = vld [vmem:[#allocation13 + $0x5f0] sm:$0xf0] }
 0x74d   :  { %v5599_v56 = vor.u32 %v5597_v52, %v5596_v26  ;;  %v5592_v23 = vor.u32 %v5590_v37, %v5589_v12  ;;  %6431 = vmatpush.bf16.msra.mxu2 %v11024_v58  ;;  %v11120_v26 = vor.u32 %v13064_v21, %v11119_v60  ;;  %v10847_v52 = vld [vmem:[#allocation13 + $0x340] sm:$0xf]  ;;  %v12996_v12 = vld [vmem:[#allocation13 + $0x34c] sm:$0xf0]  ;;  %v10944_v60 = vor.u32 %v13020_v36, %v10943_v48  ;;  %v12986_v21 = vld [vmem:[#allocation13 + $0x304] sm:$0xf] }
 0x74e   :  { %v10975_v37 = vld [vmem:[#allocation13 + $0x440] sm:$0xf]  ;;  %v10848_v35 = vor.u32 %v12996_v12, %v10847_v52  ;;  %v11057_v52 = vld [vmem:[#allocation13 + $0x4f0] sm:$0xf0]  ;;  %v13078_v29 = vld [vmem:[#allocation13 + $0x5e4] sm:$0xf] }
 0x74f   :  { %5602 = vrot.lane.b32.xlu0 %v5599_v56, %s13883_s8  ;;  %5600 = vrot.lane.b32.xlu2 %v5592_v23, %s13883_s8  ;;  %v10868_v56 = vor.u32 %v12998_v5, %v10865_v24  ;;  %v13028_v23 = vld [vmem:[#allocation13 + $0x44c] sm:$0xf0]  ;;  %v11071_v41 = vld [vmem:[#allocation13 + $0x500] sm:$0xf]  ;;  %v10817_v5 = vld [vmem:[#allocation13 + $0x310] sm:$0xf0]  ;;  %v11188_v55 = vor.u32 %v13078_v29, %v11185_v61 }
 0x750   :  { %6446 = vmatpush.bf16.msrb.mxu3 %v11120_v26  ;;  %v10976_v6 = vor.u32 %v13028_v23, %v10975_v37  ;;  %6421 = vmatpush.bf16.msra.mxu0 %v10848_v35  ;;  %v13046_v26 = vld [vmem:[#allocation13 + $0x4e4] sm:$0xf]  ;;  %v10935_v35 = vld [vmem:[#allocation13 + $0x3e8] sm:$0xf]  ;;  %vm16666_vm1 = vcmask 523264   ;;  %vm16668_vm5 = vmmov %vm16657_vm13 }
 0x751   :  { %6432 = vmatpush.bf16.msra.mxu2 %v11008_v4  ;;  %6459 = vmatpush.bf16.msrb.mxu1 %v10868_v56  ;;  %v12988_v4 = vld [vmem:[#allocation13 + $0x30c] sm:$0xf0]  ;;  %v5627_v56 = vld [vmem:[#allocation4 + $0xc] sm:$0x77]  ;;  %v11060_v23 = vor.u32 %v13046_v26, %v11057_v52  ;;  %v13005_v36 = vld [vmem:[#allocation13 + $0x394] sm:$0xf0] }
 0x752   :  { %v13030_v61 = vld [vmem:[#allocation13 + $0x464] sm:$0xf] }
 0x754   :  { %6447 = vmatpush.bf16.msrb.mxu3 %v11104_v39  ;;  %6422 = vmatpush.bf16.msra.mxu0 %v10832_v50 }
 0x755   :  { %6433 = vmatpush.bf16.msra.mxu2 %v10992_v15  ;;  %6460 = vmatpush.bf16.msrb.mxu1 %v10852_v31  ;;  %v10820_v15 = vor.u32 %v12986_v21, %v10817_v5 }
 0x758   :  { %6448 = vmatpush.bf16.msrb.mxu3 %v11088_v47 }
 0x759   :  { %6434 = vmatpush.bf16.msra.mxu2 %v10976_v6  ;;  %v11063_v6 = vld [vmem:[#allocation13 + $0x4e8] sm:$0xf] }
 0x7a9   :  { %v5601_v16 = vpop.permute.xlu2 %5600 }
 0x7aa   :  { %v5604_v11 = vrot.slane %v5601_v16, 4 }
 0x7ac   :  { %v5607_v33 = vsel %vm16655_vm14, %v5604_v11, %v5601_v16  ;;  %v5625_v1 = vsel %vm15976_vm8, %v5604_v11, %v5624_v42  ;;  %v12990_v42 = vld [vmem:[#allocation13 + $0x324] sm:$0xf]  ;;  %vm5800_vm14 = vsmask.f32 7448 }
 0x7ad   :  { %v5620_v3 = vsel %vm5618_vm10, %v5607_v33, %v5619_v20  ;;  %5626 = vst [vmem:[#allocation4 + $0x8] sm:$0x7] %v5625_v1  ;;  %v10960_v20 = vor.u32 %v13024_v2, %v10959_v27  ;;  %v10836_v16 = vor.u32 %v12990_v42, %v10833_v8  ;;  %vm16006_vm2 = vmor %vm15999_vm7, %vm5800_vm14  ;;  %v10816_v1 = vor.u32 %v12988_v4, %v10815_v44  ;;  %v13049_v2 = vld [vmem:[#allocation13 + $0x4f4] sm:$0xf0]  ;;  %v13034_v4 = vld [vmem:[#allocation13 + $0x484] sm:$0xf] }
 0x7ae   :  { %5621 = vst [vmem:[#allocation4] sm:$0x77] %v5620_v3  ;;  %v13052_v3 = vld [vmem:[#allocation13 + $0x50c] sm:$0xf0]  ;;  %v10936_v27 = vor.u32 %v13017_v7, %v10935_v35  ;;  %v11064_v31 = vor.u32 %v13049_v2, %v11063_v6  ;;  %v11121_v35 = vld [vmem:[#allocation13 + $0x570] sm:$0xf0] }
 0x7af   :  { %6435 = vmatpush.bf16.msra.mxu2 %v10960_v20  ;;  %6461 = vmatpush.bf16.msrb.mxu1 %v10836_v16  ;;  %v11072_v24 = vor.u32 %v13052_v3, %v11071_v41  ;;  %v11025_v16 = vld [vmem:[#allocation13 + $0x4b0] sm:$0xf0] }
 0x7b0   :  { %6423 = vmatpush.bf16.msra.mxu0 %v10816_v1  ;;  %v10887_v1 = vld [vmem:[#allocation13 + $0x388] sm:$0xf] }
 0x7b1   :  { %6449 = vmatpush.bf16.msrb.mxu3 %v11072_v24  ;;  %v10888_v5 = vor.u32 %v13005_v36, %v10887_v1  ;;  %v11089_v1 = vld [vmem:[#allocation13 + $0x530] sm:$0xf0]  ;;  %v10839_v36 = vld [vmem:[#allocation13 + $0x328] sm:$0xf] }
 0x7b3   :  { %6436 = vmatpush.bf16.msra.mxu2 %v10944_v60  ;;  %6462 = vmatpush.bf16.msrb.mxu1 %v10820_v15  ;;  %v13037_v60 = vld [vmem:[#allocation13 + $0x494] sm:$0xf0] }
 0x7b4   :  { %v5758_v46 = vld [vmem:[#allocation4 + $0x8] sm:$0x7]  ;;  %6468 = vmatpush.bf16.msrb.mxu0 %v11060_v23 }
 0x7b5   :  { %v5757_v0 = vld [vmem:[#allocation4] sm:$0x77]  ;;  %v5766_v25 = vrot.slane %v5758_v46, 4  ;;  %v5767_v17 = vrot.slane %v5758_v46, 6  ;;  %v13042_v46 = vld [vmem:[#allocation13 + $0x4c4] sm:$0xf]  ;;  %6494 = vmatpush.bf16.msra.mxu3 %v10936_v27 }
 0x7b6   :  { %v5765_v58 = vrot.slane %v5757_v0, 2  ;;  %v11044_v8 = vor.u32 %v13042_v46, %v11041_v18  ;;  %v16020_v3 = vld [vmem:[#allocation4 + $0x8] sm:$0x3]  ;;  %v10999_v27 = vld [vmem:[#allocation13 + $0x468] sm:$0xf] }
 0x7b7   :  { %v5776_v32 = vsel %vm16657_vm13, %v5766_v25, %v5767_v17  ;;  %v5779_v54 = vsel %vm16660_vm11, %v5767_v17, %v5766_v25  ;;  %6481 = vmatpush.bf16.msrb.mxu2 %v11188_v55  ;;  %v10919_v25 = vld [vmem:[#allocation13 + $0x3c8] sm:$0xf]  ;;  %v13013_v17 = vld [vmem:[#allocation13 + $0x3d4] sm:$0xf0]  ;;  %6507 = vmatpush.bf16.msra.mxu1 %v11064_v31  ;;  %v13062_v55 = vld [vmem:[#allocation13 + $0x564] sm:$0xf] }
 0x7b8   :  { %v5773_v9 = vsel %vm16656_vm9, %v5757_v0, %v5765_v58  ;;  %v5778_v30 = vsel %vm16658_vm6, %v5757_v0, %v5765_v58  ;;  %v11169_v58 = vld [vmem:[#allocation13 + $0x5d0] sm:$0xf0]  ;;  %v10920_v47 = vor.u32 %v13013_v17, %v10919_v25  ;;  %6469 = vmatpush.bf16.msrb.mxu0 %v11044_v8  ;;  %vm16672_vm9 = vmmov %vm16663_vm4  ;;  %v13033_v18 = vld [vmem:[#allocation13 + $0x474] sm:$0xf0] }
 0x7b9   :  { %v5777_v10 = vsel %vm16659_vm3, %v5773_v9, %v5776_v32  ;;  %v5780_v34 = vsel %vm16663_vm4, %v5778_v30, %v5779_v54  ;;  %v11172_v20 = vor.u32 %v13074_v51, %v11169_v58  ;;  %v11047_v9 = vld [vmem:[#allocation13 + $0x4c8] sm:$0xf]  ;;  %v13045_v32 = vld [vmem:[#allocation13 + $0x4d4] sm:$0xf0]  ;;  %v13038_v30 = vld [vmem:[#allocation13 + $0x4a4] sm:$0xf] }
 0x7ba   :  { %v5802_v11 = vshrl.u32 %v5777_v10, 16  ;;  %v5805_v53 = vshll.u32 %v5777_v10, 16  ;;  %v5782_v13 = vrot.slane %v5780_v34, 2  ;;  %v11048_v59 = vor.u32 %v13045_v32, %v11047_v9  ;;  %v13070_v54 = vld [vmem:[#allocation13 + $0x5a4] sm:$0xf]  ;;  %6495 = vmatpush.bf16.msra.mxu3 %v10920_v47  ;;  %vm16673_vm13 = vmmov %vm16668_vm5 }
 0x7bb   :  { %6482 = vmatpush.bf16.msrb.mxu2 %v11172_v20  ;;  %v11028_v10 = vor.u32 %v13038_v30, %v11025_v16  ;;  %v11156_v49 = vor.u32 %v13070_v54, %v11153_v38  ;;  %v13009_v34 = vld [vmem:[#allocation13 + $0x3b4] sm:$0xf0]  ;;  %v13026_v51 = vld [vmem:[#allocation13 + $0x444] sm:$0xf]  ;;  %v10977_v8 = vld [vmem:[#allocation13 + $0x450] sm:$0xf0] }
 0x7bc   :  { %v5804_v62 = vrot.slane %v5802_v11, 6  ;;  %v5807_v28 = vrot.slane %v5805_v53, 7  ;;  %v5811_v33 = vshll.u32 %v5782_v13, 16  ;;  %v11031_v11 = vld [vmem:[#allocation13 + $0x4a8] sm:$0xf]  ;;  %6508 = vmatpush.bf16.msra.mxu1 %v11048_v59  ;;  %v10904_v13 = vor.u32 %v13009_v34, %v10903_v40  ;;  %vm16676_vm11 = vmmov %vm16668_vm5 }
 0x7bd   :  { %v13041_v53 = vld [vmem:[#allocation13 + $0x4b4] sm:$0xf0]  ;;  %6470 = vmatpush.bf16.msrb.mxu0 %v11028_v10  ;;  %v13058_v58 = vld [vmem:[#allocation13 + $0x544] sm:$0xf]  ;;  %v10855_v20 = vld [vmem:[#allocation13 + $0x348] sm:$0xf]  ;;  %v11124_v59 = vor.u32 %v13062_v55, %v11121_v35 }
 0x7be   :  { %v5808_v45 = vor.u32 %v5807_v28, %v5804_v62  ;;  %v5813_v37 = vrot.slane %v5811_v33, 7  ;;  %v11032_v44 = vor.u32 %v13041_v53, %v11031_v11  ;;  %v11009_v62 = vld [vmem:[#allocation13 + $0x490] sm:$0xf0]  ;;  %v13066_v28 = vld [vmem:[#allocation13 + $0x584] sm:$0xf]  ;;  %6496 = vmatpush.bf16.msra.mxu3 %v10904_v13  ;;  %v10980_v11 = vor.u32 %v13026_v51, %v10977_v8 }
 0x7bf   :  { %v11012_v48 = vor.u32 %v13034_v4, %v11009_v62  ;;  %v11137_v33 = vld [vmem:[#allocation13 + $0x590] sm:$0xf0]  ;;  %6483 = vmatpush.bf16.msrb.mxu2 %v11156_v49  ;;  %v12997_v30 = vld [vmem:[#allocation13 + $0x354] sm:$0xf0]  ;;  %v10983_v16 = vld [vmem:[#allocation13 + $0x448] sm:$0xf]  ;;  %v11000_v49 = vor.u32 %v13033_v18, %v10999_v27 }
 0x7c0   :  { %v5809_v12 = vrot.slane %v5808_v45, 2  ;;  %v11140_v41 = vor.u32 %v13066_v28, %v11137_v33  ;;  %v11015_v45 = vld [vmem:[#allocation13 + $0x488] sm:$0xf]  ;;  %6509 = vmatpush.bf16.msra.mxu1 %v11032_v44  ;;  %v13029_v34 = vld [vmem:[#allocation13 + $0x454] sm:$0xf0] }
 0x7c1   :  { %v5603_v43 = vpop.permute.xlu0 %5602  ;;  %v11016_v24 = vor.u32 %v13037_v60, %v11015_v45  ;;  %6471 = vmatpush.bf16.msrb.mxu0 %v11012_v48  ;;  %v13022_v13 = vld [vmem:[#allocation13 + $0x424] sm:$0xf]  ;;  %v10961_v44 = vld [vmem:[#allocation13 + $0x430] sm:$0xf0]  ;;  %v10856_v48 = vor.u32 %v12997_v30, %v10855_v20  ;;  %v10984_v33 = vor.u32 %v13029_v34, %v10983_v16  ;;  %v10967_v45 = vld [vmem:[#allocation13 + $0x428] sm:$0xf] }
 0x7c2   :  { %v5814_v39 = vsel %vm16006_vm2, %v5809_v12, %v5813_v37  ;;  %v5605_v14 = vrot.slane %v5603_v43, 4  ;;  %v5642_v12 = vrot.slane %v16020_v3, 4  ;;  %v16023_v37 = vld [vmem:[#allocation4] sm:$0x33]  ;;  %6497 = vmatpush.bf16.msra.mxu3 %v10888_v5  ;;  %v13054_v4 = vld [vmem:[#allocation13 + $0x524] sm:$0xf] }
 0x7c3   :  { %5926 = vst [vmem:[#allocation1] ss:$4 sm:$0xff] %v5814_v39  ;;  %6484 = vmatpush.bf16.msrb.mxu2 %v11140_v41  ;;  %v10871_v39 = vld [vmem:[#allocation13 + $0x368] sm:$0xf]  ;;  %v5641_v47 = vrot.slane %v16023_v37, 2 }
 0x7c4   :  { %v5608_v0 = vsel %vm16666_vm1, %v5605_v14, %v5603_v43  ;;  %v5631_v42 = vsel %vm15976_vm8, %v5605_v14, %v5630_v19  ;;  %vm16669_vm8 = vmmov %vm16658_vm6  ;;  %v10993_v43 = vld [vmem:[#allocation13 + $0x470] sm:$0xf0]  ;;  %6510 = vmatpush.bf16.msra.mxu1 %v11016_v24  ;;  %v13001_v14 = vld [vmem:[#allocation13 + $0x374] sm:$0xf0]  ;;  %vm16681_vm1 = vcmask 1042434  }
 0x7c5   :  { %v5628_v50 = vsel %vm5618_vm10, %v5608_v0, %v5627_v56  ;;  %5632 = vst [vmem:[#allocation4 + $0x14] sm:$0x7] %v5631_v42  ;;  %vm16670_vm10 = vmmov %vm16659_vm3  ;;  %v5643_v0 = vrot.slane %v16020_v3, 6  ;;  %v10996_v32 = vor.u32 %v13030_v61, %v10993_v43  ;;  %v10872_v40 = vor.u32 %v13001_v14, %v10871_v39  ;;  %v12993_v41 = vld [vmem:[#allocation13 + $0x334] sm:$0xf0] }
 0x7c6   :  { %5629 = vst [vmem:[#allocation4 + $0xc] sm:$0x77] %v5628_v50  ;;  %v11105_v50 = vld [vmem:[#allocation13 + $0x550] sm:$0xf0]  ;;  %v13025_v60 = vld [vmem:[#allocation13 + $0x434] sm:$0xf0]  ;;  %vm16674_vm6 = vmmov %vm16667_vm15 }
 0x7c7   :  { %6472 = vmatpush.bf16.msrb.mxu0 %v10996_v32  ;;  %6485 = vmatpush.bf16.msrb.mxu2 %v11124_v59  ;;  %v11108_v53 = vor.u32 %v13058_v58, %v11105_v50  ;;  %v13050_v61 = vld [vmem:[#allocation13 + $0x504] sm:$0xf]  ;;  %v11073_v43 = vld [vmem:[#allocation13 + $0x510] sm:$0xf0]  ;;  %v10823_v55 = vld [vmem:[#allocation13 + $0x308] sm:$0xf]  ;;  %v5652_v57 = vsel %vm16673_vm13, %v5642_v12, %v5643_v0 }
 0x7c8   :  { %6498 = vmatpush.bf16.msra.mxu3 %v10872_v40  ;;  %6511 = vmatpush.bf16.msra.mxu1 %v11000_v49  ;;  %v12989_v35 = vld [vmem:[#allocation13 + $0x314] sm:$0xf0]  ;;  %v11076_v14 = vor.u32 %v13050_v61, %v11073_v43  ;;  %v11191_v27 = vld [vmem:[#allocation13 + $0x5e8] sm:$0xf]  ;;  %v13015_v51 = vld [vmem:[#allocation13 + $0x3ec] sm:$0xf] }
 0x7c9   :  { %v13047_v8 = vld [vmem:[#allocation13 + $0x4ec] sm:$0xf]  ;;  %vm16675_vm3 = vmmov %vm16674_vm6  ;;  %v11065_v0 = vld [vmem:[#allocation13 + $0x4f8] sm:$0xf0] }
 0x7ca   :  { %v13079_v58 = vld [vmem:[#allocation13 + $0x5ec] sm:$0xf]  ;;  %v11175_v20 = vld [vmem:[#allocation13 + $0x5c8] sm:$0xf]  ;;  %vm16677_vm7 = vmmov %vm16670_vm10 }
 0x7cb   :  { %6473 = vmatpush.bf16.msrb.mxu0 %v10980_v11  ;;  %6486 = vmatpush.bf16.msrb.mxu2 %v11108_v53  ;;  %v10921_v16 = vld [vmem:[#allocation13 + $0x3d8] sm:$0xf0]  ;;  %vm16678_vm14 = vmmov %vm16677_vm7  ;;  %v13043_v40 = vld [vmem:[#allocation13 + $0x4cc] sm:$0xf] }
 0x7cc   :  { %v5760_v21 = vld [vmem:[#allocation4 + $0x14] sm:$0x7]  ;;  %6499 = vmatpush.bf16.msra.mxu3 %v10856_v48  ;;  %6512 = vmatpush.bf16.msra.mxu1 %v10984_v33  ;;  %v11049_v49 = vld [vmem:[#allocation13 + $0x4d8] sm:$0xf0]  ;;  %v13075_v34 = vld [vmem:[#allocation13 + $0x5cc] sm:$0xf] }
 0x7cd   :  { %v5759_v19 = vld [vmem:[#allocation4 + $0xc] sm:$0x77]  ;;  %v5769_v26 = vrot.slane %v5760_v21, 4  ;;  %v5770_v52 = vrot.slane %v5760_v21, 6  ;;  %v5636_v54 = vld [vmem:[#allocation4 + $0x14] sm:$0x3]  ;;  %vm16679_vm4 = vmmov %vm16675_vm3 }
 0x7ce   :  { %v5768_v15 = vrot.slane %v5759_v19, 2  ;;  %v5635_v10 = vld [vmem:[#allocation4 + $0xc] sm:$0x33]  ;;  %v5645_v5 = vrot.slane %v5636_v54, 4  ;;  %v13007_v48 = vld [vmem:[#allocation13 + $0x3ac] sm:$0xf]  ;;  %vm16688_vm13 = vmmov %vm16669_vm8 }
 0x7cf   :  { %v5788_v23 = vsel %vm16668_vm5, %v5769_v26, %v5770_v52  ;;  %v5791_v6 = vsel %vm16671_vm0, %v5770_v52, %v5769_v26  ;;  %v5644_v21 = vrot.slane %v5635_v10, 2  ;;  %v11092_v26 = vor.u32 %v13054_v4, %v11089_v1  ;;  %v13018_v52 = vld [vmem:[#allocation13 + $0x404] sm:$0xf]  ;;  %v11177_v11 = vld [vmem:[#allocation13 + $0x5d8] sm:$0xf0] }
 0x7d0   :  { %v5785_v56 = vsel %vm16667_vm15, %v5759_v19, %v5768_v15  ;;  %v5790_v29 = vsel %vm16669_vm8, %v5759_v19, %v5768_v15  ;;  %v5646_v19 = vrot.slane %v5636_v54, 6  ;;  %v10964_v15 = vor.u32 %v13022_v13, %v10961_v44  ;;  %v11159_v44 = vld [vmem:[#allocation13 + $0x5a8] sm:$0xf]  ;;  %v13073_v4 = vld [vmem:[#allocation13 + $0x5b4] sm:$0xf0] }
 0x7d1   :  { %v5789_v7 = vsel %vm16670_vm10, %v5785_v56, %v5788_v23  ;;  %v5792_v2 = vsel %vm16672_vm9, %v5790_v29, %v5791_v6  ;;  %v10945_v56 = vld [vmem:[#allocation13 + $0x410] sm:$0xf0]  ;;  %v10840_v23 = vor.u32 %v12993_v41, %v10839_v36  ;;  %v10968_v29 = vor.u32 %v13025_v60, %v10967_v45  ;;  %v13021_v6 = vld [vmem:[#allocation13 + $0x414] sm:$0xf0]  ;;  %6487 = vmatpush.bf16.msrb.mxu2 %v11092_v26  ;;  %v10905_v33 = vld [vmem:[#allocation13 + $0x3b8] sm:$0xf0] }
 0x7d2   :  { %v5815_v46 = vshrl.u32 %v5789_v7, 16  ;;  %v5818_v31 = vshll.u32 %v5789_v7, 16  ;;  %v5794_v42 = vrot.slane %v5792_v2, 2  ;;  %v10951_v7 = vld [vmem:[#allocation13 + $0x408] sm:$0xf]  ;;  %6474 = vmatpush.bf16.msrb.mxu0 %v10964_v15  ;;  %v10948_v39 = vor.u32 %v13018_v52, %v10945_v56  ;;  %vm16685_vm10 = vmmov %vm16671_vm0 }
 0x7d3   :  { %v13081_v2 = vld [vmem:[#allocation13 + $0x5f4] sm:$0xf0]  ;;  %6500 = vmatpush.bf16.msra.mxu3 %v10840_v23  ;;  %6513 = vmatpush.bf16.msra.mxu1 %v10968_v29  ;;  %v10952_v18 = vor.u32 %v13021_v6, %v10951_v7  ;;  %v5656_v3 = vsel %vm16675_vm3, %v5635_v10, %v5644_v21  ;;  %v5659_v12 = vsel %vm16676_vm11, %v5645_v5, %v5646_v19  ;;  %v13039_v1 = vld [vmem:[#allocation13 + $0x4ac] sm:$0xf]  ;;  %v11033_v36 = vld [vmem:[#allocation13 + $0x4b8] sm:$0xf0] }
 0x7d4   :  { %v5817_v25 = vrot.slane %v5815_v46, 6  ;;  %v5820_v17 = vrot.slane %v5818_v31, 7  ;;  %v5824_v9 = vshll.u32 %v5794_v42, 16  ;;  %v5649_v46 = vsel %vm16674_vm6, %v16023_v37, %v5641_v47  ;;  %v10937_v42 = vld [vmem:[#allocation13 + $0x3f8] sm:$0xf0]  ;;  %vm16686_vm0 = vmmov %vm16675_vm3 }
 0x7d5   :  { %v10824_v31 = vor.u32 %v12989_v35, %v10823_v55  ;;  %v13077_v37 = vld [vmem:[#allocation13 + $0x5d4] sm:$0xf0]  ;;  %v13011_v47 = vld [vmem:[#allocation13 + $0x3cc] sm:$0xf]  ;;  %6488 = vmatpush.bf16.msrb.mxu2 %v11076_v14  ;;  %v11192_v59 = vor.u32 %v13081_v2, %v11191_v27  ;;  %v10940_v30 = vor.u32 %v13015_v51, %v10937_v42  ;;  %v5660_v10 = vsel %vm16678_vm14, %v5656_v3, %v5659_v12  ;;  %v11161_v45 = vld [vmem:[#allocation13 + $0x5b8] sm:$0xf0] }
 0x7d6   :  { %v5821_v38 = vor.u32 %v5820_v17, %v5817_v25  ;;  %v5826_v28 = vrot.slane %v5824_v9, 7  ;;  %v11193_v25 = vld [vmem:[#allocation13 + $0x5f8] sm:$0xf0]  ;;  %v5653_v9 = vsel %vm16677_vm7, %v5649_v46, %v5652_v57  ;;  %6475 = vmatpush.bf16.msrb.mxu0 %v10948_v39  ;;  %v11068_v54 = vor.u32 %v13047_v8, %v11065_v0  ;;  %v13071_v41 = vld [vmem:[#allocation13 + $0x5ac] sm:$0xf]  ;;  %vm16689_vm6 = vmmov %vm16685_vm10 }
 0x7d7   :  { %6501 = vmatpush.bf16.msra.mxu3 %v10824_v31  ;;  %6514 = vmatpush.bf16.msra.mxu1 %v10952_v18  ;;  %v11176_v53 = vor.u32 %v13077_v37, %v11175_v20  ;;  %v10924_v13 = vor.u32 %v13011_v47, %v10921_v16  ;;  %v11160_v60 = vor.u32 %v13073_v4, %v11159_v44  ;;  %v11143_v5 = vld [vmem:[#allocation13 + $0x588] sm:$0xf]  ;;  %v13069_v19 = vld [vmem:[#allocation13 + $0x594] sm:$0xf0]  ;;  %v13003_v26 = vld [vmem:[#allocation13 + $0x38c] sm:$0xf] }
 0x7d8   :  { %v5822_v62 = vrot.slane %v5821_v38, 2  ;;  %v11196_v38 = vor.u32 %v13079_v58, %v11193_v25  ;;  %v10908_v21 = vor.u32 %v13007_v48, %v10905_v33  ;;  %v11164_v15 = vor.u32 %v13071_v41, %v11161_v45  ;;  %v10889_v52 = vld [vmem:[#allocation13 + $0x398] sm:$0xf0]  ;;  %v13035_v56 = vld [vmem:[#allocation13 + $0x48c] sm:$0xf]  ;;  %vm16690_vm3 = vmmov %vm16677_vm7 }
 0x7d9   :  { %v11017_v23 = vld [vmem:[#allocation13 + $0x498] sm:$0xf0]  ;;  %v13067_v29 = vld [vmem:[#allocation13 + $0x58c] sm:$0xf]  ;;  %v11144_v43 = vor.u32 %v13069_v19, %v11143_v5  ;;  %v10892_v55 = vor.u32 %v13003_v26, %v10889_v52  ;;  %v11127_v35 = vld [vmem:[#allocation13 + $0x568] sm:$0xf] }
 0x7da   :  { %v5827_v24 = vsel %vm16006_vm2, %v5822_v62, %v5826_v28  ;;  %v11052_v62 = vor.u32 %v13043_v40, %v11049_v49  ;;  %v11180_v28 = vor.u32 %v13075_v34, %v11177_v11  ;;  %v11145_v61 = vld [vmem:[#allocation13 + $0x598] sm:$0xf0]  ;;  %v13065_v7 = vld [vmem:[#allocation13 + $0x574] sm:$0xf0]  ;;  %v11020_v6 = vor.u32 %v13035_v56, %v11017_v23  ;;  %v12999_v39 = vld [vmem:[#allocation13 + $0x36c] sm:$0xf] }
 0x7db   :  { %5929 = vst [vmem:[#allocation1 + $0x1] ss:$4 sm:$0xff] %v5827_v24  ;;  %v11036_v24 = vor.u32 %v13039_v1, %v11033_v36  ;;  %v11148_v57 = vor.u32 %v13067_v29, %v11145_v61  ;;  %v10873_v14 = vld [vmem:[#allocation13 + $0x378] sm:$0xf0]  ;;  %v13031_v27 = vld [vmem:[#allocation13 + $0x46c] sm:$0xf]  ;;  %v11128_v42 = vor.u32 %v13065_v7, %v11127_v35  ;;  %vm16680_vm2 = vmmov %vm16668_vm5 }
 0x7dc   :  { %v11001_v2 = vld [vmem:[#allocation13 + $0x478] sm:$0xf0]  ;;  %v13063_v46 = vld [vmem:[#allocation13 + $0x56c] sm:$0xf]  ;;  %v16054_v18 = vld [vmem:[#allocation4 + $0x8] sm:$0x6]  ;;  %v10876_v8 = vor.u32 %v12999_v39, %v10873_v14 }
 0x7dd   :  { %v11129_v31 = vld [vmem:[#allocation13 + $0x578] sm:$0xf0]  ;;  %v16056_v51 = vld [vmem:[#allocation4] sm:$0x66]  ;;  %v11111_v3 = vld [vmem:[#allocation13 + $0x548] sm:$0xf]  ;;  %v11004_v0 = vor.u32 %v13031_v27, %v11001_v2 }
 0x7de   :  { %v13061_v12 = vld [vmem:[#allocation13 + $0x554] sm:$0xf0]  ;;  %v11132_v58 = vor.u32 %v13063_v46, %v11129_v31  ;;  %v12995_v25 = vld [vmem:[#allocation13 + $0x34c] sm:$0xf]  ;;  %v10857_v20 = vld [vmem:[#allocation13 + $0x358] sm:$0xf0] }
 0x7df   :  { %v13027_v37 = vld [vmem:[#allocation13 + $0x44c] sm:$0xf]  ;;  %v10985_v47 = vld [vmem:[#allocation13 + $0x458] sm:$0xf0]  ;;  %v7226_v16 = vrot.slane %v16054_v18, 4  ;;  %v10860_v40 = vor.u32 %v12995_v25, %v10857_v20  ;;  %v7227_v33 = vrot.slane %v16054_v18, 6  ;;  %vm16687_vm9 = vmmov %vm16680_vm2 }
 0x7e0   :  { %v11095_v49 = vld [vmem:[#allocation13 + $0x528] sm:$0xf]  ;;  %v13057_v34 = vld [vmem:[#allocation13 + $0x534] sm:$0xf0]  ;;  %v10988_v11 = vor.u32 %v13027_v37, %v10985_v47  ;;  %v10841_v44 = vld [vmem:[#allocation13 + $0x338] sm:$0xf0] }
 0x7e1   :  { %v13023_v4 = vld [vmem:[#allocation13 + $0x42c] sm:$0xf]  ;;  %v11097_v48 = vld [vmem:[#allocation13 + $0x538] sm:$0xf0]  ;;  %v11079_v45 = vld [vmem:[#allocation13 + $0x508] sm:$0xf]  ;;  %v7236_v46 = vsel %vm16680_vm2, %v7226_v16, %v7227_v33 }
 0x7e2   :  { %v16042_v17 = vld.sshfl [vmem:[#allocation1] sm:$0xff pattern:$0x73625140]  ;;  %v16044_v50 = vld.sshfl [vmem:[#allocation1 + $0x8] sm:$0xff pattern:$0x73625140] }
 0x7e3   :  { %v16047_v32 = vld.sshfl [vmem:[#allocation1 + $0x10] sm:$0xff pattern:$0x73625140]  ;;  %6424 = vmatmul.bf16.vlgmr.msra.gmra.mxu0 %v16042_v17  ;;  %6437 = vmatmul.bf16.vlgmr.msra.gmra.mxu2 %v16044_v50  ;;  %v13053_v5 = vld [vmem:[#allocation13 + $0x514] sm:$0xf0]  ;;  %vm16682_vm15 = vcmask 1040384  }
 0x7e4   :  { %6572 = vst [vmem:[#allocation1] ss:$4 sm:$0xff] %v5653_v9  ;;  %6450 = vmatmul.bf16.vlgmr.msrb.gmra.mxu3 %v16047_v32  ;;  %6463 = vmatmul.bf16.vlgmr.msrb.gmra.mxu1 %v16042_v17  ;;  %v13059_v9 = vld [vmem:[#allocation13 + $0x54c] sm:$0xf]  ;;  %v10953_v56 = vld [vmem:[#allocation13 + $0x418] sm:$0xf0]  ;;  %vm16077_vm5 = vmor %vm16682_vm15, %vm16681_vm1 }
 0x7e5   :  { %6574 = vst [vmem:[#allocation1 + $0x1] ss:$4 sm:$0xff] %v5660_v10  ;;  %6520 = vmatpush.bf16.msra.mxu0 %v11192_v59  ;;  %6533 = vmatpush.bf16.msra.mxu2 %v10940_v30  ;;  %v11113_v59 = vld [vmem:[#allocation13 + $0x558] sm:$0xf0]  ;;  %v7225_v30 = vrot.slane %v16056_v51, 2  ;;  %vm16691_vm11 = vcmask 1045506  }
 0x7e6   :  { %6546 = vmatpush.bf16.msrb.mxu3 %v11068_v54  ;;  %6559 = vmatpush.bf16.msrb.mxu1 %v11196_v38  ;;  %v16062_v10 = vld [vmem:[#allocation4 + $0x14] sm:$0x6]  ;;  %v16066_v54 = vld [vmem:[#allocation4 + $0xc] sm:$0x66]  ;;  %v11112_v38 = vor.u32 %v13061_v12, %v11111_v3  ;;  %v12987_v19 = vld [vmem:[#allocation13 + $0x30c] sm:$0xf]  ;;  %v7240_v3 = vsel %vm16685_vm10, %v7227_v33, %v7226_v16 }
 0x7e7   :  { %v7228_v1 = vrot.slane %v16066_v54, 2  ;;  %v7229_v36 = vrot.slane %v16062_v10, 4  ;;  %v7230_v41 = vrot.slane %v16062_v10, 6  ;;  %v13019_v52 = vld [vmem:[#allocation13 + $0x40c] sm:$0xf]  ;;  %vm16692_vm7 = vcmask 1044484   ;;  %vm16696_vm2 = vmmov %vm16691_vm11 }
 0x7e8   :  { %v13051_v23 = vld [vmem:[#allocation13 + $0x50c] sm:$0xf]  ;;  %v11081_v29 = vld [vmem:[#allocation13 + $0x518] sm:$0xf0]  ;;  %v11311_v61 = vld [vmem:[#allocation13 + $0xe0] sm:$0xf]  ;;  %v10956_v31 = vor.u32 %v13019_v52, %v10953_v56 }
 0x7e9   :  { %6521 = vmatpush.bf16.msra.mxu0 %v11176_v53  ;;  %6534 = vmatpush.bf16.msra.mxu2 %v10924_v13  ;;  %v11116_v53 = vor.u32 %v13059_v9, %v11113_v59  ;;  %v12991_v13 = vld [vmem:[#allocation13 + $0x32c] sm:$0xf]  ;;  %v12952_v35 = vld [vmem:[#allocation13 + $0x1ec] sm:$0xf0]  ;;  %v11567_v7 = vld [vmem:[#allocation13 + $0x2e0] sm:$0xf]  ;;  %v11084_v18 = vor.u32 %v13051_v23, %v11081_v29  ;;  %v7246_v20 = vsel %vm16686_vm0, %v16066_v54, %v7228_v1 }
 0x7ea   :  { %6547 = vmatpush.bf16.msrb.mxu3 %v11052_v62  ;;  %6560 = vmatpush.bf16.msrb.mxu1 %v11180_v28  ;;  %v10969_v62 = vld [vmem:[#allocation13 + $0x438] sm:$0xf0]  ;;  %v13055_v28 = vld [vmem:[#allocation13 + $0x52c] sm:$0xf]  ;;  %v12984_v14 = vld [vmem:[#allocation13 + $0x2ec] sm:$0xf0]  ;;  %v7249_v37 = vsel %vm16687_vm9, %v7229_v36, %v7230_v41 }
 0x7eb   :  { %v11100_v26 = vor.u32 %v13055_v28, %v11097_v48  ;;  %v12918_v27 = vld [vmem:[#allocation13 + $0xe4] sm:$0xf]  ;;  %v11313_v2 = vld [vmem:[#allocation13 + $0xf0] sm:$0xf0]  ;;  %v12916_v25 = vld [vmem:[#allocation13 + $0xcc] sm:$0xf0]  ;;  %v11568_v47 = vor.u32 %v12984_v14, %v11567_v7 }
 0x7ec   :  { %v11316_v9 = vor.u32 %v12918_v27, %v11313_v2  ;;  %v11423_v59 = vld [vmem:[#allocation13 + $0x1c0] sm:$0xf]  ;;  %v12948_v10 = vld [vmem:[#allocation13 + $0x1cc] sm:$0xf0]  ;;  %v12914_v16 = vld [vmem:[#allocation13 + $0xc4] sm:$0xf] }
 0x7ed   :  { %6522 = vmatpush.bf16.msra.mxu0 %v11160_v60  ;;  %6535 = vmatpush.bf16.msra.mxu2 %v10908_v21  ;;  %v11096_v60 = vor.u32 %v13057_v34, %v11095_v49  ;;  %v10844_v21 = vor.u32 %v12991_v13, %v10841_v44  ;;  %v11297_v49 = vld [vmem:[#allocation13 + $0xd0] sm:$0xf0]  ;;  %vm16095_vm14 = vmor %vm16077_vm5, %vm16692_vm7  ;;  %v11424_v44 = vor.u32 %v12948_v10, %v11423_v59  ;;  %vm16697_vm1 = vcmask 1046534   ;;  %v11263_v56 = vld [vmem:[#allocation13 + $0x80] sm:$0xf] }
 0x7ee   :  { %6548 = vmatpush.bf16.msrb.mxu3 %v11036_v24  ;;  %6561 = vmatpush.bf16.msrb.mxu1 %v11164_v15  ;;  %v10825_v24 = vld [vmem:[#allocation13 + $0x318] sm:$0xf0]  ;;  %v10972_v15 = vor.u32 %v13023_v4, %v10969_v62  ;;  %v11279_v4 = vld [vmem:[#allocation13 + $0xa0] sm:$0xf]  ;;  %v12912_v62 = vld [vmem:[#allocation13 + $0xac] sm:$0xf0]  ;;  %v11300_v33 = vor.u32 %v12914_v16, %v11297_v49 }
 0x7ef   :  { %v10828_v39 = vor.u32 %v12987_v19, %v10825_v24  ;;  %vm16108_vm15 = vmor %vm16095_vm14, %vm16697_vm1  ;;  %v12908_v23 = vld [vmem:[#allocation13 + $0x8c] sm:$0xf0]  ;;  %v11265_v7 = vld [vmem:[#allocation13 + $0x90] sm:$0xf0] }
 0x7f0   :  { %v12936_v14 = vld [vmem:[#allocation13 + $0x16c] sm:$0xf0]  ;;  %v16112_v27 = vld.sshfl [vmem:[#allocation1] sm:$0xff pattern:$0x73625140]  ;;  %vm16700_vm5 = vmmov %vm16686_vm0 }
 0x7f1   :  { %6523 = vmatpush.bf16.msra.mxu0 %v11144_v43  ;;  %6536 = vmatpush.bf16.msra.mxu2 %v10892_v55  ;;  %v12920_v43 = vld [vmem:[#allocation13 + $0xec] sm:$0xf0]  ;;  %v11439_v55 = vld [vmem:[#allocation13 + $0x1e0] sm:$0xf]  ;;  %v12898_v49 = vld [vmem:[#allocation13 + $0x44] sm:$0xf] }
 0x7f2   :  { %6549 = vmatpush.bf16.msrb.mxu3 %v11020_v6  ;;  %6562 = vmatpush.bf16.msrb.mxu1 %v11148_v57  ;;  %v7233_v6 = vsel %vm16679_vm4, %v16056_v51, %v7225_v30  ;;  %v11080_v57 = vor.u32 %v13053_v5, %v11079_v45  ;;  %v11312_v12 = vor.u32 %v12920_v43, %v11311_v61  ;;  %vm16695_vm4 = vmmov %vm16690_vm3  ;;  %v12976_v45 = vld [vmem:[#allocation13 + $0x2ac] sm:$0xf0]  ;;  %v11519_v43 = vld [vmem:[#allocation13 + $0x280] sm:$0xf] }
 0x7f3   :  { %6476 = vmatmul.bf16.vlgmr.msrb.gmra.mxu0 %v16044_v50  ;;  %6489 = vmatmul.bf16.vlgmr.msrb.gmra.mxu2 %v16047_v32  ;;  %v7237_v34 = vsel %vm16690_vm3, %v7233_v6, %v7236_v46  ;;  %v12940_v61 = vld [vmem:[#allocation13 + $0x18c] sm:$0xf0]  ;;  %v11247_v6 = vld [vmem:[#allocation13 + $0x60] sm:$0xf]  ;;  %v11264_v46 = vor.u32 %v12908_v23, %v11263_v56  ;;  %v11201_v56 = vld [vmem:[#allocation13 + $0x10] sm:$0xf0] }
 0x7f4   :  { %6502 = vmatmul.bf16.vlgmr.msra.gmra.mxu3 %v16042_v17  ;;  %6515 = vmatmul.bf16.vlgmr.msra.gmra.mxu1 %v16044_v50  ;;  %v11581_v5 = vrot.slane %v7237_v34, 9  ;;  %v12900_v59 = vld [vmem:[#allocation13 + $0x4c] sm:$0xf0]  ;;  %v11233_v34 = vld [vmem:[#allocation13 + $0x50] sm:$0xf0]  ;;  %vm16701_vm10 = vmmov %vm16687_vm9 }
 0x7f5   :  { %6524 = vmatpush.bf16.msra.mxu0 %v11128_v42  ;;  %6537 = vmatpush.bf16.msra.mxu2 %v10876_v8  ;;  %v7239_v8 = vsel %vm16669_vm8, %v16056_v51, %v7225_v30  ;;  %v7253_v51 = vsel %vm16689_vm6, %v7230_v41, %v7229_v36  ;;  %v12980_v30 = vld [vmem:[#allocation13 + $0x2cc] sm:$0xf0]  ;;  %v11535_v41 = vld [vmem:[#allocation13 + $0x2a0] sm:$0xf]  ;;  %v12950_v23 = vld [vmem:[#allocation13 + $0x1e4] sm:$0xf] }
 0x7f6   :  { %6550 = vmatpush.bf16.msrb.mxu3 %v11004_v0  ;;  %6563 = vmatpush.bf16.msrb.mxu1 %v11132_v58  ;;  %v11440_v0 = vor.u32 %v12952_v35, %v11439_v55  ;;  %v11295_v58 = vld [vmem:[#allocation13 + $0xc0] sm:$0xf]  ;;  %v12944_v36 = vld [vmem:[#allocation13 + $0x1ac] sm:$0xf0]  ;;  %v12906_v35 = vld [vmem:[#allocation13 + $0x84] sm:$0xf] }
 0x7f7   :  { %v11296_v13 = vor.u32 %v12916_v25, %v11295_v58  ;;  %v12972_v55 = vld [vmem:[#allocation13 + $0x28c] sm:$0xf0]  ;;  %v12902_v25 = vld [vmem:[#allocation13 + $0x64] sm:$0xf]  ;;  %vm16702_vm0 = vmmov %vm16689_vm6 }
 0x7f8   :  { %v16118_v42 = vld.sshfl [vmem:[#allocation1 + $0x10] sm:$0xff pattern:$0x73625140]  ;;  %vm16704_vm6 = vmmov %vm16700_vm5 }
 0x7f9   :  { %6525 = vmatpush.bf16.msra.mxu0 %v11112_v38  ;;  %6538 = vmatpush.bf16.msra.mxu2 %v10860_v40  ;;  %v11551_v38 = vld [vmem:[#allocation13 + $0x2c0] sm:$0xf]  ;;  %v7252_v40 = vsel %vm16688_vm13, %v16066_v54, %v7228_v1  ;;  %v7250_v54 = vsel %vm16695_vm4, %v7246_v20, %v7249_v37  ;;  %v12968_v58 = vld [vmem:[#allocation13 + $0x26c] sm:$0xf0]  ;;  %v11249_v20 = vld [vmem:[#allocation13 + $0x70] sm:$0xf0] }
 0x7fa   :  { %6551 = vmatpush.bf16.msrb.mxu3 %v10988_v11  ;;  %6564 = vmatpush.bf16.msrb.mxu1 %v11116_v53  ;;  %v7241_v11 = vsel %vm16691_vm11, %v7239_v8, %v7240_v3  ;;  %v7254_v28 = vsel %vm16696_vm2, %v7252_v40, %v7253_v51  ;;  %v11552_v48 = vor.u32 %v12980_v30, %v11551_v38  ;;  %v11407_v1 = vld [vmem:[#allocation13 + $0x1a0] sm:$0xf]  ;;  %v12932_v51 = vld [vmem:[#allocation13 + $0x14c] sm:$0xf0]  ;;  %vm16703_vm13 = vmmov %vm16702_vm0 }
 0x7fb   :  { %v11582_v19 = vrot.slane %v7241_v11, 9  ;;  %v11408_v52 = vor.u32 %v12944_v36, %v11407_v1  ;;  %v11520_v3 = vor.u32 %v12972_v55, %v11519_v43  ;;  %v11252_v38 = vor.u32 %v12902_v25, %v11249_v20  ;;  %v11359_v40 = vld [vmem:[#allocation13 + $0x140] sm:$0xf]  ;;  %v12964_v16 = vld [vmem:[#allocation13 + $0x24c] sm:$0xf0]  ;;  %vm16705_vm3 = vmmov %vm16669_vm8 }
 0x7fc   :  { %v11487_v30 = vld [vmem:[#allocation13 + $0x240] sm:$0xf]  ;;  %v11360_v53 = vor.u32 %v12932_v51, %v11359_v40  ;;  %v12894_v1 = vld [vmem:[#allocation13 + $0x24] sm:$0xf]  ;;  %v11217_v36 = vld [vmem:[#allocation13 + $0x30] sm:$0xf0] }
 0x7fd   :  { %6526 = vmatpush.bf16.msra.mxu0 %v11096_v60  ;;  %6539 = vmatpush.bf16.msra.mxu2 %v10844_v21  ;;  %v12910_v60 = vld [vmem:[#allocation13 + $0xa4] sm:$0xf]  ;;  %v11281_v21 = vld [vmem:[#allocation13 + $0xb0] sm:$0xf0]  ;;  %v7263_v2 = vsel %vm16108_vm15, %v11581_v5, %v11582_v19  ;;  %v11327_v5 = vld [vmem:[#allocation13 + $0x100] sm:$0xf] }
 0x7fe   :  { %6552 = vmatpush.bf16.msrb.mxu3 %v10972_v15  ;;  %6565 = vmatpush.bf16.msrb.mxu1 %v11100_v26  ;;  %v11583_v15 = vrot.slane %v7250_v54, 9  ;;  %v11584_v26 = vrot.slane %v7254_v28, 9  ;;  %v11284_v29 = vor.u32 %v12910_v60, %v11281_v21  ;;  %v11215_v54 = vld [vmem:[#allocation13 + $0x20] sm:$0xf]  ;;  %v12928_v28 = vld [vmem:[#allocation13 + $0x12c] sm:$0xf0]  ;;  %vm16706_vm11 = vmmov %vm16695_vm4 }
 0x7ff   :  { %v12892_v21 = vld [vmem:[#allocation13 + $0xc] sm:$0xf0]  ;;  %v12917_v25 = vld [vmem:[#allocation13 + $0xd4] sm:$0xf0]  ;;  %v11431_v20 = vld [vmem:[#allocation13 + $0x1c8] sm:$0xf] }
 0x800   :  { %v7267_v8 = vsel %vm16108_vm15, %v11583_v15, %v11584_v26  ;;  %v12924_v19 = vld [vmem:[#allocation13 + $0x10c] sm:$0xf0]  ;;  %v11220_v15 = vor.u32 %v12894_v1, %v11217_v36  ;;  %v11455_v26 = vld [vmem:[#allocation13 + $0x200] sm:$0xf]  ;;  %v12974_v51 = vld [vmem:[#allocation13 + $0x2a4] sm:$0xf] }
 0x801   :  { %6527 = vmatpush.bf16.msra.mxu0 %v11080_v57  ;;  %6540 = vmatpush.bf16.msra.mxu2 %v10828_v39  ;;  %v12904_v57 = vld [vmem:[#allocation13 + $0x6c] sm:$0xf0]  ;;  %v11375_v39 = vld [vmem:[#allocation13 + $0x160] sm:$0xf]  ;;  %v11328_v55 = vor.u32 %v12924_v19, %v11327_v5  ;;  %v12909_v1 = vld [vmem:[#allocation13 + $0x94] sm:$0xf0] }
 0x802   :  { %6553 = vmatpush.bf16.msrb.mxu3 %v10956_v31  ;;  %6566 = vmatpush.bf16.msrb.mxu1 %v11084_v18  ;;  %v16116_v18 = vld.sshfl [vmem:[#allocation1 + $0x8] sm:$0xff pattern:$0x73625140]  ;;  %v11248_v37 = vor.u32 %v12904_v57, %v11247_v6  ;;  %v12953_v6 = vld [vmem:[#allocation13 + $0x1f4] sm:$0xf0]  ;;  %vm16707_vm7 = vmmov %vm16696_vm2 }
 0x803   :  { %7366 = vst [vmem:[#allocation1] ss:$4 sm:$0xff] %v7263_v2  ;;  %v11399_v36 = vld [vmem:[#allocation13 + $0x188] sm:$0xf]  ;;  %v11377_v5 = vld [vmem:[#allocation13 + $0x170] sm:$0xf0]  ;;  %vm16708_vm14 = vmmov %vm16695_vm4 }
 0x804   :  { %6528 = vmatmul.bf16.vlgmr.msra.gmra.mxu0 %v16047_v32  ;;  %6541 = vmatmul.bf16.vlgmr.msra.gmra.mxu2 %v16042_v17  ;;  %v11280_v17 = vor.u32 %v12912_v62, %v11279_v4  ;;  %7369 = vst [vmem:[#allocation1 + $0x1] ss:$4 sm:$0xff] %v7267_v8  ;;  %v11236_v4 = vor.u32 %v12898_v49, %v11233_v34  ;;  %v11343_v62 = vld [vmem:[#allocation13 + $0x120] sm:$0xf]  ;;  %v12913_v49 = vld [vmem:[#allocation13 + $0xb4] sm:$0xf0]  ;;  %vm16709_vm4 = vmmov %vm16696_vm2 }
 0x805   :  { %7061 = vmatpush.bf16.msrb.mxu0 %v11312_v12  ;;  %7074 = vmatpush.bf16.msrb.mxu2 %v11440_v0  ;;  %v11268_v12 = vor.u32 %v12906_v35, %v11265_v7  ;;  %v11503_v0 = vld [vmem:[#allocation13 + $0x260] sm:$0xf]  ;;  %v11344_v60 = vor.u32 %v12928_v28, %v11343_v62  ;;  %v12921_v35 = vld [vmem:[#allocation13 + $0xf4] sm:$0xf0]  ;;  %v11447_v7 = vld [vmem:[#allocation13 + $0x1e8] sm:$0xf] }
 0x806   :  { %7087 = vmatpush.bf16.msra.mxu3 %v11568_v47  ;;  %7100 = vmatpush.bf16.msra.mxu1 %v11316_v9  ;;  %v11376_v47 = vor.u32 %v12936_v14, %v11375_v39  ;;  %v11231_v9 = vld [vmem:[#allocation13 + $0x40] sm:$0xf]  ;;  %v11504_v10 = vor.u32 %v12968_v58, %v11503_v0  ;;  %v11553_v0 = vld [vmem:[#allocation13 + $0x2d0] sm:$0xf0]  ;;  %v11303_v58 = vld [vmem:[#allocation13 + $0xc8] sm:$0xf] }
 0x807   :  { %6554 = vmatmul.bf16.vlgmr.msrb.gmra.mxu3 %v16044_v50  ;;  %6567 = vmatmul.bf16.vlgmr.msrb.gmra.mxu1 %v16047_v32  ;;  %v11536_v50 = vor.u32 %v12976_v45, %v11535_v41  ;;  %v11391_v32 = vld [vmem:[#allocation13 + $0x180] sm:$0xf]  ;;  %v11232_v11 = vor.u32 %v12900_v59, %v11231_v9  ;;  %v12942_v59 = vld [vmem:[#allocation13 + $0x1a4] sm:$0xf]  ;;  %v11415_v34 = vld [vmem:[#allocation13 + $0x1a8] sm:$0xf] }
 0x808   :  { %v11392_v31 = vor.u32 %v12940_v61, %v11391_v32  ;;  %v11199_v41 = vld [vmem:[#allocation13] sm:$0xf]  ;;  %v11569_v32 = vld [vmem:[#allocation13 + $0x2f0] sm:$0xf0]  ;;  %v11319_v61 = vld [vmem:[#allocation13 + $0xe8] sm:$0xf] }
 0x809   :  { %7062 = vmatpush.bf16.msrb.mxu0 %v11296_v13  ;;  %7075 = vmatpush.bf16.msrb.mxu2 %v11424_v44  ;;  %v12896_v13 = vld [vmem:[#allocation13 + $0x2c] sm:$0xf0]  ;;  %v11488_v44 = vor.u32 %v12964_v16, %v11487_v30  ;;  %v11200_v43 = vor.u32 %v12892_v21, %v11199_v41  ;;  %v11320_v8 = vor.u32 %v12921_v35, %v11319_v61  ;;  %v11537_v30 = vld [vmem:[#allocation13 + $0x2b0] sm:$0xf0]  ;;  %v11287_v16 = vld [vmem:[#allocation13 + $0xa8] sm:$0xf] }
 0x80a   :  { %7088 = vmatpush.bf16.msra.mxu3 %v11552_v48  ;;  %7101 = vmatpush.bf16.msra.mxu1 %v11300_v33  ;;  %v11471_v48 = vld [vmem:[#allocation13 + $0x220] sm:$0xf]  ;;  %v12960_v33 = vld [vmem:[#allocation13 + $0x22c] sm:$0xf0]  ;;  %v11216_v45 = vor.u32 %v12896_v13, %v11215_v54  ;;  %v11540_v54 = vor.u32 %v12974_v51, %v11537_v30  ;;  %v12938_v13 = vld [vmem:[#allocation13 + $0x184] sm:$0xf] }
 0x80b   :  { %v11472_v24 = vor.u32 %v12960_v33, %v11471_v48  ;;  %v12970_v28 = vld [vmem:[#allocation13 + $0x284] sm:$0xf]  ;;  %v11521_v48 = vld [vmem:[#allocation13 + $0x290] sm:$0xf0]  ;;  %v11271_v33 = vld [vmem:[#allocation13 + $0x88] sm:$0xf] }
 0x80c   :  { %v12941_v41 = vld [vmem:[#allocation13 + $0x194] sm:$0xf0]  ;;  %v12934_v21 = vld [vmem:[#allocation13 + $0x164] sm:$0xf]  ;;  %v11272_v19 = vor.u32 %v12909_v1, %v11271_v33  ;;  %v11361_v61 = vld [vmem:[#allocation13 + $0x150] sm:$0xf0] }
 0x80d   :  { %7063 = vmatpush.bf16.msrb.mxu0 %v11280_v17  ;;  %7076 = vmatpush.bf16.msrb.mxu2 %v11408_v52  ;;  %v12956_v17 = vld [vmem:[#allocation13 + $0x20c] sm:$0xf0]  ;;  %v12890_v52 = vld [vmem:[#allocation13 + $0x4] sm:$0xf]  ;;  %v11457_v51 = vld [vmem:[#allocation13 + $0x210] sm:$0xf0] }
 0x80e   :  { %7089 = vmatpush.bf16.msra.mxu3 %v11536_v50  ;;  %7102 = vmatpush.bf16.msra.mxu1 %v11284_v29  ;;  %v11441_v50 = vld [vmem:[#allocation13 + $0x1f0] sm:$0xf0]  ;;  %v12982_v29 = vld [vmem:[#allocation13 + $0x2e4] sm:$0xf]  ;;  %v11456_v57 = vor.u32 %v12956_v17, %v11455_v26  ;;  %v11204_v39 = vor.u32 %v12890_v52, %v11201_v56  ;;  %v11255_v17 = vld [vmem:[#allocation13 + $0x68] sm:$0xf] }
 0x80f   :  { %v11444_v14 = vor.u32 %v12950_v23, %v11441_v50  ;;  %v11572_v2 = vor.u32 %v12982_v29, %v11569_v32  ;;  %v11505_v26 = vld [vmem:[#allocation13 + $0x270] sm:$0xf0]  ;;  %v12905_v52 = vld [vmem:[#allocation13 + $0x74] sm:$0xf0]  ;;  %v11383_v56 = vld [vmem:[#allocation13 + $0x168] sm:$0xf]  ;;  %v11380_v50 = vor.u32 %v12934_v21, %v11377_v5 }
 0x810   :  { %v12937_v23 = vld [vmem:[#allocation13 + $0x174] sm:$0xf0]  ;;  %v12930_v32 = vld [vmem:[#allocation13 + $0x144] sm:$0xf]  ;;  %v11449_v33 = vld [vmem:[#allocation13 + $0x1f8] sm:$0xf0] }
 0x811   :  { %7064 = vmatpush.bf16.msrb.mxu0 %v11264_v46  ;;  %7077 = vmatpush.bf16.msrb.mxu2 %v11392_v31  ;;  %v12946_v46 = vld [vmem:[#allocation13 + $0x1c4] sm:$0xf]  ;;  %v11425_v31 = vld [vmem:[#allocation13 + $0x1d0] sm:$0xf0]  ;;  %v12983_v1 = vld [vmem:[#allocation13 + $0x2ec] sm:$0xf] }
 0x812   :  { %7090 = vmatpush.bf16.msra.mxu3 %v11520_v3  ;;  %7103 = vmatpush.bf16.msra.mxu1 %v11268_v12  ;;  %v11448_v3 = vor.u32 %v12953_v6, %v11447_v7  ;;  %v12978_v12 = vld [vmem:[#allocation13 + $0x2c4] sm:$0xf]  ;;  %v11489_v7 = vld [vmem:[#allocation13 + $0x250] sm:$0xf0]  ;;  %v11239_v6 = vld [vmem:[#allocation13 + $0x48] sm:$0xf] }
 0x813   :  { %v11556_v9 = vor.u32 %v12978_v12, %v11553_v0  ;;  %v12962_v35 = vld [vmem:[#allocation13 + $0x244] sm:$0xf]  ;;  %v11559_v5 = vld [vmem:[#allocation13 + $0x2c8] sm:$0xf]  ;;  %vm16710_vm2 = vmmov %vm16700_vm5 }
 0x814   :  { %v12958_v0 = vld [vmem:[#allocation13 + $0x224] sm:$0xf]  ;;  %vm16711_vm1 = vmmov %vm16710_vm2 }
 0x815   :  { %7065 = vmatpush.bf16.msrb.mxu0 %v11248_v37  ;;  %7078 = vmatpush.bf16.msrb.mxu2 %v11376_v47  ;;  %v12949_v37 = vld [vmem:[#allocation13 + $0x1d4] sm:$0xf0]  ;;  %v11428_v47 = vor.u32 %v12946_v46, %v11425_v31  ;;  %v11492_v46 = vor.u32 %v12962_v35, %v11489_v7  ;;  %v12926_v31 = vld [vmem:[#allocation13 + $0x124] sm:$0xf]  ;;  %v12911_v7 = vld [vmem:[#allocation13 + $0xac] sm:$0xf] }
 0x816   :  { %7091 = vmatpush.bf16.msra.mxu3 %v11504_v10  ;;  %7104 = vmatpush.bf16.msra.mxu1 %v11252_v38  ;;  %v11409_v10 = vld [vmem:[#allocation13 + $0x1b0] sm:$0xf0]  ;;  %v11304_v38 = vor.u32 %v12917_v25, %v11303_v58  ;;  %v11432_v40 = vor.u32 %v12949_v37, %v11431_v20  ;;  %v11223_v25 = vld [vmem:[#allocation13 + $0x28] sm:$0xf]  ;;  %v12897_v20 = vld [vmem:[#allocation13 + $0x34] sm:$0xf0] }
 0x817   :  { %v11473_v58 = vld [vmem:[#allocation13 + $0x230] sm:$0xf0]  ;;  %v11351_v37 = vld [vmem:[#allocation13 + $0x128] sm:$0xf]  ;;  %v11224_v30 = vor.u32 %v12897_v20, %v11223_v25  ;;  %v11273_v25 = vld [vmem:[#allocation13 + $0x98] sm:$0xf0] }
 0x818   :  { %v12939_v20 = vld [vmem:[#allocation13 + $0x18c] sm:$0xf]  ;;  %vm16712_vm15 = vmmov %vm16711_vm1 }
 0x819   :  { %7066 = vmatpush.bf16.msrb.mxu0 %v11232_v11  ;;  %7079 = vmatpush.bf16.msrb.mxu2 %v11360_v53  ;;  %v12945_v11 = vld [vmem:[#allocation13 + $0x1b4] sm:$0xf0]  ;;  %v11412_v53 = vor.u32 %v12942_v59, %v11409_v10  ;;  %v11476_v10 = vor.u32 %v12958_v0, %v11473_v58  ;;  %v12907_v58 = vld [vmem:[#allocation13 + $0x8c] sm:$0xf] }
 0x81a   :  { %7092 = vmatpush.bf16.msra.mxu3 %v11488_v44  ;;  %7105 = vmatpush.bf16.msra.mxu1 %v11236_v4  ;;  %v11393_v44 = vld [vmem:[#allocation13 + $0x190] sm:$0xf0]  ;;  %v11288_v4 = vor.u32 %v12913_v49, %v11287_v16  ;;  %v11416_v62 = vor.u32 %v12945_v11, %v11415_v34  ;;  %v11207_v49 = vld [vmem:[#allocation13 + $0x8] sm:$0xf]  ;;  %v12893_v34 = vld [vmem:[#allocation13 + $0x14] sm:$0xf0] }
 0x81b   :  { %v11335_v11 = vld [vmem:[#allocation13 + $0x108] sm:$0xf] }
 0x81d   :  { %7067 = vmatpush.bf16.msrb.mxu0 %v11216_v45  ;;  %7080 = vmatpush.bf16.msrb.mxu2 %v11344_v60  ;;  %v11396_v45 = vor.u32 %v12938_v13, %v11393_v44  ;;  %v11524_v60 = vor.u32 %v12970_v28, %v11521_v48  ;;  %v12985_v13 = vld [vmem:[#allocation13 + $0x2f4] sm:$0xf0]  ;;  %v12919_v44 = vld [vmem:[#allocation13 + $0xec] sm:$0xf] }
 0x81e   :  { %7093 = vmatpush.bf16.msra.mxu3 %v11472_v24  ;;  %7106 = vmatpush.bf16.msra.mxu1 %v11220_v15  ;;  %v11400_v24 = vor.u32 %v12941_v41, %v11399_v36  ;;  %v12966_v15 = vld [vmem:[#allocation13 + $0x264] sm:$0xf]  ;;  %v11577_v36 = vld [vmem:[#allocation13 + $0x2f8] sm:$0xf0]  ;;  %v11208_v41 = vor.u32 %v12893_v34, %v11207_v49  ;;  %v12935_v34 = vld [vmem:[#allocation13 + $0x16c] sm:$0xf] }
 0x81f   :  { %v11508_v29 = vor.u32 %v12966_v15, %v11505_v26  ;;  %v11580_v15 = vor.u32 %v12983_v1, %v11577_v36  ;;  %v12915_v26 = vld [vmem:[#allocation13 + $0xcc] sm:$0xf]  ;;  %v11257_v49 = vld [vmem:[#allocation13 + $0x78] sm:$0xf0] }
 0x820   :  { %v11241_v1 = vld [vmem:[#allocation13 + $0x58] sm:$0xf0]  ;;  %v12931_v36 = vld [vmem:[#allocation13 + $0x14c] sm:$0xf] }
 0x821   :  { %7068 = vmatpush.bf16.msrb.mxu0 %v11200_v43  ;;  %7081 = vmatpush.bf16.msrb.mxu2 %v11328_v55  ;;  %v11256_v43 = vor.u32 %v12905_v52, %v11255_v17  ;;  %v11384_v55 = vor.u32 %v12937_v23, %v11383_v56  ;;  %v11305_v17 = vld [vmem:[#allocation13 + $0xd8] sm:$0xf0]  ;;  %v12947_v52 = vld [vmem:[#allocation13 + $0x1cc] sm:$0xf] }
 0x822   :  { %7094 = vmatpush.bf16.msra.mxu3 %v11456_v57  ;;  %7107 = vmatpush.bf16.msra.mxu1 %v11204_v39  ;;  %v12901_v57 = vld [vmem:[#allocation13 + $0x54] sm:$0xf0]  ;;  %v11367_v39 = vld [vmem:[#allocation13 + $0x148] sm:$0xf]  ;;  %v11433_v56 = vld [vmem:[#allocation13 + $0x1d8] sm:$0xf0] }
 0x823   :  { %v12979_v23 = vld [vmem:[#allocation13 + $0x2cc] sm:$0xf] }
 0x824   :  { %7069 = vmatmul.bf16.vlgmr.msrb.gmra.mxu0 %v16112_v27  ;;  %7082 = vmatmul.bf16.vlgmr.msrb.gmra.mxu2 %v16116_v18 }
 0x825   :  { %7113 = vmatpush.bf16.msra.mxu0 %v11444_v14  ;;  %7126 = vmatpush.bf16.msra.mxu2 %v11572_v2  ;;  %v12933_v14 = vld [vmem:[#allocation13 + $0x154] sm:$0xf0]  ;;  %v11364_v2 = vor.u32 %v12930_v32, %v11361_v61  ;;  %v11308_v32 = vor.u32 %v12915_v26, %v11305_v17  ;;  %v11543_v61 = vld [vmem:[#allocation13 + $0x2a8] sm:$0xf]  ;;  %v12895_v17 = vld [vmem:[#allocation13 + $0x2c] sm:$0xf] }
 0x826   :  { %7139 = vmatpush.bf16.msrb.mxu3 %v11320_v8  ;;  %7152 = vmatpush.bf16.msrb.mxu1 %v11448_v3  ;;  %v11345_v8 = vld [vmem:[#allocation13 + $0x130] sm:$0xf0]  ;;  %v11240_v3 = vor.u32 %v12901_v57, %v11239_v6  ;;  %v11368_v12 = vor.u32 %v12933_v14, %v11367_v39  ;;  %v11289_v6 = vld [vmem:[#allocation13 + $0xb8] sm:$0xf0]  ;;  %v12943_v57 = vld [vmem:[#allocation13 + $0x1ac] sm:$0xf] }
 0x827   :  { %7095 = vmatmul.bf16.vlgmr.msra.gmra.mxu3 %v16118_v42  ;;  %7108 = vmatmul.bf16.vlgmr.msra.gmra.mxu1 %v16112_v27  ;;  %v11348_v59 = vor.u32 %v12926_v31, %v11345_v8  ;;  %v11417_v39 = vld [vmem:[#allocation13 + $0x1b8] sm:$0xf0]  ;;  %v12975_v14 = vld [vmem:[#allocation13 + $0x2ac] sm:$0xf]  ;;  %v11292_v31 = vor.u32 %v12911_v7, %v11289_v6  ;;  %v11527_v8 = vld [vmem:[#allocation13 + $0x288] sm:$0xf] }
 0x828   :  { %v11209_v7 = vld [vmem:[#allocation13 + $0x18] sm:$0xf0] }
 0x829   :  { %7114 = vmatpush.bf16.msra.mxu0 %v11428_v47  ;;  %7127 = vmatpush.bf16.msra.mxu2 %v11556_v9  ;;  %v12929_v47 = vld [vmem:[#allocation13 + $0x134] sm:$0xf0]  ;;  %v12922_v9 = vld [vmem:[#allocation13 + $0x104] sm:$0xf] }
 0x82a   :  { %7140 = vmatpush.bf16.msrb.mxu3 %v11304_v38  ;;  %7153 = vmatpush.bf16.msrb.mxu1 %v11432_v40  ;;  %v11329_v38 = vld [vmem:[#allocation13 + $0x110] sm:$0xf0]  ;;  %v12954_v40 = vld [vmem:[#allocation13 + $0x204] sm:$0xf]  ;;  %v11352_v16 = vor.u32 %v12929_v47, %v11351_v37  ;;  %v11401_v37 = vld [vmem:[#allocation13 + $0x198] sm:$0xf0] }
 0x82b   :  { %v11332_v28 = vor.u32 %v12922_v9, %v11329_v38  ;;  %v11460_v48 = vor.u32 %v12954_v40, %v11457_v51  ;;  %v12971_v47 = vld [vmem:[#allocation13 + $0x28c] sm:$0xf]  ;;  %v11529_v9 = vld [vmem:[#allocation13 + $0x298] sm:$0xf0]  ;;  %v11511_v38 = vld [vmem:[#allocation13 + $0x268] sm:$0xf]  ;;  %v11404_v51 = vor.u32 %v12939_v20, %v11401_v37 }
 0x82c   :  { %v12969_v40 = vld [vmem:[#allocation13 + $0x274] sm:$0xf0]  ;;  %v13176_v20 = vld [vmem:[#allocation13 + $0x8ec] sm:$0xf0]  ;;  %v13110_v37 = vld [vmem:[#allocation13 + $0x6e4] sm:$0xf] }
 0x82d   :  { %7115 = vmatpush.bf16.msra.mxu0 %v11412_v53  ;;  %7128 = vmatpush.bf16.msra.mxu2 %v11540_v54  ;;  %v12925_v53 = vld [vmem:[#allocation13 + $0x114] sm:$0xf0]  ;;  %v11575_v54 = vld [vmem:[#allocation13 + $0x2e8] sm:$0xf] }
 0x82e   :  { %7141 = vmatpush.bf16.msrb.mxu3 %v11288_v4  ;;  %7154 = vmatpush.bf16.msrb.mxu1 %v11416_v62  ;;  %v11321_v4 = vld [vmem:[#allocation13 + $0xf8] sm:$0xf0]  ;;  %v12951_v62 = vld [vmem:[#allocation13 + $0x1ec] sm:$0xf] }
 0x82f   :  { %v11324_v21 = vor.u32 %v12919_v44, %v11321_v4  ;;  %v11495_v4 = vld [vmem:[#allocation13 + $0x248] sm:$0xf] }
 0x831   :  { %7116 = vmatpush.bf16.msra.mxu0 %v11396_v45  ;;  %7129 = vmatpush.bf16.msra.mxu2 %v11524_v60  ;;  %v11336_v45 = vor.u32 %v12925_v53, %v11335_v11  ;;  %v11576_v60 = vor.u32 %v12985_v13, %v11575_v54  ;;  %v11385_v11 = vld [vmem:[#allocation13 + $0x178] sm:$0xf0]  ;;  %v12967_v53 = vld [vmem:[#allocation13 + $0x26c] sm:$0xf]  ;;  %v11512_v13 = vor.u32 %v12969_v40, %v11511_v38  ;;  %v11683_v40 = vld [vmem:[#allocation13 + $0x6c0] sm:$0xf] }
 0x832   :  { %7142 = vmatpush.bf16.msrb.mxu3 %v11272_v19  ;;  %7155 = vmatpush.bf16.msrb.mxu1 %v11400_v24  ;;  %v12981_v19 = vld [vmem:[#allocation13 + $0x2d4] sm:$0xf0]  ;;  %v11452_v24 = vor.u32 %v12951_v62, %v11449_v33  ;;  %v11513_v54 = vld [vmem:[#allocation13 + $0x278] sm:$0xf0]  ;;  %v12899_v33 = vld [vmem:[#allocation13 + $0x4c] sm:$0xf] }
 0x833   :  { %v12965_v62 = vld [vmem:[#allocation13 + $0x254] sm:$0xf0] }
 0x835   :  { %7117 = vmatpush.bf16.msra.mxu0 %v11380_v50  ;;  %7130 = vmatpush.bf16.msra.mxu2 %v11508_v29  ;;  %v11561_v50 = vld [vmem:[#allocation13 + $0x2d8] sm:$0xf0]  ;;  %v11560_v29 = vor.u32 %v12981_v19, %v11559_v5  ;;  %v11244_v5 = vor.u32 %v12899_v33, %v11241_v1  ;;  %v11479_v19 = vld [vmem:[#allocation13 + $0x228] sm:$0xf]  ;;  %v11795_v1 = vld [vmem:[#allocation13 + $0x7a0] sm:$0xf] }
 0x836   :  { %7143 = vmatpush.bf16.msrb.mxu3 %v11256_v43  ;;  %7156 = vmatpush.bf16.msrb.mxu1 %v11384_v55  ;;  %v12977_v43 = vld [vmem:[#allocation13 + $0x2b4] sm:$0xf0]  ;;  %v11436_v55 = vor.u32 %v12947_v52, %v11433_v56  ;;  %v11564_v35 = vor.u32 %v12979_v23, %v11561_v50  ;;  %v11225_v52 = vld [vmem:[#allocation13 + $0x38] sm:$0xf0]  ;;  %v12927_v56 = vld [vmem:[#allocation13 + $0x12c] sm:$0xf] }
 0x837   :  { %v11353_v23 = vld [vmem:[#allocation13 + $0x138] sm:$0xf0]  ;;  %v12959_v50 = vld [vmem:[#allocation13 + $0x22c] sm:$0xf] }
 0x838   :  { %v11356_v6 = vor.u32 %v12927_v56, %v11353_v23  ;;  %v11779_v56 = vld [vmem:[#allocation13 + $0x780] sm:$0xf]  ;;  %v13132_v23 = vld [vmem:[#allocation13 + $0x78c] sm:$0xf0] }
 0x839   :  { %7118 = vmatpush.bf16.msra.mxu0 %v11364_v2  ;;  %7131 = vmatpush.bf16.msra.mxu2 %v11492_v46  ;;  %v11545_v2 = vld [vmem:[#allocation13 + $0x2b8] sm:$0xf0]  ;;  %v11544_v46 = vor.u32 %v12977_v43, %v11543_v61  ;;  %v11228_v43 = vor.u32 %v12895_v17, %v11225_v52  ;;  %v13100_v17 = vld [vmem:[#allocation13 + $0x68c] sm:$0xf0] }
 0x83a   :  { %7144 = vmatpush.bf16.msrb.mxu3 %v11240_v3  ;;  %7157 = vmatpush.bf16.msrb.mxu1 %v11368_v12  ;;  %v12973_v3 = vld [vmem:[#allocation13 + $0x294] sm:$0xf0]  ;;  %v11420_v12 = vor.u32 %v12943_v57, %v11417_v39  ;;  %v11548_v0 = vor.u32 %v12975_v14, %v11545_v2  ;;  %v12923_v39 = vld [vmem:[#allocation13 + $0x10c] sm:$0xf]  ;;  %v11337_v14 = vld [vmem:[#allocation13 + $0x118] sm:$0xf0] }
 0x83b   :  { %v12955_v2 = vld [vmem:[#allocation13 + $0x20c] sm:$0xf] }
 0x83d   :  { %7119 = vmatpush.bf16.msra.mxu0 %v11348_v59  ;;  %7132 = vmatpush.bf16.msra.mxu2 %v11476_v10  ;;  %v11528_v59 = vor.u32 %v12973_v3, %v11527_v8  ;;  %v11276_v10 = vor.u32 %v12907_v58, %v11273_v25  ;;  %v13112_v8 = vld [vmem:[#allocation13 + $0x6ec] sm:$0xf0]  ;;  %v11827_v3 = vld [vmem:[#allocation13 + $0x7e0] sm:$0xf] }
 0x83e   :  { %7145 = vmatpush.bf16.msrb.mxu3 %v11224_v30  ;;  %7158 = vmatpush.bf16.msrb.mxu1 %v11352_v16  ;;  %v11532_v30 = vor.u32 %v12971_v47, %v11529_v9  ;;  %v12903_v16 = vld [vmem:[#allocation13 + $0x6c] sm:$0xf]  ;;  %v11701_v47 = vld [vmem:[#allocation13 + $0x6f0] sm:$0xf0]  ;;  %v11340_v9 = vor.u32 %v12923_v39, %v11337_v14  ;;  %v13128_v39 = vld [vmem:[#allocation13 + $0x76c] sm:$0xf0] }
 0x83f   :  { %v11260_v44 = vor.u32 %v12903_v16, %v11257_v49  ;;  %v11704_v16 = vor.u32 %v13110_v37, %v11701_v47  ;;  %v11811_v49 = vld [vmem:[#allocation13 + $0x7c0] sm:$0xf]  ;;  %v13092_v47 = vld [vmem:[#allocation13 + $0x64c] sm:$0xf0] }
 0x840   :  { %v11891_v14 = vld [vmem:[#allocation13 + $0x860] sm:$0xf] }
 0x841   :  { %7120 = vmatpush.bf16.msra.mxu0 %v11332_v28  ;;  %7133 = vmatpush.bf16.msra.mxu2 %v11460_v48  ;;  %v11388_v28 = vor.u32 %v12935_v34, %v11385_v11  ;;  %v11516_v48 = vor.u32 %v12967_v53, %v11513_v54  ;;  %v13140_v34 = vld [vmem:[#allocation13 + $0x7cc] sm:$0xf0]  ;;  %v11939_v11 = vld [vmem:[#allocation13 + $0x8c0] sm:$0xf]  ;;  %v13106_v54 = vld [vmem:[#allocation13 + $0x6c4] sm:$0xf] }
 0x842   :  { %7146 = vmatpush.bf16.msrb.mxu3 %v11208_v41  ;;  %7159 = vmatpush.bf16.msrb.mxu1 %v11336_v45  ;;  %v11369_v41 = vld [vmem:[#allocation13 + $0x158] sm:$0xf0]  ;;  %v12963_v45 = vld [vmem:[#allocation13 + $0x24c] sm:$0xf]  ;;  %v13172_v53 = vld [vmem:[#allocation13 + $0x8cc] sm:$0xf0] }
 0x843   :  { %v11619_v37 = vld [vmem:[#allocation13 + $0x640] sm:$0xf] }
 0x844   :  { %7121 = vmatmul.bf16.vlgmr.msra.gmra.mxu0 %v16116_v18  ;;  %7134 = vmatmul.bf16.vlgmr.msra.gmra.mxu2 %v16118_v42 }
 0x845   :  { %7165 = vmatpush.bf16.msrb.mxu0 %v11576_v60  ;;  %7178 = vmatpush.bf16.msrb.mxu2 %v11324_v21  ;;  %v11497_v60 = vld [vmem:[#allocation13 + $0x258] sm:$0xf0]  ;;  %v11496_v21 = vor.u32 %v12965_v62, %v11495_v4  ;;  %v11812_v4 = vor.u32 %v13140_v34, %v11811_v49  ;;  %v11667_v62 = vld [vmem:[#allocation13 + $0x6a0] sm:$0xf]  ;;  %v11620_v49 = vor.u32 %v13092_v47, %v11619_v37  ;;  %v13170_v47 = vld [vmem:[#allocation13 + $0x8c4] sm:$0xf] }
 0x846   :  { %7191 = vmatpush.bf16.msra.mxu3 %v11452_v24  ;;  %7204 = vmatpush.bf16.msra.mxu1 %v11580_v15  ;;  %v12961_v24 = vld [vmem:[#allocation13 + $0x234] sm:$0xf0]  ;;  %v11372_v15 = vor.u32 %v12931_v36, %v11369_v41  ;;  %v11500_v26 = vor.u32 %v12963_v45, %v11497_v60  ;;  %v13136_v36 = vld [vmem:[#allocation13 + $0x7ac] sm:$0xf0]  ;;  %v11923_v41 = vld [vmem:[#allocation13 + $0x8a0] sm:$0xf] }
 0x847   :  { %7147 = vmatmul.bf16.vlgmr.msrb.gmra.mxu3 %v16112_v27  ;;  %7160 = vmatmul.bf16.vlgmr.msrb.gmra.mxu1 %v16116_v18  ;;  %v11480_v61 = vor.u32 %v12961_v24, %v11479_v19  ;;  %v13168_v45 = vld [vmem:[#allocation13 + $0x8ac] sm:$0xf0]  ;;  %v13102_v60 = vld [vmem:[#allocation13 + $0x6a4] sm:$0xf]  ;;  %v11796_v24 = vor.u32 %v13136_v36, %v11795_v1  ;;  %v11605_v36 = vld [vmem:[#allocation13 + $0x630] sm:$0xf0] }
 0x848   :  { %v11924_v52 = vor.u32 %v13168_v45, %v11923_v41  ;;  %v13086_v1 = vld [vmem:[#allocation13 + $0x624] sm:$0xf]  ;;  %v11587_v45 = vld [vmem:[#allocation13 + $0x600] sm:$0xf] }
 0x849   :  { %7166 = vmatpush.bf16.msrb.mxu0 %v11560_v29  ;;  %7179 = vmatpush.bf16.msrb.mxu2 %v11308_v32  ;;  %v11481_v29 = vld [vmem:[#allocation13 + $0x238] sm:$0xf0]  ;;  %v11463_v32 = vld [vmem:[#allocation13 + $0x208] sm:$0xf] }
 0x84a   :  { %7192 = vmatpush.bf16.msra.mxu3 %v11436_v55  ;;  %7205 = vmatpush.bf16.msra.mxu1 %v11564_v35  ;;  %v12957_v55 = vld [vmem:[#allocation13 + $0x214] sm:$0xf0]  ;;  %v12891_v35 = vld [vmem:[#allocation13 + $0xc] sm:$0xf]  ;;  %v11484_v57 = vor.u32 %v12959_v50, %v11481_v29  ;;  %v11907_v50 = vld [vmem:[#allocation13 + $0x880] sm:$0xf] }
 0x84b   :  { %v11464_v58 = vor.u32 %v12957_v55, %v11463_v32  ;;  %v11212_v25 = vor.u32 %v12891_v35, %v11209_v7  ;;  %v13164_v29 = vld [vmem:[#allocation13 + $0x88c] sm:$0xf0]  ;;  %v11653_v32 = vld [vmem:[#allocation13 + $0x690] sm:$0xf0] }
 0x84c   :  { %v13096_v55 = vld [vmem:[#allocation13 + $0x66c] sm:$0xf0]  ;;  %v11908_v35 = vor.u32 %v13164_v29, %v11907_v50  ;;  %v13082_v50 = vld [vmem:[#allocation13 + $0x604] sm:$0xf]  ;;  %v11589_v29 = vld [vmem:[#allocation13 + $0x610] sm:$0xf0] }
 0x84d   :  { %7167 = vmatpush.bf16.msrb.mxu0 %v11544_v46  ;;  %7180 = vmatpush.bf16.msrb.mxu2 %v11292_v31  ;;  %v11465_v46 = vld [vmem:[#allocation13 + $0x218] sm:$0xf0]  ;;  %v11699_v31 = vld [vmem:[#allocation13 + $0x6e0] sm:$0xf] }
 0x84e   :  { %7193 = vmatpush.bf16.msra.mxu3 %v11420_v12  ;;  %7206 = vmatpush.bf16.msra.mxu1 %v11548_v0  ;;  %v13144_v12 = vld [vmem:[#allocation13 + $0x7ec] sm:$0xf0]  ;;  %v11955_v0 = vld [vmem:[#allocation13 + $0x8e0] sm:$0xf] }
 0x84f   :  { %v11828_v38 = vor.u32 %v13144_v12, %v11827_v3  ;;  %v11637_v3 = vld [vmem:[#allocation13 + $0x670] sm:$0xf0] }
 0x851   :  { %7168 = vmatpush.bf16.msrb.mxu0 %v11528_v59  ;;  %7181 = vmatpush.bf16.msrb.mxu2 %v11276_v10  ;;  %v11468_v59 = vor.u32 %v12955_v2, %v11465_v46  ;;  %v11700_v10 = vor.u32 %v13112_v8, %v11699_v31  ;;  %v13160_v31 = vld [vmem:[#allocation13 + $0x86c] sm:$0xf0]  ;;  %v13094_v8 = vld [vmem:[#allocation13 + $0x664] sm:$0xf] }
 0x852   :  { %7194 = vmatpush.bf16.msra.mxu3 %v11404_v51  ;;  %7207 = vmatpush.bf16.msra.mxu1 %v11532_v30  ;;  %v13108_v51 = vld [vmem:[#allocation13 + $0x6cc] sm:$0xf0]  ;;  %v11956_v30 = vor.u32 %v13176_v20, %v11955_v0 }
 0x855   :  { %7169 = vmatpush.bf16.msrb.mxu0 %v11512_v13  ;;  %7182 = vmatpush.bf16.msrb.mxu2 %v11260_v44  ;;  %v11685_v13 = vld [vmem:[#allocation13 + $0x6d0] sm:$0xf0]  ;;  %v11684_v44 = vor.u32 %v13108_v51, %v11683_v40  ;;  %v11875_v40 = vld [vmem:[#allocation13 + $0x840] sm:$0xf]  ;;  %v13156_v51 = vld [vmem:[#allocation13 + $0x84c] sm:$0xf0] }
 0x856   :  { %7195 = vmatpush.bf16.msra.mxu3 %v11388_v28  ;;  %7208 = vmatpush.bf16.msra.mxu1 %v11516_v48  ;;  %v13104_v28 = vld [vmem:[#allocation13 + $0x6ac] sm:$0xf0]  ;;  %v11940_v48 = vor.u32 %v13172_v53, %v11939_v11  ;;  %v11688_v33 = vor.u32 %v13106_v54, %v11685_v13  ;;  %v11603_v11 = vld [vmem:[#allocation13 + $0x620] sm:$0xf]  ;;  %v11876_v54 = vor.u32 %v13156_v51, %v11875_v40  ;;  %v11819_v40 = vld [vmem:[#allocation13 + $0x7c8] sm:$0xf] }
 0x857   :  { %v11668_v19 = vor.u32 %v13104_v28, %v11667_v62  ;;  %v13088_v53 = vld [vmem:[#allocation13 + $0x62c] sm:$0xf0]  ;;  %v11859_v28 = vld [vmem:[#allocation13 + $0x820] sm:$0xf]  ;;  %v13141_v51 = vld [vmem:[#allocation13 + $0x7d4] sm:$0xf0] }
 0x858   :  { %v13120_v62 = vld [vmem:[#allocation13 + $0x72c] sm:$0xf0] }
 0x859   :  { %7170 = vmatpush.bf16.msrb.mxu0 %v11496_v21  ;;  %7183 = vmatpush.bf16.msrb.mxu2 %v11244_v5  ;;  %v11669_v21 = vld [vmem:[#allocation13 + $0x6b0] sm:$0xf0] }
 0x85a   :  { %7196 = vmatpush.bf16.msra.mxu3 %v11372_v15  ;;  %7209 = vmatpush.bf16.msra.mxu1 %v11500_v26  ;;  %v11651_v26 = vld [vmem:[#allocation13 + $0x680] sm:$0xf] }
 0x85d   :  { %7171 = vmatpush.bf16.msrb.mxu0 %v11480_v61  ;;  %7184 = vmatpush.bf16.msrb.mxu2 %v11228_v43  ;;  %v11780_v61 = vor.u32 %v13132_v23, %v11779_v56  ;;  %v11635_v43 = vld [vmem:[#allocation13 + $0x660] sm:$0xf]  ;;  %v13148_v23 = vld [vmem:[#allocation13 + $0x80c] sm:$0xf0] }
 0x85e   :  { %7197 = vmatpush.bf16.msra.mxu3 %v11356_v6  ;;  %7210 = vmatpush.bf16.msra.mxu1 %v11484_v57  ;;  %v11763_v57 = vld [vmem:[#allocation13 + $0x760] sm:$0xf] }
 0x85f   :  { %v11843_v56 = vld [vmem:[#allocation13 + $0x800] sm:$0xf] }
 0x860   :  { %v6425_v5 = vpop.f32.mrf.mxu0 }
 0x861   :  { %7172 = vmatpush.bf16.msrb.mxu0 %v11464_v58  ;;  %7185 = vmatpush.bf16.msrb.mxu2 %v11212_v25  ;;  %v16134_v15 = vpop.f32.mrf.mxu1  ;;  %v11636_v58 = vor.u32 %v13096_v55, %v11635_v43  ;;  %v11764_v25 = vor.u32 %v13128_v39, %v11763_v57  ;;  %v11707_v43 = vld [vmem:[#allocation13 + $0x6e8] sm:$0xf]  ;;  %v11844_v57 = vor.u32 %v13148_v23, %v11843_v56  ;;  %v13133_v23 = vld [vmem:[#allocation13 + $0x794] sm:$0xf0] }
 0x862   :  { %7198 = vmatpush.bf16.msra.mxu3 %v11340_v9  ;;  %7211 = vmatpush.bf16.msra.mxu1 %v11468_v59  ;;  %v11892_v9 = vor.u32 %v13160_v31, %v11891_v14  ;;  %v11640_v59 = vor.u32 %v13094_v8, %v11637_v3  ;;  %v11592_v39 = vor.u32 %v13082_v50, %v11589_v29  ;;  %v13138_v3 = vld [vmem:[#allocation13 + $0x7c4] sm:$0xf]  ;;  %v11787_v56 = vld [vmem:[#allocation13 + $0x788] sm:$0xf] }
 0x864   :  { %7173 = vmatmul.bf16.vlgmr.msrb.gmra.mxu0 %v16118_v42  ;;  %7186 = vmatmul.bf16.vlgmr.msrb.gmra.mxu2 %v16112_v27  ;;  %v11672_v27 = vor.u32 %v13102_v60, %v11669_v21  ;;  %v11604_v60 = vor.u32 %v13088_v53, %v11603_v11  ;;  %v13134_v53 = vld [vmem:[#allocation13 + $0x7a4] sm:$0xf] }
 0x865   :  { %7856 = vmatpush.bf16.msra.mxu0 %v11700_v10  ;;  %7869 = vmatpush.bf16.msra.mxu2 %v11828_v38  ;;  %v11747_v10 = vld [vmem:[#allocation13 + $0x740] sm:$0xf]  ;;  %v13124_v38 = vld [vmem:[#allocation13 + $0x74c] sm:$0xf0] }
 0x866   :  { %7882 = vmatpush.bf16.msrb.mxu3 %v11956_v30  ;;  %7895 = vmatpush.bf16.msrb.mxu1 %v11704_v16  ;;  %v6438_v6 = vpop.f32.mrf.mxu2  ;;  %v13090_v30 = vld [vmem:[#allocation13 + $0x644] sm:$0xf]  ;;  %v11621_v16 = vld [vmem:[#allocation13 + $0x650] sm:$0xf0]  ;;  %v11748_v34 = vor.u32 %v13124_v38, %v11747_v10  ;;  %v13109_v38 = vld [vmem:[#allocation13 + $0x6d4] sm:$0xf0] }
 0x867   :  { %7199 = vmatmul.bf16.vlgmr.msra.gmra.mxu3 %v16116_v18  ;;  %7212 = vmatmul.bf16.vlgmr.msra.gmra.mxu1 %v16118_v42  ;;  %v13098_v18 = vld [vmem:[#allocation13 + $0x684] sm:$0xf]  ;;  %v11652_v42 = vor.u32 %v13100_v17, %v11651_v26  ;;  %v6439_v2 = vadd.f32 %v6438_v6, %v6425_v5  ;;  %v6451_v46 = vpop.f32.mrf.mxu3  ;;  %v11624_v13 = vor.u32 %v13090_v30, %v11621_v16  ;;  %v11715_v26 = vld [vmem:[#allocation13 + $0x700] sm:$0xf]  ;;  %v13116_v17 = vld [vmem:[#allocation13 + $0x70c] sm:$0xf0] }
 0x868   :  { %v11656_v7 = vor.u32 %v13098_v18, %v11653_v32  ;;  %v6427_v12 = vpop.f32.mrf.mxu0  ;;  %v13142_v18 = vld [vmem:[#allocation13 + $0x7e4] sm:$0xf]  ;;  %v11829_v32 = vld [vmem:[#allocation13 + $0x7f0] sm:$0xf0]  ;;  %v11716_v55 = vor.u32 %v13116_v17, %v11715_v26  ;;  %v13145_v6 = vld [vmem:[#allocation13 + $0x7f4] sm:$0xf0] }
 0x869   :  { %7857 = vmatpush.bf16.msra.mxu0 %v11684_v44  ;;  %7870 = vmatpush.bf16.msra.mxu2 %v11812_v4  ;;  %v16136_v0 = vadd.f32 %v6451_v46, %v6439_v2  ;;  %v6466_v20 = vpop.f32.mrf.mxu1  ;;  %v11731_v4 = vld [vmem:[#allocation13 + $0x720] sm:$0xf]  ;;  %v11832_v2 = vor.u32 %v13142_v18, %v11829_v32  ;;  %v11813_v12 = vld [vmem:[#allocation13 + $0x7d0] sm:$0xf0]  ;;  %v13162_v26 = vld [vmem:[#allocation13 + $0x884] sm:$0xf] }
 0x86a   :  { %7883 = vmatpush.bf16.msrb.mxu3 %v11940_v48  ;;  %7896 = vmatpush.bf16.msrb.mxu1 %v11688_v33  ;;  %v13152_v33 = vld [vmem:[#allocation13 + $0x82c] sm:$0xf0]  ;;  %v11732_v21 = vor.u32 %v13120_v62, %v11731_v4  ;;  %v16141_v30 = vld.sshfl [vmem:[#allocation1] sm:$0xff pattern:$0x73625140] }
 0x86b   :  { %v16143_v16 = vld.sshfl [vmem:[#allocation1 + $0x8] sm:$0xff pattern:$0x73625140]  ;;  %v13166_v4 = vld [vmem:[#allocation13 + $0x8a4] sm:$0xf] }
 0x86c   :  { %v11925_v62 = vld [vmem:[#allocation13 + $0x8b0] sm:$0xf0] }
 0x86d   :  { %7858 = vmatpush.bf16.msra.mxu0 %v11668_v19  ;;  %7871 = vmatpush.bf16.msra.mxu2 %v11796_v24  ;;  %v13084_v24 = vld [vmem:[#allocation13 + $0x60c] sm:$0xf0]  ;;  %v11909_v17 = vld [vmem:[#allocation13 + $0x890] sm:$0xf0] }
 0x86e   :  { %7884 = vmatpush.bf16.msrb.mxu3 %v11924_v52  ;;  %7897 = vmatpush.bf16.msrb.mxu1 %v11672_v27  ;;  %v6440_v44 = vpop.f32.mrf.mxu2  ;;  %v11860_v52 = vor.u32 %v13152_v33, %v11859_v28  ;;  %v11608_v27 = vor.u32 %v13086_v1, %v11605_v36  ;;  %v11675_v28 = vld [vmem:[#allocation13 + $0x6a8] sm:$0xf]  ;;  %v13137_v1 = vld [vmem:[#allocation13 + $0x7b4] sm:$0xf0] }
 0x86f   :  { %v6453_v48 = vpop.f32.mrf.mxu3  ;;  %v11820_v44 = vor.u32 %v13141_v51, %v11819_v40  ;;  %v11803_v33 = vld [vmem:[#allocation13 + $0x7a8] sm:$0xf] }
 0x870   :  { %v6477_v41 = vpop.f32.mrf.mxu0  ;;  %v13105_v48 = vld [vmem:[#allocation13 + $0x6b4] sm:$0xf0] }
 0x871   :  { %7859 = vmatpush.bf16.msra.mxu0 %v11652_v42  ;;  %7872 = vmatpush.bf16.msra.mxu2 %v11780_v61  ;;  %v6478_v5 = vadd.f32 %v6477_v41, %v16134_v15  ;;  %v6516_v19 = vpop.f32.mrf.mxu1  ;;  %v13174_v42 = vld [vmem:[#allocation13 + $0x8e4] sm:$0xf]  ;;  %v11957_v61 = vld [vmem:[#allocation13 + $0x8f0] sm:$0xf0]  ;;  %v11588_v15 = vor.u32 %v13084_v24, %v11587_v45  ;;  %v11928_v45 = vor.u32 %v13166_v4, %v11925_v62 }
 0x872   :  { %7885 = vmatpush.bf16.msrb.mxu3 %v11908_v35  ;;  %7898 = vmatpush.bf16.msrb.mxu1 %v11656_v7  ;;  %v13113_v35 = vld [vmem:[#allocation13 + $0x6f4] sm:$0xf0]  ;;  %v11835_v7 = vld [vmem:[#allocation13 + $0x7e8] sm:$0xf]  ;;  %v11960_v46 = vor.u32 %v13174_v42, %v11957_v61  ;;  %v11804_v24 = vor.u32 %v13137_v1, %v11803_v33  ;;  %v11912_v42 = vor.u32 %v13162_v26, %v11909_v17  ;;  %v13126_v61 = vld [vmem:[#allocation13 + $0x764] sm:$0xf] }
 0x873   :  { %v13150_v62 = vld [vmem:[#allocation13 + $0x824] sm:$0xf]  ;;  %v13089_v33 = vld [vmem:[#allocation13 + $0x634] sm:$0xf0]  ;;  %v11739_v1 = vld [vmem:[#allocation13 + $0x728] sm:$0xf] }
 0x875   :  { %7860 = vmatpush.bf16.msra.mxu0 %v11636_v58  ;;  %7873 = vmatpush.bf16.msra.mxu2 %v11764_v25  ;;  %v11708_v58 = vor.u32 %v13113_v35, %v11707_v43  ;;  %v11836_v25 = vor.u32 %v13145_v6, %v11835_v7  ;;  %v11765_v43 = vld [vmem:[#allocation13 + $0x770] sm:$0xf0]  ;;  %v13158_v35 = vld [vmem:[#allocation13 + $0x864] sm:$0xf]  ;;  %v11643_v6 = vld [vmem:[#allocation13 + $0x668] sm:$0xf] }
 0x876   :  { %7886 = vmatpush.bf16.msrb.mxu3 %v11892_v9  ;;  %7899 = vmatpush.bf16.msrb.mxu1 %v11640_v59  ;;  %v6490_v14 = vpop.f32.mrf.mxu2  ;;  %v11941_v9 = vld [vmem:[#allocation13 + $0x8d0] sm:$0xf0]  ;;  %v11691_v59 = vld [vmem:[#allocation13 + $0x6c8] sm:$0xf] }
 0x877   :  { %v16139_v31 = vadd.f32 %v6490_v14, %v6478_v5  ;;  %v6503_v8 = vpop.f32.mrf.mxu3  ;;  %v11944_v11 = vor.u32 %v13170_v47, %v11941_v9  ;;  %v11781_v5 = vld [vmem:[#allocation13 + $0x790] sm:$0xf0]  ;;  %v13129_v14 = vld [vmem:[#allocation13 + $0x774] sm:$0xf0]  ;;  %v11627_v47 = vld [vmem:[#allocation13 + $0x648] sm:$0xf] }
 0x878   :  { %v6517_v20 = vadd.f32 %v6516_v19, %v6503_v8  ;;  %v6479_v37 = vpop.f32.mrf.mxu0  ;;  %v11676_v19 = vor.u32 %v13105_v48, %v11675_v28  ;;  %v11893_v7 = vld [vmem:[#allocation13 + $0x870] sm:$0xf0]  ;;  %v13122_v8 = vld [vmem:[#allocation13 + $0x744] sm:$0xf]  ;;  %v11611_v48 = vld [vmem:[#allocation13 + $0x628] sm:$0xf] }
 0x879   :  { %7861 = vmatpush.bf16.msra.mxu0 %v11620_v49  ;;  %7874 = vmatpush.bf16.msra.mxu2 %v11748_v34  ;;  %v6518_v10 = vpop.f32.mrf.mxu1  ;;  %v16145_v49 = vld.sshfl [vmem:[#allocation1 + $0x10] sm:$0xff pattern:$0x73625140]  ;;  %v11816_v34 = vor.u32 %v13138_v3, %v11813_v12 }
 0x87a   :  { %7887 = vmatpush.bf16.msrb.mxu3 %v11876_v54  ;;  %7900 = vmatpush.bf16.msrb.mxu1 %v11624_v13  ;;  %v11797_v54 = vld [vmem:[#allocation13 + $0x7b0] sm:$0xf0]  ;;  %v11692_v13 = vor.u32 %v13109_v38, %v11691_v59  ;;  %v13093_v59 = vld [vmem:[#allocation13 + $0x654] sm:$0xf0]  ;;  %v11755_v10 = vld [vmem:[#allocation13 + $0x748] sm:$0xf] }
 0x87b   :  { %v11800_v41 = vor.u32 %v13134_v53, %v11797_v54  ;;  %v11749_v3 = vld [vmem:[#allocation13 + $0x750] sm:$0xf0]  ;;  %v13125_v38 = vld [vmem:[#allocation13 + $0x754] sm:$0xf0]  ;;  %v13118_v54 = vld [vmem:[#allocation13 + $0x724] sm:$0xf] }
 0x87c   :  { %v11877_v37 = vld [vmem:[#allocation13 + $0x850] sm:$0xf0]  ;;  %v11756_v4 = vor.u32 %v13125_v38, %v11755_v10 }
 0x87d   :  { %7862 = vmatpush.bf16.msra.mxu0 %v11604_v60  ;;  %7875 = vmatpush.bf16.msra.mxu2 %v11732_v21  ;;  %v13130_v21 = vld [vmem:[#allocation13 + $0x784] sm:$0xf]  ;;  %v11861_v28 = vld [vmem:[#allocation13 + $0x830] sm:$0xf0] }
 0x87e   :  { %7888 = vmatpush.bf16.msrb.mxu3 %v11860_v52  ;;  %7901 = vmatpush.bf16.msrb.mxu1 %v11608_v27  ;;  %v6492_v36 = vpop.f32.mrf.mxu2  ;;  %v11659_v52 = vld [vmem:[#allocation13 + $0x688] sm:$0xf]  ;;  %v13101_v27 = vld [vmem:[#allocation13 + $0x694] sm:$0xf0]  ;;  %v11784_v32 = vor.u32 %v13130_v21, %v11781_v5  ;;  %v11717_v21 = vld [vmem:[#allocation13 + $0x710] sm:$0xf0] }
 0x87f   :  { %v6505_v60 = vpop.f32.mrf.mxu3  ;;  %v13121_v36 = vld [vmem:[#allocation13 + $0x734] sm:$0xf0]  ;;  %v13146_v5 = vld [vmem:[#allocation13 + $0x804] sm:$0xf] }
 0x880   :  { %v11864_v60 = vor.u32 %v13150_v62, %v11861_v28  ;;  %v11740_v26 = vor.u32 %v13121_v36, %v11739_v1  ;;  %v13167_v62 = vld [vmem:[#allocation13 + $0x8ac] sm:$0xf]  ;;  %v11933_v28 = vld [vmem:[#allocation13 + $0x8b8] sm:$0xf0]  ;;  %v11915_v1 = vld [vmem:[#allocation13 + $0x888] sm:$0xf] }
 0x881   :  { %7863 = vmatpush.bf16.msra.mxu0 %v11588_v15  ;;  %7876 = vmatpush.bf16.msra.mxu2 %v11716_v55  ;;  %v6529_v50 = vpop.f32.mrf.mxu0  ;;  %v11660_v15 = vor.u32 %v13101_v27, %v11659_v52  ;;  %v11788_v55 = vor.u32 %v13133_v23, %v11787_v56  ;;  %v11595_v52 = vld [vmem:[#allocation13 + $0x608] sm:$0xf]  ;;  %v13085_v27 = vld [vmem:[#allocation13 + $0x614] sm:$0xf0] }
 0x882   :  { %7889 = vmatpush.bf16.msrb.mxu3 %v11844_v57  ;;  %7902 = vmatpush.bf16.msrb.mxu1 %v11592_v39  ;;  %v16151_v29 = vadd.f32 %v6529_v50, %v6517_v20  ;;  %v13097_v57 = vld [vmem:[#allocation13 + $0x674] sm:$0xf0]  ;;  %v11771_v39 = vld [vmem:[#allocation13 + $0x768] sm:$0xf]  ;;  %v13154_v20 = vld [vmem:[#allocation13 + $0x844] sm:$0xf] }
 0x883   :  { %v11644_v12 = vor.u32 %v13097_v57, %v11643_v6  ;;  %v11880_v53 = vor.u32 %v13154_v20, %v11877_v37  ;;  %v11723_v56 = vld [vmem:[#allocation13 + $0x708] sm:$0xf]  ;;  %v13117_v50 = vld [vmem:[#allocation13 + $0x714] sm:$0xf0]  ;;  %v13175_v6 = vld [vmem:[#allocation13 + $0x8ec] sm:$0xf] }
 0x884   :  { %7864 = vmatmul.bf16.vlgmr.msra.gmra.mxu0 %v16141_v30  ;;  %7877 = vmatmul.bf16.vlgmr.msra.gmra.mxu2 %v16143_v16  ;;  %v16153_v18 = vpop.f32.mrf.mxu1  ;;  %v11965_v57 = vld [vmem:[#allocation13 + $0x8f8] sm:$0xf0]  ;;  %v13139_v37 = vld [vmem:[#allocation13 + $0x7cc] sm:$0xf]  ;;  %v13165_v36 = vld [vmem:[#allocation13 + $0x894] sm:$0xf0] }
 0x885   :  { %7908 = vmatpush.bf16.msrb.mxu0 %v11832_v2  ;;  %7921 = vmatpush.bf16.msrb.mxu2 %v11960_v46  ;;  %v11768_v2 = vor.u32 %v13126_v61, %v11765_v43  ;;  %v11896_v46 = vor.u32 %v13158_v35, %v11893_v7  ;;  %v13111_v61 = vld [vmem:[#allocation13 + $0x6ec] sm:$0xf]  ;;  %v11709_v43 = vld [vmem:[#allocation13 + $0x6f8] sm:$0xf0] }
 0x886   :  { %7934 = vmatpush.bf16.msra.mxu3 %v11708_v58  ;;  %7947 = vmatpush.bf16.msra.mxu1 %v11836_v25  ;;  %v11772_v58 = vor.u32 %v13129_v14, %v11771_v39  ;;  %v11837_v7 = vld [vmem:[#allocation13 + $0x7f8] sm:$0xf0]  ;;  %v11596_v39 = vor.u32 %v13085_v27, %v11595_v52  ;;  %v11724_v14 = vor.u32 %v13117_v50, %v11723_v56  ;;  %v11899_v50 = vld [vmem:[#allocation13 + $0x868] sm:$0xf] }
 0x887   :  { %7890 = vmatmul.bf16.vlgmr.msrb.gmra.mxu3 %v16145_v49  ;;  %7903 = vmatmul.bf16.vlgmr.msrb.gmra.mxu1 %v16141_v30  ;;  %v6542_v25 = vpop.f32.mrf.mxu2  ;;  %v11693_v20 = vld [vmem:[#allocation13 + $0x6d8] sm:$0xf0]  ;;  %v11916_v52 = vor.u32 %v13165_v36, %v11915_v1  ;;  %v11851_v36 = vld [vmem:[#allocation13 + $0x808] sm:$0xf] }
 0x889   :  { %7909 = vmatpush.bf16.msrb.mxu0 %v11816_v34  ;;  %7922 = vmatpush.bf16.msrb.mxu2 %v11944_v11  ;;  %v6531_v51 = vpop.f32.mrf.mxu0  ;;  %v11752_v11 = vor.u32 %v13122_v8, %v11749_v3  ;;  %v11947_v8 = vld [vmem:[#allocation13 + $0x8c8] sm:$0xf]  ;;  %v13173_v3 = vld [vmem:[#allocation13 + $0x8d4] sm:$0xf0] }
 0x88a   :  { %7935 = vmatpush.bf16.msra.mxu3 %v11692_v13  ;;  %7948 = vmatpush.bf16.msra.mxu1 %v11820_v44  ;;  %v6555_v9 = vpop.f32.mrf.mxu3  ;;  %v11733_v13 = vld [vmem:[#allocation13 + $0x730] sm:$0xf0]  ;;  %v11628_v44 = vor.u32 %v13093_v59, %v11627_v47  ;;  %v11821_v47 = vld [vmem:[#allocation13 + $0x7d8] sm:$0xf0]  ;;  %v11948_v10 = vor.u32 %v13173_v3, %v11947_v8  ;;  %v11931_v51 = vld [vmem:[#allocation13 + $0x8a8] sm:$0xf] }
 0x88b   :  { %v16155_v40 = vadd.f32 %v6555_v9, %v6542_v25  ;;  %v13107_v25 = vld [vmem:[#allocation13 + $0x6cc] sm:$0xf]  ;;  %v11949_v59 = vld [vmem:[#allocation13 + $0x8d8] sm:$0xf0] }
 0x88c   :  { %v6570_v34 = vpop.f32.mrf.mxu1  ;;  %v13171_v9 = vld [vmem:[#allocation13 + $0x8cc] sm:$0xf]  ;;  %v11696_v38 = vor.u32 %v13107_v25, %v11693_v20  ;;  %v11629_v3 = vld [vmem:[#allocation13 + $0x658] sm:$0xf0] }
 0x88d   :  { %7910 = vmatpush.bf16.msrb.mxu0 %v11800_v41  ;;  %7923 = vmatpush.bf16.msrb.mxu2 %v11928_v45  ;;  %v13114_v41 = vld [vmem:[#allocation13 + $0x704] sm:$0xf]  ;;  %v11736_v45 = vor.u32 %v13118_v54, %v11733_v13  ;;  %v13169_v34 = vld [vmem:[#allocation13 + $0x8b4] sm:$0xf0]  ;;  %v13103_v54 = vld [vmem:[#allocation13 + $0x6ac] sm:$0xf] }
 0x88e   :  { %7936 = vmatpush.bf16.msra.mxu3 %v11676_v19  ;;  %7949 = vmatpush.bf16.msra.mxu1 %v11804_v24  ;;  %v11845_v19 = vld [vmem:[#allocation13 + $0x810] sm:$0xf0]  ;;  %v11612_v24 = vor.u32 %v13089_v33, %v11611_v48  ;;  %v11677_v13 = vld [vmem:[#allocation13 + $0x6b8] sm:$0xf0]  ;;  %v11932_v48 = vor.u32 %v13169_v34, %v11931_v51  ;;  %v13091_v8 = vld [vmem:[#allocation13 + $0x64c] sm:$0xf] }
 0x88f   :  { %v6544_v17 = vpop.f32.mrf.mxu2  ;;  %v11848_v35 = vor.u32 %v13146_v5, %v11845_v19  ;;  %v11680_v33 = vor.u32 %v13103_v54, %v11677_v13  ;;  %v13131_v5 = vld [vmem:[#allocation13 + $0x78c] sm:$0xf]  ;;  %v11789_v19 = vld [vmem:[#allocation13 + $0x798] sm:$0xf0]  ;;  %v11632_v51 = vor.u32 %v13091_v8, %v11629_v3  ;;  %v11867_v34 = vld [vmem:[#allocation13 + $0x828] sm:$0xf] }
 0x890   :  { %v11757_v20 = vld [vmem:[#allocation13 + $0x758] sm:$0xf0]  ;;  %v13087_v13 = vld [vmem:[#allocation13 + $0x62c] sm:$0xf] }
 0x891   :  { %7911 = vmatpush.bf16.msrb.mxu0 %v11784_v32  ;;  %7924 = vmatpush.bf16.msrb.mxu2 %v11912_v42  ;;  %v11963_v32 = vld [vmem:[#allocation13 + $0x8e8] sm:$0xf]  ;;  %v13177_v42 = vld [vmem:[#allocation13 + $0x8f4] sm:$0xf0] }
 0x892   :  { %7937 = vmatpush.bf16.msra.mxu3 %v11660_v15  ;;  %7950 = vmatpush.bf16.msra.mxu1 %v11788_v55  ;;  %v6557_v23 = vpop.f32.mrf.mxu3  ;;  %v13143_v15 = vld [vmem:[#allocation13 + $0x7ec] sm:$0xf]  ;;  %v11720_v55 = vor.u32 %v13114_v41, %v11717_v21  ;;  %v11661_v21 = vld [vmem:[#allocation13 + $0x698] sm:$0xf0] }
 0x895   :  { %7912 = vmatpush.bf16.msrb.mxu0 %v11768_v2  ;;  %7925 = vmatpush.bf16.msrb.mxu2 %v11896_v46  ;;  %v11964_v2 = vor.u32 %v13177_v42, %v11963_v32  ;;  %v11712_v46 = vor.u32 %v13111_v61, %v11709_v43  ;;  %v13161_v32 = vld [vmem:[#allocation13 + $0x874] sm:$0xf0]  ;;  %v16164_v42 = vadd.f32 %v16153_v18, %v16155_v40 }
 0x896   :  { %7938 = vmatpush.bf16.msra.mxu3 %v11644_v12  ;;  %7951 = vmatpush.bf16.msra.mxu1 %v11772_v58  ;;  %v11840_v12 = vor.u32 %v13143_v15, %v11837_v7  ;;  %v11968_v58 = vor.u32 %v13175_v6, %v11965_v57  ;;  %v11792_v43 = vor.u32 %v13131_v5, %v11789_v19  ;;  %v13127_v7 = vld [vmem:[#allocation13 + $0x76c] sm:$0xf]  ;;  %v11773_v6 = vld [vmem:[#allocation13 + $0x778] sm:$0xf0]  ;;  %v13157_v18 = vld [vmem:[#allocation13 + $0x854] sm:$0xf0] }
 0x897   :  { %v11901_v57 = vld [vmem:[#allocation13 + $0x878] sm:$0xf0]  ;;  %v11776_v40 = vor.u32 %v13127_v7, %v11773_v6  ;;  %v13083_v5 = vld [vmem:[#allocation13 + $0x60c] sm:$0xf] }
 0x898   :  { %v11597_v19 = vld [vmem:[#allocation13 + $0x618] sm:$0xf0] }
 0x899   :  { %7913 = vmatpush.bf16.msrb.mxu0 %v11752_v11  ;;  %7926 = vmatpush.bf16.msrb.mxu2 %v11880_v53  ;;  %v11824_v11 = vor.u32 %v13139_v37, %v11821_v47  ;;  %v11952_v53 = vor.u32 %v13171_v9, %v11949_v59  ;;  %v13155_v37 = vld [vmem:[#allocation13 + $0x84c] sm:$0xf]  ;;  %v11885_v47 = vld [vmem:[#allocation13 + $0x858] sm:$0xf0] }
 0x89a   :  { %7939 = vmatpush.bf16.msra.mxu3 %v11628_v44  ;;  %7952 = vmatpush.bf16.msra.mxu1 %v11756_v4  ;;  %v13135_v44 = vld [vmem:[#allocation13 + $0x7ac] sm:$0xf]  ;;  %v11805_v4 = vld [vmem:[#allocation13 + $0x7b8] sm:$0xf0]  ;;  %v11888_v54 = vor.u32 %v13155_v37, %v11885_v47 }
 0x89b   :  { %v11808_v41 = vor.u32 %v13135_v44, %v11805_v4  ;;  %v11613_v44 = vld [vmem:[#allocation13 + $0x638] sm:$0xf0]  ;;  %v13119_v4 = vld [vmem:[#allocation13 + $0x72c] sm:$0xf] }
 0x89c   :  { %v11616_v1 = vor.u32 %v13087_v13, %v11613_v44  ;;  %v16183_v13 = vld [vmem:[#allocation14] sm:$0xf] }
 0x89d   :  { %7914 = vmatpush.bf16.msrb.mxu0 %v11736_v45  ;;  %7927 = vmatpush.bf16.msrb.mxu2 %v11864_v60  ;;  %v11936_v45 = vor.u32 %v13167_v62, %v11933_v28  ;;  %v13099_v60 = vld [vmem:[#allocation13 + $0x68c] sm:$0xf]  ;;  %v11741_v62 = vld [vmem:[#allocation13 + $0x738] sm:$0xf0] }
 0x89e   :  { %7940 = vmatpush.bf16.msra.mxu3 %v11612_v24  ;;  %7953 = vmatpush.bf16.msra.mxu1 %v11740_v26  ;;  %v13163_v24 = vld [vmem:[#allocation13 + $0x88c] sm:$0xf]  ;;  %v11917_v26 = vld [vmem:[#allocation13 + $0x898] sm:$0xf0]  ;;  %v11664_v23 = vor.u32 %v13099_v60, %v11661_v21 }
 0x89f   :  { %v11920_v15 = vor.u32 %v13163_v24, %v11917_v26  ;;  %v13151_v28 = vld [vmem:[#allocation13 + $0x82c] sm:$0xf] }
 0x8a0   :  { %v13115_v24 = vld [vmem:[#allocation13 + $0x70c] sm:$0xf] }
 0x8a1   :  { %7915 = vmatpush.bf16.msrb.mxu0 %v11720_v55  ;;  %7928 = vmatpush.bf16.msrb.mxu2 %v11848_v35  ;;  %v7070_v17 = vpop.f32.mrf.mxu0  ;;  %v13095_v55 = vld [vmem:[#allocation13 + $0x66c] sm:$0xf]  ;;  %v11645_v35 = vld [vmem:[#allocation13 + $0x678] sm:$0xf0] }
 0x8a2   :  { %7941 = vmatpush.bf16.msra.mxu3 %v11596_v39  ;;  %7954 = vmatpush.bf16.msra.mxu1 %v11724_v14  ;;  %v7071_v27 = vadd.f32 %v7070_v17, %v16136_v0  ;;  %v13159_v0 = vld [vmem:[#allocation13 + $0x86c] sm:$0xf]  ;;  %v11900_v39 = vor.u32 %v13161_v32, %v11899_v50  ;;  %v11648_v14 = vor.u32 %v13095_v55, %v11645_v35  ;;  %v11725_v17 = vld [vmem:[#allocation13 + $0x718] sm:$0xf0] }
 0x8a3   :  { %v11728_v50 = vor.u32 %v13115_v24, %v11725_v17 }
 0x8a4   :  { %7916 = vmatmul.bf16.vlgmr.msrb.gmra.mxu0 %v16143_v16  ;;  %7929 = vmatmul.bf16.vlgmr.msrb.gmra.mxu2 %v16145_v49  ;;  %v7109_v56 = vpop.f32.mrf.mxu1 }
 0x8a5   :  { %7960 = vmatpush.bf16.msra.mxu0 %v11964_v2  ;;  %7973 = vmatpush.bf16.msra.mxu2 %v11712_v46  ;;  %v16167_v61 = vadd.f32 %v7109_v56, %v16139_v31  ;;  %v11883_v2 = vld [vmem:[#allocation13 + $0x848] sm:$0xf]  ;;  %v11904_v46 = vor.u32 %v13159_v0, %v11901_v57 }
 0x8a6   :  { %7986 = vmatpush.bf16.msrb.mxu3 %v11840_v12  ;;  %7999 = vmatpush.bf16.msrb.mxu1 %v11968_v58  ;;  %v13123_v12 = vld [vmem:[#allocation13 + $0x74c] sm:$0xf] }
 0x8a7   :  { %7942 = vmatmul.bf16.vlgmr.msra.gmra.mxu3 %v16141_v30  ;;  %7955 = vmatmul.bf16.vlgmr.msra.gmra.mxu1 %v16143_v16  ;;  %v7083_v31 = vpop.f32.mrf.mxu2 }
 0x8a8   :  { %v7084_v58 = vadd.f32 %v7083_v31, %v7071_v27  ;;  %v11853_v27 = vld [vmem:[#allocation13 + $0x818] sm:$0xf0] }
 0x8a9   :  { %7961 = vmatpush.bf16.msra.mxu0 %v11948_v10  ;;  %7974 = vmatpush.bf16.msra.mxu2 %v11696_v38  ;;  %v7072_v9 = vpop.f32.mrf.mxu0  ;;  %v11884_v38 = vor.u32 %v13157_v18, %v11883_v2 }
 0x8aa   :  { %7987 = vmatpush.bf16.msrb.mxu3 %v11824_v11  ;;  %8000 = vmatpush.bf16.msrb.mxu1 %v11952_v53  ;;  %v7096_v25 = vpop.f32.mrf.mxu3  ;;  %v13153_v11 = vld [vmem:[#allocation13 + $0x834] sm:$0xf0]  ;;  %v11760_v53 = vor.u32 %v13123_v12, %v11757_v20 }
 0x8ab   :  { %v16169_v59 = vadd.f32 %v7096_v25, %v7084_v58 }
 0x8ac   :  { %v7111_v10 = vpop.f32.mrf.mxu1 }
 0x8ad   :  { %7962 = vmatpush.bf16.msra.mxu0 %v11932_v48  ;;  %7975 = vmatpush.bf16.msra.mxu2 %v11680_v33  ;;  %v11869_v48 = vld [vmem:[#allocation13 + $0x838] sm:$0xf0]  ;;  %v11868_v33 = vor.u32 %v13153_v11, %v11867_v34 }
 0x8ae   :  { %7988 = vmatpush.bf16.msrb.mxu3 %v11808_v41  ;;  %8001 = vmatpush.bf16.msrb.mxu1 %v11936_v45  ;;  %v13149_v41 = vld [vmem:[#allocation13 + $0x814] sm:$0xf0]  ;;  %v11744_v45 = vor.u32 %v13119_v4, %v11741_v62  ;;  %v11872_v60 = vor.u32 %v13151_v28, %v11869_v48  ;;  %v8018_v62 = vperm.slane %v16183_v13, 0  ;;  %v8019_v48 = vperm.slane %v16183_v13, 1 }
 0x8af   :  { %v7085_v21 = vpop.f32.mrf.mxu2  ;;  %v11852_v56 = vor.u32 %v13149_v41, %v11851_v36 }
 0x8b1   :  { %7963 = vmatpush.bf16.msra.mxu0 %v11916_v52  ;;  %7976 = vmatpush.bf16.msra.mxu2 %v11664_v23  ;;  %v13147_v52 = vld [vmem:[#allocation13 + $0x80c] sm:$0xf]  ;;  %v11600_v23 = vor.u32 %v13083_v5, %v11597_v19 }
 0x8b2   :  { %7989 = vmatpush.bf16.msrb.mxu3 %v11792_v43  ;;  %8002 = vmatpush.bf16.msrb.mxu1 %v11920_v15  ;;  %v7098_v26 = vpop.f32.mrf.mxu3  ;;  %v11856_v32 = vor.u32 %v13147_v52, %v11853_v27 }
 0x8b5   :  { %7964 = vmatpush.bf16.msra.mxu0 %v11900_v39  ;;  %7977 = vmatpush.bf16.msra.mxu2 %v11648_v14 }
 0x8b6   :  { %7990 = vmatpush.bf16.msrb.mxu3 %v11776_v40  ;;  %8003 = vmatpush.bf16.msrb.mxu1 %v11904_v46 }
 0x8b9   :  { %7965 = vmatpush.bf16.msra.mxu0 %v11884_v38  ;;  %7978 = vmatpush.bf16.msra.mxu2 %v11632_v51 }
 0x8ba   :  { %7991 = vmatpush.bf16.msrb.mxu3 %v11760_v53  ;;  %8004 = vmatpush.bf16.msrb.mxu1 %v11888_v54 }
 0x8bd   :  { %7966 = vmatpush.bf16.msra.mxu0 %v11868_v33  ;;  %7979 = vmatpush.bf16.msra.mxu2 %v11616_v1 }
 0x8be   :  { %7992 = vmatpush.bf16.msrb.mxu3 %v11744_v45  ;;  %8005 = vmatpush.bf16.msrb.mxu1 %v11872_v60 }
 0x8c1   :  { %7967 = vmatpush.bf16.msra.mxu0 %v11852_v56  ;;  %7980 = vmatpush.bf16.msra.mxu2 %v11600_v23  ;;  %v7122_v43 = vpop.f32.mrf.mxu0  ;;  %v12083_v56 = vld [vmem:[#allocation16 + $0xe0] sm:$0xf]  ;;  %v13208_v23 = vld [vmem:[#allocation16 + $0xec] sm:$0xf0] }
 0x8c2   :  { %7993 = vmatpush.bf16.msrb.mxu3 %v11728_v50  ;;  %8006 = vmatpush.bf16.msrb.mxu1 %v11856_v32  ;;  %v7123_v15 = vadd.f32 %v7122_v43, %v16167_v61  ;;  %v12211_v50 = vld [vmem:[#allocation16 + $0x1e0] sm:$0xf]  ;;  %v12084_v32 = vor.u32 %v13208_v23, %v12083_v56  ;;  %v13240_v43 = vld [vmem:[#allocation16 + $0x1ec] sm:$0xf0] }
 0x8c3   :  { %v12147_v56 = vld [vmem:[#allocation16 + $0x160] sm:$0xf]  ;;  %v13224_v23 = vld [vmem:[#allocation16 + $0x16c] sm:$0xf0] }
 0x8c4   :  { %7968 = vmatmul.bf16.vlgmr.msra.gmra.mxu0 %v16145_v49  ;;  %7981 = vmatmul.bf16.vlgmr.msra.gmra.mxu2 %v16141_v30  ;;  %v7161_v55 = vpop.f32.mrf.mxu1 }
 0x8c5   :  { %7994 = vmatmul.bf16.vlgmr.msrb.gmra.mxu3 %v16143_v16  ;;  %8007 = vmatmul.bf16.vlgmr.msrb.gmra.mxu1 %v16145_v49 }
 0x8c6   :  { %9096 = vmatpush.bf16.msrb.mxu0 %v12084_v32  ;;  %v13256_v32 = vld [vmem:[#allocation16 + $0x26c] sm:$0xf0] }
 0x8c7   :  { %v7135_v35 = vpop.f32.mrf.mxu2 }
 0x8c8   :  { %v7136_v7 = vadd.f32 %v7135_v35, %v7123_v15  ;;  %v12339_v15 = vld [vmem:[#allocation16 + $0x2e0] sm:$0xf]  ;;  %v12212_v35 = vor.u32 %v13240_v43, %v12211_v50 }
 0x8c9   :  { %v7124_v57 = vpop.f32.mrf.mxu0  ;;  %v12275_v50 = vld [vmem:[#allocation16 + $0x260] sm:$0xf] }
 0x8ca   :  { %v7148_v6 = vpop.f32.mrf.mxu3  ;;  %v12467_v57 = vld [vmem:[#allocation16 + $0x3e0] sm:$0xf]  ;;  %9109 = vmatpush.bf16.msrb.mxu2 %v12212_v35 }
 0x8cb   :  { %v7149_v0 = vadd.f32 %v7148_v6, %v16151_v29  ;;  %v12067_v6 = vld [vmem:[#allocation16 + $0xc0] sm:$0xf] }
 0x8cc   :  { %v7163_v39 = vpop.f32.mrf.mxu1 }
 0x8cd   :  { %v7162_v14 = vadd.f32 %v7161_v55, %v7149_v0  ;;  %v13272_v55 = vld [vmem:[#allocation16 + $0x2ec] sm:$0xf0] }
 0x8ce   :  { %v13204_v0 = vld [vmem:[#allocation16 + $0xcc] sm:$0xf0] }
 0x8cf   :  { %v7137_v2 = vpop.f32.mrf.mxu2  ;;  %v12068_v39 = vor.u32 %v13204_v0, %v12067_v6  ;;  %v13288_v6 = vld [vmem:[#allocation16 + $0x36c] sm:$0xf0] }
 0x8d0   :  { %v12195_v2 = vld [vmem:[#allocation16 + $0x1c0] sm:$0xf] }
 0x8d1   :  { %9097 = vmatpush.bf16.msrb.mxu0 %v12068_v39  ;;  %v12148_v39 = vor.u32 %v13224_v23, %v12147_v56 }
 0x8d2   :  { %v7150_v18 = vpop.f32.mrf.mxu3 }
 0x8d3   :  { %v13236_v18 = vld [vmem:[#allocation16 + $0x1cc] sm:$0xf0] }
 0x8e1   :  { %v7174_v40 = vpop.f32.mrf.mxu0 }
 0x8e2   :  { %v16177_v30 = vadd.f32 %v7174_v40, %v7162_v14  ;;  %v13304_v14 = vld [vmem:[#allocation16 + $0x3ec] sm:$0xf0] }
 0x8e3   :  { %v12468_v40 = vor.u32 %v13304_v14, %v12467_v57  ;;  %v12276_v14 = vor.u32 %v13256_v32, %v12275_v50 }
 0x8e4   :  { %v7213_v16 = vpop.f32.mrf.mxu1 }
 0x8e5   :  { %9135 = vmatpush.bf16.msra.mxu1 %v12468_v40  ;;  %v12131_v40 = vld [vmem:[#allocation16 + $0x140] sm:$0xf] }
 0x8e7   :  { %v7187_v46 = vpop.f32.mrf.mxu2 }
 0x8e8   :  { %v7188_v49 = vadd.f32 %v7187_v46, %v16164_v42  ;;  %v12323_v46 = vld [vmem:[#allocation16 + $0x2c0] sm:$0xf] }
 0x8e9   :  { %v7176_v61 = vpop.f32.mrf.mxu0 }
 0x8ea   :  { %v7200_v31 = vpop.f32.mrf.mxu3 }
 0x8eb   :  { %v7201_v8 = vadd.f32 %v7200_v31, %v7188_v49  ;;  %v13268_v49 = vld [vmem:[#allocation16 + $0x2cc] sm:$0xf0]  ;;  %v12051_v31 = vld [vmem:[#allocation16 + $0xa0] sm:$0xf] }
 0x8ec   :  { %v7215_v3 = vpop.f32.mrf.mxu1  ;;  %v12324_v61 = vor.u32 %v13268_v49, %v12323_v46  ;;  %v13220_v46 = vld [vmem:[#allocation16 + $0x14c] sm:$0xf0]  ;;  %v12259_v49 = vld [vmem:[#allocation16 + $0x240] sm:$0xf] }
 0x8ed   :  { %v16180_v12 = vadd.f32 %v7213_v16, %v7201_v8  ;;  %v12196_v16 = vor.u32 %v13236_v18, %v12195_v2  ;;  %v13200_v8 = vld [vmem:[#allocation16 + $0xac] sm:$0xf0]  ;;  %v12451_v3 = vld [vmem:[#allocation16 + $0x3c0] sm:$0xf] }
 0x8ee   :  { %v12003_v2 = vld [vmem:[#allocation16 + $0x40] sm:$0xf]  ;;  %v13188_v18 = vld [vmem:[#allocation16 + $0x4c] sm:$0xf0] }
 0x8ef   :  { %v7189_v58 = vpop.f32.mrf.mxu2  ;;  %9110 = vmatpush.bf16.msrb.mxu2 %v12196_v16 }
 0x8f0   :  { %v13300_v58 = vld [vmem:[#allocation16 + $0x3cc] sm:$0xf0] }
 0x8f2   :  { %v7202_v29 = vpop.f32.mrf.mxu3 }
 0x8f3   :  { %v12452_v29 = vor.u32 %v13300_v58, %v12451_v3  ;;  %v8021_v3 = vperm.slane %v16183_v13, 3 }
 0x8f5   :  { %9136 = vmatpush.bf16.msra.mxu1 %v12452_v29  ;;  %v11987_v29 = vld [vmem:[#allocation16 + $0x20] sm:$0xf] }
 0x901   :  { %v7865_v25 = vpop.f32.mrf.mxu0 }
 0x904   :  { %v7904_v20 = vpop.f32.mrf.mxu1 }
 0x907   :  { %v7878_v37 = vpop.f32.mrf.mxu2 }
 0x908   :  { %v7879_v47 = vadd.f32 %v7878_v37, %v7865_v25  ;;  %v12179_v25 = vld [vmem:[#allocation16 + $0x1a0] sm:$0xf] }
 0x909   :  { %v7867_v10 = vpop.f32.mrf.mxu0  ;;  %v12307_v37 = vld [vmem:[#allocation16 + $0x2a0] sm:$0xf] }
 0x90a   :  { %v7891_v9 = vpop.f32.mrf.mxu3  ;;  %v13264_v10 = vld [vmem:[#allocation16 + $0x2ac] sm:$0xf0] }
 0x90b   :  { %v7892_v38 = vadd.f32 %v7891_v9, %v7879_v47  ;;  %v12052_v9 = vor.u32 %v13200_v8, %v12051_v31  ;;  %v13252_v31 = vld [vmem:[#allocation16 + $0x24c] sm:$0xf0] }
 0x90c   :  { %v7906_v51 = vpop.f32.mrf.mxu1 }
 0x90d   :  { %v8012_v34 = vadd.f32 %v7892_v38, %v16169_v59  ;;  %v12035_v38 = vld [vmem:[#allocation16 + $0x80] sm:$0xf]  ;;  %v13196_v51 = vld [vmem:[#allocation16 + $0x8c] sm:$0xf0]  ;;  %9098 = vmatpush.bf16.msrb.mxu0 %v12052_v9 }
 0x90e   :  { %v12115_v9 = vld [vmem:[#allocation16 + $0x120] sm:$0xf] }
 0x90f   :  { %v7880_v11 = vpop.f32.mrf.mxu2  ;;  %v8026_v45 = vadd.f32 %v8018_v62, %v8012_v34 }
 0x911   :  { %v8030_v5 = vmax.f32 %v8026_v45, 0.0  ;;  %v12036_v45 = vor.u32 %v13196_v51, %v12035_v38  ;;  %v12132_v38 = vor.u32 %v13220_v46, %v12131_v40  ;;  %v12260_v51 = vor.u32 %v13252_v31, %v12259_v49  ;;  %v12469_v40 = vld [vmem:[#allocation16 + $0x3f0] sm:$0xf0] }
 0x912   :  { %v7893_v42 = vpop.f32.mrf.mxu3 }
 0x913   :  { %v12308_v42 = vor.u32 %v13264_v10, %v12307_v37  ;;  %9099 = vmatpush.bf16.msrb.mxu0 %v12036_v45  ;;  %v12387_v37 = vld [vmem:[#allocation16 + $0x340] sm:$0xf]  ;;  %v13238_v45 = vld [vmem:[#allocation16 + $0x1e4] sm:$0xf] }
 0x921   :  { %v7917_v53 = vpop.f32.mrf.mxu0 }
 0x922   :  { %v7918_v44 = vadd.f32 %v7917_v53, %v7904_v20  ;;  %v13232_v20 = vld [vmem:[#allocation16 + $0x1ac] sm:$0xf0]  ;;  %v12435_v53 = vld [vmem:[#allocation16 + $0x3a0] sm:$0xf] }
 0x923   :  { %v12180_v11 = vor.u32 %v13232_v20, %v12179_v25  ;;  %v13184_v25 = vld [vmem:[#allocation16 + $0x2c] sm:$0xf0]  ;;  %v12004_v20 = vor.u32 %v13188_v18, %v12003_v2  ;;  %v13302_v18 = vld [vmem:[#allocation16 + $0x3e4] sm:$0xf] }
 0x924   :  { %v7956_v54 = vpop.f32.mrf.mxu1 }
 0x925   :  { %9111 = vmatpush.bf16.msrb.mxu2 %v12180_v11  ;;  %v12243_v11 = vld [vmem:[#allocation16 + $0x220] sm:$0xf] }
 0x927   :  { %v7930_v4 = vpop.f32.mrf.mxu2 }
 0x928   :  { %v7931_v28 = vadd.f32 %v7930_v4, %v7918_v44  ;;  %v13296_v44 = vld [vmem:[#allocation16 + $0x3ac] sm:$0xf0]  ;;  %v12163_v4 = vld [vmem:[#allocation16 + $0x180] sm:$0xf] }
 0x929   :  { %v7919_v1 = vpop.f32.mrf.mxu0 }
 0x92a   :  { %v7943_v33 = vpop.f32.mrf.mxu3  ;;  %v8013_v36 = vadd.f32 %v7931_v28, %v7136_v7  ;;  %v12340_v7 = vor.u32 %v13272_v55, %v12339_v15  ;;  %v12291_v1 = vld [vmem:[#allocation16 + $0x280] sm:$0xf] }
 0x92b   :  { %v7957_v47 = vadd.f32 %v7956_v54, %v7943_v33  ;;  %v8020_v54 = vperm.slane %v16183_v13, 2  ;;  %v12436_v33 = vor.u32 %v13296_v44, %v12435_v53  ;;  %v11971_v53 = vld [vmem:[#allocation16] sm:$0xf]  ;;  %v13180_v13 = vld [vmem:[#allocation16 + $0xc] sm:$0xf0] }
 0x92c   :  { %v7958_v41 = vpop.f32.mrf.mxu1  ;;  %v8027_v60 = vadd.f32 %v8019_v48, %v8013_v36  ;;  %9122 = vmatpush.bf16.msra.mxu3 %v12340_v7  ;;  %v13228_v48 = vld [vmem:[#allocation16 + $0x18c] sm:$0xf0]  ;;  %v12403_v7 = vld [vmem:[#allocation16 + $0x360] sm:$0xf]  ;;  %v11972_v50 = vor.u32 %v13180_v13, %v11971_v53  ;;  %v13262_v53 = vld [vmem:[#allocation16 + $0x2a4] sm:$0xf] }
 0x92d   :  { %v13260_v36 = vld [vmem:[#allocation16 + $0x28c] sm:$0xf0]  ;;  %9137 = vmatpush.bf16.msra.mxu1 %v12436_v33  ;;  %v12404_v58 = vor.u32 %v13288_v6, %v12403_v7  ;;  %v12371_v44 = vld [vmem:[#allocation16 + $0x320] sm:$0xf]  ;;  %v13270_v6 = vld [vmem:[#allocation16 + $0x2e4] sm:$0xf] }
 0x92e   :  { %v8031_v59 = vmax.f32 %v8027_v60, 0.0  ;;  %v12419_v60 = vld [vmem:[#allocation16 + $0x380] sm:$0xf]  ;;  %v13276_v7 = vld [vmem:[#allocation16 + $0x30c] sm:$0xf0] }
 0x92f   :  { %v7932_v21 = vpop.f32.mrf.mxu2  ;;  %v12309_v13 = vld [vmem:[#allocation16 + $0x2b0] sm:$0xf0] }
 0x930   :  { %v8038_v19 = vrot.slane %v8031_v59, 6  ;;  %9123 = vmatpush.bf16.msra.mxu3 %v12324_v61  ;;  %v13292_v59 = vld [vmem:[#allocation16 + $0x38c] sm:$0xf0]  ;;  %v12164_v21 = vor.u32 %v13228_v48, %v12163_v4 }
 0x931   :  { %v12420_v55 = vor.u32 %v13292_v59, %v12419_v60  ;;  %v13280_v4 = vld [vmem:[#allocation16 + $0x32c] sm:$0xf0]  ;;  %v12213_v60 = vld [vmem:[#allocation16 + $0x1f0] sm:$0xf0] }
 0x932   :  { %v7945_v24 = vpop.f32.mrf.mxu3  ;;  %v16188_v26 = vsel %vm16700_vm5, %v8030_v5, %v8038_v19  ;;  %v16191_v17 = vsel %vm16669_vm8, %v8030_v5, %v8038_v19  ;;  %v16194_v52 = vsel %vm16701_vm10, %v8030_v5, %v8038_v19  ;;  %v16197_v27 = vsel %vm16702_vm0, %v8038_v19, %v8030_v5  ;;  %v12019_v19 = vld [vmem:[#allocation16 + $0x60] sm:$0xf]  ;;  %9112 = vmatpush.bf16.msrb.mxu2 %v12164_v21  ;;  %vm16713_vm5 = vmmov %vm16711_vm1 }
 0x933   :  { %v12292_v5 = vor.u32 %v13260_v36, %v12291_v1  ;;  %v13192_v24 = vld [vmem:[#allocation16 + $0x6c] sm:$0xf0]  ;;  %9138 = vmatpush.bf16.msra.mxu1 %v12420_v55  ;;  %v12099_v1 = vld [vmem:[#allocation16 + $0x100] sm:$0xf]  ;;  %v12372_v32 = vor.u32 %v13280_v4, %v12371_v44  ;;  %vm16714_vm8 = vmmov %vm16711_vm1 }
 0x934   :  { %9124 = vmatpush.bf16.msra.mxu3 %v12308_v42  ;;  %v12020_v35 = vor.u32 %v13192_v24, %v12019_v19  ;;  %v13248_v42 = vld [vmem:[#allocation16 + $0x22c] sm:$0xf0]  ;;  %vm16715_vm10 = vmmov %vm16711_vm1 }
 0x935   :  { %v13212_v36 = vld [vmem:[#allocation16 + $0x10c] sm:$0xf0]  ;;  %v12244_v24 = vor.u32 %v13248_v42, %v12243_v11  ;;  %v12181_v11 = vld [vmem:[#allocation16 + $0x1b0] sm:$0xf0]  ;;  %vm16716_vm0 = vmmov %vm16711_vm1 }
 0x936   :  { %9100 = vmatpush.bf16.msrb.mxu0 %v12020_v35  ;;  %9113 = vmatpush.bf16.msrb.mxu2 %v12148_v39  ;;  %v13244_v19 = vld [vmem:[#allocation16 + $0x20c] sm:$0xf0] }
 0x937   :  { %9139 = vmatpush.bf16.msra.mxu1 %v12404_v58 }
 0x938   :  { %9125 = vmatpush.bf16.msra.mxu3 %v12292_v5  ;;  %v12227_v5 = vld [vmem:[#allocation16 + $0x200] sm:$0xf] }
 0x939   :  { %v12228_v35 = vor.u32 %v13244_v19, %v12227_v5  ;;  %v13290_v5 = vld [vmem:[#allocation16 + $0x384] sm:$0xf] }
 0x93a   :  { %9101 = vmatpush.bf16.msrb.mxu0 %v12004_v20  ;;  %9114 = vmatpush.bf16.msrb.mxu2 %v12132_v38  ;;  %v13266_v20 = vld [vmem:[#allocation16 + $0x2c4] sm:$0xf]  ;;  %v12053_v38 = vld [vmem:[#allocation16 + $0xb0] sm:$0xf0] }
 0x93c   :  { %9126 = vmatpush.bf16.msra.mxu3 %v12276_v14 }
 0x940   :  { %9127 = vmatpush.bf16.msra.mxu3 %v12260_v51 }
 0x941   :  { %v7969_v34 = vpop.f32.mrf.mxu0 }
 0x942   :  { %v7970_v62 = vadd.f32 %v7969_v34, %v7957_v47  ;;  %v8008_v28 = vpop.f32.mrf.mxu1  ;;  %v13284_v47 = vld [vmem:[#allocation16 + $0x34c] sm:$0xf0] }
 0x943   :  { %v13216_v34 = vld [vmem:[#allocation16 + $0x12c] sm:$0xf0]  ;;  %v12388_v48 = vor.u32 %v13284_v47, %v12387_v37  ;;  %v12325_v37 = vld [vmem:[#allocation16 + $0x2d0] sm:$0xf0] }
 0x944   :  { %v8014_v41 = vadd.f32 %v7970_v62, %v16177_v30  ;;  %v12116_v21 = vor.u32 %v13216_v34, %v12115_v9  ;;  %9128 = vmatpush.bf16.msra.mxu3 %v12244_v24  ;;  %v12453_v47 = vld [vmem:[#allocation16 + $0x3d0] sm:$0xf0]  ;;  %v12328_v51 = vor.u32 %v13266_v20, %v12325_v37  ;;  %v13230_v34 = vld [vmem:[#allocation16 + $0x1a4] sm:$0xf] }
 0x945   :  { %9140 = vmatpush.bf16.msra.mxu1 %v12388_v48  ;;  %v12184_v48 = vor.u32 %v13230_v34, %v12181_v11  ;;  %v12421_v24 = vld [vmem:[#allocation16 + $0x390] sm:$0xf0] }
 0x946   :  { %v16201_v43 = vadd.f32 %v8020_v54, %v8014_v41  ;;  %v13206_v54 = vld [vmem:[#allocation16 + $0xe4] sm:$0xf]  ;;  %v12085_v41 = vld [vmem:[#allocation16 + $0xf0] sm:$0xf0]  ;;  %9115 = vmatpush.bf16.msrb.mxu2 %v12116_v21 }
 0x947   :  { %v7982_v15 = vpop.f32.mrf.mxu2  ;;  %v12088_v55 = vor.u32 %v13206_v54, %v12085_v41  ;;  %v13226_v54 = vld [vmem:[#allocation16 + $0x184] sm:$0xf]  ;;  %v12021_v21 = vld [vmem:[#allocation16 + $0x70] sm:$0xf0] }
 0x948   :  { %v7995_v30 = vpop.f32.mrf.mxu3  ;;  %v8032_v61 = vmax.f32 %v16201_v43, 0.0  ;;  %v12355_v43 = vld [vmem:[#allocation16 + $0x300] sm:$0xf]  ;;  %9129 = vmatpush.bf16.msra.mxu3 %v12228_v35  ;;  %v13258_v41 = vld [vmem:[#allocation16 + $0x284] sm:$0xf] }
 0x949   :  { %v7996_v0 = vadd.f32 %v7995_v30, %v7982_v15  ;;  %v7971_v57 = vpop.f32.mrf.mxu0  ;;  %v12100_v15 = vor.u32 %v13212_v36, %v12099_v1  ;;  %v12216_v30 = vor.u32 %v13238_v45, %v12213_v60  ;;  %9141 = vmatpush.bf16.msra.mxu1 %v12372_v32  ;;  %v13194_v1 = vld [vmem:[#allocation16 + $0x84] sm:$0xf]  ;;  %v12037_v36 = vld [vmem:[#allocation16 + $0x90] sm:$0xf0] }
 0x94a   :  { %v8010_v16 = vpop.f32.mrf.mxu1  ;;  %v8039_v56 = vrot.slane %v8032_v61, 4  ;;  %v13202_v61 = vld [vmem:[#allocation16 + $0xc4] sm:$0xf]  ;;  %v12293_v45 = vld [vmem:[#allocation16 + $0x290] sm:$0xf0]  ;;  %v12040_v19 = vor.u32 %v13194_v1, %v12037_v36 }
 0x94b   :  { %v8009_v8 = vadd.f32 %v8008_v28, %v7996_v0  ;;  %v12341_v0 = vld [vmem:[#allocation16 + $0x2f0] sm:$0xf0]  ;;  %9116 = vmatpush.bf16.msrb.mxu2 %v12100_v15  ;;  %v13254_v32 = vld [vmem:[#allocation16 + $0x264] sm:$0xf] }
 0x94c   :  { %v16223_v15 = vld [vmem:[#allocation16 + $0x44] sm:$0xf]  ;;  %v12405_v35 = vld [vmem:[#allocation16 + $0x370] sm:$0xf0] }
 0x94d   :  { %v8015_v10 = vadd.f32 %v8009_v8, %v16180_v12  ;;  %v11988_v12 = vor.u32 %v13184_v25, %v11987_v29  ;;  %v12069_v8 = vld [vmem:[#allocation16 + $0xd0] sm:$0xf0]  ;;  %v12356_v29 = vor.u32 %v13276_v7, %v12355_v43  ;;  %v12296_v7 = vor.u32 %v13258_v41, %v12293_v45 }
 0x94e   :  { %v12197_v25 = vld [vmem:[#allocation16 + $0x1d0] sm:$0xf0] }
 0x94f   :  { %v8029_v62 = vadd.f32 %v8021_v3, %v8015_v10  ;;  %v7984_v28 = vpop.f32.mrf.mxu2  ;;  %9102 = vmatpush.bf16.msrb.mxu0 %v11988_v12  ;;  %v13234_v3 = vld [vmem:[#allocation16 + $0x1c4] sm:$0xf]  ;;  %9161 = vmatpush.bf16.msra.mxu2 %v12216_v30  ;;  %v12165_v12 = vld [vmem:[#allocation16 + $0x190] sm:$0xf0] }
 0x950   :  { %v7997_v33 = vpop.f32.mrf.mxu3  ;;  %v12200_v9 = vor.u32 %v13234_v3, %v12197_v25  ;;  %v13198_v10 = vld [vmem:[#allocation16 + $0xa4] sm:$0xf]  ;;  %9142 = vmatpush.bf16.msra.mxu1 %v12356_v29  ;;  %v12437_v28 = vld [vmem:[#allocation16 + $0x3b0] sm:$0xf0] }
 0x951   :  { %v8033_v59 = vmax.f32 %v8029_v62, 0.0  ;;  %v12056_v4 = vor.u32 %v13198_v10, %v12053_v38  ;;  %v13294_v62 = vld [vmem:[#allocation16 + $0x3a4] sm:$0xf]  ;;  %v12312_v33 = vor.u32 %v13262_v53, %v12309_v13  ;;  %v12277_v43 = vld [vmem:[#allocation16 + $0x270] sm:$0xf0] }
 0x952   :  { %v12440_v60 = vor.u32 %v13294_v62, %v12437_v28  ;;  %v13286_v30 = vld [vmem:[#allocation16 + $0x364] sm:$0xf]  ;;  %v12117_v38 = vld [vmem:[#allocation16 + $0x130] sm:$0xf0] }
 0x953   :  { %v8040_v23 = vrot.slane %v8033_v59, 2  ;;  %9103 = vmatpush.bf16.msrb.mxu0 %v11972_v50  ;;  %9162 = vmatpush.bf16.msra.mxu2 %v12200_v9  ;;  %v13190_v59 = vld [vmem:[#allocation16 + $0x64] sm:$0xf]  ;;  %v12168_v50 = vor.u32 %v13226_v54, %v12165_v12  ;;  %v12373_v41 = vld [vmem:[#allocation16 + $0x330] sm:$0xf0] }
 0x954   :  { %v13214_v10 = vld [vmem:[#allocation16 + $0x124] sm:$0xf] }
 0x955   :  { %v8042_v57 = vsel %vm16687_vm9, %v8039_v56, %v8040_v23  ;;  %v8045_v39 = vsel %vm16703_vm13, %v8040_v23, %v8039_v56  ;;  %v8049_v14 = vsel %vm16704_vm6, %v8039_v56, %v8040_v23  ;;  %v8053_v2 = vsel %vm16705_vm3, %v8039_v56, %v8040_v23  ;;  %v13222_v56 = vld [vmem:[#allocation16 + $0x164] sm:$0xf]  ;;  %v12149_v23 = vld [vmem:[#allocation16 + $0x170] sm:$0xf0]  ;;  %vm16717_vm9 = vmmov %vm16716_vm0 }
 0x956   :  { %v8043_v16 = vsel %vm16706_vm11, %v16188_v26, %v8042_v57  ;;  %v8046_v46 = vsel %vm16707_vm7, %v16191_v17, %v8045_v39  ;;  %v16216_v49 = vsel %vm16708_vm14, %v8049_v14, %v16194_v52  ;;  %v16220_v31 = vsel %vm16709_vm4, %v8053_v2, %v16197_v27  ;;  %v13298_v27 = vld [vmem:[#allocation16 + $0x3c4] sm:$0xf]  ;;  %v16233_v39 = vld [vmem:[#allocation16 + $0x250] sm:$0xf0]  ;;  %vm16718_vm13 = vmmov %vm16716_vm0 }
 0x957   :  { %v8047_v58 = vrot.slane %v8046_v46, 2  ;;  %8056 = vst [vmem:[#allocation1] ss:$4 sm:$0xff] %v8043_v16  ;;  %v12344_v26 = vor.u32 %v13270_v6, %v12341_v0  ;;  %v12472_v17 = vor.u32 %v13302_v18, %v12469_v40  ;;  %9148 = vmatpush.bf16.msra.mxu0 %v12088_v55  ;;  %v12072_v52 = vor.u32 %v13202_v61, %v12069_v8  ;;  %v16225_v55 = vld [vmem:[#allocation16 + $0x50] sm:$0xf0]  ;;  %vm16719_vm6 = vmmov %vm16716_vm0 }
 0x958   :  { %v12456_v42 = vor.u32 %v13298_v27, %v12453_v47  ;;  %v8051_v44 = vrot.slane %v16216_v49, 4  ;;  %9163 = vmatpush.bf16.msra.mxu2 %v12184_v48  ;;  %v16227_v6 = vld [vmem:[#allocation16 + $0x144] sm:$0xf]  ;;  %v16229_v0 = vld [vmem:[#allocation16 + $0x150] sm:$0xf0]  ;;  %v8055_v2 = vrot.slane %v16220_v31, 6  ;;  %v12424_v18 = vor.u32 %v13290_v5, %v12421_v24  ;;  %vm16720_vm3 = vmmov %vm16716_vm0 }
 0x959   :  { %8062 = vst [vmem:[#allocation1 + $0x20] ss:$4 sm:$0xff] %v8047_v58  ;;  %9174 = vmatpush.bf16.msrb.mxu3 %v12344_v26  ;;  %9187 = vmatpush.bf16.msrb.mxu1 %v12472_v17  ;;  %v16231_v57 = vld [vmem:[#allocation16 + $0x244] sm:$0xf]  ;;  %v16238_v40 = vld [vmem:[#allocation16 + $0x350] sm:$0xf0]  ;;  %v12024_v46 = vor.u32 %v13190_v59, %v12021_v21  ;;  %v12152_v3 = vor.u32 %v13222_v56, %v12149_v23  ;;  %vm16721_vm11 = vmmov %vm16716_vm0 }
 0x95a   :  { %v16235_v14 = vld [vmem:[#allocation16 + $0x344] sm:$0xf]  ;;  %v12280_v26 = vor.u32 %v13254_v32, %v12277_v43  ;;  %v12008_v25 = vor.u32 %v16223_v15, %v16225_v55  ;;  %v12408_v17 = vor.u32 %v13286_v30, %v12405_v35  ;;  %v12136_v37 = vor.u32 %v16227_v6, %v16229_v0  ;;  %v11989_v47 = vld [vmem:[#allocation16 + $0x30] sm:$0xf0]  ;;  %vm16722_vm7 = vmmov %vm16716_vm0 }
 0x95b   :  { %9149 = vmatpush.bf16.msra.mxu0 %v12072_v52  ;;  %v12264_v52 = vor.u32 %v16231_v57, %v16233_v39  ;;  %v13182_v27 = vld [vmem:[#allocation16 + $0x24] sm:$0xf]  ;;  %v12392_v9 = vor.u32 %v16235_v14, %v16238_v40  ;;  %v12245_v49 = vld [vmem:[#allocation16 + $0x230] sm:$0xf0]  ;;  %vm16723_vm14 = vmmov %vm16716_vm0 }
 0x95c   :  { %9164 = vmatpush.bf16.msra.mxu2 %v12168_v50  ;;  %v13278_v12 = vld [vmem:[#allocation16 + $0x324] sm:$0xf]  ;;  %v11992_v5 = vor.u32 %v13182_v27, %v11989_v47  ;;  %v11973_v32 = vld [vmem:[#allocation16 + $0x10] sm:$0xf0]  ;;  %vm16724_vm4 = vmmov %vm16716_vm0 }
 0x95d   :  { %9175 = vmatpush.bf16.msrb.mxu3 %v12328_v51  ;;  %9188 = vmatpush.bf16.msrb.mxu1 %v12456_v42  ;;  %v13178_v24 = vld [vmem:[#allocation16 + $0x4] sm:$0xf]  ;;  %v12376_v30 = vor.u32 %v13278_v12, %v12373_v41 }
 0x95e   :  { %v8057_v16 = vld.sshfl [vmem:[#allocation1] sm:$0xff pattern:$0x73625140]  ;;  %v8058_v61 = vld.sshfl [vmem:[#allocation1 + $0x8] sm:$0xff pattern:$0x73625140] }
 0x95f   :  { %9150 = vmatpush.bf16.msra.mxu0 %v12056_v4  ;;  %v8059_v8 = vld.sshfl [vmem:[#allocation1 + $0x10] sm:$0xff pattern:$0x73625140]  ;;  %v8060_v58 = vld.sshfl [vmem:[#allocation1 + $0x18] sm:$0xff pattern:$0x73625140] }
 0x960   :  { %v8063_v29 = vld.sshfl [vmem:[#allocation1 + $0x20] sm:$0xff pattern:$0x73625140]  ;;  %v8064_v31 = vld.sshfl [vmem:[#allocation1 + $0x28] sm:$0xff pattern:$0x73625140]  ;;  %9165 = vmatpush.bf16.msra.mxu2 %v12152_v3 }
 0x961   :  { %9176 = vmatpush.bf16.msrb.mxu3 %v12312_v33  ;;  %9189 = vmatpush.bf16.msrb.mxu1 %v12440_v60  ;;  %v8065_v20 = vld.sshfl [vmem:[#allocation1 + $0x30] sm:$0xff pattern:$0x73625140]  ;;  %v8066_v51 = vld.sshfl [vmem:[#allocation1 + $0x38] sm:$0xff pattern:$0x73625140] }
 0x962   :  { %8067 = vst [vmem:[#allocation1] ss:$4 sm:$0xff] %v8051_v44  ;;  %v8093_v34 = vsel %vm16710_vm2, %v8057_v16, -inf  ;;  %v8100_v42 = vsel %vm16711_vm1, %v8058_v61, -inf  ;;  %v8107_v53 = vsel %vm16712_vm15, %v8059_v8, -inf  ;;  %v8114_v13 = vsel %vm16713_vm5, %v8060_v58, -inf  ;;  %vm16725_vm2 = vmmov %vm16716_vm0 }
 0x963   :  { %9151 = vmatpush.bf16.msra.mxu0 %v12040_v19  ;;  %8072 = vst [vmem:[#allocation1 + $0x20] ss:$4 sm:$0xff] %v8055_v2  ;;  %v8094_v11 = vrot.slane %v8093_v34, 4  ;;  %v13246_v4 = vld [vmem:[#allocation16 + $0x224] sm:$0xf]  ;;  %v8101_v62 = vrot.slane %v8100_v42, 4  ;;  %v12120_v19 = vor.u32 %v13214_v10, %v12117_v38  ;;  %v11976_v2 = vor.u32 %v13178_v24, %v11973_v32 }
 0x964   :  { %v8108_v28 = vrot.slane %v8107_v53, 4  ;;  %v8115_v48 = vrot.slane %v8114_v13, 4  ;;  %v8121_v1 = vsel %vm16714_vm8, %v8063_v29, -inf  ;;  %v8128_v54 = vsel %vm16715_vm10, %v8064_v31, -inf  ;;  %9166 = vmatpush.bf16.msra.mxu2 %v12136_v37 }
 0x965   :  { %9177 = vmatpush.bf16.msrb.mxu3 %v12296_v7  ;;  %9190 = vmatpush.bf16.msrb.mxu1 %v12424_v18  ;;  %v8095_v44 = vmax.f32 %v8093_v34, %v8094_v11  ;;  %v8122_v36 = vrot.slane %v8121_v1, 4  ;;  %v8135_v33 = vsel %vm16716_vm0, %v8065_v20, -inf  ;;  %v8102_v45 = vmax.f32 %v8100_v42, %v8101_v62 }
 0x966   :  { %v8109_v60 = vmax.f32 %v8107_v53, %v8108_v28  ;;  %v8116_v59 = vmax.f32 %v8114_v13, %v8115_v48  ;;  %v8129_v21 = vrot.slane %v8128_v54, 4  ;;  %v8136_v23 = vrot.slane %v8135_v33, 4 }
 0x967   :  { %9152 = vmatpush.bf16.msra.mxu0 %v12024_v46  ;;  %v8096_v56 = vrot.slane %v8095_v44, 2  ;;  %v12248_v50 = vor.u32 %v13246_v4, %v12245_v49  ;;  %v8103_v43 = vrot.slane %v8102_v45, 2  ;;  %v8123_v7 = vmax.f32 %v8121_v1, %v8122_v36 }
 0x968   :  { %v8110_v15 = vrot.slane %v8109_v60, 2  ;;  %v8117_v55 = vrot.slane %v8116_v59, 2  ;;  %v8130_v6 = vmax.f32 %v8128_v54, %v8129_v21  ;;  %v8137_v14 = vmax.f32 %v8135_v33, %v8136_v23  ;;  %9167 = vmatpush.bf16.msra.mxu2 %v12120_v19 }
 0x969   :  { %9178 = vmatpush.bf16.msrb.mxu3 %v12280_v26  ;;  %9191 = vmatpush.bf16.msrb.mxu1 %v12408_v17  ;;  %v8097_v35 = vmax.f32 %v8095_v44, %v8096_v56  ;;  %v8104_v0 = vmax.f32 %v8102_v45, %v8103_v43  ;;  %v8142_v18 = vsel %vm16717_vm9, %v8066_v51, -inf  ;;  %v8068_v40 = vld.sshfl [vmem:[#allocation1] sm:$0xff pattern:$0x73625140]  ;;  %v8124_v26 = vrot.slane %v8123_v7, 2 }
 0x96a   :  { %v8111_v57 = vmax.f32 %v8109_v60, %v8110_v15  ;;  %v8118_v39 = vmax.f32 %v8116_v59, %v8117_v55  ;;  %v8069_v16 = vld.sshfl [vmem:[#allocation1 + $0x8] sm:$0xff pattern:$0x73625140]  ;;  %v8070_v46 = vld.sshfl [vmem:[#allocation1 + $0x10] sm:$0xff pattern:$0x73625140] }
 0x96b   :  { %9153 = vmatpush.bf16.msra.mxu0 %v12008_v25  ;;  %v8071_v61 = vld.sshfl [vmem:[#allocation1 + $0x18] sm:$0xff pattern:$0x73625140]  ;;  %v8098_v8 = vrot.slane %v8097_v35, 1  ;;  %v8105_v3 = vrot.slane %v8104_v0, 1  ;;  %v8131_v25 = vrot.slane %v8130_v6, 2  ;;  %v8125_v47 = vmax.f32 %v8123_v7, %v8124_v26 }
 0x96c   :  { %v8112_v58 = vrot.slane %v8111_v57, 1  ;;  %v8119_v29 = vrot.slane %v8118_v39, 1  ;;  %v8138_v17 = vrot.slane %v8137_v14, 2  ;;  %v8143_v31 = vrot.slane %v8142_v18, 4 }
 0x96d   :  { %9179 = vmatpush.bf16.msrb.mxu3 %v12264_v52  ;;  %9192 = vmatpush.bf16.msrb.mxu1 %v12392_v9  ;;  %v16258_v20 = vmax.f32 %v8097_v35, %v8098_v8  ;;  %v16260_v37 = vmax.f32 %v8104_v0, %v8105_v3  ;;  %v8132_v9 = vmax.f32 %v8130_v6, %v8131_v25  ;;  %v8073_v51 = vld.sshfl [vmem:[#allocation1 + $0x20] sm:$0xff pattern:$0x73625140]  ;;  %v8074_v34 = vld.sshfl [vmem:[#allocation1 + $0x28] sm:$0xff pattern:$0x73625140] }
 0x96e   :  { %v16262_v52 = vmax.f32 %v8111_v57, %v8112_v58  ;;  %v16264_v27 = vmax.f32 %v8118_v39, %v8119_v29  ;;  %v8139_v10 = vmax.f32 %v8137_v14, %v8138_v17  ;;  %v8144_v38 = vmax.f32 %v8142_v18, %v8143_v31  ;;  %v8075_v11 = vld.sshfl [vmem:[#allocation1 + $0x30] sm:$0xff pattern:$0x73625140]  ;;  %v8076_v60 = vld.sshfl [vmem:[#allocation1 + $0x38] sm:$0xff pattern:$0x73625140] }
 0x96f   :  { %9154 = vmatpush.bf16.msra.mxu0 %v11992_v5  ;;  %v8149_v42 = vsel %vm16718_vm13, %v8068_v40, -inf  ;;  %v8156_v53 = vsel %vm16719_vm6, %v8069_v16, -inf  ;;  %v8163_v13 = vsel %vm16720_vm3, %v8070_v46, -inf  ;;  %v8170_v4 = vsel %vm16721_vm11, %v8071_v61, -inf }
 0x970   :  { %v8126_v62 = vrot.slane %v8125_v47, 1  ;;  %v8133_v28 = vrot.slane %v8132_v9, 1  ;;  %v8140_v48 = vrot.slane %v8139_v10, 1  ;;  %v8145_v1 = vrot.slane %v8144_v38, 2 }
 0x971   :  { %9180 = vmatpush.bf16.msrb.mxu3 %v12248_v50  ;;  %9193 = vmatpush.bf16.msrb.mxu1 %v12376_v30  ;;  %v8150_v49 = vrot.slane %v8149_v42, 4  ;;  %v8157_v44 = vrot.slane %v8156_v53, 4  ;;  %v8164_v36 = vrot.slane %v8163_v13, 4  ;;  %v8171_v54 = vrot.slane %v8170_v4, 4 }
 0x972   :  { %v8127_v33 = vmax.f32 %v8125_v47, %v8126_v62  ;;  %v8134_v12 = vmax.f32 %v8132_v9, %v8133_v28  ;;  %v16270_v41 = vmax.f32 %v8139_v10, %v8140_v48  ;;  %v8146_v45 = vmax.f32 %v8144_v38, %v8145_v1 }
 0x973   :  { %9155 = vmatpush.bf16.msra.mxu0 %v11976_v2  ;;  %v8151_v59 = vmax.f32 %v8149_v42, %v8150_v49  ;;  %v8158_v21 = vmax.f32 %v8156_v53, %v8157_v44  ;;  %v8165_v5 = vmax.f32 %v8163_v13, %v8164_v36  ;;  %v8172_v19 = vmax.f32 %v8170_v4, %v8171_v54 }
 0x974   :  { %v8147_v24 = vrot.slane %v8146_v45, 1  ;;  %v8177_v56 = vsel %vm16722_vm7, %v8073_v51, -inf  ;;  %v8184_v23 = vsel %vm16723_vm14, %v8074_v34, -inf  ;;  %v8191_v50 = vsel %vm16724_vm4, %v8075_v11, -inf }
 0x975   :  { %v8152_v32 = vrot.slane %v8151_v59, 2  ;;  %v8159_v43 = vrot.slane %v8158_v21, 2  ;;  %v8166_v15 = vrot.slane %v8165_v5, 2  ;;  %v8173_v55 = vrot.slane %v8172_v19, 2 }
 0x976   :  { %v16275_v30 = vmax.f32 %v8146_v45, %v8147_v24  ;;  %v8178_v35 = vrot.slane %v8177_v56, 4  ;;  %v8185_v7 = vrot.slane %v8184_v23, 4  ;;  %v8192_v6 = vrot.slane %v8191_v50, 4 }
 0x977   :  { %v8153_v0 = vmax.f32 %v8151_v59, %v8152_v32  ;;  %v8160_v57 = vmax.f32 %v8158_v21, %v8159_v43  ;;  %v8167_v39 = vmax.f32 %v8165_v5, %v8166_v15  ;;  %v8174_v14 = vmax.f32 %v8172_v19, %v8173_v55  ;;  %v13210_v59 = vld [vmem:[#allocation16 + $0x104] sm:$0xf]  ;;  %v12229_v15 = vld [vmem:[#allocation16 + $0x210] sm:$0xf0] }
 0x978   :  { %v8179_v2 = vmax.f32 %v8177_v56, %v8178_v35  ;;  %v8186_v18 = vmax.f32 %v8184_v23, %v8185_v7  ;;  %v8193_v40 = vmax.f32 %v8191_v50, %v8192_v6  ;;  %v8198_v16 = vsel %vm16725_vm2, %v8076_v60, -inf  ;;  %v13242_v43 = vld [vmem:[#allocation16 + $0x204] sm:$0xf] }
 0x979   :  { %v8154_v46 = vrot.slane %v8153_v0, 1  ;;  %v8161_v61 = vrot.slane %v8160_v57, 1  ;;  %v8168_v8 = vrot.slane %v8167_v39, 1  ;;  %v8175_v3 = vrot.slane %v8174_v14, 1  ;;  %v13274_v6 = vld [vmem:[#allocation16 + $0x304] sm:$0xf] }
 0x97a   :  { %v8180_v58 = vrot.slane %v8179_v2, 2  ;;  %v8187_v29 = vrot.slane %v8186_v18, 2  ;;  %v8194_v26 = vrot.slane %v8193_v40, 2  ;;  %v8199_v25 = vrot.slane %v8198_v16, 4 }
 0x97b   :  { %v8155_v17 = vmax.f32 %v8153_v0, %v8154_v46  ;;  %v8162_v31 = vmax.f32 %v8160_v57, %v8161_v61  ;;  %v8169_v47 = vmax.f32 %v8167_v39, %v8168_v8  ;;  %v8176_v9 = vmax.f32 %v8174_v14, %v8175_v3 }
 0x97c   :  { %v8181_v10 = vmax.f32 %v8179_v2, %v8180_v58  ;;  %v8188_v38 = vmax.f32 %v8186_v18, %v8187_v29  ;;  %v8195_v51 = vmax.f32 %v8193_v40, %v8194_v26  ;;  %v8200_v34 = vmax.f32 %v8198_v16, %v8199_v25 }
 0x97d   :  { %v8221_v11 = vrot.slane %v8127_v33, 7  ;;  %v8223_v42 = vrot.slane %v8155_v17, 6  ;;  %v8227_v53 = vrot.slane %v8134_v12, 7  ;;  %v8229_v13 = vrot.slane %v8162_v31, 6  ;;  %v12101_v12 = vld [vmem:[#allocation16 + $0x110] sm:$0xf0] }
 0x97e   :  { %v8182_v4 = vrot.slane %v8181_v10, 1  ;;  %v8189_v62 = vrot.slane %v8188_v38, 1  ;;  %v8196_v28 = vrot.slane %v8195_v51, 1  ;;  %v8201_v48 = vrot.slane %v8200_v34, 2 }
 0x97f   :  { %vm16726_vm1 = vcmask 1041409   ;;  %v8233_v44 = vrot.slane %v16270_v41, 7  ;;  %v8235_v36 = vrot.slane %v8169_v47, 6  ;;  %vm16728_vm5 = vcmask 1042434  }
 0x980   :  { %v8222_v1 = vsel %vm16726_vm1, %v8221_v11, %v16258_v20  ;;  %vm16727_vm15 = vmmov %vm16726_vm1  ;;  %v8183_v54 = vmax.f32 %v8181_v10, %v8182_v4  ;;  %v8190_v45 = vmax.f32 %v8188_v38, %v8189_v62  ;;  %v8197_v60 = vmax.f32 %v8195_v51, %v8196_v28  ;;  %v13209_v62 = vld [vmem:[#allocation16 + $0xf4] sm:$0xf0] }
 0x981   :  { %v8228_v49 = vsel %vm16727_vm15, %v8227_v53, %v16260_v37  ;;  %v8202_v33 = vmax.f32 %v8200_v34, %v8201_v48  ;;  %v8224_v21 = vsel %vm16728_vm5, %v8223_v42, %v8222_v1  ;;  %vm16729_vm8 = vmmov %vm16728_vm5  ;;  %v8239_v20 = vrot.slane %v16275_v30, 7  ;;  %v12357_v30 = vld [vmem:[#allocation16 + $0x310] sm:$0xf0]  ;;  %v12091_v42 = vld [vmem:[#allocation16 + $0xe8] sm:$0xf] }
 0x982   :  { %v8230_v5 = vsel %vm16729_vm8, %v8229_v13, %v8228_v49  ;;  %vm16730_vm10 = vmmov %vm16726_vm1  ;;  %v8225_v37 = vrot.slane %v8183_v54, 5  ;;  %v8231_v56 = vrot.slane %v8190_v45, 5  ;;  %v8237_v23 = vrot.slane %v8197_v60, 5  ;;  %v12219_v1 = vld [vmem:[#allocation16 + $0x1e8] sm:$0xf] }
 0x983   :  { %v8234_v19 = vsel %vm16730_vm10, %v8233_v44, %v16262_v52  ;;  %v8203_v24 = vrot.slane %v8202_v33, 1  ;;  %vm16731_vm0 = vmmov %vm16728_vm5  ;;  %v8241_v50 = vrot.slane %v8176_v9, 6  ;;  %v12104_v32 = vor.u32 %v13210_v59, %v12101_v12  ;;  %v13241_v54 = vld [vmem:[#allocation16 + $0x1f4] sm:$0xf0]  ;;  %v12347_v12 = vld [vmem:[#allocation16 + $0x2e8] sm:$0xf] }
 0x984   :  { %v8236_v41 = vsel %vm16731_vm0, %v8235_v36, %v8234_v19  ;;  %vm16732_vm9 = vcmask 1043459   ;;  %vm16734_vm6 = vmmov %vm16726_vm1  ;;  %v12232_v40 = vor.u32 %v13242_v43, %v12229_v15  ;;  %v12360_v61 = vor.u32 %v13274_v6, %v12357_v30 }
 0x985   :  { %v8204_v55 = vmax.f32 %v8202_v33, %v8203_v24  ;;  %v8226_v35 = vsel %vm16732_vm9, %v8225_v37, %v8224_v21  ;;  %vm16733_vm13 = vmmov %vm16732_vm9  ;;  %v8240_v52 = vsel %vm16734_vm6, %v8239_v20, %v16264_v27  ;;  %9168 = vmatpush.bf16.msra.mxu2 %v12104_v32  ;;  %vm16738_vm14 = vcmask 1040384   ;;  %v13273_v21 = vld [vmem:[#allocation16 + $0x2f4] sm:$0xf0]  ;;  %v12075_v20 = vld [vmem:[#allocation16 + $0xc8] sm:$0xf] }
 0x986   :  { %v8232_v7 = vsel %vm16733_vm13, %v8231_v56, %v8230_v5  ;;  %vm16735_vm3 = vmmov %vm16732_vm9  ;;  %v8249_v39 = vperm.slane %v8226_v35, %v14900_v63  ;;  %9181 = vmatpush.bf16.msrb.mxu3 %v12232_v40  ;;  %9194 = vmatpush.bf16.msrb.mxu1 %v12360_v61  ;;  %v12092_v60 = vor.u32 %v13209_v62, %v12091_v42  ;;  %v13205_v24 = vld [vmem:[#allocation16 + $0xd4] sm:$0xf0]  ;;  %v12203_v35 = vld [vmem:[#allocation16 + $0x1c8] sm:$0xf]  ;;  %vm9624_vm10 = vcmask 74752  }
 0x987   :  { %v8238_v0 = vsel %vm16735_vm3, %v8237_v23, %v8236_v41  ;;  %vm16736_vm11 = vmmov %vm16731_vm0  ;;  %v8275_v14 = vperm.slane %v8232_v7, %v14900_v63  ;;  %v8243_v2 = vrot.slane %v8204_v55, 5  ;;  %v12220_v56 = vor.u32 %v13241_v54, %v12219_v1  ;;  %v13305_v32 = vld [vmem:[#allocation16 + $0x3f4] sm:$0xf0]  ;;  %v12283_v54 = vld [vmem:[#allocation16 + $0x268] sm:$0xf] }
 0x988   :  { %v8242_v57 = vsel %vm16736_vm11, %v8241_v50, %v8240_v52  ;;  %v8254_v18 = vperm.slane %v8238_v0, %v14900_v63  ;;  %v8257_v16 = vrot.slane %v8249_v39, 4  ;;  %vm16737_vm7 = vmmov %vm16735_vm3  ;;  %v12475_v50 = vld [vmem:[#allocation16 + $0x3e8] sm:$0xf]  ;;  %v12348_v55 = vor.u32 %v13273_v21, %v12347_v12  ;;  %v13237_v7 = vld [vmem:[#allocation16 + $0x1d4] sm:$0xf0] }
 0x989   :  { %v8283_v46 = vrot.slane %v8275_v14, 4  ;;  %v8244_v27 = vsel %vm16737_vm7, %v8243_v2, %v8242_v57  ;;  %vm16739_vm4 = vmmov %vm16726_vm1  ;;  %v12076_v30 = vor.u32 %v13205_v24, %v12075_v20  ;;  %v12331_v0 = vld [vmem:[#allocation16 + $0x2c8] sm:$0xf]  ;;  %v13269_v57 = vld [vmem:[#allocation16 + $0x2d4] sm:$0xf0] }
 0x98a   :  { %v8255_v8 = vrot.slane %v8254_v18, 4  ;;  %v8258_v3 = vsel %vm2105_vm12, %v8254_v18, %v8257_v16  ;;  %v8280_v58 = vperm.slane %v8244_v27, %v14900_v63  ;;  %vm16740_vm2 = vmmov %vm16738_vm14  ;;  %v12059_v2 = vld [vmem:[#allocation16 + $0xa8] sm:$0xf]  ;;  %v13201_v18 = vld [vmem:[#allocation16 + $0xb4] sm:$0xf0]  ;;  %v12204_v16 = vor.u32 %v13237_v7, %v12203_v35 }
 0x98b   :  { %v8266_v26 = vperm.slane %v8258_v3, %v15016_v22  ;;  %vm16741_vm15 = vmmov %vm16740_vm2  ;;  %v13301_v61 = vld [vmem:[#allocation16 + $0x3d4] sm:$0xf0]  ;;  %v12332_v27 = vor.u32 %v13269_v57, %v12331_v0  ;;  %v12411_v12 = vld [vmem:[#allocation16 + $0x368] sm:$0xf] }
 0x98c   :  { %v8256_v29 = vsel %vm2105_vm12, %v8255_v8, %v8249_v39  ;;  %v8281_v17 = vrot.slane %v8280_v58, 4  ;;  %v8284_v31 = vsel %vm2105_vm12, %v8280_v58, %v8283_v46  ;;  %vm16743_vm5 = vmmov %vm16740_vm2  ;;  %v12459_v46 = vld [vmem:[#allocation16 + $0x3c8] sm:$0xf]  ;;  %v13233_v3 = vld [vmem:[#allocation16 + $0x1b4] sm:$0xf0]  ;;  %v12060_v58 = vor.u32 %v13201_v18, %v12059_v2 }
 0x98d   :  { %v8262_v25 = vperm.slane %v8256_v29, %v15016_v22  ;;  %v8292_v47 = vperm.slane %v8284_v31, %v15016_v22  ;;  %v8269_v9 = vrot.slane %v8266_v26, 4  ;;  %vm16744_vm8 = vmmov %vm16726_vm1  ;;  %v12187_v8 = vld [vmem:[#allocation16 + $0x1a8] sm:$0xf]  ;;  %v13197_v31 = vld [vmem:[#allocation16 + $0x94] sm:$0xf0] }
 0x98e   :  { %v8282_v10 = vsel %vm2105_vm12, %v8281_v17, %v8275_v14  ;;  %v12476_v14 = vor.u32 %v13305_v32, %v12475_v50  ;;  %v12315_v29 = vld [vmem:[#allocation16 + $0x2a8] sm:$0xf]  ;;  %v13261_v42 = vld [vmem:[#allocation16 + $0x294] sm:$0xf0] }
 0x98f   :  { %v8267_v38 = vrot.slane %v8262_v25, 4  ;;  %v8288_v51 = vperm.slane %v8282_v10, %v15016_v22  ;;  %v8299_v34 = vmax.f32 %v8266_v26, %v8292_v47  ;;  %v8270_v63 = vsel %vm2105_vm12, 0.0, %v8269_v9  ;;  %v13265_v26 = vld [vmem:[#allocation16 + $0x2b4] sm:$0xf0]  ;;  %v12043_v17 = vld [vmem:[#allocation16 + $0x88] sm:$0xf] }
 0x990   :  { %v8295_v11 = vrot.slane %v8292_v47, 4  ;;  %v12188_v47 = vor.u32 %v13233_v3, %v12187_v8  ;;  %v12443_v9 = vld [vmem:[#allocation16 + $0x3a8] sm:$0xf]  ;;  %v13297_v10 = vld [vmem:[#allocation16 + $0x3b4] sm:$0xf0] }
 0x991   :  { %v8268_v53 = vsel %vm2105_vm12, 0.0, %v8267_v38  ;;  %v8297_v13 = vmax.f32 %v8262_v25, %v8288_v51  ;;  %v8303_v4 = vrot.slane %v8299_v34, 7  ;;  %v8293_v28 = vrot.slane %v8288_v51, 4  ;;  %v12171_v51 = vld [vmem:[#allocation16 + $0x188] sm:$0xf] }
 0x992   :  { %v8296_v48 = vsel %vm2105_vm12, 0.0, %v8295_v11  ;;  %v12460_v25 = vor.u32 %v13301_v61, %v12459_v46  ;;  %v12316_v38 = vor.u32 %v13265_v26, %v12315_v29  ;;  %v12299_v11 = vld [vmem:[#allocation16 + $0x288] sm:$0xf]  ;;  %v13289_v21 = vld [vmem:[#allocation16 + $0x374] sm:$0xf0] }
 0x993   :  { %v8300_v49 = vmax.f32 %v8270_v63, %v8296_v48  ;;  %v8302_v44 = vsel %vm16738_vm14, %v8297_v13, 0.0  ;;  %v8305_v36 = vrot.slane %v8297_v13, 1  ;;  %v8294_v22 = vsel %vm2105_vm12, 0.0, %v8293_v28  ;;  %vm16742_vm12 = vmmov %vm16726_vm1  ;;  %v12027_v13 = vld [vmem:[#allocation16 + $0x68] sm:$0xf] }
 0x994   :  { %v8304_v45 = vsel %vm16739_vm4, %v8303_v4, %v8302_v44  ;;  %v8298_v33 = vmax.f32 %v8268_v53, %v8294_v22  ;;  %v12044_v63 = vor.u32 %v13197_v31, %v12043_v17  ;;  %v12444_v53 = vor.u32 %v13297_v10, %v12443_v9  ;;  %v13193_v4 = vld [vmem:[#allocation16 + $0x74] sm:$0xf0]  ;;  %v12427_v28 = vld [vmem:[#allocation16 + $0x388] sm:$0xf]  ;;  %v12093_v8 = vld [vmem:[#allocation16 + $0xf8] sm:$0xf0] }
 0x995   :  { %v8309_v59 = vrot.slane %v8300_v49, 7  ;;  %v16314_v5 = vpack.c.bf16 %v8304_v45, %v8304_v45  ;;  %v8306_v19 = vsel %vm16740_vm2, %v8305_v36, 0.0  ;;  %v13293_v48 = vld [vmem:[#allocation16 + $0x394] sm:$0xf0]  ;;  %v12300_v1 = vor.u32 %v13261_v42, %v12299_v11  ;;  %v12139_v20 = vld [vmem:[#allocation16 + $0x148] sm:$0xf] }
 0x996   :  { %v8307_v37 = vsel %vm16726_vm1, %v8299_v34, %v8306_v19  ;;  %v8308_v41 = vsel %vm16741_vm15, %v8298_v33, 0.0  ;;  %v8311_v23 = vrot.slane %v8298_v33, 1  ;;  %v13229_v34 = vld [vmem:[#allocation16 + $0x194] sm:$0xf0]  ;;  %v12028_v36 = vor.u32 %v13193_v4, %v12027_v13  ;;  %v11995_v50 = vld [vmem:[#allocation16 + $0x28] sm:$0xf] }
 0x997   :  { %9104 = vmatmul.bf16.vlgmr.msrb.gmra.mxu0 %v16314_v5  ;;  %v16320_v43 = vpack.c.bf16 %v8307_v37, %v8307_v37  ;;  %v8310_v15 = vsel %vm16742_vm12, %v8309_v59, %v8308_v41  ;;  %v12172_v62 = vor.u32 %v13229_v34, %v12171_v51  ;;  %v13225_v44 = vld [vmem:[#allocation16 + $0x174] sm:$0xf0]  ;;  %v12428_v45 = vor.u32 %v13293_v48, %v12427_v28  ;;  %v12251_v57 = vld [vmem:[#allocation16 + $0x228] sm:$0xf]  ;;  %v13239_v26 = vld [vmem:[#allocation16 + $0x1ec] sm:$0xf] }
 0x998   :  { %9200 = vmatpush.bf16.msrb.mxu0 %v12092_v60  ;;  %v16323_v52 = vpack.c.bf16 %v8310_v15, %v8310_v15  ;;  %v8312_v6 = vsel %vm16743_vm5, %v8311_v23, 0.0  ;;  %v13257_v22 = vld [vmem:[#allocation16 + $0x274] sm:$0xf0]  ;;  %v12011_v60 = vld [vmem:[#allocation16 + $0x48] sm:$0xf]  ;;  %v12412_v23 = vor.u32 %v13289_v21, %v12411_v12 }
 0x999   :  { %9117 = vmatmul.bf16.vlgmr.msrb.gmra.mxu2 %v16320_v43  ;;  %v8313_v39 = vsel %vm16744_vm8, %v8300_v49, %v8312_v6  ;;  %v12155_v49 = vld [vmem:[#allocation16 + $0x168] sm:$0xf]  ;;  %v13189_v33 = vld [vmem:[#allocation16 + $0x54] sm:$0xf0]  ;;  %v12284_v19 = vor.u32 %v13257_v22, %v12283_v54  ;;  %v12221_v17 = vld [vmem:[#allocation16 + $0x1f8] sm:$0xf0] }
 0x99a   :  { %9213 = vmatpush.bf16.msrb.mxu2 %v12220_v56  ;;  %9130 = vmatmul.bf16.vlgmr.msra.gmra.mxu3 %v16323_v52  ;;  %v16329_v40 = vpack.c.bf16 %v8313_v39, %v8313_v39  ;;  %v12156_v59 = vor.u32 %v13225_v44, %v12155_v49  ;;  %v13221_v24 = vld [vmem:[#allocation16 + $0x154] sm:$0xf0]  ;;  %v12012_v37 = vor.u32 %v13189_v33, %v12011_v60  ;;  %v12267_v56 = vld [vmem:[#allocation16 + $0x248] sm:$0xf]  ;;  %v12349_v51 = vld [vmem:[#allocation16 + $0x2f8] sm:$0xf0] }
 0x99b   :  { %9226 = vmatpush.bf16.msra.mxu3 %v12348_v55  ;;  %v13253_v41 = vld [vmem:[#allocation16 + $0x254] sm:$0xf0]  ;;  %v12140_v15 = vor.u32 %v13221_v24, %v12139_v20  ;;  %v12395_v55 = vld [vmem:[#allocation16 + $0x348] sm:$0xf]  ;;  %v13203_v42 = vld [vmem:[#allocation16 + $0xcc] sm:$0xf] }
 0x99c   :  { %9143 = vmatmul.bf16.vlgmr.msra.gmra.mxu1 %v16329_v40  ;;  %9201 = vmatpush.bf16.msrb.mxu0 %v12076_v30  ;;  %v13185_v32 = vld [vmem:[#allocation16 + $0x34] sm:$0xf0]  ;;  %v12268_v7 = vor.u32 %v13253_v41, %v12267_v56  ;;  %v12123_v6 = vld [vmem:[#allocation16 + $0x128] sm:$0xf]  ;;  %v12077_v4 = vld [vmem:[#allocation16 + $0xd8] sm:$0xf0] }
 0x99d   :  { %9239 = vmatpush.bf16.msra.mxu1 %v12476_v14  ;;  %v13285_v35 = vld [vmem:[#allocation16 + $0x354] sm:$0xf0]  ;;  %v11996_v0 = vor.u32 %v13185_v32, %v11995_v50  ;;  %v11979_v2 = vld [vmem:[#allocation16 + $0x8] sm:$0xf]  ;;  %v12477_v28 = vld [vmem:[#allocation16 + $0x3f8] sm:$0xf0]  ;;  %v12080_v22 = vor.u32 %v13203_v42, %v12077_v4 }
 0x99e   :  { %9214 = vmatpush.bf16.msrb.mxu2 %v12204_v16  ;;  %v13217_v30 = vld [vmem:[#allocation16 + $0x134] sm:$0xf0]  ;;  %v12396_v14 = vor.u32 %v13285_v35, %v12395_v55  ;;  %v12379_v16 = vld [vmem:[#allocation16 + $0x328] sm:$0xf]  ;;  %v12205_v49 = vld [vmem:[#allocation16 + $0x1d8] sm:$0xf0] }
 0x99f   :  { %9227 = vmatpush.bf16.msra.mxu3 %v12332_v27  ;;  %v13249_v39 = vld [vmem:[#allocation16 + $0x234] sm:$0xf0]  ;;  %v12124_v46 = vor.u32 %v13217_v30, %v12123_v6  ;;  %v13207_v27 = vld [vmem:[#allocation16 + $0xec] sm:$0xf]  ;;  %v12235_v31 = vld [vmem:[#allocation16 + $0x208] sm:$0xf] }
 0x9a0   :  { %9202 = vmatpush.bf16.msrb.mxu0 %v12060_v58  ;;  %v13181_v18 = vld [vmem:[#allocation16 + $0x14] sm:$0xf0]  ;;  %v12252_v3 = vor.u32 %v13249_v39, %v12251_v57  ;;  %v12107_v58 = vld [vmem:[#allocation16 + $0x108] sm:$0xf]  ;;  %v12096_v10 = vor.u32 %v13207_v27, %v12093_v8  ;;  %v12333_v54 = vld [vmem:[#allocation16 + $0x2d8] sm:$0xf0] }
 0x9a1   :  { %9240 = vmatpush.bf16.msra.mxu1 %v12460_v25  ;;  %v13281_v61 = vld [vmem:[#allocation16 + $0x334] sm:$0xf0]  ;;  %v11980_v25 = vor.u32 %v13181_v18, %v11979_v2  ;;  %v13199_v60 = vld [vmem:[#allocation16 + $0xac] sm:$0xf]  ;;  %v12461_v21 = vld [vmem:[#allocation16 + $0x3d8] sm:$0xf0] }
 0x9a2   :  { %9215 = vmatpush.bf16.msrb.mxu2 %v12188_v47  ;;  %v13213_v29 = vld [vmem:[#allocation16 + $0x114] sm:$0xf0]  ;;  %v12380_v9 = vor.u32 %v13281_v61, %v12379_v16  ;;  %v13299_v12 = vld [vmem:[#allocation16 + $0x3cc] sm:$0xf]  ;;  %v12189_v24 = vld [vmem:[#allocation16 + $0x1b8] sm:$0xf0] }
 0x9a3   :  { %9228 = vmatpush.bf16.msra.mxu3 %v12316_v38  ;;  %v13245_v47 = vld [vmem:[#allocation16 + $0x214] sm:$0xf0]  ;;  %v13271_v38 = vld [vmem:[#allocation16 + $0x2ec] sm:$0xf]  ;;  %v12108_v34 = vor.u32 %v13213_v29, %v12107_v58  ;;  %v12317_v56 = vld [vmem:[#allocation16 + $0x2b8] sm:$0xf0] }
 0x9a4   :  { %9203 = vmatpush.bf16.msrb.mxu0 %v12044_v63  ;;  %v12363_v63 = vld [vmem:[#allocation16 + $0x308] sm:$0xf]  ;;  %v13277_v11 = vld [vmem:[#allocation16 + $0x314] sm:$0xf0]  ;;  %v12236_v13 = vor.u32 %v13245_v47, %v12235_v31  ;;  %v12352_v48 = vor.u32 %v13271_v38, %v12349_v51  ;;  %v13231_v20 = vld [vmem:[#allocation16 + $0x1ac] sm:$0xf] }
 0x9a5   :  { %9241 = vmatpush.bf16.msra.mxu1 %v12444_v53  ;;  %v12224_v53 = vor.u32 %v13239_v26, %v12221_v17  ;;  %v12364_v44 = vor.u32 %v13277_v11, %v12363_v63  ;;  %v13195_v50 = vld [vmem:[#allocation16 + $0x8c] sm:$0xf]  ;;  %v12192_v32 = vor.u32 %v13231_v20, %v12189_v24  ;;  %v12445_v35 = vld [vmem:[#allocation16 + $0x3b8] sm:$0xf0] }
 0x9a6   :  { %9216 = vmatpush.bf16.msrb.mxu2 %v12172_v62  ;;  %v13303_v62 = vld [vmem:[#allocation16 + $0x3ec] sm:$0xf]  ;;  %v12173_v30 = vld [vmem:[#allocation16 + $0x198] sm:$0xf0] }
 0x9a7   :  { %9229 = vmatpush.bf16.msra.mxu3 %v12300_v1  ;;  %9156 = vmatmul.bf16.vlgmr.msra.gmra.mxu0 %v16314_v5  ;;  %v13235_v1 = vld [vmem:[#allocation16 + $0x1cc] sm:$0xf]  ;;  %v12301_v57 = vld [vmem:[#allocation16 + $0x298] sm:$0xf0] }
 0x9a8   :  { %9204 = vmatpush.bf16.msrb.mxu0 %v12028_v36  ;;  %v13267_v36 = vld [vmem:[#allocation16 + $0x2cc] sm:$0xf]  ;;  %v12208_v33 = vor.u32 %v13235_v1, %v12205_v49  ;;  %v12029_v16 = vld [vmem:[#allocation16 + $0x78] sm:$0xf0] }
 0x9a9   :  { %9242 = vmatpush.bf16.msra.mxu1 %v12428_v45  ;;  %9169 = vmatmul.bf16.vlgmr.msra.gmra.mxu2 %v16320_v43  ;;  %v12480_v45 = vor.u32 %v13303_v62, %v12477_v28  ;;  %v13295_v55 = vld [vmem:[#allocation16 + $0x3ac] sm:$0xf]  ;;  %v12429_v61 = vld [vmem:[#allocation16 + $0x398] sm:$0xf0] }
 0x9aa   :  { %9217 = vmatpush.bf16.msrb.mxu2 %v12156_v59  ;;  %9182 = vmatmul.bf16.vlgmr.msrb.gmra.mxu3 %v16323_v52  ;;  %v12061_v59 = vld [vmem:[#allocation16 + $0xb8] sm:$0xf0]  ;;  %v13227_v6 = vld [vmem:[#allocation16 + $0x18c] sm:$0xf] }
 0x9ab   :  { %9230 = vmatpush.bf16.msra.mxu3 %v12284_v19  ;;  %v12336_v19 = vor.u32 %v13267_v36, %v12333_v54  ;;  %v12064_v41 = vor.u32 %v13199_v60, %v12061_v59  ;;  %v13191_v2 = vld [vmem:[#allocation16 + $0x6c] sm:$0xf]  ;;  %v12176_v18 = vor.u32 %v13227_v6, %v12173_v30  ;;  %v12285_v29 = vld [vmem:[#allocation16 + $0x278] sm:$0xf0]  ;;  %v13311_v30 = vld [vmem:[%s16458_s9 + $0x28] sm:$0xff] }
 0x9ac   :  { %9195 = vmatmul.bf16.vlgmr.msrb.gmra.mxu1 %v16329_v40  ;;  %9205 = vmatpush.bf16.msrb.mxu0 %v12012_v37  ;;  %v13263_v37 = vld [vmem:[#allocation16 + $0x2ac] sm:$0xf]  ;;  %v12032_v26 = vor.u32 %v13191_v2, %v12029_v16  ;;  %v12013_v47 = vld [vmem:[#allocation16 + $0x58] sm:$0xf0]  ;;  %v13317_v16 = vld [vmem:[%s16458_s9 + $0x58] sm:$0xff] }
 0x9ad   :  { %9243 = vmatpush.bf16.msra.mxu1 %v12412_v23  ;;  %v12464_v23 = vor.u32 %v13299_v12, %v12461_v21  ;;  %v13223_v8 = vld [vmem:[#allocation16 + $0x16c] sm:$0xf]  ;;  %v12269_v11 = vld [vmem:[#allocation16 + $0x258] sm:$0xf0] }
 0x9ae   :  { %9218 = vmatpush.bf16.msrb.mxu2 %v12140_v15  ;;  %v12045_v15 = vld [vmem:[#allocation16 + $0x98] sm:$0xf0]  ;;  %v13255_v58 = vld [vmem:[#allocation16 + $0x26c] sm:$0xf] }
 0x9af   :  { %9231 = vmatpush.bf16.msra.mxu3 %v12268_v7  ;;  %v12320_v7 = vor.u32 %v13263_v37, %v12317_v56  ;;  %v12048_v39 = vor.u32 %v13195_v50, %v12045_v15  ;;  %v13187_v17 = vld [vmem:[#allocation16 + $0x4c] sm:$0xf]  ;;  %v12288_v38 = vor.u32 %v13255_v58, %v12285_v29  ;;  %v11997_v62 = vld [vmem:[#allocation16 + $0x38] sm:$0xf0]  ;;  %v13327_v58 = vld [vmem:[%s16458_s9 + $0xa8] sm:$0xff] }
 0x9b0   :  { %9206 = vmatpush.bf16.msrb.mxu0 %v11996_v0  ;;  %v13259_v0 = vld [vmem:[#allocation16 + $0x28c] sm:$0xf]  ;;  %v12016_v42 = vor.u32 %v13187_v17, %v12013_v47  ;;  %v12253_v54 = vld [vmem:[#allocation16 + $0x238] sm:$0xf0]  ;;  %v13325_v47 = vld [vmem:[%s16458_s9 + $0x98] sm:$0xff] }
 0x9b1   :  { %9244 = vmatpush.bf16.msra.mxu1 %v12396_v14  ;;  %v12448_v14 = vor.u32 %v13295_v55, %v12445_v35  ;;  %v12304_v27 = vor.u32 %v13259_v0, %v12301_v57  ;;  %v13219_v51 = vld [vmem:[#allocation16 + $0x14c] sm:$0xf]  ;;  %v11981_v59 = vld [vmem:[#allocation16 + $0x18] sm:$0xf0]  ;;  %v13313_v55 = vld [vmem:[%s16458_s9 + $0x38] sm:$0xff] }
 0x9b2   :  { %9219 = vmatpush.bf16.msrb.mxu2 %v12124_v46  ;;  %v13291_v46 = vld [vmem:[#allocation16 + $0x38c] sm:$0xf]  ;;  %v12381_v21 = vld [vmem:[#allocation16 + $0x338] sm:$0xf0]  ;;  %v13307_v57 = vld [vmem:[%s16458_s9 + $0x8] sm:$0xff] }
 0x9b3   :  { %9232 = vmatpush.bf16.msra.mxu3 %v12252_v3  ;;  %v12157_v3 = vld [vmem:[#allocation16 + $0x178] sm:$0xf0]  ;;  %v13251_v63 = vld [vmem:[#allocation16 + $0x24c] sm:$0xf] }
 0x9b4   :  { %9207 = vmatpush.bf16.msrb.mxu0 %v11980_v25  ;;  %v12432_v25 = vor.u32 %v13291_v46, %v12429_v61  ;;  %v12160_v31 = vor.u32 %v13223_v8, %v12157_v3  ;;  %v13283_v28 = vld [vmem:[#allocation16 + $0x34c] sm:$0xf]  ;;  %v12272_v1 = vor.u32 %v13251_v63, %v12269_v11  ;;  %v12109_v24 = vld [vmem:[#allocation16 + $0x118] sm:$0xf0]  ;;  %v13315_v3 = vld [vmem:[%s16458_s9 + $0x48] sm:$0xff] }
 0x9b5   :  { %9245 = vmatpush.bf16.msra.mxu1 %v12380_v9  ;;  %v13287_v9 = vld [vmem:[#allocation16 + $0x36c] sm:$0xf]  ;;  %v12237_v56 = vld [vmem:[#allocation16 + $0x218] sm:$0xf0] }
 0x9b6   :  { %9220 = vmatpush.bf16.msrb.mxu2 %v12108_v34  ;;  %v12141_v34 = vld [vmem:[#allocation16 + $0x158] sm:$0xf0]  ;;  %v13215_v49 = vld [vmem:[#allocation16 + $0x12c] sm:$0xf] }
 0x9b7   :  { %9233 = vmatpush.bf16.msra.mxu3 %v12236_v13  ;;  %9208 = vmatmul.bf16.vlgmr.msrb.gmra.mxu0 %v16314_v5  ;;  %v13183_v13 = vld [vmem:[#allocation16 + $0x2c] sm:$0xf]  ;;  %v12144_v4 = vor.u32 %v13219_v51, %v12141_v34  ;;  %v12365_v15 = vld [vmem:[#allocation16 + $0x318] sm:$0xf0] }
 0x9b8   :  { %9252 = vmatpush.bf16.msra.mxu0 %v12096_v10  ;;  %v12413_v10 = vld [vmem:[#allocation16 + $0x378] sm:$0xf0]  ;;  %v13247_v36 = vld [vmem:[#allocation16 + $0x22c] sm:$0xf] }
 0x9b9   :  { %9246 = vmatpush.bf16.msra.mxu1 %v12364_v44  ;;  %9221 = vmatmul.bf16.vlgmr.msrb.gmra.mxu2 %v16320_v43  ;;  %v12125_v44 = vld [vmem:[#allocation16 + $0x138] sm:$0xf0]  ;;  %v13179_v60 = vld [vmem:[#allocation16 + $0xc] sm:$0xf] }
 0x9ba   :  { %9265 = vmatpush.bf16.msra.mxu2 %v12224_v53  ;;  %9234 = vmatmul.bf16.vlgmr.msra.gmra.mxu3 %v16323_v52  ;;  %v12416_v53 = vor.u32 %v13287_v9, %v12413_v10  ;;  %v13279_v12 = vld [vmem:[#allocation16 + $0x32c] sm:$0xf]  ;;  %v13310_v0 = vld [vmem:[%s16458_s9 + $0x20] sm:$0xff] }
 0x9bb   :  { %9278 = vmatpush.bf16.msrb.mxu3 %v12352_v48  ;;  %v12397_v48 = vld [vmem:[#allocation16 + $0x358] sm:$0xf0]  ;;  %v13211_v20 = vld [vmem:[#allocation16 + $0x10c] sm:$0xf] }
 0x9bc   :  { %9253 = vmatpush.bf16.msra.mxu0 %v12080_v22  ;;  %9247 = vmatmul.bf16.vlgmr.msra.gmra.mxu1 %v16329_v40  ;;  %v12000_v22 = vor.u32 %v13183_v13, %v11997_v62  ;;  %v13243_v37 = vld [vmem:[#allocation16 + $0x20c] sm:$0xf]  ;;  %v12112_v50 = vor.u32 %v13211_v20, %v12109_v24  ;;  %v13318_v2 = vld [vmem:[%s16458_s9 + $0x60] sm:$0xff] }
 0x9bd   :  { %9291 = vmatpush.bf16.msrb.mxu1 %v12480_v45  ;;  %v12400_v45 = vor.u32 %v13283_v28, %v12397_v48  ;;  %v12240_v35 = vor.u32 %v13243_v37, %v12237_v56  ;;  %v13312_v6 = vld [vmem:[%s16458_s9 + $0x30] sm:$0xff]  ;;  %v13323_v48 = vld [vmem:[%s16458_s9 + $0x88] sm:$0xff] }
 0x9be   :  { %9266 = vmatpush.bf16.msra.mxu2 %v12208_v33  ;;  %v12128_v33 = vor.u32 %v13215_v49, %v12125_v44  ;;  %v13328_v46 = vld [vmem:[%s16458_s9 + $0xb0] sm:$0xff]  ;;  %v13322_v44 = vld [vmem:[%s16458_s9 + $0x80] sm:$0xff] }
 0x9bf   :  { %9279 = vmatpush.bf16.msrb.mxu3 %v12336_v19  ;;  %v12256_v19 = vor.u32 %v13247_v36, %v12253_v54  ;;  %v13316_v61 = vld [vmem:[%s16458_s9 + $0x50] sm:$0xff] }
 0x9c0   :  { %9254 = vmatpush.bf16.msra.mxu0 %v12064_v41  ;;  %v11984_v41 = vor.u32 %v13179_v60, %v11981_v59  ;;  %v13324_v63 = vld [vmem:[%s16458_s9 + $0x90] sm:$0xff] }
 0x9c1   :  { %9292 = vmatpush.bf16.msrb.mxu1 %v12464_v23  ;;  %v12384_v23 = vor.u32 %v13279_v12, %v12381_v21  ;;  %v13336_v36 = vld [vmem:[%s16458_s9 + $0xf0] sm:$0xff] }
 0x9c2   :  { %9267 = vmatpush.bf16.msra.mxu2 %v12192_v32  ;;  %v13275_v32 = vld [vmem:[#allocation16 + $0x30c] sm:$0xf] }
 0x9c3   :  { %9280 = vmatpush.bf16.msrb.mxu3 %v12320_v7  ;;  %v12368_v7 = vor.u32 %v13275_v32, %v12365_v15 }
 0x9c4   :  { %9255 = vmatpush.bf16.msra.mxu0 %v12048_v39  ;;  %v13319_v39 = vld [vmem:[%s16458_s9 + $0x68] sm:$0xff] }
 0x9c5   :  { %9293 = vmatpush.bf16.msrb.mxu1 %v12448_v14  ;;  %v13306_v14 = vld [vmem:[%s16458_s9] sm:$0xff] }
 0x9c6   :  { %9268 = vmatpush.bf16.msra.mxu2 %v12176_v18  ;;  %v13329_v18 = vld [vmem:[%s16458_s9 + $0xb8] sm:$0xff] }
 0x9c7   :  { %9281 = vmatpush.bf16.msrb.mxu3 %v12304_v27  ;;  %v16392_v27 = vld [vmem:[#allocation17] sm:$0xf] }
 0x9c8   :  { %9256 = vmatpush.bf16.msra.mxu0 %v12032_v26  ;;  %v8448_v29 = vperm.slane %v16392_v27, 0  ;;  %v13314_v26 = vld [vmem:[%s16458_s9 + $0x40] sm:$0xff]  ;;  %v8449_v49 = vperm.slane %v16392_v27, 1  ;;  %v8450_v15 = vperm.slane %v16392_v27, 2 }
 0x9c9   :  { %9294 = vmatpush.bf16.msrb.mxu1 %v12432_v25  ;;  %v13326_v25 = vld [vmem:[%s16458_s9 + $0xa0] sm:$0xff] }
 0x9ca   :  { %9269 = vmatpush.bf16.msra.mxu2 %v12160_v31 }
 0x9cb   :  { %9282 = vmatpush.bf16.msrb.mxu3 %v12288_v38 }
 0x9cc   :  { %9257 = vmatpush.bf16.msra.mxu0 %v12016_v42 }
 0x9cd   :  { %9295 = vmatpush.bf16.msrb.mxu1 %v12416_v53 }
 0x9ce   :  { %9270 = vmatpush.bf16.msra.mxu2 %v12144_v4 }
 0x9cf   :  { %9283 = vmatpush.bf16.msrb.mxu3 %v12272_v1  ;;  %v13337_v1 = vld [vmem:[%s16458_s9 + $0xf8] sm:$0xff] }
 0x9d0   :  { %9258 = vmatpush.bf16.msra.mxu0 %v12000_v22 }
 0x9d1   :  { %9296 = vmatpush.bf16.msrb.mxu1 %v12400_v45 }
 0x9d2   :  { %9271 = vmatpush.bf16.msra.mxu2 %v12128_v33  ;;  %v13335_v33 = vld [vmem:[%s16458_s9 + $0xe8] sm:$0xff] }
 0x9d3   :  { %9284 = vmatpush.bf16.msrb.mxu3 %v12256_v19  ;;  %v13334_v19 = vld [vmem:[%s16458_s9 + $0xe0] sm:$0xff] }
 0x9d4   :  { %9259 = vmatpush.bf16.msra.mxu0 %v11984_v41  ;;  %v13333_v41 = vld [vmem:[%s16458_s9 + $0xd8] sm:$0xff] }
 0x9d5   :  { %9297 = vmatpush.bf16.msrb.mxu1 %v12384_v23 }
 0x9d6   :  { %9272 = vmatpush.bf16.msra.mxu2 %v12112_v50 }
 0x9d7   :  { %9285 = vmatpush.bf16.msrb.mxu3 %v12240_v35  ;;  %9260 = vmatmul.bf16.vlgmr.msra.gmra.mxu0 %v16314_v5  ;;  %v13309_v5 = vld [vmem:[%s16458_s9 + $0x18] sm:$0xff]  ;;  %v13332_v35 = vld [vmem:[%s16458_s9 + $0xd0] sm:$0xff] }
 0x9d8   :  { %9572 = vmatpush.bf16.msrb.mxu0 %v13313_v55 }
 0x9d9   :  { %9273 = vmatmul.bf16.vlgmr.msra.gmra.mxu2 %v16320_v43  ;;  %9298 = vmatpush.bf16.msrb.mxu1 %v12368_v7  ;;  %v13321_v43 = vld [vmem:[%s16458_s9 + $0x78] sm:$0xff] }
 0x9da   :  { %9286 = vmatmul.bf16.vlgmr.msrb.gmra.mxu3 %v16323_v52  ;;  %9585 = vmatpush.bf16.msrb.mxu2 %v13321_v43  ;;  %v13308_v52 = vld [vmem:[%s16458_s9 + $0x10] sm:$0xff] }
 0x9db   :  { %9598 = vmatpush.bf16.msra.mxu3 %v13329_v18 }
 0x9dc   :  { %9573 = vmatpush.bf16.msrb.mxu0 %v13312_v6  ;;  %9299 = vmatmul.bf16.vlgmr.msrb.gmra.mxu1 %v16329_v40  ;;  %v13320_v40 = vld [vmem:[%s16458_s9 + $0x70] sm:$0xff] }
 0x9dd   :  { %9611 = vmatpush.bf16.msra.mxu1 %v13337_v1 }
 0x9de   :  { %9586 = vmatpush.bf16.msrb.mxu2 %v13320_v40 }
 0x9df   :  { %9599 = vmatpush.bf16.msra.mxu3 %v13328_v46 }
 0x9e0   :  { %9574 = vmatpush.bf16.msrb.mxu0 %v13311_v30 }
 0x9e1   :  { %9612 = vmatpush.bf16.msra.mxu1 %v13336_v36 }
 0x9e2   :  { %9587 = vmatpush.bf16.msrb.mxu2 %v13319_v39 }
 0x9e3   :  { %9600 = vmatpush.bf16.msra.mxu3 %v13327_v58 }
 0x9e4   :  { %9575 = vmatpush.bf16.msrb.mxu0 %v13310_v0 }
 0x9e5   :  { %9613 = vmatpush.bf16.msra.mxu1 %v13335_v33 }
 0x9e6   :  { %9588 = vmatpush.bf16.msrb.mxu2 %v13318_v2  ;;  %v13330_v2 = vld [vmem:[%s16458_s9 + $0xc0] sm:$0xff] }
 0x9e7   :  { %9601 = vmatpush.bf16.msra.mxu3 %v13326_v25 }
 0x9e8   :  { %9576 = vmatpush.bf16.msrb.mxu0 %v13309_v5 }
 0x9e9   :  { %9614 = vmatpush.bf16.msra.mxu1 %v13334_v19 }
 0x9ea   :  { %9589 = vmatpush.bf16.msrb.mxu2 %v13317_v16 }
 0x9eb   :  { %9602 = vmatpush.bf16.msra.mxu3 %v13325_v47 }
 0x9ec   :  { %9577 = vmatpush.bf16.msrb.mxu0 %v13308_v52 }
 0x9ed   :  { %9615 = vmatpush.bf16.msra.mxu1 %v13333_v41 }
 0x9ee   :  { %9590 = vmatpush.bf16.msrb.mxu2 %v13316_v61  ;;  %v8451_v61 = vperm.slane %v16392_v27, 3 }
 0x9ef   :  { %9603 = vmatpush.bf16.msra.mxu3 %v13324_v63 }
 0x9f0   :  { %9578 = vmatpush.bf16.msrb.mxu0 %v13307_v57  ;;  %v13331_v57 = vld [vmem:[%s16458_s9 + $0xc8] sm:$0xff]  ;;  %s13888_s9 = smov [#allocation20]  }
 0x9f1   :  { %9616 = vmatpush.bf16.msra.mxu1 %v13332_v35  ;;  %s9631_s29 = sshll.u32 %s13888_s9, 4  ;;  %s9632_s29 = int_to_ptr.vmem [resolvable:$true] %s9631_s29 }
 0x9f2   :  { %9591 = vmatpush.bf16.msrb.mxu2 %v13315_v3 }
 0x9f3   :  { %9604 = vmatpush.bf16.msra.mxu3 %v13323_v48 }
 0x9f4   :  { %9579 = vmatpush.bf16.msrb.mxu0 %v13306_v14 }
 0x9f5   :  { %9617 = vmatpush.bf16.msra.mxu1 %v13331_v57 }
 0x9f6   :  { %9592 = vmatpush.bf16.msrb.mxu2 %v13314_v26 }
 0x9f7   :  { %9605 = vmatpush.bf16.msra.mxu3 %v13322_v44 }
 0x9f9   :  { %9618 = vmatpush.bf16.msra.mxu1 %v13330_v2 }
 0xa14   :  { %v9105_v8 = vpop.f32.mrf.mxu0 }
 0xa15   :  { %v9106_v31 = vadd.f32 %v9105_v8, %v8448_v29 }
 0xa19   :  { %v9144_v17 = vpop.f32.mrf.mxu1 }
 0xa1c   :  { %v9118_v9 = vpop.f32.mrf.mxu2  ;;  %v9107_v10 = vpop.f32.mrf.mxu0 }
 0xa1d   :  { %v9119_v38 = vadd.f32 %v9118_v9, %v9106_v31  ;;  %v9131_v51 = vpop.f32.mrf.mxu3 }
 0xa1f   :  { %v9132_v34 = vadd.f32 %v9131_v51, %v9119_v38 }
 0xa21   :  { %v9145_v11 = vadd.f32 %v9144_v17, %v9132_v34  ;;  %v9146_v42 = vpop.f32.mrf.mxu1 }
 0xa23   :  { %v9304_v53 = vmax.f32 %v9145_v11, 0.0 }
 0xa24   :  { %v9120_v13 = vpop.f32.mrf.mxu2  ;;  %v9157_v4 = vpop.f32.mrf.mxu0 }
 0xa25   :  { %v9308_v62 = vpack.c.bf16 %v9304_v53, %v9304_v53  ;;  %v9133_v28 = vpop.f32.mrf.mxu3  ;;  %v9158_v22 = vadd.f32 %v9157_v4, %v8449_v49  ;;  %v13617_v13 = vld [vmem:[#allocation19] ss:$0 sm:$0xff] }
 0xa27   :  { %9580 = vmatmul.bf16.vlgmr.msrb.gmra.mxu0 %v9308_v62 }
 0xa29   :  { %v9196_v54 = vpop.f32.mrf.mxu1 }
 0xa2c   :  { %v9170_v45 = vpop.f32.mrf.mxu2  ;;  %v9159_v60 = vpop.f32.mrf.mxu0 }
 0xa2d   :  { %v9171_v59 = vadd.f32 %v9170_v45, %v9158_v22  ;;  %v9183_v12 = vpop.f32.mrf.mxu3 }
 0xa2f   :  { %v9184_v21 = vadd.f32 %v9183_v12, %v9171_v59 }
 0xa31   :  { %v9197_v20 = vadd.f32 %v9196_v54, %v9184_v21  ;;  %v9198_v24 = vpop.f32.mrf.mxu1 }
 0xa33   :  { %v9305_v37 = vmax.f32 %v9197_v20, 0.0 }
 0xa34   :  { %v9172_v56 = vpop.f32.mrf.mxu2  ;;  %v9209_v50 = vpop.f32.mrf.mxu0 }
 0xa35   :  { %v9309_v23 = vpack.c.bf16 %v9305_v37, %v9305_v37  ;;  %v9185_v32 = vpop.f32.mrf.mxu3  ;;  %v9210_v7 = vadd.f32 %v9209_v50, %v8450_v15 }
 0xa37   :  { %9593 = vmatmul.bf16.vlgmr.msrb.gmra.mxu2 %v9309_v23 }
 0xa39   :  { %v9248_v55 = vpop.f32.mrf.mxu1 }
 0xa3c   :  { %v9222_v6 = vpop.f32.mrf.mxu2  ;;  %v9211_v0 = vpop.f32.mrf.mxu0 }
 0xa3d   :  { %v9223_v30 = vadd.f32 %v9222_v6, %v9210_v7  ;;  %v9235_v5 = vpop.f32.mrf.mxu3 }
 0xa3f   :  { %v9236_v43 = vadd.f32 %v9235_v5, %v9223_v30 }
 0xa41   :  { %v9249_v52 = vadd.f32 %v9248_v55, %v9236_v43  ;;  %v9250_v40 = vpop.f32.mrf.mxu1 }
 0xa43   :  { %v9306_v39 = vmax.f32 %v9249_v52, 0.0 }
 0xa44   :  { %v9224_v14 = vpop.f32.mrf.mxu2 }
 0xa45   :  { %v9310_v18 = vpack.c.bf16 %v9306_v39, %v9306_v39  ;;  %v9237_v16 = vpop.f32.mrf.mxu3 }
 0xa47   :  { %9606 = vmatmul.bf16.vlgmr.msra.gmra.mxu3 %v9310_v18 }
 0xa54   :  { %v9261_v46 = vpop.f32.mrf.mxu0 }
 0xa55   :  { %v9262_v3 = vadd.f32 %v9261_v46, %v8451_v61 }
 0xa59   :  { %v9300_v8 = vpop.f32.mrf.mxu1 }
 0xa5c   :  { %v9274_v58 = vpop.f32.mrf.mxu2  ;;  %v9263_v26 = vpop.f32.mrf.mxu0 }
 0xa5d   :  { %v9275_v29 = vadd.f32 %v9274_v58, %v9262_v3  ;;  %v9287_v25 = vpop.f32.mrf.mxu3 }
 0xa5f   :  { %v9288_v17 = vadd.f32 %v9287_v25, %v9275_v29 }
 0xa61   :  { %v9301_v31 = vadd.f32 %v9300_v8, %v9288_v17  ;;  %v9302_v47 = vpop.f32.mrf.mxu1 }
 0xa63   :  { %v9307_v9 = vmax.f32 %v9301_v31, 0.0 }
 0xa64   :  { %v9276_v10 = vpop.f32.mrf.mxu2 }
 0xa65   :  { %v9311_v38 = vpack.c.bf16 %v9307_v9, %v9307_v9  ;;  %v9289_v51 = vpop.f32.mrf.mxu3 }
 0xa67   :  { %9619 = vmatmul.bf16.vlgmr.msra.gmra.mxu1 %v9311_v38 }
 0xaa4   :  { %v9581_v34 = vpop.f32.mrf.mxu0 }
 0xaa5   :  { %v9582_v4 = vadd.f32 %v13617_v13, %v9581_v34 }
 0xaac   :  { %v9583_v63 = vpop.f32.mrf.mxu0 }
 0xaba   :  { %v9594_v11 = vpop.f32.mrf.mxu2 }
 0xabb   :  { %v9595_v62 = vadd.f32 %v9594_v11, %v9582_v4 }
 0xac2   :  { %v9596_v42 = vpop.f32.mrf.mxu2 }
 0xaca   :  { %v9607_v53 = vpop.f32.mrf.mxu3 }
 0xacb   :  { %v9608_v28 = vadd.f32 %v9607_v53, %v9595_v62 }
 0xad2   :  { %v9609_v27 = vpop.f32.mrf.mxu3 }
 0xae4   :  { %v9620_v48 = vpop.f32.mrf.mxu1 }
 0xae5   :  { %v9621_v1 = vadd.f32 %v9620_v48, %v9608_v28 }
 0xae7   :  { %9625 = vst.msk [vmem:[#allocation20] sm:$0x3] %vm9624_vm10, %v9621_v1 }
 0xae8   :  { %9636 = dma.vmem_to_hbm [thread:$0]  %s9632_s29, 32, %s9634_s12, [#allocation7]  }
 0xaec   :  { %v9622_v49 = vpop.f32.mrf.mxu1 }
 0xaed   :  { %13868 = dma.done.wait [#allocation7], 32  }
 0xaee   :  { %13869 = vsyncadd [#allocation7], 4294967264 }
 0xaef   :  { %9641 = vsyncpa [#allocation6], 1 }
 0xaf0   :  { %9642 = vsyncpa [#allocation9], 1 }
 0xaf1   :  { %9643 = vsyncpa [#allocation12], 1 }
 0xaf2   :  { %9644 = vsyncpa [#allocation15], 1 }
 0xaf3   :  { %9645 = vsyncpa [#allocation18], 1 }
 0xaf4   :  { %9646 = vsyncpa [#allocation7], 1 }

</bundles_post_ra>
